<compile_context>
chip_gen: v6e
topology: v6e:2x2x1
jax: 0.10.0
libtpu: 0.0.40
codegen_flags: <defaults>
</compile_context>

<pallas_src>
import functools

import jax
import jax.numpy as jnp
from jax.experimental import pallas as pl
from jax.experimental.pallas import tpu as pltpu

NEG_SLOPE = 0.01   # nn.LeakyReLU(0.01)
K1 = 3             # conv1 kernel width (1, 3)


def _leaky(v):
    # Exact LeakyReLU(0.01) for finite inputs; single VALU max per element.
    return jnp.maximum(v, NEG_SLOPE * v)


def _actor_kernel(x_ref, pw_ref, w2a_ref, w2b_ref, b2_ref, w3_ref,
                  w1_s, b1_s, misc_s, out_ref):
    # x_ref  : (C, M*W, Bt)      price block, batch on lanes, rows r = m*W + t
    # pw_ref : (M, Bt)           previous portfolio weights
    # w2a/w2b: (M*20, M*W - 2)   block-diagonal conv2 weights (bf16, per conv1 ch)
    # b2_ref : (M*20, 1)         conv2 bias per (asset, channel) row (f32)
    # w3_ref : (M, M*20)         block-diagonal 1x1-conv weights (bf16)
    # w1_s   : (2*C*K1,)  SMEM   conv1 weights flattened [o, c, k]
    # b1_s   : (2,)       SMEM   conv1 bias
    # misc_s : (3,)       SMEM   [w3 weight of prev-weight channel, b3, cash_bias]
    # out_ref: (M, Bt)           softmax([cash, scores])[1:] for this batch block
    C, MW, Bt = x_ref.shape
    R = MW - (K1 - 1)   # rows carrying conv1 outputs (invalid tail rows are
                        # killed by zero columns of the block-diagonal weights)

    # ---- conv1 (1,3): C -> 2 channels + LeakyReLU.  Nine shifted slabs shared
    # between the two output channels; scalar-weight mul/adds on the VPU.
    acc0 = jnp.zeros((R, Bt), jnp.float32) + b1_s[0]
    acc1 = jnp.zeros((R, Bt), jnp.float32) + b1_s[1]
    for c in range(C):
        for k in range(K1):
            xk = x_ref[c, pl.ds(k, R), :]                  # (R, Bt)
            acc0 = acc0 + w1_s[(0 * C + c) * K1 + k] * xk
            acc1 = acc1 + w1_s[(1 * C + c) * K1 + k] * xk
    h0 = _leaky(acc0).astype(jnp.bfloat16)                 # bf16 MXU operands
    h1 = _leaky(acc1).astype(jnp.bfloat16)

    # ---- conv2 (1,48): 2 -> 20 channels for all assets at once via
    # block-diagonal bf16 weights; rows of h2 are (asset m, channel j) = m*20+j.
    h2 = (jnp.dot(w2a_ref[...], h0, preferred_element_type=jnp.float32)
          + jnp.dot(w2b_ref[...], h1, preferred_element_type=jnp.float32)
          + b2_ref[...])                                    # (M*20, Bt) f32
    h2 = _leaky(h2).astype(jnp.bfloat16)

    # ---- 1x1 conv over [20 conv channels ++ prev_weights] -> per-asset score.
    s = jnp.dot(w3_ref[...], h2, preferred_element_type=jnp.float32)   # (M, Bt)
    s = s + pw_ref[...] * misc_s[0] + misc_s[1]

    # ---- prepend cash bias, softmax per batch element (over sublanes), drop cash.
    cash = misc_s[2]
    mx = jnp.maximum(jnp.max(s, axis=0, keepdims=True), cash)          # (1, Bt)
    e = jnp.exp(s - mx)                                                # (M, Bt)
    denom = jnp.sum(e, axis=0, keepdims=True) + jnp.exp(cash - mx)     # (1, Bt)
    out_ref[...] = (e * pl.reciprocal(denom, approx=True)).astype(out_ref.dtype)


def _round_up(v, m):
    return ((v + m - 1) // m) * m


@functools.partial(jax.jit, static_argnames=("batch_block",))
def actor_forward_pallas(price, prev_weights, params, *, batch_block=512):
    """price: (B, C, M, W) f32, prev_weights: (B, M) f32 -> (B, M) f32."""
    B, C, M, W = price.shape
    Wc = W - (K1 - 1)
    w1, b1 = params["conv1_w"], params["conv1_b"]     # (2, C, 1, 3), (2,)
    w2, b2 = params["conv2_w"], params["conv2_b"]     # (F, 2, 1, Wc), (F,)
    w3, b3 = params["conv3_w"], params["conv3_b"]     # (1, F+1, 1, 1), (1,)
    cash = params["cash_bias"]
    F = w2.shape[0]                                   # 20 conv2 channels

    # Batch-block selection: as large as allowed (DMA/step-overhead amortization)
    # but never larger than the padded batch, and keeping >= 2 grid steps when
    # the batch allows it so v7x's 2 TensorCores both get work.
    bt = max(128, min(batch_block, _round_up(B, 128)))
    if _round_up(B, bt) // bt < 2 and bt > 128:
        bt = max(128, _round_up((B + 1) // 2, 128))
    B_pad = _round_up(B, bt)

    # batch-on-lanes layouts (wrapper-side layout plumbing).
    # TODO(synk): this transpose is a full extra HBM pass over `price`; feed the
    # kernel (C, M*W, B)-layout data upstream to eliminate it entirely.
    x = jnp.transpose(price.astype(jnp.float32), (1, 2, 3, 0)).reshape(C, M * W, B)
    pw = jnp.transpose(prev_weights.astype(jnp.float32), (1, 0))        # (M, B)
    if B_pad != B:
        x = jnp.pad(x, ((0, 0), (0, 0), (0, B_pad - B)))
        pw = jnp.pad(pw, ((0, 0), (0, B_pad - B)))

    # conv1 scalars -> SMEM
    w1_s = w1.reshape(-1).astype(jnp.float32)                           # (2*C*3,)
    b1_s = b1.astype(jnp.float32)                                       # (2,)
    misc = jnp.stack([w3[0, F, 0, 0].astype(jnp.float32),
                      b3[0].astype(jnp.float32),
                      jnp.asarray(cash, jnp.float32).reshape(())])      # (3,)

    # conv2 / 1x1-conv as block-diagonal bf16 matmul weights acting on rows
    # r = m*W + t (the W - Wc trailing zero columns of each block kill the
    # invalid cross-asset window rows).
    eye_m = jnp.eye(M, dtype=jnp.float32)

    def conv2_big(o):
        a = jnp.pad(w2[:, o, 0, :].astype(jnp.float32), ((0, 0), (0, W - Wc)))  # (F, W)
        return jnp.kron(eye_m, a)[:, :M * W - (K1 - 1)].astype(jnp.bfloat16)

    w2a_big = conv2_big(0)                                              # (M*F, M*W-2) bf16
    w2b_big = conv2_big(1)
    b2_col = jnp.tile(b2.astype(jnp.float32), M).reshape(M * F, 1)      # (M*F, 1) f32
    w3_big = jnp.kron(eye_m, w3[0, :F, 0, 0].astype(jnp.float32)
                      .reshape(1, F)).astype(jnp.bfloat16)              # (M, M*F) bf16

    out = pl.pallas_call(
        _actor_kernel,
        out_shape=jax.ShapeDtypeStruct((M, B_pad), jnp.float32),
        grid=(B_pad // bt,),
        in_specs=[
            pl.BlockSpec((C, M * W, bt), lambda b: (0, 0, b)),
            pl.BlockSpec((M, bt), lambda b: (0, b)),
            pl.BlockSpec((M * F, M * W - (K1 - 1)), lambda b: (0, 0)),
            pl.BlockSpec((M * F, M * W - (K1 - 1)), lambda b: (0, 0)),
            pl.BlockSpec((M * F, 1), lambda b: (0, 0)),
            pl.BlockSpec((M, M * F), lambda b: (0, 0)),
            pl.BlockSpec(memory_space=pltpu.MemorySpace.SMEM),
            pl.BlockSpec(memory_space=pltpu.MemorySpace.SMEM),
            pl.BlockSpec(memory_space=pltpu.MemorySpace.SMEM),
        ],
        out_specs=pl.BlockSpec((M, bt), lambda b: (0, b)),
        compiler_params=pltpu.CompilerParams(
            dimension_semantics=("parallel",),
            vmem_limit_bytes=32 * 1024 * 1024),
    )(x, pw, w2a_big, w2b_big, b2_col, w3_big, w1_s, b1_s, misc)

    return jnp.transpose(out, (1, 0))[:B]


def actor_reference(price, prev_weights, params):
    """Pure-JAX f32 reference mirroring the PyTorch forward exactly."""
    dn = ("NCHW", "OIHW", "NCHW")
    w1, b1 = params["conv1_w"], params["conv1_b"]
    w2, b2 = params["conv2_w"], params["conv2_b"]
    w3, b3 = params["conv3_w"], params["conv3_b"]
    cash = params["cash_bias"]
    B = price.shape[0]
    h = jax.lax.conv_general_dilated(price, w1, (1, 1), "VALID", dimension_numbers=dn)
    h = h + b1.reshape(1, -1, 1, 1)
    h = jnp.where(h > 0, h, NEG_SLOPE * h)
    h = jax.lax.conv_general_dilated(h, w2, (1, 1), "VALID", dimension_numbers=dn)
    h = h + b2.reshape(1, -1, 1, 1)
    h = jnp.where(h > 0, h, NEG_SLOPE * h)
    pw = prev_weights[:, None, :, None]
    h = jnp.concatenate([h, pw], axis=1)
    h = jax.lax.conv_general_dilated(h, w3, (1, 1), "VALID", dimension_numbers=dn)
    h = h + b3.reshape(1, -1, 1, 1)
    cashb = jnp.full((B, 1, 1, 1), cash, h.dtype)
    h = jnp.concatenate([cashb, h], axis=2)
    sm = jax.nn.softmax(h, axis=2).reshape(B, -1)
    return sm[:, 1:]


if __name__ == "__main__":
    # Shapes implied by the module: window 50 so conv1 (1,3) -> width 48 matches
    # conv2's (1,48) kernel; assets = output_dim = 11; features = 3.
    C, M, W = 3, 11, 50
    key = jax.random.PRNGKey(0)
    keys = jax.random.split(key, 10)

    def kaiming(k, shape):  # kaiming_normal-ish for conv weights (synthetic)
        fan_in = shape[1] * shape[2] * shape[3]
        return jax.random.normal(k, shape, jnp.float32) * jnp.sqrt(2.0 / fan_in)

    params = {
        "conv1_w": kaiming(keys[2], (2, C, 1, 3)),
        "conv1_b": 0.1 * jax.random.normal(keys[3], (2,), jnp.float32),
        "conv2_w": kaiming(keys[4], (20, 2, 1, W - 2)),
        "conv2_b": 0.1 * jax.random.normal(keys[5], (20,), jnp.float32),
        "conv3_w": kaiming(keys[6], (1, 21, 1, 1)),
        "conv3_b": 0.1 * jax.random.normal(keys[7], (1,), jnp.float32),
        "cash_bias": jnp.float32(0.3),
    }

    # B=2: single mostly-padded 128 block; B=133: two 128-wide grid steps
    # (v7x split heuristic) + ragged padding; B=700: two 512-wide steps.
    for B in (2, 133, 700):
        price = jax.random.normal(keys[0], (B, C, M, W), jnp.float32)
        prev_w = jax.nn.softmax(jax.random.normal(keys[1], (B, M), jnp.float32), axis=-1)

        out = jax.block_until_ready(actor_forward_pallas(price, prev_w, params))
        ref = actor_reference(price, prev_w, params)
        assert out.shape == (B, M)
        # bf16 MXU operands + approx reciprocal => relaxed tolerance vs f32 ref.
        if not jnp.allclose(out, ref, atol=1e-2, rtol=1e-2):
            raise AssertionError(
                f"Pallas/reference mismatch (B={B}), "
                f"max abs err = {jnp.max(jnp.abs(out - ref))}")
    print("KERNEL_OK")
</pallas_src>

<mosaic_0001>
module attributes {stable_mosaic.version = 11 : i64} {
  func.func @_actor_kernel(%arg0: i32, %arg1: memref<3x550x128xf32, #tpu.memory_space<vmem>>, %arg2: memref<11x128xf32, #tpu.memory_space<vmem>>, %arg3: memref<220x548xbf16, #tpu.memory_space<vmem>>, %arg4: memref<220x548xbf16, #tpu.memory_space<vmem>>, %arg5: memref<220x1xf32, #tpu.memory_space<vmem>>, %arg6: memref<11x220xbf16, #tpu.memory_space<vmem>>, %arg7: memref<18xf32, #tpu.memory_space<smem>>, %arg8: memref<2xf32, #tpu.memory_space<smem>>, %arg9: memref<3xf32, #tpu.memory_space<smem>>, %arg10: memref<11x128xf32, #tpu.memory_space<vmem>>) attributes {dimension_semantics = [#tpu.dimension_semantics<parallel>], iteration_bounds = array<i64: 1>, scalar_prefetch = 0 : i64, scratch_operands = 0 : i64, tpu.core_type = #tpu.core_type<tc>, window_params = [{transform_indices = @transform_0, window_bounds = array<i64: 3, 550, 128>}, {transform_indices = @transform_1, window_bounds = array<i64: 11, 128>}, {pipeline_mode = #tpu.pipeline_mode<synchronous>, transform_indices = @transform_2, window_bounds = array<i64: 220, 548>}, {pipeline_mode = #tpu.pipeline_mode<synchronous>, transform_indices = @transform_3, window_bounds = array<i64: 220, 548>}, {pipeline_mode = #tpu.pipeline_mode<synchronous>, transform_indices = @transform_4, window_bounds = array<i64: 220, 1>}, {pipeline_mode = #tpu.pipeline_mode<synchronous>, transform_indices = @transform_5, window_bounds = array<i64: 11, 220>}, {transform_indices = @transform_6, window_bounds = array<i64: 18>}, {transform_indices = @transform_7, window_bounds = array<i64: 2>}, {transform_indices = @transform_8, window_bounds = array<i64: 3>}, {transform_indices = @transform_9, window_bounds = array<i64: 11, 128>}]} {
    %cst = arith.constant 0.000000e+00 : f32
    %0 = vector.broadcast %cst : f32 to vector<548x128xf32>
    %c0 = arith.constant 0 : index
    %1 = memref.load %arg8[%c0] : memref<2xf32, #tpu.memory_space<smem>>
    %2 = vector.broadcast %1 : f32 to vector<548x128xf32>
    %3 = arith.addf %0, %2 : vector<548x128xf32>
    %cst_0 = arith.constant 0.000000e+00 : f32
    %4 = vector.broadcast %cst_0 : f32 to vector<548x128xf32>
    %c1 = arith.constant 1 : index
    %5 = memref.load %arg8[%c1] : memref<2xf32, #tpu.memory_space<smem>>
    %6 = vector.broadcast %5 : f32 to vector<548x128xf32>
    %7 = arith.addf %4, %6 : vector<548x128xf32>
    %c0_1 = arith.constant 0 : index
    %c0_2 = arith.constant 0 : index
    %c0_3 = arith.constant 0 : index
    %8 = vector.load %arg1[%c0_1, %c0_2, %c0_3] : memref<3x550x128xf32, #tpu.memory_space<vmem>>, vector<1x548x128xf32>
    %9 = vector.shape_cast %8 : vector<1x548x128xf32> to vector<548x128xf32>
    %c0_4 = arith.constant 0 : index
    %10 = memref.load %arg7[%c0_4] : memref<18xf32, #tpu.memory_space<smem>>
    %11 = vector.broadcast %10 : f32 to vector<548x128xf32>
    %12 = arith.mulf %11, %9 : vector<548x128xf32>
    %13 = arith.addf %3, %12 : vector<548x128xf32>
    %c9 = arith.constant 9 : index
    %14 = memref.load %arg7[%c9] : memref<18xf32, #tpu.memory_space<smem>>
    %15 = vector.broadcast %14 : f32 to vector<548x128xf32>
    %16 = arith.mulf %15, %9 : vector<548x128xf32>
    %17 = arith.addf %7, %16 : vector<548x128xf32>
    %c0_5 = arith.constant 0 : index
    %c1_6 = arith.constant 1 : index
    %c0_7 = arith.constant 0 : index
    %18 = vector.load %arg1[%c0_5, %c1_6, %c0_7] : memref<3x550x128xf32, #tpu.memory_space<vmem>>, vector<1x548x128xf32>
    %19 = vector.shape_cast %18 : vector<1x548x128xf32> to vector<548x128xf32>
    %c1_8 = arith.constant 1 : index
    %20 = memref.load %arg7[%c1_8] : memref<18xf32, #tpu.memory_space<smem>>
    %21 = vector.broadcast %20 : f32 to vector<548x128xf32>
    %22 = arith.mulf %21, %19 : vector<548x128xf32>
    %23 = arith.addf %13, %22 : vector<548x128xf32>
    %c10 = arith.constant 10 : index
    %24 = memref.load %arg7[%c10] : memref<18xf32, #tpu.memory_space<smem>>
    %25 = vector.broadcast %24 : f32 to vector<548x128xf32>
    %26 = arith.mulf %25, %19 : vector<548x128xf32>
    %27 = arith.addf %17, %26 : vector<548x128xf32>
    %c0_9 = arith.constant 0 : index
    %c2 = arith.constant 2 : index
    %c0_10 = arith.constant 0 : index
    %28 = vector.load %arg1[%c0_9, %c2, %c0_10] : memref<3x550x128xf32, #tpu.memory_space<vmem>>, vector<1x548x128xf32>
    %29 = vector.shape_cast %28 : vector<1x548x128xf32> to vector<548x128xf32>
    %c2_11 = arith.constant 2 : index
    %30 = memref.load %arg7[%c2_11] : memref<18xf32, #tpu.memory_space<smem>>
    %31 = vector.broadcast %30 : f32 to vector<548x128xf32>
    %32 = arith.mulf %31, %29 : vector<548x128xf32>
    %33 = arith.addf %23, %32 : vector<548x128xf32>
    %c11 = arith.constant 11 : index
    %34 = memref.load %arg7[%c11] : memref<18xf32, #tpu.memory_space<smem>>
    %35 = vector.broadcast %34 : f32 to vector<548x128xf32>
    %36 = arith.mulf %35, %29 : vector<548x128xf32>
    %37 = arith.addf %27, %36 : vector<548x128xf32>
    %c1_12 = arith.constant 1 : index
    %c0_13 = arith.constant 0 : index
    %c0_14 = arith.constant 0 : index
    %38 = vector.load %arg1[%c1_12, %c0_13, %c0_14] : memref<3x550x128xf32, #tpu.memory_space<vmem>>, vector<1x548x128xf32>
    %39 = vector.shape_cast %38 : vector<1x548x128xf32> to vector<548x128xf32>
    %c3 = arith.constant 3 : index
    %40 = memref.load %arg7[%c3] : memref<18xf32, #tpu.memory_space<smem>>
    %41 = vector.broadcast %40 : f32 to vector<548x128xf32>
    %42 = arith.mulf %41, %39 : vector<548x128xf32>
    %43 = arith.addf %33, %42 : vector<548x128xf32>
    %c12 = arith.constant 12 : index
    %44 = memref.load %arg7[%c12] : memref<18xf32, #tpu.memory_space<smem>>
    %45 = vector.broadcast %44 : f32 to vector<548x128xf32>
    %46 = arith.mulf %45, %39 : vector<548x128xf32>
    %47 = arith.addf %37, %46 : vector<548x128xf32>
    %c1_15 = arith.constant 1 : index
    %c1_16 = arith.constant 1 : index
    %c0_17 = arith.constant 0 : index
    %48 = vector.load %arg1[%c1_15, %c1_16, %c0_17] : memref<3x550x128xf32, #tpu.memory_space<vmem>>, vector<1x548x128xf32>
    %49 = vector.shape_cast %48 : vector<1x548x128xf32> to vector<548x128xf32>
    %c4 = arith.constant 4 : index
    %50 = memref.load %arg7[%c4] : memref<18xf32, #tpu.memory_space<smem>>
    %51 = vector.broadcast %50 : f32 to vector<548x128xf32>
    %52 = arith.mulf %51, %49 : vector<548x128xf32>
    %53 = arith.addf %43, %52 : vector<548x128xf32>
    %c13 = arith.constant 13 : index
    %54 = memref.load %arg7[%c13] : memref<18xf32, #tpu.memory_space<smem>>
    %55 = vector.broadcast %54 : f32 to vector<548x128xf32>
    %56 = arith.mulf %55, %49 : vector<548x128xf32>
    %57 = arith.addf %47, %56 : vector<548x128xf32>
    %c1_18 = arith.constant 1 : index
    %c2_19 = arith.constant 2 : index
    %c0_20 = arith.constant 0 : index
    %58 = vector.load %arg1[%c1_18, %c2_19, %c0_20] : memref<3x550x128xf32, #tpu.memory_space<vmem>>, vector<1x548x128xf32>
    %59 = vector.shape_cast %58 : vector<1x548x128xf32> to vector<548x128xf32>
    %c5 = arith.constant 5 : index
    %60 = memref.load %arg7[%c5] : memref<18xf32, #tpu.memory_space<smem>>
    %61 = vector.broadcast %60 : f32 to vector<548x128xf32>
    %62 = arith.mulf %61, %59 : vector<548x128xf32>
    %63 = arith.addf %53, %62 : vector<548x128xf32>
    %c14 = arith.constant 14 : index
    %64 = memref.load %arg7[%c14] : memref<18xf32, #tpu.memory_space<smem>>
    %65 = vector.broadcast %64 : f32 to vector<548x128xf32>
    %66 = arith.mulf %65, %59 : vector<548x128xf32>
    %67 = arith.addf %57, %66 : vector<548x128xf32>
    %c2_21 = arith.constant 2 : index
    %c0_22 = arith.constant 0 : index
    %c0_23 = arith.constant 0 : index
    %68 = vector.load %arg1[%c2_21, %c0_22, %c0_23] : memref<3x550x128xf32, #tpu.memory_space<vmem>>, vector<1x548x128xf32>
    %69 = vector.shape_cast %68 : vector<1x548x128xf32> to vector<548x128xf32>
    %c6 = arith.constant 6 : index
    %70 = memref.load %arg7[%c6] : memref<18xf32, #tpu.memory_space<smem>>
    %71 = vector.broadcast %70 : f32 to vector<548x128xf32>
    %72 = arith.mulf %71, %69 : vector<548x128xf32>
    %73 = arith.addf %63, %72 : vector<548x128xf32>
    %c15 = arith.constant 15 : index
    %74 = memref.load %arg7[%c15] : memref<18xf32, #tpu.memory_space<smem>>
    %75 = vector.broadcast %74 : f32 to vector<548x128xf32>
    %76 = arith.mulf %75, %69 : vector<548x128xf32>
    %77 = arith.addf %67, %76 : vector<548x128xf32>
    %c2_24 = arith.constant 2 : index
    %c1_25 = arith.constant 1 : index
    %c0_26 = arith.constant 0 : index
    %78 = vector.load %arg1[%c2_24, %c1_25, %c0_26] : memref<3x550x128xf32, #tpu.memory_space<vmem>>, vector<1x548x128xf32>
    %79 = vector.shape_cast %78 : vector<1x548x128xf32> to vector<548x128xf32>
    %c7 = arith.constant 7 : index
    %80 = memref.load %arg7[%c7] : memref<18xf32, #tpu.memory_space<smem>>
    %81 = vector.broadcast %80 : f32 to vector<548x128xf32>
    %82 = arith.mulf %81, %79 : vector<548x128xf32>
    %83 = arith.addf %73, %82 : vector<548x128xf32>
    %c16 = arith.constant 16 : index
    %84 = memref.load %arg7[%c16] : memref<18xf32, #tpu.memory_space<smem>>
    %85 = vector.broadcast %84 : f32 to vector<548x128xf32>
    %86 = arith.mulf %85, %79 : vector<548x128xf32>
    %87 = arith.addf %77, %86 : vector<548x128xf32>
    %c2_27 = arith.constant 2 : index
    %c2_28 = arith.constant 2 : index
    %c0_29 = arith.constant 0 : index
    %88 = vector.load %arg1[%c2_27, %c2_28, %c0_29] : memref<3x550x128xf32, #tpu.memory_space<vmem>>, vector<1x548x128xf32>
    %89 = vector.shape_cast %88 : vector<1x548x128xf32> to vector<548x128xf32>
    %c8 = arith.constant 8 : index
    %90 = memref.load %arg7[%c8] : memref<18xf32, #tpu.memory_space<smem>>
    %91 = vector.broadcast %90 : f32 to vector<548x128xf32>
    %92 = arith.mulf %91, %89 : vector<548x128xf32>
    %93 = arith.addf %83, %92 : vector<548x128xf32>
    %c17 = arith.constant 17 : index
    %94 = memref.load %arg7[%c17] : memref<18xf32, #tpu.memory_space<smem>>
    %95 = vector.broadcast %94 : f32 to vector<548x128xf32>
    %96 = arith.mulf %95, %89 : vector<548x128xf32>
    %97 = arith.addf %87, %96 : vector<548x128xf32>
    %cst_30 = arith.constant 0.00999999977 : f32
    %98 = vector.broadcast %cst_30 : f32 to vector<548x128xf32>
    %99 = arith.mulf %98, %93 : vector<548x128xf32>
    %100 = arith.maximumf %93, %99 : vector<548x128xf32>
    %101 = arith.truncf %100 : vector<548x128xf32> to vector<548x128xbf16>
    %cst_31 = arith.constant 0.00999999977 : f32
    %102 = vector.broadcast %cst_31 : f32 to vector<548x128xf32>
    %103 = arith.mulf %102, %97 : vector<548x128xf32>
    %104 = arith.maximumf %97, %103 : vector<548x128xf32>
    %105 = arith.truncf %104 : vector<548x128xf32> to vector<548x128xbf16>
    %c0_32 = arith.constant 0 : index
    %c0_33 = arith.constant 0 : index
    %106 = vector.load %arg3[%c0_32, %c0_33] : memref<220x548xbf16, #tpu.memory_space<vmem>>, vector<220x548xbf16>
    %cst_34 = arith.constant dense<0.000000e+00> : vector<220x128xf32>
    %107 = tpu.matmul %106, %101, %cst_34 {dimension_numbers = #tpu.dot_dimension_numbers<[1], [0], [0], [1], [0, 0, 1, 1], [], []>} : vector<220x548xbf16>, vector<548x128xbf16>, vector<220x128xf32> -> vector<220x128xf32>
    %c0_35 = arith.constant 0 : index
    %c0_36 = arith.constant 0 : index
    %108 = vector.load %arg4[%c0_35, %c0_36] : memref<220x548xbf16, #tpu.memory_space<vmem>>, vector<220x548xbf16>
    %cst_37 = arith.constant dense<0.000000e+00> : vector<220x128xf32>
    %109 = tpu.matmul %108, %105, %cst_37 {dimension_numbers = #tpu.dot_dimension_numbers<[1], [0], [0], [1], [0, 0, 1, 1], [], []>} : vector<220x548xbf16>, vector<548x128xbf16>, vector<220x128xf32> -> vector<220x128xf32>
    %110 = arith.addf %107, %109 : vector<220x128xf32>
    %c0_38 = arith.constant 0 : index
    %c0_39 = arith.constant 0 : index
    %111 = vector.load %arg5[%c0_38, %c0_39] : memref<220x1xf32, #tpu.memory_space<vmem>>, vector<220x1xf32>
    %112 = vector.broadcast %111 : vector<220x1xf32> to vector<220x128xf32>
    %113 = arith.addf %110, %112 : vector<220x128xf32>
    %cst_40 = arith.constant 0.00999999977 : f32
    %114 = vector.broadcast %cst_40 : f32 to vector<220x128xf32>
    %115 = arith.mulf %114, %113 : vector<220x128xf32>
    %116 = arith.maximumf %113, %115 : vector<220x128xf32>
    %117 = arith.truncf %116 : vector<220x128xf32> to vector<220x128xbf16>
    %c0_41 = arith.constant 0 : index
    %c0_42 = arith.constant 0 : index
    %118 = vector.load %arg6[%c0_41, %c0_42] : memref<11x220xbf16, #tpu.memory_space<vmem>>, vector<11x220xbf16>
    %cst_43 = arith.constant dense<0.000000e+00> : vector<11x128xf32>
    %119 = tpu.matmul %118, %117, %cst_43 {dimension_numbers = #tpu.dot_dimension_numbers<[1], [0], [0], [1], [0, 0, 1, 1], [], []>} : vector<11x220xbf16>, vector<220x128xbf16>, vector<11x128xf32> -> vector<11x128xf32>
    %c0_44 = arith.constant 0 : index
    %c0_45 = arith.constant 0 : index
    %120 = vector.load %arg2[%c0_44, %c0_45] : memref<11x128xf32, #tpu.memory_space<vmem>>, vector<11x128xf32>
    %c0_46 = arith.constant 0 : index
    %121 = memref.load %arg9[%c0_46] : memref<3xf32, #tpu.memory_space<smem>>
    %122 = vector.broadcast %121 : f32 to vector<11x128xf32>
    %123 = arith.mulf %120, %122 : vector<11x128xf32>
    %124 = arith.addf %119, %123 : vector<11x128xf32>
    %c1_47 = arith.constant 1 : index
    %125 = memref.load %arg9[%c1_47] : memref<3xf32, #tpu.memory_space<smem>>
    %126 = vector.broadcast %125 : f32 to vector<11x128xf32>
    %127 = arith.addf %124, %126 : vector<11x128xf32>
    %c2_48 = arith.constant 2 : index
    %128 = memref.load %arg9[%c2_48] : memref<3xf32, #tpu.memory_space<smem>>
    %cst_49 = arith.constant dense<0xFF800000> : vector<128xf32>
    %129 = vector.multi_reduction <maximumf>, %127, %cst_49 [0] : vector<11x128xf32> to vector<128xf32>
    %130 = vector.shape_cast %129 : vector<128xf32> to vector<1x128xf32>
    %131 = vector.broadcast %128 : f32 to vector<1x128xf32>
    %132 = arith.maximumf %130, %131 : vector<1x128xf32>
    %133 = vector.broadcast %132 : vector<1x128xf32> to vector<11x128xf32>
    %134 = arith.subf %127, %133 : vector<11x128xf32>
    %135 = math.exp %134 : vector<11x128xf32>
    %cst_50 = arith.constant dense<0.000000e+00> : vector<128xf32>
    %136 = vector.multi_reduction <add>, %135, %cst_50 [0] : vector<11x128xf32> to vector<128xf32>
    %137 = vector.shape_cast %136 : vector<128xf32> to vector<1x128xf32>
    %138 = vector.broadcast %128 : f32 to vector<1x128xf32>
    %139 = arith.subf %138, %132 : vector<1x128xf32>
    %140 = math.exp %139 : vector<1x128xf32>
    %141 = arith.addf %137, %140 : vector<1x128xf32>
    %142 = tpu.reciprocal %141 {approx = true} : vector<1x128xf32> -> vector<1x128xf32>
    %143 = vector.broadcast %142 : vector<1x128xf32> to vector<11x128xf32>
    %144 = arith.mulf %135, %143 : vector<11x128xf32>
    %c0_51 = arith.constant 0 : index
    %c0_52 = arith.constant 0 : index
    %145 = vector.load %arg10[%c0_51, %c0_52] : memref<11x128xf32, #tpu.memory_space<vmem>>, vector<11x128xf32>
    tpu.vector_store %arg10[%c0_51, %c0_52], %144 {strides = array<i32>} : memref<11x128xf32, #tpu.memory_space<vmem>>, vector<11x128xf32>,
    return
  }
  func.func @transform_0(%arg0: i32) -> (i32, i32, i32) {
    %c0_i32 = arith.constant 0 : i32
    %c0_i32_0 = arith.constant 0 : i32
    %c0_i32_1 = arith.constant 0 : i32
    return %c0_i32, %c0_i32_0, %arg0 : i32, i32, i32
  }
  func.func @transform_1(%arg0: i32) -> (i32, i32) {
    %c0_i32 = arith.constant 0 : i32
    %c0_i32_0 = arith.constant 0 : i32
    return %c0_i32, %arg0 : i32, i32
  }
  func.func @transform_2(%arg0: i32) -> (i32, i32) {
    %c0_i32 = arith.constant 0 : i32
    %c0_i32_0 = arith.constant 0 : i32
    %c0_i32_1 = arith.constant 0 : i32
    return %c0_i32, %c0_i32_0 : i32, i32
  }
  func.func @transform_3(%arg0: i32) -> (i32, i32) {
    %c0_i32 = arith.constant 0 : i32
    %c0_i32_0 = arith.constant 0 : i32
    %c0_i32_1 = arith.constant 0 : i32
    return %c0_i32, %c0_i32_0 : i32, i32
  }
  func.func @transform_4(%arg0: i32) -> (i32, i32) {
    %c0_i32 = arith.constant 0 : i32
    %c0_i32_0 = arith.constant 0 : i32
    %c0_i32_1 = arith.constant 0 : i32
    return %c0_i32, %c0_i32_0 : i32, i32
  }
  func.func @transform_5(%arg0: i32) -> (i32, i32) {
    %c0_i32 = arith.constant 0 : i32
    %c0_i32_0 = arith.constant 0 : i32
    %c0_i32_1 = arith.constant 0 : i32
    return %c0_i32, %c0_i32_0 : i32, i32
  }
  func.func @transform_6(%arg0: i32) -> i32 {
    %c0_i32 = arith.constant 0 : i32
    %c0_i32_0 = arith.constant 0 : i32
    return %c0_i32 : i32
  }
  func.func @transform_7(%arg0: i32) -> i32 {
    %c0_i32 = arith.constant 0 : i32
    %c0_i32_0 = arith.constant 0 : i32
    return %c0_i32 : i32
  }
  func.func @transform_8(%arg0: i32) -> i32 {
    %c0_i32 = arith.constant 0 : i32
    %c0_i32_0 = arith.constant 0 : i32
    return %c0_i32 : i32
  }
  func.func @transform_9(%arg0: i32) -> (i32, i32) {
    %c0_i32 = arith.constant 0 : i32
    %c0_i32_0 = arith.constant 0 : i32
    return %c0_i32, %arg0 : i32, i32
  }
}

</mosaic_0001>

<bundles_post_ra>
// kernel: tile.0
= control target key start
LH: loop header
LB: loop body
LE: loop exit
PB: predicated region body
PF: predicated region fallthrough
CT: control target
= control target key end

     0   :  { %s551_s8 = smov 126   ;;  %s552_s9 = smov 127   ;;  %vm3_vm0 = vcmask 7168   ;;  %s1055_s0 = inlined_call_operand.vmem [shape: f32[11,20], index: 0, kind: input, shape index: {}]   ;;  %s1056_s1 = inlined_call_operand.vmem [shape: f32[220,1], index: 1, kind: output, shape index: {}]  }
   0x1   :  { %v31_v0 = vld.sshfl [vmem:[%s1055_s0] sm:$0xff pattern:$0x36147250]   ;;  %v414_v1 = vld.sshfl [vmem:[%s1055_s0 + $0x8] sm:$0xff pattern:$0x11111120]  }
   0x2   :  { %32 = vrot.lane.b32.xlu1 %v31_v0, %s551_s8  ;;  %11 = vrot.lane.b32.xlu0 %v31_v0, %s552_s9  ;;  %s553_s12 = smov 125   ;;  %v73_v2 = vld.sshfl [vmem:[%s1055_s0] sm:$0xff pattern:$0x61472503]   ;;  %s554_s15 = smov 124  }
   0x3   :  { %s555_s16 = smov 123   ;;  %s556_s17 = smov 122   ;;  %v157_v3 = vld.sshfl [vmem:[%s1055_s0] sm:$0xff pattern:$0x14725036]  }
   0x4   :  { %s557_s18 = smov 121   ;;  %s558_s21 = smov 120   ;;  %v480_v4 = vld.sshfl [vmem:[%s1055_s0 + $0x8] sm:$0xff pattern:$0x22222201]   ;;  %v2_v7 = vld [vmem:[%s1055_s0] sm:$0xff]  }
   0x5   :  { %s559_s22 = smov 119   ;;  %s560_s23 = smov 118   ;;  %v233_v5 = vld.sshfl [vmem:[%s1055_s0] sm:$0xff pattern:$0x47250361]  }
   0x6   :  { %45 = vrot.lane.b32.xlu1 %v414_v1, %s551_s8  ;;  %24 = vrot.lane.b32.xlu0 %v414_v1, %s552_s9  ;;  %s561_s24 = smov 117   ;;  %s562_s29 = smov 116   ;;  %v317_v6 = vld.sshfl [vmem:[%s1055_s0] sm:$0xff pattern:$0x72503614]  }
   0x7   :  { %s563_s30 = smov 115   ;;  %s564_s2 = smov 114   ;;  %v401_v8 = vld [vmem:[%s1055_s0 + $0x8] sm:$0x7]   ;;  %4 = vst.msk [vmem:[%s1056_s1] ss:$20 sm:$0xff] %vm3_vm0, %v2_v7  }
   0x8   :  { %s565_s3 = smov 113   ;;  %402 = vst.msk [vmem:[%s1056_s1 + $0xa0] ss:$20 sm:$0x7] %vm3_vm0, %v401_v8   ;;  %s566_s13 = smov 112  }
   0x9   :  { %s567_s14 = smov 111  }
   0xa   :  { %66 = vrot.lane.b32.xlu1 %v414_v1, %s553_s12  ;;  %53 = vrot.lane.b32.xlu0 %v31_v0, %s553_s12 }
   0xe   :  { %87 = vrot.lane.b32.xlu1 %v414_v1, %s554_s15  ;;  %74 = vrot.lane.b32.xlu0 %v73_v2, %s554_s15  ;;  %s568_s15 = smov 110  }
  0x12   :  { %108 = vrot.lane.b32.xlu1 %v414_v1, %s555_s16  ;;  %95 = vrot.lane.b32.xlu0 %v73_v2, %s555_s16  ;;  %s569_s16 = smov 109  }
  0x16   :  { %129 = vrot.lane.b32.xlu1 %v414_v1, %s556_s17  ;;  %116 = vrot.lane.b32.xlu0 %v73_v2, %s556_s17 }
  0x1a   :  { %150 = vrot.lane.b32.xlu1 %v414_v1, %s557_s18  ;;  %137 = vrot.lane.b32.xlu0 %v73_v2, %s557_s18 }
  0x1e   :  { %169 = vrot.lane.b32.xlu1 %v414_v1, %s558_s21  ;;  %158 = vrot.lane.b32.xlu0 %v157_v3, %s558_s21 }
  0x22   :  { %188 = vrot.lane.b32.xlu1 %v414_v1, %s559_s22  ;;  %177 = vrot.lane.b32.xlu0 %v157_v3, %s559_s22 }
  0x26   :  { %207 = vrot.lane.b32.xlu1 %v414_v1, %s560_s23  ;;  %196 = vrot.lane.b32.xlu0 %v157_v3, %s560_s23 }
  0x2a   :  { %226 = vrot.lane.b32.xlu1 %v414_v1, %s561_s24  ;;  %215 = vrot.lane.b32.xlu0 %v157_v3, %s561_s24 }
  0x2e   :  { %247 = vrot.lane.b32.xlu1 %v480_v4, %s562_s29  ;;  %234 = vrot.lane.b32.xlu0 %v233_v5, %s562_s29 }
  0x32   :  { %268 = vrot.lane.b32.xlu1 %v480_v4, %s563_s30  ;;  %255 = vrot.lane.b32.xlu0 %v233_v5, %s563_s30 }
  0x36   :  { %289 = vrot.lane.b32.xlu1 %v480_v4, %s564_s2  ;;  %276 = vrot.lane.b32.xlu0 %v233_v5, %s564_s2 }
  0x3a   :  { %310 = vrot.lane.b32.xlu1 %v480_v4, %s565_s3  ;;  %297 = vrot.lane.b32.xlu0 %v233_v5, %s565_s3 }
  0x3e   :  { %331 = vrot.lane.b32.xlu1 %v480_v4, %s566_s13  ;;  %318 = vrot.lane.b32.xlu0 %v317_v6, %s566_s13 }
  0x42   :  { %352 = vrot.lane.b32.xlu1 %v480_v4, %s567_s14  ;;  %339 = vrot.lane.b32.xlu0 %v317_v6, %s567_s14 }
  0x46   :  { %373 = vrot.lane.b32.xlu1 %v480_v4, %s568_s15  ;;  %360 = vrot.lane.b32.xlu0 %v317_v6, %s568_s15 }
  0x4a   :  { %394 = vrot.lane.b32.xlu1 %v480_v4, %s569_s16  ;;  %381 = vrot.lane.b32.xlu0 %v317_v6, %s569_s16 }
  0x74   :  { %v33_v9 = vpop.permute.xlu1 %32   ;;  %v12_v10 = vpop.permute.xlu0 %11  }
  0x75   :  { %410 = vst.msk [vmem:[%s1056_s1 + $0x2] ss:$100 sm:$0x3] %vm3_vm0, %v33_v9   ;;  %411 = vst.msk [vmem:[%s1056_s1 - $0x9e] ss:$100 sm:$0xc] %vm3_vm0, %v33_v9  }
  0x76   :  { %412 = vst.msk [vmem:[%s1056_s1 + $0x142] ss:$-60 sm:$0x30] %vm3_vm0, %v33_v9   ;;  %413 = vst.msk [vmem:[%s1056_s1 + $0x1e2] ss:$-60 sm:$0xc0] %vm3_vm0, %v33_v9  }
  0x77   :  { %403 = vst.msk [vmem:[%s1056_s1 + $0x1] ss:$100 sm:$0x3] %vm3_vm0, %v12_v10   ;;  %404 = vst.msk [vmem:[%s1056_s1 - $0x9f] ss:$100 sm:$0xc] %vm3_vm0, %v12_v10  }
  0x78   :  { %405 = vst.msk [vmem:[%s1056_s1 + $0x141] ss:$-60 sm:$0x30] %vm3_vm0, %v12_v10   ;;  %406 = vst.msk [vmem:[%s1056_s1 + $0x1e1] ss:$-60 sm:$0xc0] %vm3_vm0, %v12_v10   ;;  %v46_v11 = vpop.permute.xlu1 %45   ;;  %v25_v12 = vpop.permute.xlu0 %24  }
  0x79   :  { %415 = vst.msk [vmem:[%s1056_s1 + $0xa2] ss:$40 sm:$0x3] %vm3_vm0, %v46_v11   ;;  %416 = vst.msk [vmem:[%s1056_s1 + $0xb4] sm:$0x4] %vm3_vm0, %v46_v11  }
  0x7a   :  { %408 = vst.msk [vmem:[%s1056_s1 + $0xa1] ss:$40 sm:$0x3] %vm3_vm0, %v25_v12   ;;  %409 = vst.msk [vmem:[%s1056_s1 + $0xb3] sm:$0x4] %vm3_vm0, %v25_v12  }
  0x7c   :  { %v67_v13 = vpop.permute.xlu1 %66   ;;  %v54_v14 = vpop.permute.xlu0 %53  }
  0x7d   :  { %422 = vst.msk [vmem:[%s1056_s1 + $0xa3] ss:$40 sm:$0x3] %vm3_vm0, %v67_v13   ;;  %423 = vst.msk [vmem:[%s1056_s1 + $0xb5] sm:$0x4] %vm3_vm0, %v67_v13  }
  0x7e   :  { %417 = vst.msk [vmem:[%s1056_s1 + $0x3] ss:$100 sm:$0x3] %vm3_vm0, %v54_v14   ;;  %418 = vst.msk [vmem:[%s1056_s1 - $0x9d] ss:$100 sm:$0xc] %vm3_vm0, %v54_v14  }
  0x7f   :  { %419 = vst.msk [vmem:[%s1056_s1 + $0x143] ss:$-60 sm:$0x30] %vm3_vm0, %v54_v14   ;;  %420 = vst.msk [vmem:[%s1056_s1 + $0x1e3] ss:$-60 sm:$0xc0] %vm3_vm0, %v54_v14  }
  0x80   :  { %v88_v15 = vpop.permute.xlu1 %87   ;;  %v75_v16 = vpop.permute.xlu0 %74  }
  0x81   :  { %429 = vst.msk [vmem:[%s1056_s1 + $0xa4] ss:$40 sm:$0x3] %vm3_vm0, %v88_v15   ;;  %430 = vst.msk [vmem:[%s1056_s1 + $0xb6] sm:$0x4] %vm3_vm0, %v88_v15  }
  0x82   :  { %424 = vst.msk [vmem:[%s1056_s1 + $0x40] ss:$-60 sm:$0x3] %vm3_vm0, %v75_v16   ;;  %425 = vst.msk [vmem:[%s1056_s1 + $0xe0] ss:$-60 sm:$0xc] %vm3_vm0, %v75_v16  }
  0x83   :  { %426 = vst.msk [vmem:[%s1056_s1 + $0x180] ss:$-60 sm:$0x70] %vm3_vm0, %v75_v16   ;;  %427 = vst.msk [vmem:[%s1056_s1 + $0x75] sm:$0x80] %vm3_vm0, %v75_v16  }
  0x84   :  { %v109_v17 = vpop.permute.xlu1 %108   ;;  %v96_v18 = vpop.permute.xlu0 %95  }
  0x85   :  { %436 = vst.msk [vmem:[%s1056_s1 + $0xa5] ss:$40 sm:$0x3] %vm3_vm0, %v109_v17   ;;  %437 = vst.msk [vmem:[%s1056_s1 + $0xb7] sm:$0x4] %vm3_vm0, %v109_v17  }
  0x86   :  { %431 = vst.msk [vmem:[%s1056_s1 + $0x41] ss:$-60 sm:$0x3] %vm3_vm0, %v96_v18   ;;  %432 = vst.msk [vmem:[%s1056_s1 + $0xe1] ss:$-60 sm:$0xc] %vm3_vm0, %v96_v18  }
  0x87   :  { %433 = vst.msk [vmem:[%s1056_s1 + $0x181] ss:$-60 sm:$0x70] %vm3_vm0, %v96_v18   ;;  %434 = vst.msk [vmem:[%s1056_s1 + $0x76] sm:$0x80] %vm3_vm0, %v96_v18  }
  0x88   :  { %v130_v19 = vpop.permute.xlu1 %129   ;;  %v117_v20 = vpop.permute.xlu0 %116  }
  0x89   :  { %443 = vst.msk [vmem:[%s1056_s1 + $0xa6] ss:$40 sm:$0x3] %vm3_vm0, %v130_v19   ;;  %444 = vst.msk [vmem:[%s1056_s1 + $0xb8] sm:$0x4] %vm3_vm0, %v130_v19  }
  0x8a   :  { %438 = vst.msk [vmem:[%s1056_s1 + $0x42] ss:$-60 sm:$0x3] %vm3_vm0, %v117_v20   ;;  %439 = vst.msk [vmem:[%s1056_s1 + $0xe2] ss:$-60 sm:$0xc] %vm3_vm0, %v117_v20  }
  0x8b   :  { %440 = vst.msk [vmem:[%s1056_s1 + $0x182] ss:$-60 sm:$0x70] %vm3_vm0, %v117_v20   ;;  %441 = vst.msk [vmem:[%s1056_s1 + $0x77] sm:$0x80] %vm3_vm0, %v117_v20  }
  0x8c   :  { %v151_v21 = vpop.permute.xlu1 %150   ;;  %v138_v22 = vpop.permute.xlu0 %137  }
  0x8d   :  { %450 = vst.msk [vmem:[%s1056_s1 + $0xa7] ss:$40 sm:$0x3] %vm3_vm0, %v151_v21   ;;  %451 = vst.msk [vmem:[%s1056_s1 + $0xb9] sm:$0x4] %vm3_vm0, %v151_v21  }
  0x8e   :  { %445 = vst.msk [vmem:[%s1056_s1 + $0x43] ss:$-60 sm:$0x3] %vm3_vm0, %v138_v22   ;;  %446 = vst.msk [vmem:[%s1056_s1 + $0xe3] ss:$-60 sm:$0xc] %vm3_vm0, %v138_v22  }
  0x8f   :  { %447 = vst.msk [vmem:[%s1056_s1 + $0x183] ss:$-60 sm:$0x70] %vm3_vm0, %v138_v22   ;;  %448 = vst.msk [vmem:[%s1056_s1 + $0x78] sm:$0x80] %vm3_vm0, %v138_v22  }
  0x90   :  { %v170_v23 = vpop.permute.xlu1 %169   ;;  %v159_v24 = vpop.permute.xlu0 %158  }
  0x91   :  { %456 = vst.msk [vmem:[%s1056_s1 + $0xa8] ss:$40 sm:$0x3] %vm3_vm0, %v170_v23   ;;  %457 = vst.msk [vmem:[%s1056_s1 + $0xba] sm:$0x4] %vm3_vm0, %v170_v23  }
  0x92   :  { %452 = vst.msk [vmem:[%s1056_s1 + $0x80] ss:$-60 sm:$0x7] %vm3_vm0, %v159_v24   ;;  %453 = vst.msk [vmem:[%s1056_s1 + $0x120] ss:$-60 sm:$0x18] %vm3_vm0, %v159_v24  }
  0x93   :  { %454 = vst.msk [vmem:[%s1056_s1 + $0x1c0] ss:$-60 sm:$0xe0] %vm3_vm0, %v159_v24  }
  0x94   :  { %v189_v25 = vpop.permute.xlu1 %188   ;;  %v178_v26 = vpop.permute.xlu0 %177  }
  0x95   :  { %462 = vst.msk [vmem:[%s1056_s1 + $0xa9] ss:$40 sm:$0x3] %vm3_vm0, %v189_v25   ;;  %463 = vst.msk [vmem:[%s1056_s1 + $0xbb] sm:$0x4] %vm3_vm0, %v189_v25  }
  0x96   :  { %458 = vst.msk [vmem:[%s1056_s1 + $0x81] ss:$-60 sm:$0x7] %vm3_vm0, %v178_v26   ;;  %459 = vst.msk [vmem:[%s1056_s1 + $0x121] ss:$-60 sm:$0x18] %vm3_vm0, %v178_v26  }
  0x97   :  { %460 = vst.msk [vmem:[%s1056_s1 + $0x1c1] ss:$-60 sm:$0xe0] %vm3_vm0, %v178_v26  }
  0x98   :  { %v208_v27 = vpop.permute.xlu1 %207   ;;  %v197_v28 = vpop.permute.xlu0 %196  }
  0x99   :  { %468 = vst.msk [vmem:[%s1056_s1 + $0xaa] ss:$40 sm:$0x3] %vm3_vm0, %v208_v27   ;;  %469 = vst.msk [vmem:[%s1056_s1 + $0xbc] sm:$0x4] %vm3_vm0, %v208_v27  }
  0x9a   :  { %464 = vst.msk [vmem:[%s1056_s1 + $0x82] ss:$-60 sm:$0x7] %vm3_vm0, %v197_v28   ;;  %465 = vst.msk [vmem:[%s1056_s1 + $0x122] ss:$-60 sm:$0x18] %vm3_vm0, %v197_v28  }
  0x9b   :  { %466 = vst.msk [vmem:[%s1056_s1 + $0x1c2] ss:$-60 sm:$0xe0] %vm3_vm0, %v197_v28  }
  0x9c   :  { %v227_v29 = vpop.permute.xlu1 %226   ;;  %v216_v30 = vpop.permute.xlu0 %215  }
  0x9d   :  { %474 = vst.msk [vmem:[%s1056_s1 + $0xab] ss:$40 sm:$0x3] %vm3_vm0, %v227_v29   ;;  %475 = vst.msk [vmem:[%s1056_s1 + $0xbd] sm:$0x4] %vm3_vm0, %v227_v29  }
  0x9e   :  { %470 = vst.msk [vmem:[%s1056_s1 + $0x83] ss:$-60 sm:$0x7] %vm3_vm0, %v216_v30   ;;  %471 = vst.msk [vmem:[%s1056_s1 + $0x123] ss:$-60 sm:$0x18] %vm3_vm0, %v216_v30  }
  0x9f   :  { %472 = vst.msk [vmem:[%s1056_s1 + $0x1c3] ss:$-60 sm:$0xe0] %vm3_vm0, %v216_v30  }
  0xa0   :  { %v248_v31 = vpop.permute.xlu1 %247   ;;  %v235_v32 = vpop.permute.xlu0 %234  }
  0xa1   :  { %481 = vst.msk [vmem:[%s1056_s1 + $0xc0] ss:$-20 sm:$0x3] %vm3_vm0, %v248_v31   ;;  %482 = vst.msk [vmem:[%s1056_s1 + $0xd2] sm:$0x4] %vm3_vm0, %v248_v31  }
  0xa2   :  { %476 = vst.msk [vmem:[%s1056_s1 + $0x20] ss:$100 sm:$0x3] %vm3_vm0, %v235_v32   ;;  %477 = vst.msk [vmem:[%s1056_s1 + $0xc0] ss:$-60 sm:$0xc] %vm3_vm0, %v235_v32  }
  0xa3   :  { %478 = vst.msk [vmem:[%s1056_s1 + $0x160] ss:$-60 sm:$0x30] %vm3_vm0, %v235_v32   ;;  %479 = vst.msk [vmem:[%s1056_s1 + $0x200] ss:$-60 sm:$0xc0] %vm3_vm0, %v235_v32  }
  0xa4   :  { %v269_v33 = vpop.permute.xlu1 %268   ;;  %v256_v34 = vpop.permute.xlu0 %255  }
  0xa5   :  { %488 = vst.msk [vmem:[%s1056_s1 + $0xc1] ss:$-20 sm:$0x3] %vm3_vm0, %v269_v33   ;;  %489 = vst.msk [vmem:[%s1056_s1 + $0xd3] sm:$0x4] %vm3_vm0, %v269_v33  }
  0xa6   :  { %483 = vst.msk [vmem:[%s1056_s1 + $0x21] ss:$100 sm:$0x3] %vm3_vm0, %v256_v34   ;;  %484 = vst.msk [vmem:[%s1056_s1 + $0xc1] ss:$-60 sm:$0xc] %vm3_vm0, %v256_v34  }
  0xa7   :  { %485 = vst.msk [vmem:[%s1056_s1 + $0x161] ss:$-60 sm:$0x30] %vm3_vm0, %v256_v34   ;;  %486 = vst.msk [vmem:[%s1056_s1 + $0x201] ss:$-60 sm:$0xc0] %vm3_vm0, %v256_v34  }
  0xa8   :  { %v290_v35 = vpop.permute.xlu1 %289   ;;  %v277_v36 = vpop.permute.xlu0 %276  }
  0xa9   :  { %495 = vst.msk [vmem:[%s1056_s1 + $0xc2] ss:$-20 sm:$0x3] %vm3_vm0, %v290_v35   ;;  %496 = vst.msk [vmem:[%s1056_s1 + $0xd4] sm:$0x4] %vm3_vm0, %v290_v35  }
  0xaa   :  { %490 = vst.msk [vmem:[%s1056_s1 + $0x22] ss:$100 sm:$0x3] %vm3_vm0, %v277_v36   ;;  %491 = vst.msk [vmem:[%s1056_s1 + $0xc2] ss:$-60 sm:$0xc] %vm3_vm0, %v277_v36  }
  0xab   :  { %492 = vst.msk [vmem:[%s1056_s1 + $0x162] ss:$-60 sm:$0x30] %vm3_vm0, %v277_v36   ;;  %493 = vst.msk [vmem:[%s1056_s1 + $0x202] ss:$-60 sm:$0xc0] %vm3_vm0, %v277_v36  }
  0xac   :  { %v311_v37 = vpop.permute.xlu1 %310   ;;  %v298_v38 = vpop.permute.xlu0 %297  }
  0xad   :  { %502 = vst.msk [vmem:[%s1056_s1 + $0xc3] ss:$-20 sm:$0x3] %vm3_vm0, %v311_v37   ;;  %503 = vst.msk [vmem:[%s1056_s1 + $0xd5] sm:$0x4] %vm3_vm0, %v311_v37  }
  0xae   :  { %497 = vst.msk [vmem:[%s1056_s1 + $0x23] ss:$100 sm:$0x3] %vm3_vm0, %v298_v38   ;;  %498 = vst.msk [vmem:[%s1056_s1 + $0xc3] ss:$-60 sm:$0xc] %vm3_vm0, %v298_v38  }
  0xaf   :  { %499 = vst.msk [vmem:[%s1056_s1 + $0x163] ss:$-60 sm:$0x30] %vm3_vm0, %v298_v38   ;;  %500 = vst.msk [vmem:[%s1056_s1 + $0x203] ss:$-60 sm:$0xc0] %vm3_vm0, %v298_v38  }
  0xb0   :  { %v332_v39 = vpop.permute.xlu1 %331   ;;  %v319_v40 = vpop.permute.xlu0 %318  }
  0xb1   :  { %509 = vst.msk [vmem:[%s1056_s1 + $0xc4] ss:$-20 sm:$0x3] %vm3_vm0, %v332_v39   ;;  %510 = vst.msk [vmem:[%s1056_s1 + $0xd6] sm:$0x4] %vm3_vm0, %v332_v39  }
  0xb2   :  { %504 = vst.msk [vmem:[%s1056_s1 + $0x60] ss:$-60 sm:$0x3] %vm3_vm0, %v319_v40   ;;  %505 = vst.msk [vmem:[%s1056_s1 + $0x100] ss:$-60 sm:$0x1c] %vm3_vm0, %v319_v40  }
  0xb3   :  { %506 = vst.msk [vmem:[%s1056_s1 + $0x1a0] ss:$-60 sm:$0x60] %vm3_vm0, %v319_v40   ;;  %507 = vst.msk [vmem:[%s1056_s1 + $0x95] sm:$0x80] %vm3_vm0, %v319_v40  }
  0xb4   :  { %v353_v41 = vpop.permute.xlu1 %352   ;;  %v340_v42 = vpop.permute.xlu0 %339  }
  0xb5   :  { %516 = vst.msk [vmem:[%s1056_s1 + $0xc5] ss:$-20 sm:$0x3] %vm3_vm0, %v353_v41   ;;  %517 = vst.msk [vmem:[%s1056_s1 + $0xd7] sm:$0x4] %vm3_vm0, %v353_v41  }
  0xb6   :  { %511 = vst.msk [vmem:[%s1056_s1 + $0x61] ss:$-60 sm:$0x3] %vm3_vm0, %v340_v42   ;;  %512 = vst.msk [vmem:[%s1056_s1 + $0x101] ss:$-60 sm:$0x1c] %vm3_vm0, %v340_v42  }
  0xb7   :  { %513 = vst.msk [vmem:[%s1056_s1 + $0x1a1] ss:$-60 sm:$0x60] %vm3_vm0, %v340_v42   ;;  %514 = vst.msk [vmem:[%s1056_s1 + $0x96] sm:$0x80] %vm3_vm0, %v340_v42  }
  0xb8   :  { %v374_v43 = vpop.permute.xlu1 %373   ;;  %v361_v44 = vpop.permute.xlu0 %360  }
  0xb9   :  { %523 = vst.msk [vmem:[%s1056_s1 + $0xc6] ss:$-20 sm:$0x3] %vm3_vm0, %v374_v43   ;;  %524 = vst.msk [vmem:[%s1056_s1 + $0xd8] sm:$0x4] %vm3_vm0, %v374_v43  }
  0xba   :  { %518 = vst.msk [vmem:[%s1056_s1 + $0x62] ss:$-60 sm:$0x3] %vm3_vm0, %v361_v44   ;;  %519 = vst.msk [vmem:[%s1056_s1 + $0x102] ss:$-60 sm:$0x1c] %vm3_vm0, %v361_v44  }
  0xbb   :  { %520 = vst.msk [vmem:[%s1056_s1 + $0x1a2] ss:$-60 sm:$0x60] %vm3_vm0, %v361_v44   ;;  %521 = vst.msk [vmem:[%s1056_s1 + $0x97] sm:$0x80] %vm3_vm0, %v361_v44  }
  0xbc   :  { %v395_v45 = vpop.permute.xlu1 %394   ;;  %v382_v46 = vpop.permute.xlu0 %381  }
  0xbd   :  { %530 = vst.msk [vmem:[%s1056_s1 + $0xc7] ss:$-20 sm:$0x3] %vm3_vm0, %v395_v45   ;;  %531 = vst.msk [vmem:[%s1056_s1 + $0xd9] sm:$0x4] %vm3_vm0, %v395_v45  }
  0xbe   :  { %525 = vst.msk [vmem:[%s1056_s1 + $0x63] ss:$-60 sm:$0x3] %vm3_vm0, %v382_v46   ;;  %526 = vst.msk [vmem:[%s1056_s1 + $0x103] ss:$-60 sm:$0x1c] %vm3_vm0, %v382_v46  }
  0xbf   :  { %527 = vst.msk [vmem:[%s1056_s1 + $0x1a3] ss:$-60 sm:$0x60] %vm3_vm0, %v382_v46   ;;  %528 = vst.msk [vmem:[%s1056_s1 + $0x98] sm:$0x80] %vm3_vm0, %v382_v46  }

// kernel: actor_forward_pallas.1
= control target key start
LH: loop header
LB: loop body
LE: loop exit
PB: predicated region body
PF: predicated region fallthrough
CT: control target
= control target key end

     0   :  { %14 = vsyncpa [#allocation3], 0  ;;  %s14001_s0 = inlined_call_operand.vmem [shape: f32[3,550,128], index: 0, kind: input, shape index: {}]   ;;  %s14002_s1 = inlined_call_operand.vmem [shape: f32[11,128], index: 1, kind: input, shape index: {}]   ;;  %s14003_s2 = inlined_call_operand.vmem [shape: bf16[220,548], index: 2, kind: input, shape index: {}]   ;;  %s14004_s3 = inlined_call_operand.vmem [shape: bf16[220,548], index: 3, kind: input, shape index: {}]   ;;  %s14005_s4 = inlined_call_operand.vmem [shape: f32[220,1], index: 4, kind: input, shape index: {}]   ;;  %s14006_s5 = inlined_call_operand.vmem [shape: bf16[11,220], index: 5, kind: input, shape index: {}]   ;;  %s14007_s6 = inlined_call_operand.vmem [shape: f32[18], index: 6, kind: input, shape index: {}]   ;;  %s14008_s7 = inlined_call_operand.vmem [shape: f32[2], index: 7, kind: input, shape index: {}]   ;;  %s14009_s8 = inlined_call_operand.vmem [shape: f32[3], index: 8, kind: input, shape index: {}]   ;;  %s14010_s9 = inlined_call_operand.vmem [shape: f32[11,128], index: 9, kind: output, shape index: {}]  }
   0x1   :  { %15 = vsyncpa [#allocation5], 0  ;;  %s44_s11 = sshll.u32 %s14008_s7, 4  ;;  %s34_s14 = sshll.u32 %s14007_s6, 4  ;;  %s45_s11 = int_to_ptr.vmem [resolvable:$true] %s44_s11  ;;  %s35_s14 = int_to_ptr.vmem [resolvable:$true] %s34_s14 }
   0x2   :  { %s7396_s15 = scalar_lea.vmem %s45_s11, 16  ;;  %p7401_p1 = scmp.lt.s32.totalorder %s45_s11, %s45_s11 }
   0x3   :  { %p7397_p0 = scmp.ne.s32.totalorder %s45_s11, %s7396_s15  ;;  %p7402_p2 = scmp.lt.s32.totalorder %s7396_s15, %s7396_s15 }
   0x5   :  { %p7403_p3 = por %p7402_p2, %p7401_p1 }
   0x7   :  { %p7404_p4 = pnand %p7403_p3, %p7397_p0 }
   0x9   :  { %7407 = shalt.err (!%p7404_p4)
}
   0xa   :  { %s7436_s16 = smov [#allocation4]   ;;  %s7408_s17 = scalar_lea.vmem %s35_s14, 16 }
   0xb   :  { %47 = dma.vmem_to_smem %s45_s11, 16, %s7436_s16, [#allocation5]  }
   0xc   :  { %p7409_p5 = scmp.ne.s32.totalorder %s35_s14, %s7408_s17  ;;  %p7413_p6 = scmp.lt.s32.totalorder %s35_s14, %s35_s14 }
   0xd   :  { %p7414_p7 = scmp.lt.s32.totalorder %s7408_s17, %s7408_s17 }
   0xf   :  { %p7415_p8 = por %p7414_p7, %p7413_p6 }
  0x11   :  { %p7416_p9 = pnand %p7415_p8, %p7409_p5 }
  0x13   :  { %7419 = shalt.err (!%p7416_p9)
}
  0x14   :  { %s7437_s7 = smov [#allocation2]   ;;  %s54_s19 = sshll.u32 %s14009_s8, 4  ;;  %s55_s19 = int_to_ptr.vmem [resolvable:$true] %s54_s19 }
  0x15   :  { %37 = dma.vmem_to_smem %s35_s14, 16, %s7437_s7, [#allocation3]  }
  0x16   :  { %s7420_s20 = scalar_lea.vmem %s55_s19, 16  ;;  %p7425_p11 = scmp.lt.s32.totalorder %s55_s19, %s55_s19 }
  0x17   :  { %p7421_p10 = scmp.ne.s32.totalorder %s55_s19, %s7420_s20  ;;  %p7426_p12 = scmp.lt.s32.totalorder %s7420_s20, %s7420_s20 }
  0x19   :  { %p7427_p13 = por %p7426_p12, %p7425_p11 }
  0x1b   :  { %p7428_p0 = pnand %p7427_p13, %p7421_p10 }
  0x1d   :  { %7431 = shalt.err (!%p7428_p0)
}
  0x1e   :  { %s7438_s21 = smov [#allocation6]  }
  0x1f   :  { %57 = dma.vmem_to_smem %s55_s19, 16, %s7438_s21, [#allocation5]  }
  0x20   :  { %7432 = dma.done.wait [#allocation3], 16  }
  0x21   :  { %7433 = vsyncadd [#allocation3], 4294967280 }
  0x22   :  { %7434 = dma.done.wait [#allocation5], 32  }
  0x23   :  { %7435 = vsyncadd [#allocation5], 4294967264 }
  0x24   :  { %67 = sfence }
  0x25   :  { %s5771_s22 = sld [smem:[#allocation4 + $0x1]]  ;;  %v105_v0 = vld [vmem:[%s14001_s0 + $0xf0] sm:$0xff]  ;;  %v106_v1 = vld [vmem:[%s14001_s0 + $0xf8] sm:$0xff]  ;;  %v5808_v22 = vld [vmem:[%s14001_s0 + $0x320] sm:$0xff]  ;;  %vm4125_vm0 = vcmask 1041408   ;;  %vm4082_vm1 = vcmask 293888  }
  0x26   :  { %s144_s23 = sld [smem:[#allocation2]]  ;;  %v454_v4 = vld [vmem:[%s14001_s0 + $0xf1] sm:$0xff]  ;;  %v455_v5 = vld [vmem:[%s14001_s0 + $0xf9] sm:$0xff]  ;;  %v5879_v34 = vld [vmem:[%s14001_s0 + $0x321] sm:$0xff]  ;;  %vm5677_vm2 = vcmask 752640   ;;  %vm5681_vm3 = vcmask 1045504  }
  0x27   :  { %s5772_s24 = sld [smem:[#allocation2 + $0x9]]  ;;  %v137_v11 = vld [vmem:[%s14001_s0 + $0x1f0] sm:$0xff]  ;;  %v804_v17 = vld [vmem:[%s14001_s0 + $0xfa] sm:$0xff]  ;;  %v5950_v43 = vld [vmem:[%s14001_s0 + $0x322] sm:$0xff]  ;;  %vm5731_vm4 = vcmask 1042432  }
  0x28   :  { %s5773_s25 = sld [smem:[#allocation2 + $0x1]]  ;;  %v803_v16 = vld [vmem:[%s14001_s0 + $0xf2] sm:$0xff]  ;;  %v5949_v42 = vld [vmem:[%s14001_s0 + $0x31a] sm:$0xff]  ;;  %v6021_v54 = vld [vmem:[%s14001_s0 + $0x548] sm:$0xff] }
  0x29   :  { %s5774_s8 = sld [smem:[#allocation2 + $0xa]]  ;;  %v5807_v21 = vld [vmem:[%s14001_s0 + $0x318] sm:$0xff]  ;;  %v6020_v53 = vld [vmem:[%s14001_s0 + $0x540] sm:$0xff] }
  0x2a   :  { %s5776_s30 = sld [smem:[#allocation2 + $0xb]]  ;;  %v138_v23 = vld [vmem:[%s14001_s0 + $0x1f8] sm:$0xff]  ;;  %v6091_v63 = vld [vmem:[%s14001_s0 + $0x541] sm:$0xff] }
  0x2b   :  { %s7505_s10 = sld [smem:[#allocation2 + $0x2]]  ;;  %v7507_v2 = vstv %s5771_s22  ;;  %v5878_v33 = vld [vmem:[%s14001_s0 + $0x319] sm:$0xff] }
  0x2c   :  { %s7517_s15 = sld [smem:[#allocation2 + $0xc]]  ;;  %v7519_v6 = vstv %s144_s23 }
  0x2d   :  { %v7509_v3 = vstv %s5772_s24  ;;  %s7523_s16 = sld [smem:[#allocation2 + $0x3]]  ;;  %v7547_v18 = vmul.f32 %v7519_v6, %v105_v0  ;;  %v7550_v19 = vmul.f32 %v7519_v6, %v106_v1  ;;  %v7566_v24 = vmul.f32 %v7519_v6, %v137_v11 }
  0x2e   :  { %v316_v7 = vmul.f32 %v7509_v3, %v105_v0  ;;  %v317_v8 = vmul.f32 %v7509_v3, %v106_v1  ;;  %v7525_v9 = vstv %s5773_s25  ;;  %s7529_s17 = sld [smem:[#allocation2 + $0xd]]  ;;  %v7571_v27 = vmul.f32 %v7519_v6, %v138_v23  ;;  %v6092_v0 = vld [vmem:[%s14001_s0 + $0x549] sm:$0xff] }
  0x2f   :  { %v7527_v10 = vstv %s5774_s8  ;;  %s7544_s22 = sld [smem:[#allocation2 + $0x4]]  ;;  %14013 = vst [vmem:[#allocation9_spill] sm:$0xff] %v7566_v24  ;;  %v348_v28 = vmul.f32 %v7509_v3, %v137_v11  ;;  %v7575_v29 = vmul.f32 %v7525_v9, %v454_v4  ;;  %v7591_v35 = vmul.f32 %v7525_v9, %v455_v5  ;;  %v6052_v24 = vld [vmem:[%s14001_s0 + $0x640] sm:$0xff] }
  0x30   :  { %v385_v12 = vadd.f32 %v316_v7, %v7507_v2  ;;  %v386_v13 = vadd.f32 %v317_v8, %v7507_v2  ;;  %v665_v14 = vmul.f32 %v7527_v10, %v454_v4  ;;  %v666_v15 = vmul.f32 %v7527_v10, %v455_v5  ;;  %s7560_s26 = sld [smem:[#allocation2 + $0xe]]  ;;  %14014 = vst [vmem:[#allocation10_spill] sm:$0xff] %v7571_v27 }
  0x31   :  { %v7552_v20 = vstv %s5776_s30  ;;  %s7568_s29 = sld [smem:[#allocation2 + $0x5]]  ;;  %v7594_v36 = vstv %s7505_s10  ;;  %v349_v44 = vmul.f32 %v7509_v3, %v138_v23  ;;  %v417_v48 = vadd.f32 %v348_v28, %v7507_v2 }
  0x32   :  { %v734_v25 = vadd.f32 %v665_v14, %v385_v12  ;;  %v735_v26 = vadd.f32 %v666_v15, %v386_v13  ;;  %v1014_v30 = vmul.f32 %v7552_v20, %v803_v16  ;;  %v1015_v31 = vmul.f32 %v7552_v20, %v804_v17  ;;  %s7588_s14 = sld [smem:[#allocation2 + $0xf]]  ;;  %v6162_v14 = vld [vmem:[%s14001_s0 + $0x542] sm:$0xff]  ;;  %v6163_v15 = vld [vmem:[%s14001_s0 + $0x54a] sm:$0xff] }
  0x33   :  { %v7580_v32 = vstv %s7517_s15  ;;  %s7598_s15 = sld [smem:[#allocation2 + $0x6]]  ;;  %v7613_v45 = vstv %s7523_s16  ;;  %v7621_v49 = vmul.f32 %v7594_v36, %v803_v16  ;;  %v7633_v55 = vmul.f32 %v7594_v36, %v804_v17 }
  0x34   :  { %v1364_v37 = vmul.f32 %v5807_v21, %v7580_v32  ;;  %v1365_v38 = vmul.f32 %v5808_v22, %v7580_v32  ;;  %v1083_v39 = vadd.f32 %v1014_v30, %v734_v25  ;;  %v1084_v40 = vadd.f32 %v1015_v31, %v735_v26  ;;  %s7609_s10 = sld [smem:[#allocation2 + $0x10]]  ;;  %v486_v30 = vld [vmem:[%s14001_s0 + $0x1f1] sm:$0xff]  ;;  %v487_v31 = vld [vmem:[%s14001_s0 + $0x1f9] sm:$0xff] }
  0x35   :  { %v7601_v41 = vstv %s7529_s17  ;;  %s7617_s17 = sld [smem:[#allocation2 + $0x7]]  ;;  %v7636_v56 = vstv %s7544_s22  ;;  %v7643_v59 = vmul.f32 %v5807_v21, %v7613_v45  ;;  %v7655_v1 = vmul.f32 %v5808_v22, %v7613_v45 }
  0x36   :  { %v1713_v46 = vmul.f32 %v5878_v33, %v7601_v41  ;;  %v1714_v47 = vmul.f32 %v5879_v34, %v7601_v41  ;;  %v1433_v50 = vadd.f32 %v1364_v37, %v1083_v39  ;;  %v1434_v51 = vadd.f32 %v1365_v38, %v1084_v40  ;;  %s6202_s24 = sld [smem:[#allocation2 + $0x11]]  ;;  %v835_v39 = vld [vmem:[%s14001_s0 + $0x1f2] sm:$0xff] }
  0x37   :  { %v7624_v52 = vstv %s7560_s26  ;;  %s7640_s25 = sld [smem:[#allocation2 + $0x8]]  ;;  %v7658_v4 = vstv %s7568_s29  ;;  %v7663_v8 = vmul.f32 %v5878_v33, %v7636_v56  ;;  %v7675_v16 = vmul.f32 %v5879_v34, %v7636_v56 }
  0x38   :  { %v2062_v57 = vmul.f32 %v5949_v42, %v7624_v52  ;;  %v2063_v58 = vmul.f32 %v5950_v43, %v7624_v52  ;;  %v1782_v60 = vadd.f32 %v1713_v46, %v1433_v50  ;;  %v1783_v61 = vadd.f32 %v1714_v47, %v1434_v51  ;;  %s10958_s28 = sld [smem:[#allocation4]] }
  0x39   :  { %v7646_v62 = vstv %s7588_s14  ;;  %14015 = vst [vmem:[#allocation11_spill] sm:$0xff] %v7663_v8  ;;  %14016 = vst [vmem:[#allocation12_spill] sm:$0xff] %v7675_v16  ;;  %v7678_v17 = vstv %s7598_s15  ;;  %v7683_v23 = vmul.f32 %v5949_v42, %v7658_v4  ;;  %v7694_v33 = vmul.f32 %v5950_v43, %v7658_v4  ;;  %v836_v43 = vld [vmem:[%s14001_s0 + $0x1fa] sm:$0xff]  ;;  %v834_v16 = vld [vmem:[%s14001_s0 + $0x1ea] sm:$0xff]  ;;  %s5664_s21 = sld [smem:[#allocation6]] }
  0x3a   :  { %v2412_v5 = vmul.f32 %v6020_v53, %v7646_v62  ;;  %v2413_v7 = vmul.f32 %v6021_v54, %v7646_v62  ;;  %v2131_v11 = vadd.f32 %v2062_v57, %v1782_v60  ;;  %v2132_v12 = vadd.f32 %v2063_v58, %v1783_v61 }
  0x3b   :  { %v7666_v13 = vstv %s7609_s10  ;;  %14017 = vst [vmem:[#allocation13_spill] sm:$0xff] %v7683_v23  ;;  %14018 = vst [vmem:[#allocation14_spill] sm:$0xff] %v7694_v33  ;;  %v7697_v34 = vstv %s7617_s17  ;;  %v7705_v40 = vmul.f32 %v6020_v53, %v7678_v17  ;;  %v418_v47 = vadd.f32 %v349_v44, %v7507_v2  ;;  %v5839_v53 = vld [vmem:[%s14001_s0 + $0x418] sm:$0xff] }
  0x3c   :  { %v2761_v21 = vmul.f32 %v6091_v63, %v7666_v13  ;;  %v2762_v22 = vmul.f32 %v6092_v0, %v7666_v13  ;;  %v2481_v25 = vadd.f32 %v2412_v5, %v2131_v11  ;;  %v2482_v26 = vadd.f32 %v2413_v7, %v2132_v12  ;;  %v6090_v23 = vld [vmem:[%s14001_s0 + $0x539] sm:$0xff] }
  0x3d   :  { %v7685_v28 = vstv %s6202_s24  ;;  %14019 = vst [vmem:[#allocation15_spill] sm:$0xff] %v7705_v40  ;;  %v7712_v50 = vmul.f32 %v6021_v54, %v7678_v17  ;;  %v7715_v51 = vstv %s7640_s25  ;;  %v697_v57 = vmul.f32 %v7527_v10, %v486_v30  ;;  %v5840_v54 = vld [vmem:[%s14001_s0 + $0x420] sm:$0xff]  ;;  %s6374_s24 = sld [smem:[#allocation6 + $0x1]] }
  0x3e   :  { %v3110_v37 = vmul.f32 %v6162_v14, %v7685_v28  ;;  %v3111_v38 = vmul.f32 %v6163_v15, %v7685_v28  ;;  %v2830_v42 = vadd.f32 %v2761_v21, %v2481_v25  ;;  %v2831_v46 = vadd.f32 %v2762_v22, %v2482_v26 }
  0x3f   :  { %14020 = vst [vmem:[#allocation16_spill] sm:$0xff] %v7712_v50  ;;  %v698_v58 = vmul.f32 %v7527_v10, %v487_v31  ;;  %v7723_v60 = vmul.f32 %v6091_v63, %v7697_v34  ;;  %v1046_v5 = vmul.f32 %v7552_v20, %v835_v39  ;;  %v7730_v7 = vmul.f32 %v6092_v0, %v7697_v34  ;;  %v5910_v63 = vld [vmem:[%s14001_s0 + $0x419] sm:$0xff]  ;;  %v5911_v0 = vld [vmem:[%s14001_s0 + $0x421] sm:$0xff] }
  0x40   :  { %v3179_v44 = vadd.f32 %v3110_v37, %v2830_v42  ;;  %v3180_v61 = vadd.f32 %v3111_v38, %v2831_v46  ;;  %v766_v11 = vadd.f32 %v697_v57, %v417_v48  ;;  %v1047_v21 = vmul.f32 %v7552_v20, %v836_v43 }
  0x41   :  { %14021 = vst [vmem:[#allocation17_spill] sm:$0xff] %v7723_v60  ;;  %14022 = vst [vmem:[#allocation18_spill] sm:$0xff] %v7730_v7  ;;  %v767_v12 = vadd.f32 %v698_v58, %v418_v47  ;;  %v7737_v22 = vmul.f32 %v6162_v14, %v7715_v51  ;;  %v1396_v37 = vmul.f32 %v5839_v53, %v7580_v32  ;;  %v5981_v14 = vld [vmem:[%s14001_s0 + $0x41a] sm:$0xff]  ;;  %v5982_v47 = vld [vmem:[%s14001_s0 + $0x422] sm:$0xff] }
  0x42   :  { %v3421_v25 = vmul.f32 0.01, %v3179_v44  ;;  %v3422_v26 = vmul.f32 0.01, %v3180_v61  ;;  %v7744_v48 = vmul.f32 %v6163_v15, %v7715_v51  ;;  %v1115_v38 = vadd.f32 %v1046_v5, %v766_v11 }
  0x43   :  { %14023 = vst [vmem:[#allocation19_spill] sm:$0xff] %v7737_v22  ;;  %v1116_v42 = vadd.f32 %v1047_v21, %v767_v12  ;;  %v1397_v46 = vmul.f32 %v5840_v54, %v7580_v32  ;;  %v7754_v27 = vmul.f32 %v7525_v9, %v486_v30  ;;  %v1745_v15 = vmul.f32 %v5910_v63, %v7601_v41 }
  0x44   :  { %14024 = vst [vmem:[#allocation20_spill] sm:$0xff] %v7744_v48  ;;  %v3490_v57 = vmax.f32 %v3179_v44, %v3421_v25  ;;  %v3491_v58 = vmax.f32 %v3180_v61, %v3422_v26  ;;  %v7758_v5 = vmul.f32 %v7525_v9, %v487_v31  ;;  %v1465_v11 = vadd.f32 %v1396_v37, %v1115_v38  ;;  %v6053_v44 = vld [vmem:[%s14001_s0 + $0x648] sm:$0xff] }
  0x45   :  { %14025 = vst [vmem:[#allocation21_spill] sm:$0xff] %v7754_v27  ;;  %v1466_v12 = vadd.f32 %v1397_v46, %v1116_v42  ;;  %v1746_v21 = vmul.f32 %v5911_v0, %v7601_v41  ;;  %v7768_v30 = vmul.f32 %v7594_v36, %v835_v39  ;;  %v2094_v25 = vmul.f32 %v5981_v14, %v7624_v52  ;;  %v6123_v26 = vld [vmem:[%s14001_s0 + $0x641] sm:$0xff]  ;;  %v6124_v37 = vld [vmem:[%s14001_s0 + $0x649] sm:$0xff] }
  0x46   :  { %14026 = vst [vmem:[#allocation22_spill] sm:$0xff] %v7758_v5  ;;  %v3544_v61 = vpack.c.bf16 %v3491_v58, %v3490_v57  ;;  %v2095_v31 = vmul.f32 %v5982_v47, %v7624_v52  ;;  %v7779_v38 = vmul.f32 %v7594_v36, %v836_v43  ;;  %v7782_v42 = vmul.f32 %v5839_v53, %v7613_v45  ;;  %v6194_v43 = vld [vmem:[%s14001_s0 + $0x642] sm:$0xff]  ;;  %v6195_v53 = vld [vmem:[%s14001_s0 + $0x64a] sm:$0xff] }
  0x47   :  { %14027 = vst [vmem:[#allocation23_spill] sm:$0xff] %v7768_v30  ;;  %v1814_v39 = vadd.f32 %v1745_v15, %v1465_v11  ;;  %v1815_v46 = vadd.f32 %v1746_v21, %v1466_v12  ;;  %v7785_v57 = vmul.f32 %v5840_v54, %v7613_v45  ;;  %v7788_v58 = vmul.f32 %v5910_v63, %v7636_v56  ;;  %v89_v63 = vld [vmem:[%s14001_s0 + $0x70] sm:$0xff]  ;;  %v90_v21 = vld [vmem:[%s14001_s0 + $0x78] sm:$0xff] }
  0x48   :  { %14028 = vst [vmem:[#allocation24_spill] sm:$0xff] %v7779_v38  ;;  %14029 = vst [vmem:[#allocation25_spill] sm:$0xff] %v7782_v42  ;;  %6376 = vmatprep.subr.bf16.mxu0 %v3544_v61  ;;  %v2444_v30 = vmul.f32 %v6052_v24, %v7646_v62  ;;  %v2445_v5 = vmul.f32 %v6053_v44, %v7646_v62  ;;  %v2793_v54 = vmul.f32 %v6123_v26, %v7666_v13  ;;  %v5791_v38 = vld [vmem:[%s14001_s0 + $0x298] sm:$0xff] }
  0x49   :  { %14030 = vst [vmem:[#allocation26_spill] sm:$0xff] %v7785_v57  ;;  %14031 = vst [vmem:[#allocation27_spill] sm:$0xff] %v7788_v58  ;;  %v2163_v15 = vadd.f32 %v2094_v25, %v1814_v39  ;;  %v2164_v11 = vadd.f32 %v2095_v31, %v1815_v46  ;;  %v2794_v12 = vmul.f32 %v6124_v37, %v7666_v13  ;;  %v438_v39 = vld [vmem:[%s14001_s0 + $0x71] sm:$0xff]  ;;  %v439_v46 = vld [vmem:[%s14001_s0 + $0x79] sm:$0xff] }
  0x4a   :  { %v7807_v61 = vmul.f32 %v5911_v0, %v7636_v56  ;;  %v7810_v58 = vmul.f32 %v5981_v14, %v7658_v4  ;;  %v7813_v25 = vmul.f32 %v5982_v47, %v7658_v4  ;;  %v7816_v31 = vmul.f32 %v6052_v24, %v7678_v17 }
  0x4b   :  { %v2513_v57 = vadd.f32 %v2444_v30, %v2163_v15  ;;  %v2514_v0 = vadd.f32 %v2445_v5, %v2164_v11  ;;  %v3143_v14 = vmul.f32 %v6195_v53, %v7685_v28  ;;  %v7827_v47 = vmul.f32 %v6053_v44, %v7678_v17  ;;  %v788_v5 = vld [vmem:[%s14001_s0 + $0x7a] sm:$0xff] }
  0x4c   :  { %14032 = vst [vmem:[#allocation28_spill] sm:$0xff] %v7807_v61  ;;  %14033 = vst [vmem:[#allocation29_spill] sm:$0xff] %v7810_v58  ;;  %v3142_v61 = vmul.f32 %v6194_v43, %v7685_v28  ;;  %v7830_v24 = vmul.f32 %v6123_v26, %v7697_v34  ;;  %v787_v58 = vld [vmem:[%s14001_s0 + $0x72] sm:$0xff]  ;;  %v649_v44 = vmul.f32 %v7527_v10, %v438_v39 }
  0x4d   :  { %14034 = vst [vmem:[#allocation30_spill] sm:$0xff] %v7813_v25  ;;  %14035 = vst [vmem:[#allocation31_spill] sm:$0xff] %v7816_v31  ;;  %v300_v31 = vmul.f32 %v7509_v3, %v89_v63  ;;  %v301_v25 = vmul.f32 %v7509_v3, %v90_v21  ;;  %v2862_v30 = vadd.f32 %v2793_v54, %v2513_v57  ;;  %v5792_v57 = vld [vmem:[%s14001_s0 + $0x2a0] sm:$0xff] }
  0x4e   :  { %14036 = vst [vmem:[#allocation32_spill] sm:$0xff] %v7827_v47  ;;  %14037 = vst [vmem:[#allocation33_spill] sm:$0xff] %v7830_v24  ;;  %v2863_v15 = vadd.f32 %v2794_v12, %v2514_v0  ;;  %v650_v11 = vmul.f32 %v7527_v10, %v439_v46  ;;  %v7843_v26 = vmul.f32 %v6124_v37, %v7697_v34 }
  0x4f   :  { %v7846_v24 = vmul.f32 %v6194_v43, %v7715_v51  ;;  %v369_v47 = vadd.f32 %v300_v31, %v7507_v2  ;;  %v370_v42 = vadd.f32 %v301_v25, %v7507_v2  ;;  %v3211_v54 = vadd.f32 %v3142_v61, %v2862_v30  ;;  %v5863_v61 = vld [vmem:[%s14001_s0 + $0x2a1] sm:$0xff] }
  0x50   :  { %14038 = vst [vmem:[#allocation34_spill] sm:$0xff] %v7843_v26  ;;  %v3212_v12 = vadd.f32 %v3143_v14, %v2863_v15  ;;  %v998_v37 = vmul.f32 %v7552_v20, %v787_v58  ;;  %v999_v0 = vmul.f32 %v7552_v20, %v788_v5  ;;  %v7859_v43 = vmul.f32 %v6195_v53, %v7715_v51  ;;  %v5862_v26 = vld [vmem:[%s14001_s0 + $0x299] sm:$0xff] }
  0x51   :  { %14039 = vst [vmem:[#allocation35_spill] sm:$0xff] %v7846_v24  ;;  %v7862_v31 = vmul.f32 %v7519_v6, %v89_v63  ;;  %v718_v25 = vadd.f32 %v649_v44, %v369_v47  ;;  %v719_v24 = vadd.f32 %v650_v11, %v370_v42  ;;  %v3453_v14 = vmul.f32 0.01, %v3211_v54  ;;  %v5933_v44 = vld [vmem:[%s14001_s0 + $0x29a] sm:$0xff]  ;;  %v5934_v11 = vld [vmem:[%s14001_s0 + $0x2a2] sm:$0xff] }
  0x52   :  { %14040 = vst [vmem:[#allocation36_spill] sm:$0xff] %v7859_v43  ;;  %v3454_v30 = vmul.f32 0.01, %v3212_v12  ;;  %v1348_v15 = vmul.f32 %v5791_v38, %v7580_v32  ;;  %v1349_v53 = vmul.f32 %v5792_v57, %v7580_v32  ;;  %v7873_v43 = vmul.f32 %v7519_v6, %v90_v21 }
  0x53   :  { %v7876_v63 = vmul.f32 %v7525_v9, %v438_v39  ;;  %v1067_v42 = vadd.f32 %v998_v37, %v718_v25  ;;  %v1068_v47 = vadd.f32 %v999_v0, %v719_v24  ;;  %v3522_v27 = vmax.f32 %v3211_v54, %v3453_v14  ;;  %v6004_v39 = vld [vmem:[%s14001_s0 + $0x4c0] sm:$0xff]  ;;  %v6005_v54 = vld [vmem:[%s14001_s0 + $0x4c8] sm:$0xff] }
  0x54   :  { %v3523_v48 = vmax.f32 %v3212_v12, %v3454_v30  ;;  %v1697_v22 = vmul.f32 %v5862_v26, %v7601_v41  ;;  %v1698_v21 = vmul.f32 %v5863_v61, %v7601_v41  ;;  %v7890_v24 = vmul.f32 %v7525_v9, %v439_v46  ;;  %v6075_v46 = vld [vmem:[%s14001_s0 + $0x4c1] sm:$0xff] }
  0x55   :  { %14041 = vst [vmem:[#allocation37_spill] sm:$0xff] %v7876_v63  ;;  %v7893_v37 = vmul.f32 %v7594_v36, %v787_v58  ;;  %v1417_v0 = vadd.f32 %v1348_v15, %v1067_v42  ;;  %v1418_v25 = vadd.f32 %v1349_v53, %v1068_v47  ;;  %v7899_v14 = vmul.f32 %v7594_v36, %v788_v5  ;;  %v6076_v58 = vld [vmem:[%s14001_s0 + $0x4c9] sm:$0xff] }
  0x56   :  { %14042 = vst [vmem:[#allocation38_spill] sm:$0xff] %v7890_v24  ;;  %v3560_v12 = vpack.c.bf16 %v3523_v48, %v3522_v27  ;;  %v2046_v30 = vmul.f32 %v5933_v44, %v7624_v52  ;;  %v2047_v7 = vmul.f32 %v5934_v11, %v7624_v52  ;;  %v7910_v15 = vmul.f32 %v5791_v38, %v7613_v45  ;;  %v6146_v5 = vld [vmem:[%s14001_s0 + $0x4c2] sm:$0xff] }
  0x57   :  { %14043 = vst [vmem:[#allocation39_spill] sm:$0xff] %v7893_v37  ;;  %14044 = vst [vmem:[#allocation40_spill] sm:$0xff] %v7899_v14  ;;  %v1766_v53 = vadd.f32 %v1697_v22, %v1417_v0  ;;  %v1767_v27 = vadd.f32 %v1698_v21, %v1418_v25  ;;  %v2396_v48 = vmul.f32 %v6004_v39, %v7646_v62  ;;  %v6147_v22 = vld [vmem:[%s14001_s0 + $0x4ca] sm:$0xff] }
  0x58   :  { %14045 = vst [vmem:[#allocation41_spill] sm:$0xff] %v7910_v15  ;;  %6476 = vmatprep.subr.bf16.mxu1 %v3560_v12  ;;  %v7917_v42 = vmul.f32 %v5792_v57, %v7613_v45  ;;  %v7920_v47 = vmul.f32 %v5862_v26, %v7636_v56  ;;  %v7923_v60 = vmul.f32 %v5863_v61, %v7636_v56  ;;  %v121_v21 = vld [vmem:[%s14001_s0 + $0x170] sm:$0xff]  ;;  %v122_v61 = vld [vmem:[%s14001_s0 + $0x178] sm:$0xff] }
  0x59   :  { %v2397_v38 = vmul.f32 %v6005_v54, %v7646_v62  ;;  %v2115_v0 = vadd.f32 %v2046_v30, %v1766_v53  ;;  %v2116_v25 = vadd.f32 %v2047_v7, %v1767_v27  ;;  %v2745_v57 = vmul.f32 %v6075_v46, %v7666_v13  ;;  %v470_v12 = vld [vmem:[%s14001_s0 + $0x171] sm:$0xff]  ;;  %v471_v53 = vld [vmem:[%s14001_s0 + $0x179] sm:$0xff] }
  0x5a   :  { %14046 = vst [vmem:[#allocation42_spill] sm:$0xff] %v7917_v42  ;;  %14047 = vst [vmem:[#allocation43_spill] sm:$0xff] %v7920_v47  ;;  %v2746_v26 = vmul.f32 %v6076_v58, %v7666_v13  ;;  %v7944_v47 = vmul.f32 %v5934_v11, %v7658_v4  ;;  %v7947_v7 = vmul.f32 %v6004_v39, %v7678_v17 }
  0x5b   :  { %14048 = vst [vmem:[#allocation44_spill] sm:$0xff] %v7923_v60  ;;  %v7941_v60 = vmul.f32 %v5933_v44, %v7658_v4  ;;  %v3094_v30 = vmul.f32 %v6146_v5, %v7685_v28  ;;  %v2465_v27 = vadd.f32 %v2396_v48, %v2115_v0  ;;  %v2466_v42 = vadd.f32 %v2397_v38, %v2116_v25  ;;  %v819_v44 = vld [vmem:[%s14001_s0 + $0x172] sm:$0xff]  ;;  %v820_v48 = vld [vmem:[%s14001_s0 + $0x17a] sm:$0xff] }
  0x5c   :  { %14050 = vst [vmem:[#allocation46_spill] sm:$0xff] %v7944_v47  ;;  %14051 = vst [vmem:[#allocation47_spill] sm:$0xff] %v7947_v7  ;;  %v3095_v15 = vmul.f32 %v6147_v22, %v7685_v28  ;;  %v332_v50 = vmul.f32 %v7509_v3, %v121_v21  ;;  %v7959_v11 = vmul.f32 %v6005_v54, %v7678_v17  ;;  %v5823_v54 = vld [vmem:[%s14001_s0 + $0x398] sm:$0xff] }
  0x5d   :  { %14049 = vst [vmem:[#allocation45_spill] sm:$0xff] %v7941_v60  ;;  %v7962_v39 = vmul.f32 %v6075_v46, %v7697_v34  ;;  %v333_v7 = vmul.f32 %v7509_v3, %v122_v61  ;;  %v681_v47 = vmul.f32 %v7527_v10, %v470_v12  ;;  %v2814_v38 = vadd.f32 %v2745_v57, %v2465_v27 }
  0x5e   :  { %14052 = vst [vmem:[#allocation48_spill] sm:$0xff] %v7959_v11  ;;  %v2815_v0 = vadd.f32 %v2746_v26, %v2466_v42  ;;  %v401_v25 = vadd.f32 %v332_v50, %v7507_v2  ;;  %v682_v60 = vmul.f32 %v7527_v10, %v471_v53  ;;  %v7975_v46 = vmul.f32 %v6076_v58, %v7697_v34  ;;  %v5824_v50 = vld [vmem:[%s14001_s0 + $0x3a0] sm:$0xff] }
  0x5f   :  { %14053 = vst [vmem:[#allocation49_spill] sm:$0xff] %v7962_v39  ;;  %v7978_v39 = vmul.f32 %v6146_v5, %v7715_v51  ;;  %v402_v11 = vadd.f32 %v333_v7, %v7507_v2  ;;  %v1030_v40 = vmul.f32 %v7552_v20, %v819_v44  ;;  %v3163_v42 = vadd.f32 %v3094_v30, %v2814_v38  ;;  %v5894_v58 = vld [vmem:[%s14001_s0 + $0x399] sm:$0xff] }
  0x60   :  { %14054 = vst [vmem:[#allocation50_spill] sm:$0xff] %v7975_v46  ;;  %v3164_v57 = vadd.f32 %v3095_v15, %v2815_v0  ;;  %v750_v26 = vadd.f32 %v681_v47, %v401_v25  ;;  %v1031_v27 = vmul.f32 %v7552_v20, %v820_v48  ;;  %v7990_v5 = vmul.f32 %v6147_v22, %v7715_v51  ;;  %v5895_v15 = vld [vmem:[%s14001_s0 + $0x3a1] sm:$0xff] }
  0x61   :  { %14055 = vst [vmem:[#allocation51_spill] sm:$0xff] %v7978_v39  ;;  %v7993_v7 = vmul.f32 %v7519_v6, %v121_v21  ;;  %v751_v39 = vadd.f32 %v682_v60, %v402_v11  ;;  %v1380_v46 = vmul.f32 %v5823_v54, %v7580_v32  ;;  %v3405_v47 = vmul.f32 0.01, %v3163_v42  ;;  %v5965_v22 = vld [vmem:[%s14001_s0 + $0x39a] sm:$0xff] }
  0x62   :  { %14056 = vst [vmem:[#allocation52_spill] sm:$0xff] %v7990_v5  ;;  %v3406_v30 = vmul.f32 0.01, %v3164_v57  ;;  %v1099_v38 = vadd.f32 %v1030_v40, %v750_v26  ;;  %v1381_v0 = vmul.f32 %v5824_v50, %v7580_v32  ;;  %v8004_v25 = vmul.f32 %v7519_v6, %v122_v61  ;;  %v6036_v61 = vld [vmem:[%s14001_s0 + $0x5c0] sm:$0xff] }
  0x63   :  { %14057 = vst [vmem:[#allocation53_spill] sm:$0xff] %v7993_v7  ;;  %v8007_v60 = vmul.f32 %v7525_v9, %v470_v12  ;;  %v1100_v21 = vadd.f32 %v1031_v27, %v751_v39  ;;  %v1729_v11 = vmul.f32 %v5894_v58, %v7601_v41  ;;  %v5966_v7 = vld [vmem:[%s14001_s0 + $0x3a2] sm:$0xff]  ;;  %v3474_v40 = vmax.f32 %v3163_v42, %v3405_v47 }
  0x64   :  { %14058 = vst [vmem:[#allocation54_spill] sm:$0xff] %v8004_v25  ;;  %v3475_v26 = vmax.f32 %v3164_v57, %v3406_v30  ;;  %v1449_v5 = vadd.f32 %v1380_v46, %v1099_v38  ;;  %v1730_v14 = vmul.f32 %v5895_v15, %v7601_v41  ;;  %v6037_v12 = vld [vmem:[%s14001_s0 + $0x5c8] sm:$0xff]  ;;  %v8021_v39 = vmul.f32 %v7525_v9, %v471_v53 }
  0x65   :  { %14059 = vst [vmem:[#allocation55_spill] sm:$0xff] %v8007_v60  ;;  %v8024_v27 = vmul.f32 %v7594_v36, %v819_v44  ;;  %v1450_v60 = vadd.f32 %v1381_v0, %v1100_v21  ;;  %v2078_v42 = vmul.f32 %v5965_v22, %v7624_v52  ;;  %v8030_v46 = vld [vmem:[%s14001_s0 + $0x5c1] sm:$0xff]  ;;  %v8033_v47 = vmul.f32 %v7594_v36, %v820_v48  ;;  %v8039_v53 = vld [vmem:[%s14001_s0 + $0x5c9] sm:$0xff] }
  0x66   :  { %14060 = vst [vmem:[#allocation56_spill] sm:$0xff] %v8021_v39  ;;  %v3536_v57 = vpack.c.bf16 %v3475_v26, %v3474_v40  ;;  %v1798_v30 = vadd.f32 %v1729_v11, %v1449_v5  ;;  %v2079_v38 = vmul.f32 %v5966_v7, %v7624_v52  ;;  %v8042_v44 = vmul.f32 %v5823_v54, %v7613_v45  ;;  %v8049_v48 = vld [vmem:[%s14001_s0 + $0x5c2] sm:$0xff]  ;;  %v8054_v5 = vld [vmem:[%s14001_s0 + $0x5ca] sm:$0xff] }
  0x67   :  { %14061 = vst [vmem:[#allocation57_spill] sm:$0xff] %v8024_v27  ;;  %14062 = vst [vmem:[#allocation58_spill] sm:$0xff] %v8033_v47  ;;  %v1799_v0 = vadd.f32 %v1730_v14, %v1450_v60  ;;  %v2428_v21 = vmul.f32 %v6036_v61, %v7646_v62  ;;  %v2429_v27 = vmul.f32 %v6037_v12, %v7646_v62  ;;  %v103_v54 = vld [vmem:[%s14001_s0 + $0xe0] sm:$0xff]  ;;  %v104_v26 = vld [vmem:[%s14001_s0 + $0xe8] sm:$0xff] }
  0x68   :  { %14063 = vst [vmem:[#allocation59_spill] sm:$0xff] %v8042_v44  ;;  %6377 = vmatpush3.bf16.msra.mxu0 %v3536_v57  ;;  %v8060_v14 = vmul.f32 %v5824_v50, %v7613_v45  ;;  %v8063_v60 = vmul.f32 %v5894_v58, %v7636_v56  ;;  %v2147_v11 = vadd.f32 %v2078_v42, %v1798_v30  ;;  %v452_v44 = vld [vmem:[%s14001_s0 + $0xe1] sm:$0xff]  ;;  %v453_v50 = vld [vmem:[%s14001_s0 + $0xe9] sm:$0xff] }
  0x69   :  { %v2777_v40 = vmul.f32 %v8030_v46, %v7666_v13  ;;  %v8077_v57 = vmul.f32 %v5895_v15, %v7636_v56  ;;  %v8080_v58 = vmul.f32 %v5965_v22, %v7658_v4  ;;  %v2148_v42 = vadd.f32 %v2079_v38, %v1799_v0  ;;  %v802_v22 = vld [vmem:[%s14001_s0 + $0xea] sm:$0xff] }
  0x6a   :  { %14064 = vst [vmem:[#allocation60_spill] sm:$0xff] %v8060_v14  ;;  %14065 = vst [vmem:[#allocation61_spill] sm:$0xff] %v8063_v60  ;;  %v2778_v30 = vmul.f32 %v8039_v53, %v7666_v13  ;;  %v801_v60 = vld [vmem:[%s14001_s0 + $0xe2] sm:$0xff]  ;;  %v2497_v14 = vadd.f32 %v2428_v21, %v2147_v11  ;;  %v3126_v47 = vmul.f32 %v8049_v48, %v7685_v28 }
  0x6b   :  { %14066 = vst [vmem:[#allocation62_spill] sm:$0xff] %v8077_v57  ;;  %14067 = vst [vmem:[#allocation63_spill] sm:$0xff] %v8080_v58  ;;  %v3127_v39 = vmul.f32 %v8054_v5, %v7685_v28  ;;  %v314_v15 = vmul.f32 %v7509_v3, %v103_v54  ;;  %v2498_v38 = vadd.f32 %v2429_v27, %v2148_v42  ;;  %v5805_v21 = vld [vmem:[%s14001_s0 + $0x308] sm:$0xff]  ;;  %v5806_v27 = vld [vmem:[%s14001_s0 + $0x310] sm:$0xff] }
  0x6c   :  { %v315_v0 = vmul.f32 %v7509_v3, %v104_v26  ;;  %v663_v58 = vmul.f32 %v7527_v10, %v452_v44  ;;  %v664_v57 = vmul.f32 %v7527_v10, %v453_v50  ;;  %v8102_v11 = vmul.f32 %v5966_v7, %v7658_v4  ;;  %v5876_v44 = vld [vmem:[%s14001_s0 + $0x309] sm:$0xff] }
  0x6d   :  { %v2846_v25 = vadd.f32 %v2777_v40, %v2497_v14  ;;  %v383_v54 = vadd.f32 %v314_v15, %v7507_v2  ;;  %v1012_v37 = vmul.f32 %v7552_v20, %v801_v60  ;;  %v8113_v26 = vmul.f32 %v6036_v61, %v7678_v17  ;;  %v5877_v60 = vld [vmem:[%s14001_s0 + $0x311] sm:$0xff] }
  0x6e   :  { %14068 = vst [vmem:[#allocation64_spill] sm:$0xff] %v8102_v11  ;;  %v2847_v50 = vadd.f32 %v2778_v30, %v2498_v38  ;;  %v384_v7 = vadd.f32 %v315_v0, %v7507_v2  ;;  %v1013_v14 = vmul.f32 %v7552_v20, %v802_v22  ;;  %v5947_v40 = vld [vmem:[%s14001_s0 + $0x30a] sm:$0xff]  ;;  %v8124_v42 = vmul.f32 %v6037_v12, %v7678_v17  ;;  %v5948_v30 = vld [vmem:[%s14001_s0 + $0x312] sm:$0xff] }
  0x6f   :  { %14069 = vst [vmem:[#allocation65_spill] sm:$0xff] %v8113_v26  ;;  %v3195_v15 = vadd.f32 %v3126_v47, %v2846_v25  ;;  %v732_v11 = vadd.f32 %v663_v58, %v383_v54  ;;  %v1362_v61 = vmul.f32 %v5805_v21, %v7580_v32  ;;  %v6018_v22 = vld [vmem:[%s14001_s0 + $0x530] sm:$0xff]  ;;  %v1363_v26 = vmul.f32 %v5806_v27, %v7580_v32  ;;  %v6019_v25 = vld [vmem:[%s14001_s0 + $0x538] sm:$0xff] }
  0x70   :  { %14070 = vst [vmem:[#allocation66_spill] sm:$0xff] %v8124_v42  ;;  %v3196_v38 = vadd.f32 %v3127_v39, %v2847_v50  ;;  %v733_v0 = vadd.f32 %v664_v57, %v384_v7  ;;  %v1711_v33 = vmul.f32 %v5876_v44, %v7601_v41  ;;  %v6089_v12 = vld [vmem:[%s14001_s0 + $0x531] sm:$0xff]  ;;  %v1712_v21 = vmul.f32 %v5877_v60, %v7601_v41  ;;  %v135_v39 = vld [vmem:[%s14001_s0 + $0x1e0] sm:$0xff]  ;;  %v136_v57 = vld [vmem:[%s14001_s0 + $0x1e8] sm:$0xff] }
  0x71   :  { %v3437_v47 = vmul.f32 0.01, %v3195_v15  ;;  %v1081_v58 = vadd.f32 %v1012_v37, %v732_v11  ;;  %v2060_v54 = vmul.f32 %v5947_v40, %v7624_v52  ;;  %v2061_v50 = vmul.f32 %v5948_v30, %v7624_v52  ;;  %v484_v37 = vld [vmem:[%s14001_s0 + $0x1e1] sm:$0xff]  ;;  %v485_v11 = vld [vmem:[%s14001_s0 + $0x1e9] sm:$0xff] }
  0x72   :  { %v3438_v27 = vmul.f32 0.01, %v3196_v38  ;;  %v1082_v44 = vadd.f32 %v1013_v14, %v733_v0  ;;  %v2410_v7 = vmul.f32 %v6018_v22, %v7646_v62  ;;  %v833_v60 = vld [vmem:[%s14001_s0 + $0x1e2] sm:$0xff]  ;;  %v2411_v14 = vmul.f32 %v6019_v25, %v7646_v62 }
  0x73   :  { %v3506_v40 = vmax.f32 %v3195_v15, %v3437_v47  ;;  %v1431_v42 = vadd.f32 %v1362_v61, %v1081_v58  ;;  %v2759_v30 = vmul.f32 %v6089_v12, %v7666_v13  ;;  %v346_v24 = vmul.f32 %v7509_v3, %v135_v39  ;;  %v5837_v15 = vld [vmem:[%s14001_s0 + $0x408] sm:$0xff]  ;;  %v5838_v12 = vld [vmem:[%s14001_s0 + $0x410] sm:$0xff] }
  0x74   :  { %v3507_v0 = vmax.f32 %v3196_v38, %v3438_v27  ;;  %v1432_v22 = vadd.f32 %v1363_v26, %v1082_v44  ;;  %v347_v63 = vmul.f32 %v7509_v3, %v136_v57  ;;  %v695_v38 = vmul.f32 %v7527_v10, %v484_v37  ;;  %v6160_v39 = vld [vmem:[%s14001_s0 + $0x532] sm:$0xff]  ;;  %v5908_v27 = vld [vmem:[%s14001_s0 + $0x409] sm:$0xff] }
  0x75   :  { %v1780_v61 = vadd.f32 %v1711_v33, %v1431_v42  ;;  %v696_v26 = vmul.f32 %v7527_v10, %v485_v11  ;;  %v1044_v25 = vmul.f32 %v7552_v20, %v833_v60  ;;  %v6161_v33 = vld [vmem:[%s14001_s0 + $0x53a] sm:$0xff]  ;;  %v415_v42 = vadd.f32 %v346_v24, %v7507_v2  ;;  %v5909_v60 = vld [vmem:[%s14001_s0 + $0x411] sm:$0xff] }
  0x76   :  { %v3552_v47 = vpack.c.bf16 %v3507_v0, %v3506_v40  ;;  %v1781_v58 = vadd.f32 %v1712_v21, %v1432_v22  ;;  %v416_v57 = vadd.f32 %v347_v63, %v7507_v2  ;;  %v2760_v37 = vmul.f32 %v6090_v23, %v7666_v13 }
  0x77   :  { %v2129_v44 = vadd.f32 %v2060_v54, %v1780_v61  ;;  %v1045_v21 = vmul.f32 %v7552_v20, %v834_v16  ;;  %v1394_v11 = vmul.f32 %v5837_v15, %v7580_v32  ;;  %v764_v24 = vadd.f32 %v695_v38, %v415_v42  ;;  %v5979_v54 = vld [vmem:[%s14001_s0 + $0x40a] sm:$0xff]  ;;  %v5980_v61 = vld [vmem:[%s14001_s0 + $0x412] sm:$0xff]  ;;  %v87_v42 = vld [vmem:[%s14001_s0 + $0x60] sm:$0xff] }
  0x78   :  { %6477 = vmatpush3.bf16.msra.mxu1 %v3552_v47  ;;  %v2130_v40 = vadd.f32 %v2061_v50, %v1781_v58  ;;  %v765_v0 = vadd.f32 %v696_v26, %v416_v57  ;;  %v1395_v63 = vmul.f32 %v5838_v12, %v7580_v32  ;;  %v3108_v23 = vmul.f32 %v6160_v39, %v7685_v28  ;;  %v6050_v47 = vld [vmem:[%s14001_s0 + $0x630] sm:$0xff] }
  0x79   :  { %v2479_v22 = vadd.f32 %v2410_v7, %v2129_v44  ;;  %v3109_v16 = vmul.f32 %v6161_v33, %v7685_v28  ;;  %v1743_v15 = vmul.f32 %v5908_v27, %v7601_v41  ;;  %v1113_v38 = vadd.f32 %v1044_v25, %v764_v24  ;;  %v6051_v7 = vld [vmem:[%s14001_s0 + $0x638] sm:$0xff] }
  0x7a   :  { %v2480_v50 = vadd.f32 %v2411_v14, %v2130_v40  ;;  %v1114_v26 = vadd.f32 %v1045_v21, %v765_v0  ;;  %v1744_v12 = vmul.f32 %v5909_v60, %v7601_v41  ;;  %v6121_v58 = vld [vmem:[%s14001_s0 + $0x631] sm:$0xff]  ;;  %v8218_v39 = vmul.f32 %v8030_v46, %v7697_v34  ;;  %v6122_v46 = vld [vmem:[%s14001_s0 + $0x639] sm:$0xff] }
  0x7b   :  { %v8222_v14 = vmul.f32 %v8039_v53, %v7697_v34  ;;  %v2828_v25 = vadd.f32 %v2759_v30, %v2479_v22  ;;  %v2092_v33 = vmul.f32 %v5979_v54, %v7624_v52  ;;  %v1463_v27 = vadd.f32 %v1394_v11, %v1113_v38  ;;  %v6192_v53 = vld [vmem:[%s14001_s0 + $0x632] sm:$0xff]  ;;  %v88_v30 = vld [vmem:[%s14001_s0 + $0x68] sm:$0xff]  ;;  %v6193_v38 = vld [vmem:[%s14001_s0 + $0x63a] sm:$0xff] }
  0x7c   :  { %14071 = vst [vmem:[#allocation67_spill] sm:$0xff] %v8218_v39  ;;  %v2829_v57 = vadd.f32 %v2760_v37, %v2480_v50  ;;  %v1464_v44 = vadd.f32 %v1395_v63, %v1114_v26  ;;  %v2093_v21 = vmul.f32 %v5980_v61, %v7624_v52  ;;  %v2442_v40 = vmul.f32 %v6050_v47, %v7646_v62  ;;  %v436_v22 = vld [vmem:[%s14001_s0 + $0x61] sm:$0xff]  ;;  %v437_v61 = vld [vmem:[%s14001_s0 + $0x69] sm:$0xff] }
  0x7d   :  { %14072 = vst [vmem:[#allocation68_spill] sm:$0xff] %v8222_v14  ;;  %v3177_v60 = vadd.f32 %v3108_v23, %v2828_v25  ;;  %v2443_v37 = vmul.f32 %v6051_v7, %v7646_v62  ;;  %v2791_v11 = vmul.f32 %v6121_v58, %v7666_v13  ;;  %v1812_v0 = vadd.f32 %v1743_v15, %v1463_v27  ;;  %v785_v58 = vld [vmem:[%s14001_s0 + $0x62] sm:$0xff] }
  0x7e   :  { %v3178_v24 = vadd.f32 %v3109_v16, %v2829_v57  ;;  %v1813_v63 = vadd.f32 %v1744_v12, %v1464_v44  ;;  %v298_v54 = vmul.f32 %v7509_v3, %v87_v42  ;;  %v2792_v50 = vmul.f32 %v6122_v46, %v7666_v13  ;;  %v786_v46 = vld [vmem:[%s14001_s0 + $0x6a] sm:$0xff] }
  0x7f   :  { %v3419_v23 = vmul.f32 0.01, %v3177_v60  ;;  %v3140_v16 = vmul.f32 %v6192_v53, %v7685_v28  ;;  %v299_v15 = vmul.f32 %v7509_v3, %v88_v30  ;;  %v2161_v12 = vadd.f32 %v2092_v33, %v1812_v0 }
  0x80   :  { %v3420_v26 = vmul.f32 0.01, %v3178_v24  ;;  %v2162_v47 = vadd.f32 %v2093_v21, %v1813_v63  ;;  %v367_v7 = vadd.f32 %v298_v54, %v7507_v2  ;;  %v647_v27 = vmul.f32 %v7527_v10, %v436_v22  ;;  %v5789_v63 = vld [vmem:[%s14001_s0 + $0x288] sm:$0xff] }
  0x81   :  { %v3488_v25 = vmax.f32 %v3177_v60, %v3419_v23  ;;  %v368_v57 = vadd.f32 %v299_v15, %v7507_v2  ;;  %v648_v44 = vmul.f32 %v7527_v10, %v437_v61  ;;  %v2511_v33 = vadd.f32 %v2442_v40, %v2161_v12  ;;  %v5860_v12 = vld [vmem:[%s14001_s0 + $0x289] sm:$0xff] }
  0x82   :  { %v3489_v53 = vmax.f32 %v3178_v24, %v3420_v26  ;;  %v2512_v21 = vadd.f32 %v2443_v37, %v2162_v47  ;;  %v3141_v0 = vmul.f32 %v6193_v38, %v7685_v28  ;;  %v8270_v60 = vmul.f32 %v8049_v48, %v7715_v51  ;;  %v5790_v24 = vld [vmem:[%s14001_s0 + $0x290] sm:$0xff] }
  0x83   :  { %v716_v54 = vadd.f32 %v647_v27, %v367_v7  ;;  %v717_v23 = vadd.f32 %v648_v44, %v368_v57  ;;  %v996_v15 = vmul.f32 %v7552_v20, %v785_v58  ;;  %v2860_v37 = vadd.f32 %v2791_v11, %v2511_v33  ;;  %v5861_v11 = vld [vmem:[%s14001_s0 + $0x291] sm:$0xff] }
  0x84   :  { %14073 = vst [vmem:[#allocation69_spill] sm:$0xff] %v8270_v60  ;;  %v3543_v40 = vpack.c.bf16 %v3489_v53, %v3488_v25  ;;  %v2861_v26 = vadd.f32 %v2792_v50, %v2512_v21  ;;  %v997_v38 = vmul.f32 %v7552_v20, %v786_v46  ;;  %v8282_v48 = vmul.f32 %v8054_v5, %v7715_v51  ;;  %v5931_v5 = vld [vmem:[%s14001_s0 + $0x28a] sm:$0xff] }
  0x85   :  { %v8285_v47 = vmul.f32 %v7519_v6, %v87_v42  ;;  %v1065_v7 = vadd.f32 %v996_v15, %v716_v54  ;;  %v1346_v57 = vmul.f32 %v5789_v63, %v7580_v32  ;;  %v3209_v50 = vadd.f32 %v3140_v16, %v2860_v37  ;;  %v5932_v16 = vld [vmem:[%s14001_s0 + $0x292] sm:$0xff] }
  0x86   :  { %14074 = vst [vmem:[#allocation70_spill] sm:$0xff] %v8282_v48  ;;  %6378 = vmatprep.subr.bf16.mxu0 %v3543_v40  ;;  %v3210_v25 = vadd.f32 %v3141_v0, %v2861_v26  ;;  %v1066_v27 = vadd.f32 %v997_v38, %v717_v23  ;;  %v1347_v44 = vmul.f32 %v5790_v24, %v7580_v32  ;;  %v6003_v38 = vld [vmem:[%s14001_s0 + $0x4b8] sm:$0xff] }
  0x87   :  { %14075 = vst [vmem:[#allocation71_spill] sm:$0xff] %v8285_v47  ;;  %v8296_v42 = vmul.f32 %v7519_v6, %v88_v30  ;;  %v8299_v53 = vmul.f32 %v7525_v9, %v436_v22  ;;  %v1415_v33 = vadd.f32 %v1346_v57, %v1065_v7  ;;  %v1695_v21 = vmul.f32 %v5860_v12, %v7601_v41  ;;  %v6002_v30 = vld [vmem:[%s14001_s0 + $0x4b0] sm:$0xff] }
  0x88   :  { %v3451_v0 = vmul.f32 0.01, %v3209_v50  ;;  %v3452_v54 = vmul.f32 0.01, %v3210_v25  ;;  %v1416_v23 = vadd.f32 %v1347_v44, %v1066_v27  ;;  %v1696_v15 = vmul.f32 %v5861_v11, %v7601_v41 }
  0x89   :  { %14076 = vst [vmem:[#allocation72_spill] sm:$0xff] %v8296_v42  ;;  %14077 = vst [vmem:[#allocation73_spill] sm:$0xff] %v8299_v53  ;;  %v8310_v40 = vmul.f32 %v7525_v9, %v437_v61  ;;  %v8313_v22 = vmul.f32 %v7594_v36, %v785_v58  ;;  %v1764_v37 = vadd.f32 %v1695_v21, %v1415_v33  ;;  %v6073_v61 = vld [vmem:[%s14001_s0 + $0x4b1] sm:$0xff]  ;;  %v6074_v58 = vld [vmem:[%s14001_s0 + $0x4b9] sm:$0xff] }
  0x8a   :  { %v2044_v26 = vmul.f32 %v5931_v5, %v7624_v52  ;;  %v3520_v7 = vmax.f32 %v3209_v50, %v3451_v0  ;;  %v3521_v57 = vmax.f32 %v3210_v25, %v3452_v54  ;;  %v1765_v27 = vadd.f32 %v1696_v15, %v1416_v23  ;;  %v6144_v25 = vld [vmem:[%s14001_s0 + $0x4b2] sm:$0xff] }
  0x8b   :  { %14078 = vst [vmem:[#allocation74_spill] sm:$0xff] %v8310_v40  ;;  %14079 = vst [vmem:[#allocation75_spill] sm:$0xff] %v8313_v22  ;;  %v2045_v44 = vmul.f32 %v5932_v16, %v7624_v52  ;;  %v8327_v33 = vmul.f32 %v7594_v36, %v786_v46  ;;  %v8330_v21 = vmul.f32 %v5789_v63, %v7613_v45  ;;  %v6145_v46 = vld [vmem:[%s14001_s0 + $0x4ba] sm:$0xff] }
  0x8c   :  { %v2113_v48 = vadd.f32 %v2044_v26, %v1764_v37  ;;  %v2394_v50 = vmul.f32 %v6002_v30, %v7646_v62  ;;  %v3559_v0 = vpack.c.bf16 %v3521_v57, %v3520_v7  ;;  %v8337_v54 = vmul.f32 %v5790_v24, %v7613_v45  ;;  %v119_v24 = vld [vmem:[%s14001_s0 + $0x160] sm:$0xff]  ;;  %v120_v7 = vld [vmem:[%s14001_s0 + $0x168] sm:$0xff] }
  0x8d   :  { %14080 = vst [vmem:[#allocation76_spill] sm:$0xff] %v8327_v33  ;;  %14081 = vst [vmem:[#allocation77_spill] sm:$0xff] %v8330_v21  ;;  %v2114_v23 = vadd.f32 %v2045_v44, %v1765_v27  ;;  %v2395_v15 = vmul.f32 %v6003_v38, %v7646_v62  ;;  %v8344_v63 = vmul.f32 %v5860_v12, %v7636_v56  ;;  %v468_v44 = vld [vmem:[%s14001_s0 + $0x161] sm:$0xff] }
  0x8e   :  { %14082 = vst [vmem:[#allocation78_spill] sm:$0xff] %v8337_v54  ;;  %v2463_v37 = vadd.f32 %v2394_v50, %v2113_v48  ;;  %v2743_v26 = vmul.f32 %v6073_v61, %v7666_v13  ;;  %v2744_v60 = vmul.f32 %v6074_v58, %v7666_v13  ;;  %6478 = vmatprep.subr.bf16.mxu1 %v3559_v0  ;;  %v469_v50 = vld [vmem:[%s14001_s0 + $0x169] sm:$0xff] }
  0x8f   :  { %14083 = vst [vmem:[#allocation79_spill] sm:$0xff] %v8344_v63  ;;  %v8355_v57 = vmul.f32 %v5861_v11, %v7636_v56  ;;  %v8358_v12 = vmul.f32 %v5931_v5, %v7658_v4  ;;  %v2464_v48 = vadd.f32 %v2395_v15, %v2114_v23  ;;  %v3092_v27 = vmul.f32 %v6144_v25, %v7685_v28 }
  0x90   :  { %v8368_v14 = vmul.f32 %v5932_v16, %v7658_v4  ;;  %v8371_v11 = vmul.f32 %v6002_v30, %v7678_v17  ;;  %v2812_v0 = vadd.f32 %v2743_v26, %v2463_v37  ;;  %v3093_v5 = vmul.f32 %v6145_v46, %v7685_v28  ;;  %v818_v16 = vld [vmem:[%s14001_s0 + $0x16a] sm:$0xff] }
  0x91   :  { %14084 = vst [vmem:[#allocation80_spill] sm:$0xff] %v8355_v57  ;;  %14085 = vst [vmem:[#allocation81_spill] sm:$0xff] %v8358_v12  ;;  %v8375_v23 = vmul.f32 %v6003_v38, %v7678_v17  ;;  %v2813_v15 = vadd.f32 %v2744_v60, %v2464_v48  ;;  %v330_v39 = vmul.f32 %v7509_v3, %v119_v24  ;;  %v817_v57 = vld [vmem:[%s14001_s0 + $0x162] sm:$0xff] }
  0x92   :  { %14086 = vst [vmem:[#allocation82_spill] sm:$0xff] %v8368_v14  ;;  %14087 = vst [vmem:[#allocation83_spill] sm:$0xff] %v8371_v11  ;;  %v331_v12 = vmul.f32 %v7509_v3, %v120_v7  ;;  %v8386_v30 = vmul.f32 %v6073_v61, %v7697_v34  ;;  %v3161_v37 = vadd.f32 %v3092_v27, %v2812_v0  ;;  %v5821_v14 = vld [vmem:[%s14001_s0 + $0x388] sm:$0xff]  ;;  %v5822_v61 = vld [vmem:[%s14001_s0 + $0x390] sm:$0xff] }
  0x93   :  { %14088 = vst [vmem:[#allocation84_spill] sm:$0xff] %v8375_v23  ;;  %v679_v38 = vmul.f32 %v7527_v10, %v468_v44  ;;  %v680_v60 = vmul.f32 %v7527_v10, %v469_v50  ;;  %v8391_v26 = vmul.f32 %v6074_v58, %v7697_v34  ;;  %v3162_v48 = vadd.f32 %v3093_v5, %v2813_v15 }
  0x94   :  { %14089 = vst [vmem:[#allocation85_spill] sm:$0xff] %v8386_v30  ;;  %v399_v23 = vadd.f32 %v330_v39, %v7507_v2  ;;  %v400_v11 = vadd.f32 %v331_v12, %v7507_v2  ;;  %v8402_v27 = vmul.f32 %v6144_v25, %v7715_v51  ;;  %v3403_v0 = vmul.f32 0.01, %v3161_v37  ;;  %v5892_v30 = vld [vmem:[%s14001_s0 + $0x389] sm:$0xff]  ;;  %v5893_v25 = vld [vmem:[%s14001_s0 + $0x391] sm:$0xff] }
  0x95   :  { %14090 = vst [vmem:[#allocation86_spill] sm:$0xff] %v8391_v26  ;;  %v1028_v58 = vmul.f32 %v7552_v20, %v817_v57  ;;  %v1029_v5 = vmul.f32 %v7552_v20, %v818_v16  ;;  %v8407_v39 = vmul.f32 %v6145_v46, %v7715_v51  ;;  %v3404_v12 = vmul.f32 0.01, %v3162_v48 }
  0x96   :  { %14091 = vst [vmem:[#allocation87_spill] sm:$0xff] %v8402_v27  ;;  %v748_v15 = vadd.f32 %v679_v38, %v399_v23  ;;  %v749_v26 = vadd.f32 %v680_v60, %v400_v11  ;;  %v3472_v27 = vmax.f32 %v3161_v37, %v3403_v0  ;;  %v8416_v63 = vmul.f32 %v7519_v6, %v119_v24  ;;  %v5963_v60 = vld [vmem:[%s14001_s0 + $0x38a] sm:$0xff]  ;;  %v5964_v37 = vld [vmem:[%s14001_s0 + $0x392] sm:$0xff] }
  0x97   :  { %14092 = vst [vmem:[#allocation88_spill] sm:$0xff] %v8407_v39  ;;  %v1378_v54 = vmul.f32 %v5821_v14, %v7580_v32  ;;  %v1379_v46 = vmul.f32 %v5822_v61, %v7580_v32  ;;  %v3473_v39 = vmax.f32 %v3162_v48, %v3404_v12  ;;  %v8421_v23 = vmul.f32 %v7519_v6, %v120_v7  ;;  %v6034_v24 = vld [vmem:[%s14001_s0 + $0x5b0] sm:$0xff] }
  0x98   :  { %14093 = vst [vmem:[#allocation89_spill] sm:$0xff] %v8416_v63  ;;  %v1097_v11 = vadd.f32 %v1028_v58, %v748_v15  ;;  %v1098_v38 = vadd.f32 %v1029_v5, %v749_v26  ;;  %v8433_v0 = vmul.f32 %v7525_v9, %v468_v44  ;;  %v8436_v7 = vmul.f32 %v7525_v9, %v469_v50  ;;  %v8443_v58 = vld [vmem:[%s14001_s0 + $0x5b8] sm:$0xff] }
  0x99   :  { %14094 = vst [vmem:[#allocation90_spill] sm:$0xff] %v8421_v23  ;;  %v1727_v26 = vmul.f32 %v5892_v30, %v7601_v41  ;;  %v1728_v48 = vmul.f32 %v5893_v25, %v7601_v41  ;;  %v8448_v5 = vld [vmem:[%s14001_s0 + $0x5b1] sm:$0xff]  ;;  %v8453_v44 = vld [vmem:[%s14001_s0 + $0x5b9] sm:$0xff]  ;;  %v3535_v50 = vpack.c.bf16 %v3473_v39, %v3472_v27  ;;  %v8456_v12 = vmul.f32 %v7594_v36, %v817_v57 }
  0x9a   :  { %14095 = vst [vmem:[#allocation91_spill] sm:$0xff] %v8433_v0  ;;  %14096 = vst [vmem:[#allocation92_spill] sm:$0xff] %v8436_v7  ;;  %v1447_v15 = vadd.f32 %v1378_v54, %v1097_v11  ;;  %v1448_v7 = vadd.f32 %v1379_v46, %v1098_v38  ;;  %v8461_v0 = vld [vmem:[%s14001_s0 + $0x5b2] sm:$0xff]  ;;  %v8466_v23 = vld [vmem:[%s14001_s0 + $0x5ba] sm:$0xff]  ;;  %v8469_v63 = vmul.f32 %v7594_v36, %v818_v16 }
  0x9b   :  { %14097 = vst [vmem:[#allocation93_spill] sm:$0xff] %v8456_v12  ;;  %v8472_v27 = vmul.f32 %v5821_v14, %v7613_v45  ;;  %v2076_v57 = vmul.f32 %v5963_v60, %v7624_v52  ;;  %v2077_v54 = vmul.f32 %v5964_v37, %v7624_v52  ;;  %v101_v39 = vld [vmem:[%s14001_s0 + $0xd0] sm:$0xff]  ;;  %v102_v46 = vld [vmem:[%s14001_s0 + $0xd8] sm:$0xff]  ;;  %6379 = vmatpush3.bf16.msra.mxu0 %v3535_v50 }
  0x9c   :  { %14098 = vst [vmem:[#allocation94_spill] sm:$0xff] %v8469_v63  ;;  %v450_v16 = vld [vmem:[%s14001_s0 + $0xd1] sm:$0xff]  ;;  %v1796_v11 = vadd.f32 %v1727_v26, %v1447_v15  ;;  %v1797_v14 = vadd.f32 %v1728_v48, %v1448_v7  ;;  %v2426_v38 = vmul.f32 %v6034_v24, %v7646_v62  ;;  %v451_v63 = vld [vmem:[%s14001_s0 + $0xd9] sm:$0xff]  ;;  %v8492_v12 = vmul.f32 %v5822_v61, %v7613_v45 }
  0x9d   :  { %14099 = vst [vmem:[#allocation95_spill] sm:$0xff] %v8472_v27  ;;  %v2427_v27 = vmul.f32 %v8443_v58, %v7646_v62  ;;  %v8495_v21 = vmul.f32 %v5892_v30, %v7636_v56  ;;  %v8498_v33 = vmul.f32 %v5893_v25, %v7636_v56  ;;  %v8501_v7 = vmul.f32 %v5963_v60, %v7658_v4  ;;  %v799_v26 = vld [vmem:[%s14001_s0 + $0xd2] sm:$0xff]  ;;  %v800_v48 = vld [vmem:[%s14001_s0 + $0xda] sm:$0xff] }
  0x9e   :  { %14100 = vst [vmem:[#allocation96_spill] sm:$0xff] %v8492_v12  ;;  %v2145_v50 = vadd.f32 %v2076_v57, %v1796_v11  ;;  %v2146_v61 = vadd.f32 %v2077_v54, %v1797_v14  ;;  %v2775_v30 = vmul.f32 %v8448_v5, %v7666_v13  ;;  %v2776_v25 = vmul.f32 %v8453_v44, %v7666_v13  ;;  %v5803_v60 = vld [vmem:[%s14001_s0 + $0x2f8] sm:$0xff]  ;;  %v5804_v54 = vld [vmem:[%s14001_s0 + $0x300] sm:$0xff] }
  0x9f   :  { %14101 = vst [vmem:[#allocation97_spill] sm:$0xff] %v8495_v21  ;;  %14102 = vst [vmem:[#allocation98_spill] sm:$0xff] %v8498_v33  ;;  %v3124_v15 = vmul.f32 %v8461_v0, %v7685_v28  ;;  %v312_v33 = vmul.f32 %v7509_v3, %v101_v39  ;;  %v313_v57 = vmul.f32 %v7509_v3, %v102_v46  ;;  %v5874_v11 = vld [vmem:[%s14001_s0 + $0x2f9] sm:$0xff]  ;;  %v5875_v39 = vld [vmem:[%s14001_s0 + $0x301] sm:$0xff] }
  0xa0   :  { %14103 = vst [vmem:[#allocation99_spill] sm:$0xff] %v8501_v7  ;;  %v3125_v7 = vmul.f32 %v8466_v23, %v7685_v28  ;;  %v2495_v14 = vadd.f32 %v2426_v38, %v2145_v50  ;;  %v2496_v21 = vadd.f32 %v2427_v27, %v2146_v61  ;;  %v661_v12 = vmul.f32 %v7527_v10, %v450_v16  ;;  %v5945_v46 = vld [vmem:[%s14001_s0 + $0x2fa] sm:$0xff] }
  0xa1   :  { %v662_v22 = vmul.f32 %v7527_v10, %v451_v63  ;;  %v381_v40 = vadd.f32 %v312_v33, %v7507_v2  ;;  %v382_v53 = vadd.f32 %v313_v57, %v7507_v2  ;;  %v1010_v42 = vmul.f32 %v7552_v20, %v799_v26  ;;  %v5946_v63 = vld [vmem:[%s14001_s0 + $0x302] sm:$0xff] }
  0xa2   :  { %v1011_v27 = vmul.f32 %v7552_v20, %v800_v48  ;;  %v6016_v16 = vld [vmem:[%s14001_s0 + $0x520] sm:$0xff]  ;;  %v8547_v38 = vmul.f32 %v5964_v37, %v7658_v4  ;;  %v8550_v50 = vmul.f32 %v6034_v24, %v7678_v17  ;;  %v2844_v33 = vadd.f32 %v2775_v30, %v2495_v14  ;;  %v6017_v26 = vld [vmem:[%s14001_s0 + $0x528] sm:$0xff]  ;;  %v133_v24 = vld [vmem:[%s14001_s0 + $0x1d0] sm:$0xff] }
  0xa3   :  { %v2845_v61 = vadd.f32 %v2776_v25, %v2496_v21  ;;  %v6087_v48 = vld [vmem:[%s14001_s0 + $0x521] sm:$0xff]  ;;  %v730_v57 = vadd.f32 %v661_v12, %v381_v40  ;;  %v731_v47 = vadd.f32 %v662_v22, %v382_v53  ;;  %v1360_v8 = vmul.f32 %v5803_v60, %v7580_v32  ;;  %v134_v21 = vld [vmem:[%s14001_s0 + $0x1d8] sm:$0xff] }
  0xa4   :  { %14104 = vst [vmem:[#allocation100_spill] sm:$0xff] %v8547_v38  ;;  %14105 = vst [vmem:[#allocation101_spill] sm:$0xff] %v8550_v50  ;;  %v1361_v37 = vmul.f32 %v5804_v54, %v7580_v32  ;;  %v8568_v30 = vmul.f32 %v8443_v58, %v7678_v17  ;;  %v3193_v25 = vadd.f32 %v3124_v15, %v2844_v33  ;;  %v482_v54 = vld [vmem:[%s14001_s0 + $0x1d1] sm:$0xff]  ;;  %v483_v50 = vld [vmem:[%s14001_s0 + $0x1d9] sm:$0xff] }
  0xa5   :  { %v3194_v14 = vadd.f32 %v3125_v7, %v2845_v61  ;;  %v1709_v53 = vmul.f32 %v5874_v11, %v7601_v41  ;;  %v1079_v40 = vadd.f32 %v1010_v42, %v730_v57  ;;  %v1080_v22 = vadd.f32 %v1011_v27, %v731_v47  ;;  %v6088_v47 = vld [vmem:[%s14001_s0 + $0x529] sm:$0xff]  ;;  %v831_v27 = vld [vmem:[%s14001_s0 + $0x1d2] sm:$0xff] }
  0xa6   :  { %14106 = vst [vmem:[#allocation102_spill] sm:$0xff] %v8568_v30  ;;  %v1710_v12 = vmul.f32 %v5875_v39, %v7601_v41  ;;  %v2058_v60 = vmul.f32 %v5945_v46, %v7624_v52  ;;  %v3435_v58 = vmul.f32 0.01, %v3193_v25  ;;  %v2059_v7 = vmul.f32 %v5946_v63, %v7624_v52  ;;  %v832_v63 = vld [vmem:[%s14001_s0 + $0x1da] sm:$0xff]  ;;  %v6158_v61 = vld [vmem:[%s14001_s0 + $0x522] sm:$0xff] }
  0xa7   :  { %v3436_v30 = vmul.f32 0.01, %v3194_v14  ;;  %v2408_v15 = vmul.f32 %v6016_v16, %v7646_v62  ;;  %v1429_v42 = vadd.f32 %v1360_v8, %v1079_v40  ;;  %v1430_v11 = vadd.f32 %v1361_v37, %v1080_v22  ;;  %v6159_v8 = vld [vmem:[%s14001_s0 + $0x52a] sm:$0xff] }
  0xa8   :  { %v2409_v39 = vmul.f32 %v6017_v26, %v7646_v62  ;;  %v2757_v46 = vmul.f32 %v6087_v48, %v7666_v13  ;;  %v3504_v33 = vmax.f32 %v3193_v25, %v3435_v58  ;;  %v344_v26 = vmul.f32 %v7509_v3, %v133_v24  ;;  %v5836_v25 = vld [vmem:[%s14001_s0 + $0x400] sm:$0xff] }
  0xa9   :  { %v3505_v16 = vmax.f32 %v3194_v14, %v3436_v30  ;;  %v345_v48 = vmul.f32 %v7509_v3, %v134_v21  ;;  %v1778_v57 = vadd.f32 %v1709_v53, %v1429_v42  ;;  %v1779_v37 = vadd.f32 %v1710_v12, %v1430_v11  ;;  %v5835_v30 = vld [vmem:[%s14001_s0 + $0x3f8] sm:$0xff] }
  0xaa   :  { %v693_v40 = vmul.f32 %v7527_v10, %v482_v54  ;;  %v694_v22 = vmul.f32 %v7527_v10, %v483_v50  ;;  %v413_v58 = vadd.f32 %v344_v26, %v7507_v2  ;;  %v1042_v21 = vmul.f32 %v7552_v20, %v831_v27  ;;  %v5906_v53 = vld [vmem:[%s14001_s0 + $0x3f9] sm:$0xff]  ;;  %v5907_v50 = vld [vmem:[%s14001_s0 + $0x401] sm:$0xff] }
  0xab   :  { %v3551_v14 = vpack.c.bf16 %v3505_v16, %v3504_v33  ;;  %v414_v24 = vadd.f32 %v345_v48, %v7507_v2  ;;  %v2127_v12 = vadd.f32 %v2058_v60, %v1778_v57  ;;  %v2128_v54 = vadd.f32 %v2059_v7, %v1779_v37  ;;  %v5977_v33 = vld [vmem:[%s14001_s0 + $0x3fa] sm:$0xff]  ;;  %v5978_v27 = vld [vmem:[%s14001_s0 + $0x402] sm:$0xff] }
  0xac   :  { %v2758_v42 = vmul.f32 %v6088_v47, %v7666_v13  ;;  %v1043_v11 = vmul.f32 %v7552_v20, %v832_v63  ;;  %v762_v16 = vadd.f32 %v693_v40, %v413_v58  ;;  %v1392_v48 = vmul.f32 %v5835_v30, %v7580_v32  ;;  %v6048_v7 = vld [vmem:[%s14001_s0 + $0x620] sm:$0xff] }
  0xad   :  { %6479 = vmatpush3.bf16.msra.mxu1 %v3551_v14  ;;  %v763_v26 = vadd.f32 %v694_v22, %v414_v24  ;;  %v1393_v60 = vmul.f32 %v5836_v25, %v7580_v32  ;;  %v2477_v47 = vadd.f32 %v2408_v15, %v2127_v12  ;;  %v2478_v63 = vadd.f32 %v2409_v39, %v2128_v54  ;;  %v6049_v14 = vld [vmem:[%s14001_s0 + $0x628] sm:$0xff] }
  0xae   :  { %v3106_v57 = vmul.f32 %v6158_v61, %v7685_v28  ;;  %v3107_v37 = vmul.f32 %v6159_v8, %v7685_v28  ;;  %v6119_v40 = vld [vmem:[%s14001_s0 + $0x621] sm:$0xff]  ;;  %v1111_v22 = vadd.f32 %v1042_v21, %v762_v16  ;;  %v1741_v25 = vmul.f32 %v5906_v53, %v7601_v41  ;;  %v6120_v15 = vld [vmem:[%s14001_s0 + $0x629] sm:$0xff]  ;;  %v86_v53 = vld [vmem:[%s14001_s0 + $0x58] sm:$0xff] }
  0xaf   :  { %v1112_v30 = vadd.f32 %v1043_v11, %v763_v26  ;;  %v1742_v58 = vmul.f32 %v5907_v50, %v7601_v41  ;;  %v8645_v39 = vmul.f32 %v8448_v5, %v7697_v34  ;;  %v8649_v61 = vmul.f32 %v8453_v44, %v7697_v34  ;;  %v85_v21 = vld [vmem:[%s14001_s0 + $0x50] sm:$0xff] }
  0xb0   :  { %v2826_v8 = vadd.f32 %v2757_v46, %v2477_v47  ;;  %v2827_v24 = vadd.f32 %v2758_v42, %v2478_v63  ;;  %v1461_v50 = vadd.f32 %v1392_v48, %v1111_v22  ;;  %v2090_v54 = vmul.f32 %v5977_v33, %v7624_v52  ;;  %v6190_v42 = vld [vmem:[%s14001_s0 + $0x622] sm:$0xff]  ;;  %v434_v26 = vld [vmem:[%s14001_s0 + $0x51] sm:$0xff] }
  0xb1   :  { %14107 = vst [vmem:[#allocation103_spill] sm:$0xff] %v8645_v39  ;;  %14108 = vst [vmem:[#allocation104_spill] sm:$0xff] %v8649_v61  ;;  %v1462_v12 = vadd.f32 %v1393_v60, %v1112_v30  ;;  %v2091_v5 = vmul.f32 %v5978_v27, %v7624_v52  ;;  %v2440_v44 = vmul.f32 %v6048_v7, %v7646_v62 }
  0xb2   :  { %v3175_v11 = vadd.f32 %v3106_v57, %v2826_v8  ;;  %v3176_v16 = vadd.f32 %v3107_v37, %v2827_v24  ;;  %v2441_v46 = vmul.f32 %v6049_v14, %v7646_v62  ;;  %v1810_v48 = vadd.f32 %v1741_v25, %v1461_v50  ;;  %v6191_v57 = vld [vmem:[%s14001_s0 + $0x62a] sm:$0xff]  ;;  %v435_v14 = vld [vmem:[%s14001_s0 + $0x59] sm:$0xff] }
  0xb3   :  { %v1811_v60 = vadd.f32 %v1742_v58, %v1462_v12  ;;  %v2789_v33 = vmul.f32 %v6119_v40, %v7666_v13  ;;  %v296_v27 = vmul.f32 %v7509_v3, %v85_v21  ;;  %v2790_v7 = vmul.f32 %v6120_v15, %v7666_v13  ;;  %v783_v58 = vld [vmem:[%s14001_s0 + $0x52] sm:$0xff]  ;;  %v784_v12 = vld [vmem:[%s14001_s0 + $0x5a] sm:$0xff] }
  0xb4   :  { %v3417_v47 = vmul.f32 0.01, %v3175_v11  ;;  %v3418_v63 = vmul.f32 0.01, %v3176_v16  ;;  %v297_v37 = vmul.f32 %v7509_v3, %v86_v53  ;;  %v2159_v22 = vadd.f32 %v2090_v54, %v1810_v48 }
  0xb5   :  { %v2160_v30 = vadd.f32 %v2091_v5, %v1811_v60  ;;  %v3138_v40 = vmul.f32 %v6190_v42, %v7685_v28  ;;  %v365_v25 = vadd.f32 %v296_v27, %v7507_v2  ;;  %v645_v50 = vmul.f32 %v7527_v10, %v434_v26  ;;  %v5787_v60 = vld [vmem:[%s14001_s0 + $0x278] sm:$0xff] }
  0xb6   :  { %v3486_v15 = vmax.f32 %v3175_v11, %v3417_v47  ;;  %v3487_v8 = vmax.f32 %v3176_v16, %v3418_v63  ;;  %v366_v24 = vadd.f32 %v297_v37, %v7507_v2  ;;  %v2509_v54 = vadd.f32 %v2440_v44, %v2159_v22  ;;  %v5788_v44 = vld [vmem:[%s14001_s0 + $0x280] sm:$0xff] }
  0xb7   :  { %v2510_v5 = vadd.f32 %v2441_v46, %v2160_v30  ;;  %v3139_v42 = vmul.f32 %v6191_v57, %v7685_v28  ;;  %v646_v48 = vmul.f32 %v7527_v10, %v435_v14  ;;  %v8694_v11 = vmul.f32 %v8461_v0, %v7715_v51  ;;  %v5858_v22 = vld [vmem:[%s14001_s0 + $0x279] sm:$0xff]  ;;  %v5859_v0 = vld [vmem:[%s14001_s0 + $0x281] sm:$0xff] }
  0xb8   :  { %v3542_v16 = vpack.c.bf16 %v3487_v8, %v3486_v15  ;;  %v714_v27 = vadd.f32 %v645_v50, %v365_v25  ;;  %v994_v47 = vmul.f32 %v7552_v20, %v783_v58  ;;  %v2858_v46 = vadd.f32 %v2789_v33, %v2509_v54  ;;  %v5929_v54 = vld [vmem:[%s14001_s0 + $0x27a] sm:$0xff] }
  0xb9   :  { %14109 = vst [vmem:[#allocation105_spill] sm:$0xff] %v8694_v11  ;;  %v2859_v63 = vadd.f32 %v2790_v7, %v2510_v5  ;;  %v715_v57 = vadd.f32 %v646_v48, %v366_v24  ;;  %v995_v37 = vmul.f32 %v7552_v20, %v784_v12  ;;  %v8709_v30 = vmul.f32 %v8466_v23, %v7715_v51  ;;  %v5930_v23 = vld [vmem:[%s14001_s0 + $0x282] sm:$0xff] }
  0xba   :  { %6380 = vmatprep.subr.bf16.mxu0 %v3542_v16  ;;  %v8712_v25 = vmul.f32 %v7519_v6, %v85_v21  ;;  %v1063_v33 = vadd.f32 %v994_v47, %v714_v27  ;;  %v1344_v7 = vmul.f32 %v5787_v60, %v7580_v32  ;;  %v3207_v15 = vadd.f32 %v3138_v40, %v2858_v46  ;;  %v6000_v46 = vld [vmem:[%s14001_s0 + $0x4a0] sm:$0xff] }
  0xbb   :  { %14110 = vst [vmem:[#allocation106_spill] sm:$0xff] %v8709_v30  ;;  %v3208_v8 = vadd.f32 %v3139_v42, %v2859_v63  ;;  %v1064_v24 = vadd.f32 %v995_v37, %v715_v57  ;;  %v1345_v50 = vmul.f32 %v5788_v44, %v7580_v32  ;;  %v8723_v5 = vmul.f32 %v7519_v6, %v86_v53  ;;  %v6001_v53 = vld [vmem:[%s14001_s0 + $0x4a8] sm:$0xff] }
  0xbc   :  { %14111 = vst [vmem:[#allocation107_spill] sm:$0xff] %v8712_v25  ;;  %v8726_v21 = vmul.f32 %v7525_v9, %v434_v26  ;;  %v1413_v48 = vadd.f32 %v1344_v7, %v1063_v33  ;;  %v1693_v40 = vmul.f32 %v5858_v22, %v7601_v41  ;;  %v3449_v42 = vmul.f32 0.01, %v3207_v15  ;;  %v6071_v30 = vld [vmem:[%s14001_s0 + $0x4a1] sm:$0xff] }
  0xbd   :  { %14112 = vst [vmem:[#allocation108_spill] sm:$0xff] %v8723_v5  ;;  %v3450_v16 = vmul.f32 0.01, %v3208_v8  ;;  %v1414_v27 = vadd.f32 %v1345_v50, %v1064_v24  ;;  %v1694_v47 = vmul.f32 %v5859_v0, %v7601_v41  ;;  %v8737_v63 = vmul.f32 %v7525_v9, %v435_v14  ;;  %v6072_v14 = vld [vmem:[%s14001_s0 + $0x4a9] sm:$0xff] }
  0xbe   :  { %14113 = vst [vmem:[#allocation109_spill] sm:$0xff] %v8726_v21  ;;  %v8740_v26 = vmul.f32 %v7594_v36, %v783_v58  ;;  %v1762_v57 = vadd.f32 %v1693_v40, %v1413_v48  ;;  %v2042_v37 = vmul.f32 %v5929_v54, %v7624_v52  ;;  %v3518_v33 = vmax.f32 %v3207_v15, %v3449_v42 }
  0xbf   :  { %14114 = vst [vmem:[#allocation110_spill] sm:$0xff] %v8737_v63  ;;  %v3519_v7 = vmax.f32 %v3208_v8, %v3450_v16  ;;  %v1763_v24 = vadd.f32 %v1694_v47, %v1414_v27  ;;  %v2043_v50 = vmul.f32 %v5930_v23, %v7624_v52  ;;  %v8751_v11 = vmul.f32 %v7594_v36, %v784_v12  ;;  %v6142_v8 = vld [vmem:[%s14001_s0 + $0x4a2] sm:$0xff]  ;;  %v6143_v12 = vld [vmem:[%s14001_s0 + $0x4aa] sm:$0xff] }
  0xc0   :  { %14115 = vst [vmem:[#allocation111_spill] sm:$0xff] %v8740_v26  ;;  %v8754_v58 = vmul.f32 %v5787_v60, %v7613_v45  ;;  %v2111_v48 = vadd.f32 %v2042_v37, %v1762_v57  ;;  %v2392_v15 = vmul.f32 %v6000_v46, %v7646_v62  ;;  %v8761_v42 = vmul.f32 %v5788_v44, %v7613_v45  ;;  %v117_v44 = vld [vmem:[%s14001_s0 + $0x150] sm:$0xff] }
  0xc1   :  { %14116 = vst [vmem:[#allocation112_spill] sm:$0xff] %v8751_v11  ;;  %v3558_v40 = vpack.c.bf16 %v3519_v7, %v3518_v33  ;;  %v2112_v16 = vadd.f32 %v2043_v50, %v1763_v24  ;;  %v2393_v27 = vmul.f32 %v6001_v53, %v7646_v62  ;;  %v8768_v60 = vmul.f32 %v5858_v22, %v7636_v56  ;;  %v118_v33 = vld [vmem:[%s14001_s0 + $0x158] sm:$0xff] }
  0xc2   :  { %14117 = vst [vmem:[#allocation113_spill] sm:$0xff] %v8754_v58  ;;  %14118 = vst [vmem:[#allocation114_spill] sm:$0xff] %v8761_v42  ;;  %v2461_v47 = vadd.f32 %v2392_v15, %v2111_v48  ;;  %v2741_v57 = vmul.f32 %v6071_v30, %v7666_v13  ;;  %v2742_v37 = vmul.f32 %v6072_v14, %v7666_v13  ;;  %v466_v48 = vld [vmem:[%s14001_s0 + $0x151] sm:$0xff]  ;;  %v467_v15 = vld [vmem:[%s14001_s0 + $0x159] sm:$0xff] }
  0xc3   :  { %14119 = vst [vmem:[#allocation115_spill] sm:$0xff] %v8768_v60  ;;  %6480 = vmatprep.subr.bf16.mxu1 %v3558_v40  ;;  %v8779_v7 = vmul.f32 %v5859_v0, %v7636_v56  ;;  %v8782_v22 = vmul.f32 %v5929_v54, %v7658_v4  ;;  %v2462_v24 = vadd.f32 %v2393_v27, %v2112_v16  ;;  %v5890_v60 = vld [vmem:[%s14001_s0 + $0x379] sm:$0xff] }
  0xc4   :  { %v3090_v50 = vmul.f32 %v6142_v8, %v7685_v28  ;;  %v8792_v61 = vmul.f32 %v5930_v23, %v7658_v4  ;;  %v8795_v0 = vmul.f32 %v6000_v46, %v7678_v17  ;;  %v2810_v40 = vadd.f32 %v2741_v57, %v2461_v47  ;;  %v816_v23 = vld [vmem:[%s14001_s0 + $0x15a] sm:$0xff] }
  0xc5   :  { %14120 = vst [vmem:[#allocation116_spill] sm:$0xff] %v8779_v7  ;;  %14121 = vst [vmem:[#allocation117_spill] sm:$0xff] %v8782_v22  ;;  %v3091_v54 = vmul.f32 %v6143_v12, %v7685_v28  ;;  %v8799_v16 = vmul.f32 %v6001_v53, %v7678_v17  ;;  %v2811_v27 = vadd.f32 %v2742_v37, %v2462_v24  ;;  %v815_v22 = vld [vmem:[%s14001_s0 + $0x152] sm:$0xff]  ;;  %v5820_v24 = vld [vmem:[%s14001_s0 + $0x380] sm:$0xff] }
  0xc6   :  { %14122 = vst [vmem:[#allocation118_spill] sm:$0xff] %v8792_v61  ;;  %14123 = vst [vmem:[#allocation119_spill] sm:$0xff] %v8795_v0  ;;  %v328_v39 = vmul.f32 %v7509_v3, %v117_v44  ;;  %v329_v38 = vmul.f32 %v7509_v3, %v118_v33  ;;  %v8810_v46 = vmul.f32 %v6071_v30, %v7697_v34  ;;  %v5819_v37 = vld [vmem:[%s14001_s0 + $0x378] sm:$0xff] }
  0xc7   :  { %14124 = vst [vmem:[#allocation120_spill] sm:$0xff] %v8799_v16  ;;  %v3159_v47 = vadd.f32 %v3090_v50, %v2810_v40  ;;  %v677_v53 = vmul.f32 %v7527_v10, %v466_v48  ;;  %v678_v57 = vmul.f32 %v7527_v10, %v467_v15  ;;  %v8821_v16 = vmul.f32 %v6072_v14, %v7697_v34  ;;  %v5891_v14 = vld [vmem:[%s14001_s0 + $0x381] sm:$0xff] }
  0xc8   :  { %14125 = vst [vmem:[#allocation121_spill] sm:$0xff] %v8810_v46  ;;  %v3160_v0 = vadd.f32 %v3091_v54, %v2811_v27  ;;  %v397_v30 = vadd.f32 %v328_v39, %v7507_v2  ;;  %v398_v50 = vadd.f32 %v329_v38, %v7507_v2  ;;  %v8826_v40 = vmul.f32 %v6142_v8, %v7715_v51  ;;  %v5961_v58 = vld [vmem:[%s14001_s0 + $0x37a] sm:$0xff] }
  0xc9   :  { %14126 = vst [vmem:[#allocation122_spill] sm:$0xff] %v8821_v16  ;;  %v3401_v46 = vmul.f32 0.01, %v3159_v47  ;;  %v1026_v61 = vmul.f32 %v7552_v20, %v815_v22  ;;  %v1027_v7 = vmul.f32 %v7552_v20, %v816_v23  ;;  %v8837_v39 = vmul.f32 %v6143_v12, %v7715_v51 }
  0xca   :  { %14127 = vst [vmem:[#allocation123_spill] sm:$0xff] %v8826_v40  ;;  %v3402_v38 = vmul.f32 0.01, %v3160_v0  ;;  %v746_v54 = vadd.f32 %v677_v53, %v397_v30  ;;  %v747_v8 = vadd.f32 %v678_v57, %v398_v50  ;;  %v8840_v40 = vmul.f32 %v7519_v6, %v117_v44  ;;  %v6032_v44 = vld [vmem:[%s14001_s0 + $0x5a0] sm:$0xff]  ;;  %v8877_v57 = vld [vmem:[%s14001_s0 + $0x5a9] sm:$0xff] }
  0xcb   :  { %14128 = vst [vmem:[#allocation124_spill] sm:$0xff] %v8837_v39  ;;  %v3470_v27 = vmax.f32 %v3159_v47, %v3401_v46  ;;  %v1376_v16 = vmul.f32 %v5819_v37, %v7580_v32  ;;  %v1377_v42 = vmul.f32 %v5820_v24, %v7580_v32  ;;  %v8848_v26 = vmul.f32 %v7519_v6, %v118_v33  ;;  %v5962_v46 = vld [vmem:[%s14001_s0 + $0x382] sm:$0xff] }
  0xcc   :  { %14129 = vst [vmem:[#allocation125_spill] sm:$0xff] %v8840_v40  ;;  %v3471_v11 = vmax.f32 %v3160_v0, %v3402_v38  ;;  %v1095_v12 = vadd.f32 %v1026_v61, %v746_v54  ;;  %v1096_v39 = vadd.f32 %v1027_v7, %v747_v8  ;;  %v8859_v47 = vld [vmem:[%s14001_s0 + $0x5a8] sm:$0xff]  ;;  %v8862_v0 = vmul.f32 %v7525_v9, %v466_v48 }
  0xcd   :  { %14130 = vst [vmem:[#allocation126_spill] sm:$0xff] %v8848_v26  ;;  %v8865_v33 = vmul.f32 %v7525_v9, %v467_v15  ;;  %v1725_v61 = vmul.f32 %v5890_v60, %v7601_v41  ;;  %v1726_v7 = vmul.f32 %v5891_v14, %v7601_v41  ;;  %v8872_v53 = vld [vmem:[%s14001_s0 + $0x5a1] sm:$0xff]  ;;  %v8880_v48 = vmul.f32 %v7594_v36, %v815_v22  ;;  %v8890_v54 = vld [vmem:[%s14001_s0 + $0x5aa] sm:$0xff] }
  0xce   :  { %14131 = vst [vmem:[#allocation127_spill] sm:$0xff] %v8862_v0  ;;  %v3534_v30 = vpack.c.bf16 %v3471_v11, %v3470_v27  ;;  %v1445_v15 = vadd.f32 %v1376_v16, %v1095_v12  ;;  %v1446_v50 = vadd.f32 %v1377_v42, %v1096_v39  ;;  %v8885_v38 = vld [vmem:[%s14001_s0 + $0x5a2] sm:$0xff]  ;;  %v8893_v8 = vmul.f32 %v7594_v36, %v816_v23 }
  0xcf   :  { %14132 = vst [vmem:[#allocation128_spill] sm:$0xff] %v8865_v33  ;;  %14133 = vst [vmem:[#allocation129_spill] sm:$0xff] %v8880_v48  ;;  %v8896_v11 = vmul.f32 %v5819_v37, %v7613_v45  ;;  %v2074_v22 = vmul.f32 %v5961_v58, %v7624_v52  ;;  %v2075_v42 = vmul.f32 %v5962_v46, %v7624_v52  ;;  %v99_v16 = vld [vmem:[%s14001_s0 + $0xc0] sm:$0xff]  ;;  %v100_v39 = vld [vmem:[%s14001_s0 + $0xc8] sm:$0xff] }
  0xd0   :  { %14134 = vst [vmem:[#allocation130_spill] sm:$0xff] %v8893_v8  ;;  %v448_v23 = vld [vmem:[%s14001_s0 + $0xc1] sm:$0xff]  ;;  %6381 = vmatpush3.bf16.msra.mxu0 %v3534_v30  ;;  %v1794_v27 = vadd.f32 %v1725_v61, %v1445_v15  ;;  %v1795_v37 = vadd.f32 %v1726_v7, %v1446_v50  ;;  %v2424_v12 = vmul.f32 %v6032_v44, %v7646_v62  ;;  %v449_v8 = vld [vmem:[%s14001_s0 + $0xc9] sm:$0xff] }
  0xd1   :  { %14135 = vst [vmem:[#allocation131_spill] sm:$0xff] %v8896_v11  ;;  %v2425_v11 = vmul.f32 %v8859_v47, %v7646_v62  ;;  %v8916_v48 = vmul.f32 %v5820_v24, %v7613_v45  ;;  %v8919_v33 = vmul.f32 %v5890_v60, %v7636_v56  ;;  %v8922_v0 = vmul.f32 %v5891_v14, %v7636_v56  ;;  %v797_v7 = vld [vmem:[%s14001_s0 + $0xc2] sm:$0xff]  ;;  %v798_v30 = vld [vmem:[%s14001_s0 + $0xca] sm:$0xff] }
  0xd2   :  { %v8925_v61 = vmul.f32 %v5961_v58, %v7658_v4  ;;  %v2143_v15 = vadd.f32 %v2074_v22, %v1794_v27  ;;  %v2144_v24 = vadd.f32 %v2075_v42, %v1795_v37  ;;  %v2773_v60 = vmul.f32 %v8872_v53, %v7666_v13  ;;  %v5801_v58 = vld [vmem:[%s14001_s0 + $0x2e8] sm:$0xff]  ;;  %v5802_v42 = vld [vmem:[%s14001_s0 + $0x2f0] sm:$0xff] }
  0xd3   :  { %14136 = vst [vmem:[#allocation132_spill] sm:$0xff] %v8916_v48  ;;  %14137 = vst [vmem:[#allocation133_spill] sm:$0xff] %v8919_v33  ;;  %v2774_v14 = vmul.f32 %v8877_v57, %v7666_v13  ;;  %v3122_v50 = vmul.f32 %v8885_v38, %v7685_v28  ;;  %v311_v22 = vmul.f32 %v7509_v3, %v100_v39  ;;  %v5872_v27 = vld [vmem:[%s14001_s0 + $0x2e9] sm:$0xff] }
  0xd4   :  { %14138 = vst [vmem:[#allocation134_spill] sm:$0xff] %v8922_v0  ;;  %14139 = vst [vmem:[#allocation135_spill] sm:$0xff] %v8925_v61  ;;  %v3123_v61 = vmul.f32 %v8890_v54, %v7685_v28  ;;  %v310_v0 = vmul.f32 %v7509_v3, %v99_v16  ;;  %v2493_v37 = vadd.f32 %v2424_v12, %v2143_v15  ;;  %v5873_v16 = vld [vmem:[%s14001_s0 + $0x2f1] sm:$0xff] }
  0xd5   :  { %v2494_v33 = vadd.f32 %v2425_v11, %v2144_v24  ;;  %v659_v48 = vmul.f32 %v7527_v10, %v448_v23  ;;  %v660_v26 = vmul.f32 %v7527_v10, %v449_v8  ;;  %v5943_v39 = vld [vmem:[%s14001_s0 + $0x2ea] sm:$0xff]  ;;  %v380_v63 = vadd.f32 %v311_v22, %v7507_v2  ;;  %v5944_v8 = vld [vmem:[%s14001_s0 + $0x2f2] sm:$0xff] }
  0xd6   :  { %v379_v40 = vadd.f32 %v310_v0, %v7507_v2  ;;  %v1008_v21 = vmul.f32 %v7552_v20, %v797_v7  ;;  %v1009_v11 = vmul.f32 %v7552_v20, %v798_v30  ;;  %v6014_v23 = vld [vmem:[%s14001_s0 + $0x510] sm:$0xff]  ;;  %v8971_v12 = vmul.f32 %v5962_v46, %v7658_v4  ;;  %v6015_v7 = vld [vmem:[%s14001_s0 + $0x518] sm:$0xff] }
  0xd7   :  { %v8974_v15 = vmul.f32 %v6032_v44, %v7678_v17  ;;  %v2842_v0 = vadd.f32 %v2773_v60, %v2493_v37  ;;  %v2843_v24 = vadd.f32 %v2774_v14, %v2494_v33  ;;  %v6085_v30 = vld [vmem:[%s14001_s0 + $0x511] sm:$0xff]  ;;  %v729_v5 = vadd.f32 %v660_v26, %v380_v63  ;;  %v131_v44 = vld [vmem:[%s14001_s0 + $0x1c0] sm:$0xff]  ;;  %v132_v33 = vld [vmem:[%s14001_s0 + $0x1c8] sm:$0xff] }
  0xd8   :  { %14140 = vst [vmem:[#allocation136_spill] sm:$0xff] %v8971_v12  ;;  %v728_v22 = vadd.f32 %v659_v48, %v379_v40  ;;  %v1358_v25 = vmul.f32 %v5801_v58, %v7580_v32  ;;  %v1359_v46 = vmul.f32 %v5802_v42, %v7580_v32  ;;  %v8992_v60 = vmul.f32 %v8859_v47, %v7678_v17  ;;  %v480_v42 = vld [vmem:[%s14001_s0 + $0x1c1] sm:$0xff] }
  0xd9   :  { %14141 = vst [vmem:[#allocation137_spill] sm:$0xff] %v8974_v15  ;;  %v3191_v14 = vadd.f32 %v3122_v50, %v2842_v0  ;;  %v3192_v37 = vadd.f32 %v3123_v61, %v2843_v24  ;;  %v1707_v63 = vmul.f32 %v5872_v27, %v7601_v41  ;;  %v1078_v40 = vadd.f32 %v1009_v11, %v729_v5  ;;  %v481_v15 = vld [vmem:[%s14001_s0 + $0x1c9] sm:$0xff]  ;;  %v6086_v5 = vld [vmem:[%s14001_s0 + $0x519] sm:$0xff] }
  0xda   :  { %14142 = vst [vmem:[#allocation138_spill] sm:$0xff] %v8992_v60  ;;  %v1077_v26 = vadd.f32 %v1008_v21, %v728_v22  ;;  %v1708_v48 = vmul.f32 %v5873_v16, %v7601_v41  ;;  %v2056_v58 = vmul.f32 %v5943_v39, %v7624_v52  ;;  %v2057_v61 = vmul.f32 %v5944_v8, %v7624_v52  ;;  %v829_v11 = vld [vmem:[%s14001_s0 + $0x1c2] sm:$0xff]  ;;  %v830_v8 = vld [vmem:[%s14001_s0 + $0x1ca] sm:$0xff]  ;;  %v6156_v24 = vld [vmem:[%s14001_s0 + $0x512] sm:$0xff] }
  0xdb   :  { %v3433_v47 = vmul.f32 0.01, %v3191_v14  ;;  %v3434_v60 = vmul.f32 0.01, %v3192_v37  ;;  %v2406_v50 = vmul.f32 %v6014_v23, %v7646_v62  ;;  %v1428_v27 = vadd.f32 %v1359_v46, %v1078_v40 }
  0xdc   :  { %v1427_v21 = vadd.f32 %v1358_v25, %v1077_v26  ;;  %v2407_v16 = vmul.f32 %v6015_v7, %v7646_v62  ;;  %v2755_v39 = vmul.f32 %v6085_v30, %v7666_v13  ;;  %v6157_v25 = vld [vmem:[%s14001_s0 + $0x51a] sm:$0xff]  ;;  %v342_v7 = vmul.f32 %v7509_v3, %v131_v44 }
  0xdd   :  { %v3502_v0 = vmax.f32 %v3191_v14, %v3433_v47  ;;  %v3503_v23 = vmax.f32 %v3192_v37, %v3434_v60  ;;  %v343_v30 = vmul.f32 %v7509_v3, %v132_v33  ;;  %v1777_v46 = vadd.f32 %v1708_v48, %v1428_v27  ;;  %v5833_v60 = vld [vmem:[%s14001_s0 + $0x3e8] sm:$0xff]  ;;  %v5834_v14 = vld [vmem:[%s14001_s0 + $0x3f0] sm:$0xff] }
  0xde   :  { %v1776_v22 = vadd.f32 %v1707_v63, %v1427_v21  ;;  %v691_v26 = vmul.f32 %v7527_v10, %v480_v42  ;;  %v692_v40 = vmul.f32 %v7527_v10, %v481_v15  ;;  %v411_v47 = vadd.f32 %v342_v7, %v7507_v2  ;;  %v5904_v63 = vld [vmem:[%s14001_s0 + $0x3e9] sm:$0xff]  ;;  %v5905_v15 = vld [vmem:[%s14001_s0 + $0x3f1] sm:$0xff] }
  0xdf   :  { %v3550_v37 = vpack.c.bf16 %v3503_v23, %v3502_v0  ;;  %v412_v44 = vadd.f32 %v343_v30, %v7507_v2  ;;  %v1040_v33 = vmul.f32 %v7552_v20, %v829_v11  ;;  %v2126_v42 = vadd.f32 %v2057_v61, %v1777_v46  ;;  %v5975_v0 = vld [vmem:[%s14001_s0 + $0x3ea] sm:$0xff]  ;;  %v5976_v11 = vld [vmem:[%s14001_s0 + $0x3f2] sm:$0xff] }
  0xe0   :  { %v2125_v48 = vadd.f32 %v2056_v58, %v1776_v22  ;;  %v2756_v21 = vmul.f32 %v6086_v5, %v7666_v13  ;;  %v1041_v27 = vmul.f32 %v7552_v20, %v830_v8  ;;  %v760_v23 = vadd.f32 %v691_v26, %v411_v47  ;;  %v6046_v61 = vld [vmem:[%s14001_s0 + $0x610] sm:$0xff] }
  0xe1   :  { %6481 = vmatpush3.bf16.msra.mxu1 %v3550_v37  ;;  %v761_v7 = vadd.f32 %v692_v40, %v412_v44  ;;  %v1390_v30 = vmul.f32 %v5833_v60, %v7580_v32  ;;  %v1391_v58 = vmul.f32 %v5834_v14, %v7580_v32  ;;  %v2476_v8 = vadd.f32 %v2407_v16, %v2126_v42  ;;  %v6047_v37 = vld [vmem:[%s14001_s0 + $0x618] sm:$0xff] }
  0xe2   :  { %v2475_v5 = vadd.f32 %v2406_v50, %v2125_v48  ;;  %v3104_v22 = vmul.f32 %v6156_v24, %v7685_v28  ;;  %v3105_v46 = vmul.f32 %v6157_v25, %v7685_v28  ;;  %v6117_v26 = vld [vmem:[%s14001_s0 + $0x611] sm:$0xff]  ;;  %v1109_v40 = vadd.f32 %v1040_v33, %v760_v23  ;;  %v6118_v50 = vld [vmem:[%s14001_s0 + $0x619] sm:$0xff] }
  0xe3   :  { %v1110_v60 = vadd.f32 %v1041_v27, %v761_v7  ;;  %v1739_v14 = vmul.f32 %v5904_v63, %v7601_v41  ;;  %v1740_v47 = vmul.f32 %v5905_v15, %v7601_v41  ;;  %v9069_v16 = vmul.f32 %v8872_v53, %v7697_v34  ;;  %v83_v33 = vld [vmem:[%s14001_s0 + $0x40] sm:$0xff]  ;;  %v84_v63 = vld [vmem:[%s14001_s0 + $0x48] sm:$0xff] }
  0xe4   :  { %v9073_v24 = vmul.f32 %v8877_v57, %v7697_v34  ;;  %v2824_v25 = vadd.f32 %v2755_v39, %v2475_v5  ;;  %v2825_v44 = vadd.f32 %v2756_v21, %v2476_v8  ;;  %v1459_v15 = vadd.f32 %v1390_v30, %v1109_v40  ;;  %v6188_v21 = vld [vmem:[%s14001_s0 + $0x612] sm:$0xff]  ;;  %v432_v7 = vld [vmem:[%s14001_s0 + $0x41] sm:$0xff] }
  0xe5   :  { %14143 = vst [vmem:[#allocation139_spill] sm:$0xff] %v9069_v16  ;;  %v1460_v48 = vadd.f32 %v1391_v58, %v1110_v60  ;;  %v2088_v42 = vmul.f32 %v5975_v0, %v7624_v52  ;;  %v2089_v53 = vmul.f32 %v5976_v11, %v7624_v52  ;;  %v2438_v57 = vmul.f32 %v6046_v61, %v7646_v62 }
  0xe6   :  { %14144 = vst [vmem:[#allocation140_spill] sm:$0xff] %v9073_v24  ;;  %v3173_v27 = vadd.f32 %v3104_v22, %v2824_v25  ;;  %v3174_v23 = vadd.f32 %v3105_v46, %v2825_v44  ;;  %v2439_v39 = vmul.f32 %v6047_v37, %v7646_v62  ;;  %v1808_v30 = vadd.f32 %v1739_v14, %v1459_v15  ;;  %v6189_v22 = vld [vmem:[%s14001_s0 + $0x61a] sm:$0xff]  ;;  %v433_v37 = vld [vmem:[%s14001_s0 + $0x49] sm:$0xff] }
  0xe7   :  { %v1809_v58 = vadd.f32 %v1740_v47, %v1460_v48  ;;  %v2787_v0 = vmul.f32 %v6117_v26, %v7666_v13  ;;  %v294_v11 = vmul.f32 %v7509_v3, %v83_v33  ;;  %v2788_v61 = vmul.f32 %v6118_v50, %v7666_v13  ;;  %v781_v47 = vld [vmem:[%s14001_s0 + $0x42] sm:$0xff]  ;;  %v782_v48 = vld [vmem:[%s14001_s0 + $0x4a] sm:$0xff] }
  0xe8   :  { %v3415_v5 = vmul.f32 0.01, %v3173_v27  ;;  %v3416_v8 = vmul.f32 0.01, %v3174_v23  ;;  %v295_v46 = vmul.f32 %v7509_v3, %v84_v63  ;;  %v2157_v40 = vadd.f32 %v2088_v42, %v1808_v30 }
  0xe9   :  { %v2158_v60 = vadd.f32 %v2089_v53, %v1809_v58  ;;  %v3136_v26 = vmul.f32 %v6188_v21, %v7685_v28  ;;  %v363_v14 = vadd.f32 %v294_v11, %v7507_v2  ;;  %v643_v15 = vmul.f32 %v7527_v10, %v432_v7  ;;  %v5785_v58 = vld [vmem:[%s14001_s0 + $0x268] sm:$0xff] }
  0xea   :  { %v3484_v50 = vmax.f32 %v3173_v27, %v3415_v5  ;;  %v3485_v25 = vmax.f32 %v3174_v23, %v3416_v8  ;;  %v364_v44 = vadd.f32 %v295_v46, %v7507_v2  ;;  %v2507_v42 = vadd.f32 %v2438_v57, %v2157_v40  ;;  %v5786_v57 = vld [vmem:[%s14001_s0 + $0x270] sm:$0xff] }
  0xeb   :  { %v2508_v53 = vadd.f32 %v2439_v39, %v2158_v60  ;;  %v3137_v21 = vmul.f32 %v6189_v22, %v7685_v28  ;;  %v644_v30 = vmul.f32 %v7527_v10, %v433_v37  ;;  %v9118_v27 = vmul.f32 %v8885_v38, %v7715_v51  ;;  %v5856_v40 = vld [vmem:[%s14001_s0 + $0x269] sm:$0xff]  ;;  %v5857_v38 = vld [vmem:[%s14001_s0 + $0x271] sm:$0xff] }
  0xec   :  { %v3541_v23 = vpack.c.bf16 %v3485_v25, %v3484_v50  ;;  %v712_v11 = vadd.f32 %v643_v15, %v363_v14  ;;  %v992_v5 = vmul.f32 %v7552_v20, %v781_v47  ;;  %v2856_v39 = vadd.f32 %v2787_v0, %v2507_v42  ;;  %v5927_v42 = vld [vmem:[%s14001_s0 + $0x26a] sm:$0xff] }
  0xed   :  { %14145 = vst [vmem:[#allocation141_spill] sm:$0xff] %v9118_v27  ;;  %v2857_v8 = vadd.f32 %v2788_v61, %v2508_v53  ;;  %v713_v22 = vadd.f32 %v644_v30, %v364_v44  ;;  %v993_v46 = vmul.f32 %v7552_v20, %v782_v48  ;;  %v9133_v60 = vmul.f32 %v8890_v54, %v7715_v51  ;;  %v5928_v54 = vld [vmem:[%s14001_s0 + $0x272] sm:$0xff] }
  0xee   :  { %6382 = vmatprep.subr.bf16.mxu0 %v3541_v23  ;;  %v9136_v14 = vmul.f32 %v7519_v6, %v83_v33  ;;  %v1061_v0 = vadd.f32 %v992_v5, %v712_v11  ;;  %v1342_v61 = vmul.f32 %v5785_v58, %v7580_v32  ;;  %v3205_v50 = vadd.f32 %v3136_v26, %v2856_v39  ;;  %v5998_v39 = vld [vmem:[%s14001_s0 + $0x490] sm:$0xff] }
  0xef   :  { %14146 = vst [vmem:[#allocation142_spill] sm:$0xff] %v9133_v60  ;;  %v3206_v25 = vadd.f32 %v3137_v21, %v2857_v8  ;;  %v1062_v44 = vadd.f32 %v993_v46, %v713_v22  ;;  %v1343_v15 = vmul.f32 %v5786_v57, %v7580_v32  ;;  %v9147_v53 = vmul.f32 %v7519_v6, %v84_v63  ;;  %v5999_v63 = vld [vmem:[%s14001_s0 + $0x498] sm:$0xff] }
  0xf0   :  { %14147 = vst [vmem:[#allocation143_spill] sm:$0xff] %v9136_v14  ;;  %v9150_v33 = vmul.f32 %v7525_v9, %v432_v7  ;;  %v1411_v30 = vadd.f32 %v1342_v61, %v1061_v0  ;;  %v1691_v26 = vmul.f32 %v5856_v40, %v7601_v41  ;;  %v3447_v21 = vmul.f32 0.01, %v3205_v50  ;;  %v6069_v60 = vld [vmem:[%s14001_s0 + $0x491] sm:$0xff]  ;;  %v6013_v14 = vld [vmem:[%s14001_s0 + $0x508] sm:$0xff] }
  0xf1   :  { %14148 = vst [vmem:[#allocation144_spill] sm:$0xff] %v9147_v53  ;;  %v3448_v23 = vmul.f32 0.01, %v3206_v25  ;;  %v1412_v11 = vadd.f32 %v1343_v15, %v1062_v44  ;;  %v1692_v5 = vmul.f32 %v5857_v38, %v7601_v41  ;;  %v9161_v8 = vmul.f32 %v7525_v9, %v433_v37  ;;  %v6070_v37 = vld [vmem:[%s14001_s0 + $0x499] sm:$0xff] }
  0xf2   :  { %14149 = vst [vmem:[#allocation145_spill] sm:$0xff] %v9150_v33  ;;  %v9164_v7 = vmul.f32 %v7594_v36, %v781_v47  ;;  %v1760_v22 = vadd.f32 %v1691_v26, %v1411_v30  ;;  %v2040_v46 = vmul.f32 %v5927_v42, %v7624_v52  ;;  %v3516_v0 = vmax.f32 %v3205_v50, %v3447_v21 }
  0xf3   :  { %14150 = vst [vmem:[#allocation146_spill] sm:$0xff] %v9161_v8  ;;  %v3517_v61 = vmax.f32 %v3206_v25, %v3448_v23  ;;  %v1761_v44 = vadd.f32 %v1692_v5, %v1412_v11  ;;  %v2041_v15 = vmul.f32 %v5928_v54, %v7624_v52  ;;  %v9175_v27 = vmul.f32 %v7594_v36, %v782_v48  ;;  %v6140_v25 = vld [vmem:[%s14001_s0 + $0x492] sm:$0xff]  ;;  %v6141_v48 = vld [vmem:[%s14001_s0 + $0x49a] sm:$0xff] }
  0xf4   :  { %14151 = vst [vmem:[#allocation147_spill] sm:$0xff] %v9164_v7  ;;  %v9178_v47 = vmul.f32 %v5785_v58, %v7613_v45  ;;  %v2109_v30 = vadd.f32 %v2040_v46, %v1760_v22  ;;  %v2390_v50 = vmul.f32 %v5998_v39, %v7646_v62  ;;  %v9185_v21 = vmul.f32 %v5786_v57, %v7613_v45  ;;  %v115_v57 = vld [vmem:[%s14001_s0 + $0x140] sm:$0xff] }
  0xf5   :  { %14152 = vst [vmem:[#allocation148_spill] sm:$0xff] %v9175_v27  ;;  %v3557_v26 = vpack.c.bf16 %v3517_v61, %v3516_v0  ;;  %v2110_v23 = vadd.f32 %v2041_v15, %v1761_v44  ;;  %v2391_v11 = vmul.f32 %v5999_v63, %v7646_v62  ;;  %v9192_v58 = vmul.f32 %v5856_v40, %v7636_v56  ;;  %v116_v0 = vld [vmem:[%s14001_s0 + $0x148] sm:$0xff] }
  0xf6   :  { %14153 = vst [vmem:[#allocation149_spill] sm:$0xff] %v9178_v47  ;;  %14154 = vst [vmem:[#allocation150_spill] sm:$0xff] %v9185_v21  ;;  %v2459_v5 = vadd.f32 %v2390_v50, %v2109_v30  ;;  %v2739_v22 = vmul.f32 %v6069_v60, %v7666_v13  ;;  %v2740_v46 = vmul.f32 %v6070_v37, %v7666_v13  ;;  %v464_v30 = vld [vmem:[%s14001_s0 + $0x141] sm:$0xff]  ;;  %v465_v50 = vld [vmem:[%s14001_s0 + $0x149] sm:$0xff] }
  0xf7   :  { %14155 = vst [vmem:[#allocation151_spill] sm:$0xff] %v9192_v58  ;;  %6482 = vmatprep.subr.bf16.mxu1 %v3557_v26  ;;  %v9203_v61 = vmul.f32 %v5857_v38, %v7636_v56  ;;  %v9206_v40 = vmul.f32 %v5927_v42, %v7658_v4  ;;  %v2460_v44 = vadd.f32 %v2391_v11, %v2110_v23  ;;  %v5888_v58 = vld [vmem:[%s14001_s0 + $0x369] sm:$0xff] }
  0xf8   :  { %v3088_v15 = vmul.f32 %v6140_v25, %v7685_v28  ;;  %v9216_v24 = vmul.f32 %v5928_v54, %v7658_v4  ;;  %v9219_v38 = vmul.f32 %v5998_v39, %v7678_v17  ;;  %v2808_v26 = vadd.f32 %v2739_v22, %v2459_v5  ;;  %v814_v54 = vld [vmem:[%s14001_s0 + $0x14a] sm:$0xff] }
  0xf9   :  { %14156 = vst [vmem:[#allocation152_spill] sm:$0xff] %v9203_v61  ;;  %14157 = vst [vmem:[#allocation153_spill] sm:$0xff] %v9206_v40  ;;  %v3089_v42 = vmul.f32 %v6141_v48, %v7685_v28  ;;  %v9223_v23 = vmul.f32 %v5999_v63, %v7678_v17  ;;  %v2809_v11 = vadd.f32 %v2740_v46, %v2460_v44  ;;  %v813_v40 = vld [vmem:[%s14001_s0 + $0x142] sm:$0xff]  ;;  %v5818_v44 = vld [vmem:[%s14001_s0 + $0x370] sm:$0xff] }
  0xfa   :  { %14158 = vst [vmem:[#allocation154_spill] sm:$0xff] %v9216_v24  ;;  %14159 = vst [vmem:[#allocation155_spill] sm:$0xff] %v9219_v38  ;;  %v326_v16 = vmul.f32 %v7509_v3, %v115_v57  ;;  %v327_v12 = vmul.f32 %v7509_v3, %v116_v0  ;;  %v9234_v39 = vmul.f32 %v6069_v60, %v7697_v34  ;;  %v5817_v46 = vld [vmem:[%s14001_s0 + $0x368] sm:$0xff] }
  0xfb   :  { %14160 = vst [vmem:[#allocation156_spill] sm:$0xff] %v9223_v23  ;;  %v3157_v5 = vadd.f32 %v3088_v15, %v2808_v26  ;;  %v675_v63 = vmul.f32 %v7527_v10, %v464_v30  ;;  %v676_v22 = vmul.f32 %v7527_v10, %v465_v50  ;;  %v9245_v23 = vmul.f32 %v6070_v37, %v7697_v34  ;;  %v5889_v37 = vld [vmem:[%s14001_s0 + $0x371] sm:$0xff] }
  0xfc   :  { %14161 = vst [vmem:[#allocation157_spill] sm:$0xff] %v9234_v39  ;;  %v3158_v38 = vadd.f32 %v3089_v42, %v2809_v11  ;;  %v395_v60 = vadd.f32 %v326_v16, %v7507_v2  ;;  %v396_v15 = vadd.f32 %v327_v12, %v7507_v2  ;;  %v9250_v26 = vmul.f32 %v6140_v25, %v7715_v51  ;;  %v5959_v47 = vld [vmem:[%s14001_s0 + $0x36a] sm:$0xff] }
  0xfd   :  { %14162 = vst [vmem:[#allocation158_spill] sm:$0xff] %v9245_v23  ;;  %v3399_v39 = vmul.f32 0.01, %v3157_v5  ;;  %v1024_v24 = vmul.f32 %v7552_v20, %v813_v40  ;;  %v1025_v61 = vmul.f32 %v7552_v20, %v814_v54  ;;  %v9261_v16 = vmul.f32 %v6141_v48, %v7715_v51 }
  0xfe   :  { %14163 = vst [vmem:[#allocation159_spill] sm:$0xff] %v9250_v26  ;;  %v3400_v12 = vmul.f32 0.01, %v3158_v38  ;;  %v744_v42 = vadd.f32 %v675_v63, %v395_v60  ;;  %v745_v25 = vadd.f32 %v676_v22, %v396_v15  ;;  %v9264_v26 = vmul.f32 %v7519_v6, %v115_v57  ;;  %v6030_v57 = vld [vmem:[%s14001_s0 + $0x590] sm:$0xff]  ;;  %v9301_v22 = vld [vmem:[%s14001_s0 + $0x599] sm:$0xff] }
  0xff   :  { %14164 = vst [vmem:[#allocation160_spill] sm:$0xff] %v9261_v16  ;;  %v3468_v11 = vmax.f32 %v3157_v5, %v3399_v39  ;;  %v1374_v23 = vmul.f32 %v5817_v46, %v7580_v32  ;;  %v1375_v21 = vmul.f32 %v5818_v44, %v7580_v32  ;;  %v9272_v7 = vmul.f32 %v7519_v6, %v116_v0  ;;  %v5960_v39 = vld [vmem:[%s14001_s0 + $0x372] sm:$0xff] }
 0x100   :  { %14165 = vst [vmem:[#allocation161_spill] sm:$0xff] %v9264_v26  ;;  %v3469_v27 = vmax.f32 %v3158_v38, %v3400_v12  ;;  %v1093_v48 = vadd.f32 %v1024_v24, %v744_v42  ;;  %v1094_v16 = vadd.f32 %v1025_v61, %v745_v25  ;;  %v9283_v5 = vld [vmem:[%s14001_s0 + $0x598] sm:$0xff]  ;;  %v9286_v38 = vmul.f32 %v7525_v9, %v464_v30 }
 0x101   :  { %14166 = vst [vmem:[#allocation162_spill] sm:$0xff] %v9272_v7  ;;  %v9289_v0 = vmul.f32 %v7525_v9, %v465_v50  ;;  %v1723_v24 = vmul.f32 %v5888_v58, %v7601_v41  ;;  %v1724_v61 = vmul.f32 %v5889_v37, %v7601_v41  ;;  %v9296_v63 = vld [vmem:[%s14001_s0 + $0x591] sm:$0xff]  ;;  %v9304_v30 = vmul.f32 %v7594_v36, %v813_v40  ;;  %v9314_v42 = vld [vmem:[%s14001_s0 + $0x59a] sm:$0xff] }
 0x102   :  { %14167 = vst [vmem:[#allocation163_spill] sm:$0xff] %v9286_v38  ;;  %v3533_v60 = vpack.c.bf16 %v3469_v27, %v3468_v11  ;;  %v1443_v50 = vadd.f32 %v1374_v23, %v1093_v48  ;;  %v1444_v15 = vadd.f32 %v1375_v21, %v1094_v16  ;;  %v9309_v12 = vld [vmem:[%s14001_s0 + $0x592] sm:$0xff]  ;;  %v9317_v25 = vmul.f32 %v7594_v36, %v814_v54 }
 0x103   :  { %14168 = vst [vmem:[#allocation164_spill] sm:$0xff] %v9289_v0  ;;  %14169 = vst [vmem:[#allocation165_spill] sm:$0xff] %v9304_v30  ;;  %v9320_v27 = vmul.f32 %v5817_v46, %v7613_v45  ;;  %v2072_v40 = vmul.f32 %v5959_v47, %v7624_v52  ;;  %v2073_v21 = vmul.f32 %v5960_v39, %v7624_v52  ;;  %v97_v23 = vld [vmem:[%s14001_s0 + $0xb0] sm:$0xff]  ;;  %v98_v16 = vld [vmem:[%s14001_s0 + $0xb8] sm:$0xff] }
 0x104   :  { %14170 = vst [vmem:[#allocation166_spill] sm:$0xff] %v9317_v25  ;;  %v446_v54 = vld [vmem:[%s14001_s0 + $0xb1] sm:$0xff]  ;;  %6383 = vmatpush3.bf16.msra.mxu0 %v3533_v60  ;;  %v1792_v11 = vadd.f32 %v1723_v24, %v1443_v50  ;;  %v1793_v46 = vadd.f32 %v1724_v61, %v1444_v15  ;;  %v2422_v48 = vmul.f32 %v6030_v57, %v7646_v62  ;;  %v447_v25 = vld [vmem:[%s14001_s0 + $0xb9] sm:$0xff] }
 0x105   :  { %14171 = vst [vmem:[#allocation167_spill] sm:$0xff] %v9320_v27  ;;  %v2423_v27 = vmul.f32 %v9283_v5, %v7646_v62  ;;  %v9340_v30 = vmul.f32 %v5818_v44, %v7613_v45  ;;  %v9343_v0 = vmul.f32 %v5888_v58, %v7636_v56  ;;  %v9346_v38 = vmul.f32 %v5889_v37, %v7636_v56  ;;  %v795_v61 = vld [vmem:[%s14001_s0 + $0xb2] sm:$0xff]  ;;  %v796_v60 = vld [vmem:[%s14001_s0 + $0xba] sm:$0xff] }
 0x106   :  { %v9349_v24 = vmul.f32 %v5959_v47, %v7658_v4  ;;  %v2141_v50 = vadd.f32 %v2072_v40, %v1792_v11  ;;  %v2142_v44 = vadd.f32 %v2073_v21, %v1793_v46  ;;  %v2771_v58 = vmul.f32 %v9296_v63, %v7666_v13  ;;  %v5799_v47 = vld [vmem:[%s14001_s0 + $0x2d8] sm:$0xff]  ;;  %v5800_v21 = vld [vmem:[%s14001_s0 + $0x2e0] sm:$0xff] }
 0x107   :  { %14172 = vst [vmem:[#allocation168_spill] sm:$0xff] %v9340_v30  ;;  %14173 = vst [vmem:[#allocation169_spill] sm:$0xff] %v9343_v0  ;;  %v2772_v37 = vmul.f32 %v9301_v22, %v7666_v13  ;;  %v3120_v15 = vmul.f32 %v9309_v12, %v7685_v28  ;;  %v309_v40 = vmul.f32 %v7509_v3, %v98_v16  ;;  %v5870_v11 = vld [vmem:[%s14001_s0 + $0x2d9] sm:$0xff] }
 0x108   :  { %14174 = vst [vmem:[#allocation170_spill] sm:$0xff] %v9346_v38  ;;  %14175 = vst [vmem:[#allocation171_spill] sm:$0xff] %v9349_v24  ;;  %v3121_v24 = vmul.f32 %v9314_v42, %v7685_v28  ;;  %v308_v38 = vmul.f32 %v7509_v3, %v97_v23  ;;  %v2491_v46 = vadd.f32 %v2422_v48, %v2141_v50  ;;  %v5871_v23 = vld [vmem:[%s14001_s0 + $0x2e1] sm:$0xff] }
 0x109   :  { %v2492_v0 = vadd.f32 %v2423_v27, %v2142_v44  ;;  %v657_v30 = vmul.f32 %v7527_v10, %v446_v54  ;;  %v658_v7 = vmul.f32 %v7527_v10, %v447_v25  ;;  %v5941_v16 = vld [vmem:[%s14001_s0 + $0x2da] sm:$0xff]  ;;  %v378_v8 = vadd.f32 %v309_v40, %v7507_v2  ;;  %v5942_v25 = vld [vmem:[%s14001_s0 + $0x2e2] sm:$0xff] }
 0x10a   :  { %v377_v26 = vadd.f32 %v308_v38, %v7507_v2  ;;  %v1006_v33 = vmul.f32 %v7552_v20, %v795_v61  ;;  %v1007_v27 = vmul.f32 %v7552_v20, %v796_v60  ;;  %v6012_v54 = vld [vmem:[%s14001_s0 + $0x500] sm:$0xff]  ;;  %v9395_v48 = vmul.f32 %v5960_v39, %v7658_v4 }
 0x10b   :  { %v9398_v50 = vmul.f32 %v6030_v57, %v7678_v17  ;;  %v2840_v38 = vadd.f32 %v2771_v58, %v2491_v46  ;;  %v2841_v44 = vadd.f32 %v2772_v37, %v2492_v0  ;;  %v727_v61 = vadd.f32 %v658_v7, %v378_v8  ;;  %v6083_v39 = vld [vmem:[%s14001_s0 + $0x501] sm:$0xff] }
 0x10c   :  { %14176 = vst [vmem:[#allocation172_spill] sm:$0xff] %v9395_v48  ;;  %v726_v40 = vadd.f32 %v657_v30, %v377_v26  ;;  %v1356_v60 = vmul.f32 %v5799_v47, %v7580_v32  ;;  %v1357_v53 = vmul.f32 %v5800_v21, %v7580_v32  ;;  %v9410_v57 = vmul.f32 %v9283_v5, %v7678_v17  ;;  %v129_v47 = vld [vmem:[%s14001_s0 + $0x1b0] sm:$0xff]  ;;  %v130_v21 = vld [vmem:[%s14001_s0 + $0x1b8] sm:$0xff] }
 0x10d   :  { %14177 = vst [vmem:[#allocation173_spill] sm:$0xff] %v9398_v50  ;;  %v3189_v58 = vadd.f32 %v3120_v15, %v2840_v38  ;;  %v3190_v0 = vadd.f32 %v3121_v24, %v2841_v44  ;;  %v1705_v8 = vmul.f32 %v5870_v11, %v7601_v41  ;;  %v1076_v26 = vadd.f32 %v1007_v27, %v727_v61  ;;  %v479_v11 = vld [vmem:[%s14001_s0 + $0x1b9] sm:$0xff] }
 0x10e   :  { %14178 = vst [vmem:[#allocation174_spill] sm:$0xff] %v9410_v57  ;;  %v1075_v7 = vadd.f32 %v1006_v33, %v726_v40  ;;  %v1706_v30 = vmul.f32 %v5871_v23, %v7601_v41  ;;  %v2054_v37 = vmul.f32 %v5941_v16, %v7624_v52  ;;  %v2055_v24 = vmul.f32 %v5942_v25, %v7624_v52  ;;  %v478_v33 = vld [vmem:[%s14001_s0 + $0x1b1] sm:$0xff]  ;;  %v6084_v40 = vld [vmem:[%s14001_s0 + $0x509] sm:$0xff] }
 0x10f   :  { %v3431_v5 = vmul.f32 0.01, %v3189_v58  ;;  %v3432_v46 = vmul.f32 0.01, %v3190_v0  ;;  %v2404_v15 = vmul.f32 %v6012_v54, %v7646_v62  ;;  %v1426_v16 = vadd.f32 %v1357_v53, %v1076_v26  ;;  %v827_v25 = vld [vmem:[%s14001_s0 + $0x1b2] sm:$0xff] }
 0x110   :  { %v1425_v23 = vadd.f32 %v1356_v60, %v1075_v7  ;;  %v2405_v27 = vmul.f32 %v6013_v14, %v7646_v62  ;;  %v2753_v38 = vmul.f32 %v6083_v39, %v7666_v13  ;;  %v340_v61 = vmul.f32 %v7509_v3, %v129_v47  ;;  %v828_v14 = vld [vmem:[%s14001_s0 + $0x1ba] sm:$0xff]  ;;  %v6154_v47 = vld [vmem:[%s14001_s0 + $0x502] sm:$0xff] }
 0x111   :  { %v3500_v44 = vmax.f32 %v3189_v58, %v3431_v5  ;;  %v3501_v54 = vmax.f32 %v3190_v0, %v3432_v46  ;;  %v341_v57 = vmul.f32 %v7509_v3, %v130_v21  ;;  %v1775_v60 = vadd.f32 %v1706_v30, %v1426_v16  ;;  %v5831_v58 = vld [vmem:[%s14001_s0 + $0x3d8] sm:$0xff]  ;;  %v5832_v0 = vld [vmem:[%s14001_s0 + $0x3e0] sm:$0xff] }
 0x112   :  { %v1774_v53 = vadd.f32 %v1705_v8, %v1425_v23  ;;  %v689_v39 = vmul.f32 %v7527_v10, %v478_v33  ;;  %v690_v7 = vmul.f32 %v7527_v10, %v479_v11  ;;  %v6155_v8 = vld [vmem:[%s14001_s0 + $0x50a] sm:$0xff]  ;;  %v409_v30 = vadd.f32 %v340_v61, %v7507_v2  ;;  %v5902_v16 = vld [vmem:[%s14001_s0 + $0x3d9] sm:$0xff] }
 0x113   :  { %v3549_v26 = vpack.c.bf16 %v3501_v54, %v3500_v44  ;;  %v410_v21 = vadd.f32 %v341_v57, %v7507_v2  ;;  %v1038_v5 = vmul.f32 %v7552_v20, %v827_v25  ;;  %v2124_v33 = vadd.f32 %v2055_v24, %v1775_v60  ;;  %v5903_v44 = vld [vmem:[%s14001_s0 + $0x3e1] sm:$0xff] }
 0x114   :  { %v2123_v46 = vadd.f32 %v2054_v37, %v1774_v53  ;;  %v2754_v11 = vmul.f32 %v6084_v40, %v7666_v13  ;;  %v1039_v23 = vmul.f32 %v7552_v20, %v828_v14  ;;  %v758_v54 = vadd.f32 %v689_v39, %v409_v30  ;;  %v5973_v53 = vld [vmem:[%s14001_s0 + $0x3da] sm:$0xff]  ;;  %v5974_v60 = vld [vmem:[%s14001_s0 + $0x3e2] sm:$0xff] }
 0x115   :  { %6483 = vmatpush3.bf16.msra.mxu1 %v3549_v26  ;;  %v759_v61 = vadd.f32 %v690_v7, %v410_v21  ;;  %v1388_v57 = vmul.f32 %v5831_v58, %v7580_v32  ;;  %v1389_v37 = vmul.f32 %v5832_v0, %v7580_v32  ;;  %v2474_v25 = vadd.f32 %v2405_v27, %v2124_v33  ;;  %v6045_v27 = vld [vmem:[%s14001_s0 + $0x608] sm:$0xff] }
 0x116   :  { %v2473_v24 = vadd.f32 %v2404_v15, %v2123_v46  ;;  %v3102_v40 = vmul.f32 %v6154_v47, %v7685_v28  ;;  %v3103_v14 = vmul.f32 %v6155_v8, %v7685_v28  ;;  %v1107_v39 = vadd.f32 %v1038_v5, %v758_v54  ;;  %v6044_v15 = vld [vmem:[%s14001_s0 + $0x600] sm:$0xff]  ;;  %v81_v5 = vld [vmem:[%s14001_s0 + $0x30] sm:$0xff] }
 0x117   :  { %v1108_v7 = vadd.f32 %v1039_v23, %v759_v61  ;;  %v1737_v58 = vmul.f32 %v5902_v16, %v7601_v41  ;;  %v1738_v0 = vmul.f32 %v5903_v44, %v7601_v41  ;;  %v9487_v26 = vmul.f32 %v9296_v63, %v7697_v34  ;;  %v6115_v21 = vld [vmem:[%s14001_s0 + $0x601] sm:$0xff] }
 0x118   :  { %v9491_v47 = vmul.f32 %v9301_v22, %v7697_v34  ;;  %v2822_v8 = vadd.f32 %v2753_v38, %v2473_v24  ;;  %v2823_v30 = vadd.f32 %v2754_v11, %v2474_v25  ;;  %v1457_v46 = vadd.f32 %v1388_v57, %v1107_v39  ;;  %v6116_v22 = vld [vmem:[%s14001_s0 + $0x609] sm:$0xff]  ;;  %v82_v38 = vld [vmem:[%s14001_s0 + $0x38] sm:$0xff] }
 0x119   :  { %14179 = vst [vmem:[#allocation175_spill] sm:$0xff] %v9487_v26  ;;  %v1458_v33 = vadd.f32 %v1389_v37, %v1108_v7  ;;  %v2086_v23 = vmul.f32 %v5973_v53, %v7624_v52  ;;  %v2087_v63 = vmul.f32 %v5974_v60, %v7624_v52  ;;  %v2436_v44 = vmul.f32 %v6044_v15, %v7646_v62  ;;  %v6186_v61 = vld [vmem:[%s14001_s0 + $0x602] sm:$0xff]  ;;  %v430_v53 = vld [vmem:[%s14001_s0 + $0x31] sm:$0xff] }
 0x11a   :  { %14180 = vst [vmem:[#allocation176_spill] sm:$0xff] %v9491_v47  ;;  %v3171_v11 = vadd.f32 %v3102_v40, %v2822_v8  ;;  %v3172_v16 = vadd.f32 %v3103_v14, %v2823_v30  ;;  %v2437_v54 = vmul.f32 %v6045_v27, %v7646_v62  ;;  %v1806_v57 = vadd.f32 %v1737_v58, %v1457_v46  ;;  %v6187_v39 = vld [vmem:[%s14001_s0 + $0x60a] sm:$0xff]  ;;  %v431_v58 = vld [vmem:[%s14001_s0 + $0x39] sm:$0xff] }
 0x11b   :  { %v1807_v37 = vadd.f32 %v1738_v0, %v1458_v33  ;;  %v2785_v24 = vmul.f32 %v6115_v21, %v7666_v13  ;;  %v292_v25 = vmul.f32 %v7509_v3, %v81_v5  ;;  %v2786_v60 = vmul.f32 %v6116_v22, %v7666_v13  ;;  %v779_v30 = vld [vmem:[%s14001_s0 + $0x32] sm:$0xff]  ;;  %v780_v47 = vld [vmem:[%s14001_s0 + $0x3a] sm:$0xff] }
 0x11c   :  { %v3413_v40 = vmul.f32 0.01, %v3171_v11  ;;  %v3414_v14 = vmul.f32 0.01, %v3172_v16  ;;  %v293_v7 = vmul.f32 %v7509_v3, %v82_v38  ;;  %v2155_v0 = vadd.f32 %v2086_v23, %v1806_v57 }
 0x11d   :  { %v2156_v15 = vadd.f32 %v2087_v63, %v1807_v37  ;;  %v3134_v27 = vmul.f32 %v6186_v61, %v7685_v28  ;;  %v361_v8 = vadd.f32 %v292_v25, %v7507_v2  ;;  %v641_v22 = vmul.f32 %v7527_v10, %v430_v53  ;;  %v5783_v37 = vld [vmem:[%s14001_s0 + $0x258] sm:$0xff] }
 0x11e   :  { %v3482_v21 = vmax.f32 %v3171_v11, %v3413_v40  ;;  %v3483_v46 = vmax.f32 %v3172_v16, %v3414_v14  ;;  %v362_v33 = vadd.f32 %v293_v7, %v7507_v2  ;;  %v2505_v23 = vadd.f32 %v2436_v44, %v2155_v0  ;;  %v5784_v44 = vld [vmem:[%s14001_s0 + $0x260] sm:$0xff] }
 0x11f   :  { %v2506_v63 = vadd.f32 %v2437_v54, %v2156_v15  ;;  %v3135_v61 = vmul.f32 %v6187_v39, %v7685_v28  ;;  %v642_v57 = vmul.f32 %v7527_v10, %v431_v58  ;;  %v9542_v11 = vmul.f32 %v9309_v12, %v7715_v51  ;;  %v5854_v0 = vld [vmem:[%s14001_s0 + $0x259] sm:$0xff] }
 0x120   :  { %v3540_v16 = vpack.c.bf16 %v3483_v46, %v3482_v21  ;;  %v710_v25 = vadd.f32 %v641_v22, %v361_v8  ;;  %v990_v40 = vmul.f32 %v7552_v20, %v779_v30  ;;  %v2854_v54 = vadd.f32 %v2785_v24, %v2505_v23  ;;  %v5855_v24 = vld [vmem:[%s14001_s0 + $0x261] sm:$0xff] }
 0x121   :  { %14181 = vst [vmem:[#allocation177_spill] sm:$0xff] %v9542_v11  ;;  %v2855_v14 = vadd.f32 %v2786_v60, %v2506_v63  ;;  %v711_v39 = vadd.f32 %v642_v57, %v362_v33  ;;  %v991_v7 = vmul.f32 %v7552_v20, %v780_v47  ;;  %v9554_v12 = vmul.f32 %v9314_v42, %v7715_v51  ;;  %v5925_v42 = vld [vmem:[%s14001_s0 + $0x25a] sm:$0xff] }
 0x122   :  { %6384 = vmatprep.subr.bf16.mxu0 %v3540_v16  ;;  %v9557_v15 = vmul.f32 %v7519_v6, %v81_v5  ;;  %v1059_v8 = vadd.f32 %v990_v40, %v710_v25  ;;  %v1340_v21 = vmul.f32 %v5783_v37, %v7580_v32  ;;  %v3203_v60 = vadd.f32 %v3134_v27, %v2854_v54  ;;  %v5926_v27 = vld [vmem:[%s14001_s0 + $0x262] sm:$0xff] }
 0x123   :  { %14182 = vst [vmem:[#allocation178_spill] sm:$0xff] %v9554_v12  ;;  %v3204_v46 = vadd.f32 %v3135_v61, %v2855_v14  ;;  %v1060_v33 = vadd.f32 %v991_v7, %v711_v39  ;;  %v1341_v22 = vmul.f32 %v5784_v44, %v7580_v32  ;;  %v9568_v23 = vmul.f32 %v7519_v6, %v82_v38  ;;  %v5996_v38 = vld [vmem:[%s14001_s0 + $0x480] sm:$0xff]  ;;  %v5997_v7 = vld [vmem:[%s14001_s0 + $0x488] sm:$0xff] }
 0x124   :  { %v9571_v5 = vmul.f32 %v7525_v9, %v430_v53  ;;  %v1409_v63 = vadd.f32 %v1340_v21, %v1059_v8  ;;  %v1689_v57 = vmul.f32 %v5854_v0, %v7601_v41  ;;  %v3445_v61 = vmul.f32 0.01, %v3203_v60 }
 0x125   :  { %v3446_v16 = vmul.f32 0.01, %v3204_v46  ;;  %v1410_v25 = vadd.f32 %v1341_v22, %v1060_v33  ;;  %v1690_v40 = vmul.f32 %v5855_v24, %v7601_v41  ;;  %v9582_v54 = vmul.f32 %v7525_v9, %v431_v58  ;;  %v6067_v58 = vld [vmem:[%s14001_s0 + $0x481] sm:$0xff] }
 0x126   :  { %14183 = vst [vmem:[#allocation179_spill] sm:$0xff] %v9571_v5  ;;  %v9585_v53 = vmul.f32 %v7594_v36, %v779_v30  ;;  %v1758_v14 = vadd.f32 %v1689_v57, %v1409_v63  ;;  %v2038_v39 = vmul.f32 %v5925_v42, %v7624_v52  ;;  %v3514_v8 = vmax.f32 %v3203_v60, %v3445_v61  ;;  %v6068_v30 = vld [vmem:[%s14001_s0 + $0x489] sm:$0xff] }
 0x127   :  { %14184 = vst [vmem:[#allocation180_spill] sm:$0xff] %v9582_v54  ;;  %v3515_v21 = vmax.f32 %v3204_v46, %v3446_v16  ;;  %v1759_v33 = vadd.f32 %v1690_v40, %v1410_v25  ;;  %v2039_v22 = vmul.f32 %v5926_v27, %v7624_v52  ;;  %v9599_v63 = vmul.f32 %v7594_v36, %v780_v47  ;;  %v6138_v46 = vld [vmem:[%s14001_s0 + $0x482] sm:$0xff]  ;;  %v6139_v47 = vld [vmem:[%s14001_s0 + $0x48a] sm:$0xff] }
 0x128   :  { %14185 = vst [vmem:[#allocation181_spill] sm:$0xff] %v9585_v53  ;;  %v9602_v57 = vmul.f32 %v5783_v37, %v7613_v45  ;;  %v2107_v12 = vadd.f32 %v2038_v39, %v1758_v14  ;;  %v2388_v60 = vmul.f32 %v5996_v38, %v7646_v62  ;;  %v9609_v16 = vmul.f32 %v5784_v44, %v7613_v45  ;;  %v113_v44 = vld [vmem:[%s14001_s0 + $0x130] sm:$0xff] }
 0x129   :  { %14186 = vst [vmem:[#allocation182_spill] sm:$0xff] %v9599_v63  ;;  %v3556_v61 = vpack.c.bf16 %v3515_v21, %v3514_v8  ;;  %v2108_v25 = vadd.f32 %v2039_v22, %v1759_v33  ;;  %v2389_v40 = vmul.f32 %v5997_v7, %v7646_v62  ;;  %v9616_v37 = vmul.f32 %v5854_v0, %v7636_v56  ;;  %v114_v8 = vld [vmem:[%s14001_s0 + $0x138] sm:$0xff] }
 0x12a   :  { %14187 = vst [vmem:[#allocation183_spill] sm:$0xff] %v9602_v57  ;;  %14188 = vst [vmem:[#allocation184_spill] sm:$0xff] %v9609_v16  ;;  %v2457_v14 = vadd.f32 %v2388_v60, %v2107_v12  ;;  %v2737_v39 = vmul.f32 %v6067_v58, %v7666_v13  ;;  %v2738_v11 = vmul.f32 %v6068_v30, %v7666_v13  ;;  %v462_v22 = vld [vmem:[%s14001_s0 + $0x131] sm:$0xff]  ;;  %v463_v60 = vld [vmem:[%s14001_s0 + $0x139] sm:$0xff] }
 0x12b   :  { %14189 = vst [vmem:[#allocation185_spill] sm:$0xff] %v9616_v37  ;;  %6484 = vmatprep.subr.bf16.mxu1 %v3556_v61  ;;  %v9627_v21 = vmul.f32 %v5855_v24, %v7636_v56  ;;  %v9630_v0 = vmul.f32 %v5925_v42, %v7658_v4  ;;  %v2458_v12 = vadd.f32 %v2389_v40, %v2108_v25  ;;  %v5797_v16 = vld [vmem:[%s14001_s0 + $0x2c8] sm:$0xff]  ;;  %v5798_v57 = vld [vmem:[%s14001_s0 + $0x2d0] sm:$0xff] }
 0x12c   :  { %v3086_v33 = vmul.f32 %v6138_v46, %v7685_v28  ;;  %v9640_v26 = vmul.f32 %v5926_v27, %v7658_v4  ;;  %v9643_v24 = vmul.f32 %v5996_v38, %v7678_v17  ;;  %v2806_v61 = vadd.f32 %v2737_v39, %v2457_v14  ;;  %v812_v27 = vld [vmem:[%s14001_s0 + $0x13a] sm:$0xff] }
 0x12d   :  { %14190 = vst [vmem:[#allocation186_spill] sm:$0xff] %v9627_v21  ;;  %14191 = vst [vmem:[#allocation187_spill] sm:$0xff] %v9630_v0  ;;  %v3087_v42 = vmul.f32 %v6139_v47, %v7685_v28  ;;  %v9647_v25 = vmul.f32 %v5997_v7, %v7678_v17  ;;  %v2807_v40 = vadd.f32 %v2738_v11, %v2458_v12  ;;  %v811_v0 = vld [vmem:[%s14001_s0 + $0x132] sm:$0xff] }
 0x12e   :  { %14192 = vst [vmem:[#allocation188_spill] sm:$0xff] %v9640_v26  ;;  %14193 = vst [vmem:[#allocation189_spill] sm:$0xff] %v9643_v24  ;;  %v324_v50 = vmul.f32 %v7509_v3, %v113_v44  ;;  %v325_v48 = vmul.f32 %v7509_v3, %v114_v8  ;;  %v9658_v38 = vmul.f32 %v6067_v58, %v7697_v34  ;;  %v5815_v26 = vld [vmem:[%s14001_s0 + $0x358] sm:$0xff]  ;;  %v5816_v58 = vld [vmem:[%s14001_s0 + $0x360] sm:$0xff] }
 0x12f   :  { %14194 = vst [vmem:[#allocation190_spill] sm:$0xff] %v9647_v25  ;;  %v3155_v14 = vadd.f32 %v3086_v33, %v2806_v61  ;;  %v673_v7 = vmul.f32 %v7527_v10, %v462_v22  ;;  %v674_v11 = vmul.f32 %v7527_v10, %v463_v60  ;;  %v9663_v39 = vmul.f32 %v6068_v30, %v7697_v34 }
 0x130   :  { %14195 = vst [vmem:[#allocation191_spill] sm:$0xff] %v9658_v38  ;;  %v3156_v12 = vadd.f32 %v3087_v42, %v2807_v40  ;;  %v393_v25 = vadd.f32 %v324_v50, %v7507_v2  ;;  %v394_v24 = vadd.f32 %v325_v48, %v7507_v2  ;;  %v9674_v33 = vmul.f32 %v6138_v46, %v7715_v51  ;;  %v5886_v38 = vld [vmem:[%s14001_s0 + $0x359] sm:$0xff]  ;;  %v5887_v46 = vld [vmem:[%s14001_s0 + $0x361] sm:$0xff] }
 0x131   :  { %14196 = vst [vmem:[#allocation192_spill] sm:$0xff] %v9663_v39  ;;  %v3397_v61 = vmul.f32 0.01, %v3155_v14  ;;  %v1022_v30 = vmul.f32 %v7552_v20, %v811_v0  ;;  %v1023_v42 = vmul.f32 %v7552_v20, %v812_v27  ;;  %v9679_v50 = vmul.f32 %v6139_v47, %v7715_v51 }
 0x132   :  { %14197 = vst [vmem:[#allocation193_spill] sm:$0xff] %v9674_v33  ;;  %v3398_v48 = vmul.f32 0.01, %v3156_v12  ;;  %v742_v40 = vadd.f32 %v673_v7, %v393_v25  ;;  %v743_v39 = vadd.f32 %v674_v11, %v394_v24  ;;  %v9688_v21 = vmul.f32 %v7519_v6, %v113_v44  ;;  %v5957_v11 = vld [vmem:[%s14001_s0 + $0x35a] sm:$0xff] }
 0x133   :  { %14198 = vst [vmem:[#allocation194_spill] sm:$0xff] %v9679_v50  ;;  %v3466_v33 = vmax.f32 %v3155_v14, %v3397_v61  ;;  %v1372_v37 = vmul.f32 %v5815_v26, %v7580_v32  ;;  %v1373_v47 = vmul.f32 %v5816_v58, %v7580_v32  ;;  %v9693_v25 = vmul.f32 %v7519_v6, %v114_v8  ;;  %v5958_v14 = vld [vmem:[%s14001_s0 + $0x362] sm:$0xff] }
 0x134   :  { %14199 = vst [vmem:[#allocation195_spill] sm:$0xff] %v9688_v21  ;;  %v3467_v50 = vmax.f32 %v3156_v12, %v3398_v48  ;;  %v1091_v24 = vadd.f32 %v1022_v30, %v742_v40  ;;  %v1092_v7 = vadd.f32 %v1023_v42, %v743_v39  ;;  %v9702_v44 = vmul.f32 %v7525_v9, %v462_v22  ;;  %v6028_v39 = vld [vmem:[%s14001_s0 + $0x580] sm:$0xff]  ;;  %v6029_v30 = vld [vmem:[%s14001_s0 + $0x588] sm:$0xff] }
 0x135   :  { %14200 = vst [vmem:[#allocation196_spill] sm:$0xff] %v9693_v25  ;;  %v9705_v61 = vmul.f32 %v7525_v9, %v463_v60  ;;  %v1721_v12 = vmul.f32 %v5886_v38, %v7601_v41  ;;  %v1722_v8 = vmul.f32 %v5887_v46, %v7601_v41  ;;  %v9716_v48 = vmul.f32 %v7594_v36, %v811_v0  ;;  %v9729_v21 = vld [vmem:[%s14001_s0 + $0x581] sm:$0xff] }
 0x136   :  { %14201 = vst [vmem:[#allocation197_spill] sm:$0xff] %v9702_v44  ;;  %v3532_v42 = vpack.c.bf16 %v3467_v50, %v3466_v33  ;;  %v1441_v22 = vadd.f32 %v1372_v37, %v1091_v24  ;;  %v1442_v40 = vadd.f32 %v1373_v47, %v1092_v7  ;;  %v9719_v60 = vmul.f32 %v7594_v36, %v812_v27  ;;  %v9734_v37 = vld [vmem:[%s14001_s0 + $0x589] sm:$0xff]  ;;  %v95_v0 = vld [vmem:[%s14001_s0 + $0xa0] sm:$0xff] }
 0x137   :  { %14202 = vst [vmem:[#allocation198_spill] sm:$0xff] %v9705_v61  ;;  %14203 = vst [vmem:[#allocation199_spill] sm:$0xff] %v9716_v48  ;;  %v9722_v61 = vmul.f32 %v5815_v26, %v7613_v45  ;;  %v2070_v44 = vmul.f32 %v5957_v11, %v7624_v52  ;;  %v2071_v25 = vmul.f32 %v5958_v14, %v7624_v52  ;;  %v9744_v47 = vld [vmem:[%s14001_s0 + $0x582] sm:$0xff]  ;;  %v9749_v24 = vld [vmem:[%s14001_s0 + $0x58a] sm:$0xff] }
 0x138   :  { %14204 = vst [vmem:[#allocation200_spill] sm:$0xff] %v9719_v60  ;;  %6385 = vmatpush3.bf16.msra.mxu0 %v3532_v42  ;;  %v1790_v26 = vadd.f32 %v1721_v12, %v1441_v22  ;;  %v1791_v27 = vadd.f32 %v1722_v8, %v1442_v40  ;;  %v2420_v33 = vmul.f32 %v6028_v39, %v7646_v62  ;;  %v96_v7 = vld [vmem:[%s14001_s0 + $0xa8] sm:$0xff] }
 0x139   :  { %14205 = vst [vmem:[#allocation201_spill] sm:$0xff] %v9722_v61  ;;  %v2421_v50 = vmul.f32 %v6029_v30, %v7646_v62  ;;  %v9755_v12 = vmul.f32 %v5816_v58, %v7613_v45  ;;  %v9758_v8 = vmul.f32 %v5886_v38, %v7636_v56  ;;  %v9761_v42 = vmul.f32 %v5887_v46, %v7636_v56  ;;  %v444_v40 = vld [vmem:[%s14001_s0 + $0xa1] sm:$0xff]  ;;  %v445_v61 = vld [vmem:[%s14001_s0 + $0xa9] sm:$0xff] }
 0x13a   :  { %v9764_v22 = vmul.f32 %v5957_v11, %v7658_v4  ;;  %v2139_v60 = vadd.f32 %v2070_v44, %v1790_v26  ;;  %v2140_v58 = vadd.f32 %v2071_v25, %v1791_v27  ;;  %v2769_v38 = vmul.f32 %v9729_v21, %v7666_v13  ;;  %v793_v11 = vld [vmem:[%s14001_s0 + $0xa2] sm:$0xff] }
 0x13b   :  { %14206 = vst [vmem:[#allocation202_spill] sm:$0xff] %v9755_v12  ;;  %14207 = vst [vmem:[#allocation203_spill] sm:$0xff] %v9758_v8  ;;  %v2770_v46 = vmul.f32 %v9734_v37, %v7666_v13  ;;  %v3119_v25 = vmul.f32 %v9749_v24, %v7685_v28  ;;  %v306_v44 = vmul.f32 %v7509_v3, %v95_v0 }
 0x13c   :  { %14208 = vst [vmem:[#allocation204_spill] sm:$0xff] %v9761_v42  ;;  %14209 = vst [vmem:[#allocation205_spill] sm:$0xff] %v9764_v22  ;;  %v794_v22 = vld [vmem:[%s14001_s0 + $0xaa] sm:$0xff]  ;;  %v3118_v42 = vmul.f32 %v9744_v47, %v7685_v28  ;;  %v307_v26 = vmul.f32 %v7509_v3, %v96_v7  ;;  %v2489_v27 = vadd.f32 %v2420_v33, %v2139_v60 }
 0x13d   :  { %v2490_v8 = vadd.f32 %v2421_v50, %v2140_v58  ;;  %v655_v12 = vmul.f32 %v7527_v10, %v444_v40  ;;  %v656_v48 = vmul.f32 %v7527_v10, %v445_v61  ;;  %v375_v63 = vadd.f32 %v306_v44, %v7507_v2  ;;  %v5868_v61 = vld [vmem:[%s14001_s0 + $0x2c9] sm:$0xff]  ;;  %v5869_v44 = vld [vmem:[%s14001_s0 + $0x2d1] sm:$0xff] }
 0x13e   :  { %v376_v0 = vadd.f32 %v307_v26, %v7507_v2  ;;  %v1004_v7 = vmul.f32 %v7552_v20, %v793_v11  ;;  %v1005_v60 = vmul.f32 %v7552_v20, %v794_v22  ;;  %v9804_v33 = vmul.f32 %v5958_v14, %v7658_v4  ;;  %v5939_v22 = vld [vmem:[%s14001_s0 + $0x2ca] sm:$0xff] }
 0x13f   :  { %v9807_v50 = vmul.f32 %v6028_v39, %v7678_v17  ;;  %v2838_v40 = vadd.f32 %v2769_v38, %v2489_v27  ;;  %v2839_v58 = vadd.f32 %v2770_v46, %v2490_v8  ;;  %v724_v11 = vadd.f32 %v655_v12, %v375_v63  ;;  %v5940_v39 = vld [vmem:[%s14001_s0 + $0x2d2] sm:$0xff] }
 0x140   :  { %14210 = vst [vmem:[#allocation206_spill] sm:$0xff] %v9804_v33  ;;  %v725_v26 = vadd.f32 %v656_v48, %v376_v0  ;;  %v1354_v53 = vmul.f32 %v5797_v16, %v7580_v32  ;;  %v1355_v14 = vmul.f32 %v5798_v57, %v7580_v32  ;;  %v6010_v8 = vld [vmem:[%s14001_s0 + $0x4f0] sm:$0xff]  ;;  %v9824_v38 = vmul.f32 %v6029_v30, %v7678_v17  ;;  %v6011_v16 = vld [vmem:[%s14001_s0 + $0x4f8] sm:$0xff]  ;;  %v127_v30 = vld [vmem:[%s14001_s0 + $0x1a0] sm:$0xff] }
 0x141   :  { %14211 = vst [vmem:[#allocation207_spill] sm:$0xff] %v9807_v50  ;;  %v3187_v46 = vadd.f32 %v3118_v42, %v2838_v40  ;;  %v3188_v27 = vadd.f32 %v3119_v25, %v2839_v58  ;;  %v1703_v63 = vmul.f32 %v5868_v61, %v7601_v41  ;;  %v6081_v57 = vld [vmem:[%s14001_s0 + $0x4f1] sm:$0xff]  ;;  %v1073_v48 = vadd.f32 %v1004_v7, %v724_v11  ;;  %v128_v42 = vld [vmem:[%s14001_s0 + $0x1a8] sm:$0xff]  ;;  %v6082_v33 = vld [vmem:[%s14001_s0 + $0x4f9] sm:$0xff] }
 0x142   :  { %14212 = vst [vmem:[#allocation208_spill] sm:$0xff] %v9824_v38  ;;  %v1074_v12 = vadd.f32 %v1005_v60, %v725_v26  ;;  %v1704_v0 = vmul.f32 %v5869_v44, %v7601_v41  ;;  %v2052_v50 = vmul.f32 %v5939_v22, %v7624_v52  ;;  %v2053_v40 = vmul.f32 %v5940_v39, %v7624_v52  ;;  %v476_v7 = vld [vmem:[%s14001_s0 + $0x1a1] sm:$0xff]  ;;  %v477_v60 = vld [vmem:[%s14001_s0 + $0x1a9] sm:$0xff] }
 0x143   :  { %v3429_v25 = vmul.f32 0.01, %v3187_v46  ;;  %v3430_v61 = vmul.f32 0.01, %v3188_v27  ;;  %v2402_v58 = vmul.f32 %v6010_v8, %v7646_v62  ;;  %v1423_v44 = vadd.f32 %v1354_v53, %v1073_v48  ;;  %v825_v39 = vld [vmem:[%s14001_s0 + $0x1a2] sm:$0xff]  ;;  %v826_v53 = vld [vmem:[%s14001_s0 + $0x1aa] sm:$0xff] }
 0x144   :  { %v1424_v22 = vadd.f32 %v1355_v14, %v1074_v12  ;;  %v2403_v11 = vmul.f32 %v6011_v16, %v7646_v62  ;;  %v2751_v26 = vmul.f32 %v6081_v57, %v7666_v13  ;;  %v338_v54 = vmul.f32 %v7509_v3, %v127_v30  ;;  %v6152_v30 = vld [vmem:[%s14001_s0 + $0x4f2] sm:$0xff] }
 0x145   :  { %v3498_v38 = vmax.f32 %v3187_v46, %v3429_v25  ;;  %v3499_v8 = vmax.f32 %v3188_v27, %v3430_v61  ;;  %v339_v5 = vmul.f32 %v7509_v3, %v128_v42  ;;  %v1772_v14 = vadd.f32 %v1703_v63, %v1423_v44  ;;  %v5829_v46 = vld [vmem:[%s14001_s0 + $0x3c8] sm:$0xff]  ;;  %v5830_v27 = vld [vmem:[%s14001_s0 + $0x3d0] sm:$0xff]  ;;  %v6153_v63 = vld [vmem:[%s14001_s0 + $0x4fa] sm:$0xff] }
 0x146   :  { %v1773_v16 = vadd.f32 %v1704_v0, %v1424_v22  ;;  %v687_v57 = vmul.f32 %v7527_v10, %v476_v7  ;;  %v688_v48 = vmul.f32 %v7527_v10, %v477_v60  ;;  %v407_v0 = vadd.f32 %v338_v54, %v7507_v2  ;;  %v5900_v44 = vld [vmem:[%s14001_s0 + $0x3c9] sm:$0xff]  ;;  %v5901_v22 = vld [vmem:[%s14001_s0 + $0x3d1] sm:$0xff] }
 0x147   :  { %v3548_v12 = vpack.c.bf16 %v3499_v8, %v3498_v38  ;;  %v408_v42 = vadd.f32 %v339_v5, %v7507_v2  ;;  %v1036_v25 = vmul.f32 %v7552_v20, %v825_v39  ;;  %v2121_v61 = vadd.f32 %v2052_v50, %v1772_v14  ;;  %v5971_v14 = vld [vmem:[%s14001_s0 + $0x3ca] sm:$0xff] }
 0x148   :  { %v2122_v7 = vadd.f32 %v2053_v40, %v1773_v16  ;;  %v2752_v60 = vmul.f32 %v6082_v33, %v7666_v13  ;;  %v1037_v38 = vmul.f32 %v7552_v20, %v826_v53  ;;  %v756_v54 = vadd.f32 %v687_v57, %v407_v0  ;;  %v5972_v16 = vld [vmem:[%s14001_s0 + $0x3d2] sm:$0xff] }
 0x149   :  { %6485 = vmatpush3.bf16.msra.mxu1 %v3548_v12  ;;  %v757_v8 = vadd.f32 %v688_v48, %v408_v42  ;;  %v1386_v5 = vmul.f32 %v5829_v46, %v7580_v32  ;;  %v1387_v50 = vmul.f32 %v5830_v27, %v7580_v32  ;;  %v2471_v40 = vadd.f32 %v2402_v58, %v2121_v61  ;;  %v6042_v58 = vld [vmem:[%s14001_s0 + $0x5f0] sm:$0xff] }
 0x14a   :  { %v2472_v39 = vadd.f32 %v2403_v11, %v2122_v7  ;;  %v3100_v33 = vmul.f32 %v6152_v30, %v7685_v28  ;;  %v3101_v53 = vmul.f32 %v6153_v63, %v7685_v28  ;;  %v1105_v57 = vadd.f32 %v1036_v25, %v756_v54  ;;  %v6043_v11 = vld [vmem:[%s14001_s0 + $0x5f8] sm:$0xff]  ;;  %v79_v25 = vld [vmem:[%s14001_s0 + $0x20] sm:$0xff] }
 0x14b   :  { %v1106_v48 = vadd.f32 %v1037_v38, %v757_v8  ;;  %v1735_v46 = vmul.f32 %v5900_v44, %v7601_v41  ;;  %v1736_v27 = vmul.f32 %v5901_v22, %v7601_v41  ;;  %v9907_v12 = vmul.f32 %v9729_v21, %v7697_v34  ;;  %v6113_v42 = vld [vmem:[%s14001_s0 + $0x5f1] sm:$0xff] }
 0x14c   :  { %v9911_v30 = vmul.f32 %v9734_v37, %v7697_v34  ;;  %v2820_v63 = vadd.f32 %v2751_v26, %v2471_v40  ;;  %v2821_v0 = vadd.f32 %v2752_v60, %v2472_v39  ;;  %v1455_v61 = vadd.f32 %v1386_v5, %v1105_v57  ;;  %v6114_v37 = vld [vmem:[%s14001_s0 + $0x5f9] sm:$0xff]  ;;  %v80_v26 = vld [vmem:[%s14001_s0 + $0x28] sm:$0xff] }
 0x14d   :  { %14213 = vst [vmem:[#allocation209_spill] sm:$0xff] %v9907_v12  ;;  %v1456_v7 = vadd.f32 %v1387_v50, %v1106_v48  ;;  %v2084_v38 = vmul.f32 %v5971_v14, %v7624_v52  ;;  %v2085_v21 = vmul.f32 %v5972_v16, %v7624_v52  ;;  %v2434_v22 = vmul.f32 %v6042_v58, %v7646_v62  ;;  %v6184_v8 = vld [vmem:[%s14001_s0 + $0x5f2] sm:$0xff]  ;;  %v428_v14 = vld [vmem:[%s14001_s0 + $0x21] sm:$0xff] }
 0x14e   :  { %14214 = vst [vmem:[#allocation210_spill] sm:$0xff] %v9911_v30  ;;  %v3169_v60 = vadd.f32 %v3100_v33, %v2820_v63  ;;  %v3170_v44 = vadd.f32 %v3101_v53, %v2821_v0  ;;  %v2435_v54 = vmul.f32 %v6043_v11, %v7646_v62  ;;  %v1804_v5 = vadd.f32 %v1735_v46, %v1455_v61  ;;  %v6185_v57 = vld [vmem:[%s14001_s0 + $0x5fa] sm:$0xff]  ;;  %v429_v46 = vld [vmem:[%s14001_s0 + $0x29] sm:$0xff] }
 0x14f   :  { %v1805_v50 = vadd.f32 %v1736_v27, %v1456_v7  ;;  %v2783_v40 = vmul.f32 %v6113_v42, %v7666_v13  ;;  %v290_v39 = vmul.f32 %v7509_v3, %v79_v25  ;;  %v2784_v16 = vmul.f32 %v6114_v37, %v7666_v13  ;;  %v777_v0 = vld [vmem:[%s14001_s0 + $0x22] sm:$0xff]  ;;  %v778_v30 = vld [vmem:[%s14001_s0 + $0x2a] sm:$0xff] }
 0x150   :  { %v3411_v33 = vmul.f32 0.01, %v3169_v60  ;;  %v3412_v53 = vmul.f32 0.01, %v3170_v44  ;;  %v291_v48 = vmul.f32 %v7509_v3, %v80_v26  ;;  %v2153_v27 = vadd.f32 %v2084_v38, %v1804_v5  ;;  %v6891_v12 = vld [vmem:[%s14004_s3 + $0xc] ss:$20 sps:$4 sm:$0xff]  }
 0x151   :  { %v2154_v58 = vadd.f32 %v2085_v21, %v1805_v50  ;;  %v3132_v11 = vmul.f32 %v6184_v8, %v7685_v28  ;;  %v359_v63 = vadd.f32 %v290_v39, %v7507_v2  ;;  %v639_v37 = vmul.f32 %v7527_v10, %v428_v14  ;;  %v5781_v50 = vld [vmem:[%s14001_s0 + $0x248] sm:$0xff]  ;;  %4306 = vmatprep.mubr.bf16.mxu1 %v6891_v12 }
 0x152   :  { %v3480_v42 = vmax.f32 %v3169_v60, %v3411_v33  ;;  %v3481_v61 = vmax.f32 %v3170_v44, %v3412_v53  ;;  %v360_v7 = vadd.f32 %v291_v48, %v7507_v2  ;;  %v2503_v38 = vadd.f32 %v2434_v22, %v2153_v27  ;;  %v5782_v22 = vld [vmem:[%s14001_s0 + $0x250] sm:$0xff] }
 0x153   :  { %v2504_v21 = vadd.f32 %v2435_v54, %v2154_v58  ;;  %v3133_v8 = vmul.f32 %v6185_v57, %v7685_v28  ;;  %v640_v5 = vmul.f32 %v7527_v10, %v429_v46  ;;  %v9962_v60 = vmul.f32 %v9744_v47, %v7715_v51  ;;  %v5852_v27 = vld [vmem:[%s14001_s0 + $0x249] sm:$0xff] }
 0x154   :  { %v3539_v44 = vpack.c.bf16 %v3481_v61, %v3480_v42  ;;  %v708_v39 = vadd.f32 %v639_v37, %v359_v63  ;;  %v988_v33 = vmul.f32 %v7552_v20, %v777_v0  ;;  %v2852_v54 = vadd.f32 %v2783_v40, %v2503_v38  ;;  %v5853_v40 = vld [vmem:[%s14001_s0 + $0x251] sm:$0xff] }
 0x155   :  { %14215 = vst [vmem:[#allocation211_spill] sm:$0xff] %v9962_v60  ;;  %v2853_v53 = vadd.f32 %v2784_v16, %v2504_v21  ;;  %v709_v57 = vadd.f32 %v640_v5, %v360_v7  ;;  %v989_v48 = vmul.f32 %v7552_v20, %v778_v30  ;;  %v9974_v47 = vmul.f32 %v9749_v24, %v7715_v51  ;;  %v5923_v24 = vld [vmem:[%s14001_s0 + $0x24a] sm:$0xff] }
 0x156   :  { %6386 = vmatprep.subr.bf16.mxu0 %v3539_v44  ;;  %v9977_v58 = vmul.f32 %v7519_v6, %v79_v25  ;;  %v1057_v63 = vadd.f32 %v988_v33, %v708_v39  ;;  %v1338_v42 = vmul.f32 %v5781_v50, %v7580_v32  ;;  %v3201_v16 = vadd.f32 %v3132_v11, %v2852_v54  ;;  %v5924_v11 = vld [vmem:[%s14001_s0 + $0x252] sm:$0xff] }
 0x157   :  { %14216 = vst [vmem:[#allocation212_spill] sm:$0xff] %v9974_v47  ;;  %v3202_v61 = vadd.f32 %v3133_v8, %v2853_v53  ;;  %v1058_v7 = vadd.f32 %v989_v48, %v709_v57  ;;  %v1339_v37 = vmul.f32 %v5782_v22, %v7580_v32  ;;  %v9988_v38 = vmul.f32 %v7519_v6, %v80_v26  ;;  %v5994_v26 = vld [vmem:[%s14001_s0 + $0x470] sm:$0xff]  ;;  %v5995_v48 = vld [vmem:[%s14001_s0 + $0x478] sm:$0xff] }
 0x158   :  { %14217 = vst [vmem:[#allocation213_spill] sm:$0xff] %v9977_v58  ;;  %v9991_v25 = vmul.f32 %v7525_v9, %v428_v14  ;;  %v1407_v21 = vadd.f32 %v1338_v42, %v1057_v63  ;;  %v1687_v5 = vmul.f32 %v5852_v27, %v7601_v41  ;;  %v3443_v8 = vmul.f32 0.01, %v3201_v16 }
 0x159   :  { %14218 = vst [vmem:[#allocation214_spill] sm:$0xff] %v9988_v38  ;;  %v3444_v44 = vmul.f32 0.01, %v3202_v61  ;;  %v1408_v39 = vadd.f32 %v1339_v37, %v1058_v7  ;;  %v1688_v33 = vmul.f32 %v5853_v40, %v7601_v41  ;;  %v10002_v54 = vmul.f32 %v7525_v9, %v429_v46  ;;  %v6065_v46 = vld [vmem:[%s14001_s0 + $0x471] sm:$0xff] }
 0x15a   :  { %14219 = vst [vmem:[#allocation215_spill] sm:$0xff] %v9991_v25  ;;  %v10005_v14 = vmul.f32 %v7594_v36, %v777_v0  ;;  %v1756_v53 = vadd.f32 %v1687_v5, %v1407_v21  ;;  %v2036_v57 = vmul.f32 %v5923_v24, %v7624_v52  ;;  %v3512_v63 = vmax.f32 %v3201_v16, %v3443_v8  ;;  %v6066_v0 = vld [vmem:[%s14001_s0 + $0x479] sm:$0xff] }
 0x15b   :  { %14220 = vst [vmem:[#allocation216_spill] sm:$0xff] %v10002_v54  ;;  %v3513_v42 = vmax.f32 %v3202_v61, %v3444_v44  ;;  %v1757_v7 = vadd.f32 %v1688_v33, %v1408_v39  ;;  %v2037_v37 = vmul.f32 %v5924_v11, %v7624_v52  ;;  %v10019_v21 = vmul.f32 %v7594_v36, %v778_v30  ;;  %v6136_v61 = vld [vmem:[%s14001_s0 + $0x472] sm:$0xff]  ;;  %v6137_v30 = vld [vmem:[%s14001_s0 + $0x47a] sm:$0xff] }
 0x15c   :  { %14221 = vst [vmem:[#allocation217_spill] sm:$0xff] %v10005_v14  ;;  %v10022_v5 = vmul.f32 %v5781_v50, %v7613_v45  ;;  %v2105_v47 = vadd.f32 %v2036_v57, %v1756_v53  ;;  %v2386_v16 = vmul.f32 %v5994_v26, %v7646_v62  ;;  %v10029_v44 = vmul.f32 %v5782_v22, %v7613_v45  ;;  %v111_v22 = vld [vmem:[%s14001_s0 + $0x120] sm:$0xff] }
 0x15d   :  { %14222 = vst [vmem:[#allocation218_spill] sm:$0xff] %v10019_v21  ;;  %v3555_v8 = vpack.c.bf16 %v3513_v42, %v3512_v63  ;;  %v2106_v39 = vadd.f32 %v2037_v37, %v1757_v7  ;;  %v2387_v33 = vmul.f32 %v5995_v48, %v7646_v62  ;;  %v10036_v50 = vmul.f32 %v5852_v27, %v7636_v56  ;;  %v112_v63 = vld [vmem:[%s14001_s0 + $0x128] sm:$0xff]  ;;  %v5795_v21 = vld [vmem:[%s14001_s0 + $0x2b8] sm:$0xff]  ;;  %v5796_v14 = vld [vmem:[%s14001_s0 + $0x2c0] sm:$0xff] }
 0x15e   :  { %14223 = vst [vmem:[#allocation219_spill] sm:$0xff] %v10022_v5  ;;  %14224 = vst [vmem:[#allocation220_spill] sm:$0xff] %v10029_v44  ;;  %v2455_v53 = vadd.f32 %v2386_v16, %v2105_v47  ;;  %v2735_v57 = vmul.f32 %v6065_v46, %v7666_v13  ;;  %v2736_v60 = vmul.f32 %v6066_v0, %v7666_v13  ;;  %v460_v37 = vld [vmem:[%s14001_s0 + $0x121] sm:$0xff]  ;;  %v461_v16 = vld [vmem:[%s14001_s0 + $0x129] sm:$0xff] }
 0x15f   :  { %14225 = vst [vmem:[#allocation221_spill] sm:$0xff] %v10036_v50  ;;  %6486 = vmatprep.subr.bf16.mxu1 %v3555_v8  ;;  %v10047_v42 = vmul.f32 %v5853_v40, %v7636_v56  ;;  %v10050_v27 = vmul.f32 %v5923_v24, %v7658_v4  ;;  %v2456_v47 = vadd.f32 %v2387_v33, %v2106_v39  ;;  %v6888_v8 = vld [vmem:[%s14004_s3 + $0x4] ss:$20 sps:$4 sm:$0xff]  }
 0x160   :  { %v3084_v7 = vmul.f32 %v6136_v61, %v7685_v28  ;;  %v10063_v40 = vmul.f32 %v5924_v11, %v7658_v4  ;;  %v10066_v24 = vmul.f32 %v5994_v26, %v7678_v17  ;;  %v2804_v39 = vadd.f32 %v2735_v57, %v2455_v53  ;;  %v809_v11 = vld [vmem:[%s14001_s0 + $0x122] sm:$0xff]  ;;  %v810_v26 = vld [vmem:[%s14001_s0 + $0x12a] sm:$0xff]  ;;  %4161 = vmatprep.mubr.bf16.mxu0 %v6888_v8 }
 0x161   :  { %14226 = vst [vmem:[#allocation222_spill] sm:$0xff] %v10047_v42  ;;  %14227 = vst [vmem:[#allocation223_spill] sm:$0xff] %v10050_v27  ;;  %v3085_v33 = vmul.f32 %v6137_v30, %v7685_v28  ;;  %v10073_v27 = vmul.f32 %v5995_v48, %v7678_v17  ;;  %v2805_v42 = vadd.f32 %v2736_v60, %v2456_v47  ;;  %v5813_v8 = vld [vmem:[%s14001_s0 + $0x348] sm:$0xff] }
 0x162   :  { %14228 = vst [vmem:[#allocation224_spill] sm:$0xff] %v10063_v40  ;;  %14229 = vst [vmem:[#allocation225_spill] sm:$0xff] %v10066_v24  ;;  %v322_v50 = vmul.f32 %v7509_v3, %v111_v22  ;;  %v323_v44 = vmul.f32 %v7509_v3, %v112_v63  ;;  %v10084_v53 = vmul.f32 %v6065_v46, %v7697_v34  ;;  %v5814_v46 = vld [vmem:[%s14001_s0 + $0x350] sm:$0xff] }
 0x163   :  { %14230 = vst [vmem:[#allocation226_spill] sm:$0xff] %v10073_v27  ;;  %v3153_v57 = vadd.f32 %v3084_v7, %v2804_v39  ;;  %v671_v48 = vmul.f32 %v7527_v10, %v460_v37  ;;  %v672_v60 = vmul.f32 %v7527_v10, %v461_v16  ;;  %v10089_v47 = vmul.f32 %v6066_v0, %v7697_v34 }
 0x164   :  { %14231 = vst [vmem:[#allocation227_spill] sm:$0xff] %v10084_v53  ;;  %v3154_v27 = vadd.f32 %v3085_v33, %v2805_v42  ;;  %v391_v24 = vadd.f32 %v322_v50, %v7507_v2  ;;  %v392_v40 = vadd.f32 %v323_v44, %v7507_v2  ;;  %v10100_v7 = vmul.f32 %v6136_v61, %v7715_v51  ;;  %v5885_v61 = vld [vmem:[%s14001_s0 + $0x351] sm:$0xff] }
 0x165   :  { %14232 = vst [vmem:[#allocation228_spill] sm:$0xff] %v10089_v47  ;;  %v3395_v12 = vmul.f32 0.01, %v3153_v57  ;;  %v1020_v0 = vmul.f32 %v7552_v20, %v809_v11  ;;  %v1021_v42 = vmul.f32 %v7552_v20, %v810_v26  ;;  %v10105_v50 = vmul.f32 %v6137_v30, %v7715_v51  ;;  %v5884_v47 = vld [vmem:[%s14001_s0 + $0x349] sm:$0xff] }
 0x166   :  { %14233 = vst [vmem:[#allocation229_spill] sm:$0xff] %v10100_v7  ;;  %v3396_v44 = vmul.f32 0.01, %v3154_v27  ;;  %v740_v39 = vadd.f32 %v671_v48, %v391_v24  ;;  %v741_v33 = vadd.f32 %v672_v60, %v392_v40  ;;  %v10114_v53 = vmul.f32 %v7519_v6, %v111_v22  ;;  %v5955_v60 = vld [vmem:[%s14001_s0 + $0x34a] sm:$0xff] }
 0x167   :  { %14234 = vst [vmem:[#allocation230_spill] sm:$0xff] %v10105_v50  ;;  %v3464_v7 = vmax.f32 %v3153_v57, %v3395_v12  ;;  %v1370_v5 = vmul.f32 %v5813_v8, %v7580_v32  ;;  %v1371_v30 = vmul.f32 %v5814_v46, %v7580_v32  ;;  %v10119_v24 = vmul.f32 %v7519_v6, %v112_v63  ;;  %v5956_v57 = vld [vmem:[%s14001_s0 + $0x352] sm:$0xff] }
 0x168   :  { %14235 = vst [vmem:[#allocation231_spill] sm:$0xff] %v10114_v53  ;;  %v3465_v50 = vmax.f32 %v3154_v27, %v3396_v44  ;;  %v1089_v40 = vadd.f32 %v1020_v0, %v740_v39  ;;  %v1090_v48 = vadd.f32 %v1021_v42, %v741_v33  ;;  %v10128_v22 = vmul.f32 %v7525_v9, %v460_v37  ;;  %v6026_v0 = vld [vmem:[%s14001_s0 + $0x570] sm:$0xff]  ;;  %v6027_v42 = vld [vmem:[%s14001_s0 + $0x578] sm:$0xff] }
 0x169   :  { %14236 = vst [vmem:[#allocation232_spill] sm:$0xff] %v10119_v24  ;;  %v10131_v12 = vmul.f32 %v7525_v9, %v461_v16  ;;  %v1719_v27 = vmul.f32 %v5884_v47, %v7601_v41  ;;  %v1720_v63 = vmul.f32 %v5885_v61, %v7601_v41  ;;  %v10142_v39 = vmul.f32 %v7594_v36, %v809_v11  ;;  %v10155_v53 = vld [vmem:[%s14001_s0 + $0x571] sm:$0xff] }
 0x16a   :  { %14237 = vst [vmem:[#allocation233_spill] sm:$0xff] %v10128_v22  ;;  %v3531_v44 = vpack.c.bf16 %v3465_v50, %v3464_v7  ;;  %v1439_v37 = vadd.f32 %v1370_v5, %v1089_v40  ;;  %v1440_v33 = vadd.f32 %v1371_v30, %v1090_v48  ;;  %v10145_v16 = vmul.f32 %v7594_v36, %v810_v26  ;;  %v10160_v5 = vld [vmem:[%s14001_s0 + $0x579] sm:$0xff]  ;;  %v93_v11 = vld [vmem:[%s14001_s0 + $0x90] sm:$0xff] }
 0x16b   :  { %14238 = vst [vmem:[#allocation234_spill] sm:$0xff] %v10131_v12  ;;  %14239 = vst [vmem:[#allocation235_spill] sm:$0xff] %v10142_v39  ;;  %v10148_v12 = vmul.f32 %v5813_v8, %v7613_v45  ;;  %v2068_v22 = vmul.f32 %v5955_v60, %v7624_v52  ;;  %v2069_v24 = vmul.f32 %v5956_v57, %v7624_v52  ;;  %v10170_v30 = vld [vmem:[%s14001_s0 + $0x572] sm:$0xff]  ;;  %v10175_v40 = vld [vmem:[%s14001_s0 + $0x57a] sm:$0xff] }
 0x16c   :  { %14240 = vst [vmem:[#allocation236_spill] sm:$0xff] %v10145_v16  ;;  %6387 = vmatpush3.bf16.msra.mxu0 %v3531_v44  ;;  %v1788_v26 = vadd.f32 %v1719_v27, %v1439_v37  ;;  %v1789_v8 = vadd.f32 %v1720_v63, %v1440_v33  ;;  %v2418_v7 = vmul.f32 %v6026_v0, %v7646_v62  ;;  %v94_v48 = vld [vmem:[%s14001_s0 + $0x98] sm:$0xff] }
 0x16d   :  { %14241 = vst [vmem:[#allocation237_spill] sm:$0xff] %v10148_v12  ;;  %v2419_v50 = vmul.f32 %v6027_v42, %v7646_v62  ;;  %v10181_v27 = vmul.f32 %v5814_v46, %v7613_v45  ;;  %v10184_v63 = vmul.f32 %v5884_v47, %v7636_v56  ;;  %v10187_v44 = vmul.f32 %v5885_v61, %v7636_v56  ;;  %v442_v33 = vld [vmem:[%s14001_s0 + $0x91] sm:$0xff]  ;;  %v443_v12 = vld [vmem:[%s14001_s0 + $0x99] sm:$0xff] }
 0x16e   :  { %v10190_v37 = vmul.f32 %v5955_v60, %v7658_v4  ;;  %v2137_v16 = vadd.f32 %v2068_v22, %v1788_v26  ;;  %v2138_v46 = vadd.f32 %v2069_v24, %v1789_v8  ;;  %v2767_v47 = vmul.f32 %v10155_v53, %v7666_v13  ;;  %v791_v60 = vld [vmem:[%s14001_s0 + $0x92] sm:$0xff] }
 0x16f   :  { %14242 = vst [vmem:[#allocation238_spill] sm:$0xff] %v10181_v27  ;;  %14243 = vst [vmem:[#allocation239_spill] sm:$0xff] %v10184_v63  ;;  %v2768_v61 = vmul.f32 %v10160_v5, %v7666_v13  ;;  %v3117_v24 = vmul.f32 %v10175_v40, %v7685_v28  ;;  %v304_v22 = vmul.f32 %v7509_v3, %v93_v11 }
 0x170   :  { %14244 = vst [vmem:[#allocation240_spill] sm:$0xff] %v10187_v44  ;;  %14245 = vst [vmem:[#allocation241_spill] sm:$0xff] %v10190_v37  ;;  %v792_v37 = vld [vmem:[%s14001_s0 + $0x9a] sm:$0xff]  ;;  %v3116_v44 = vmul.f32 %v10170_v30, %v7685_v28  ;;  %v305_v26 = vmul.f32 %v7509_v3, %v94_v48  ;;  %v2487_v8 = vadd.f32 %v2418_v7, %v2137_v16 }
 0x171   :  { %v2488_v63 = vadd.f32 %v2419_v50, %v2138_v46  ;;  %v653_v27 = vmul.f32 %v7527_v10, %v442_v33  ;;  %v654_v39 = vmul.f32 %v7527_v10, %v443_v12  ;;  %v373_v54 = vadd.f32 %v304_v22, %v7507_v2  ;;  %v5866_v12 = vld [vmem:[%s14001_s0 + $0x2b9] sm:$0xff]  ;;  %v5867_v22 = vld [vmem:[%s14001_s0 + $0x2c1] sm:$0xff] }
 0x172   :  { %v374_v11 = vadd.f32 %v305_v26, %v7507_v2  ;;  %v1002_v48 = vmul.f32 %v7552_v20, %v791_v60  ;;  %v1003_v16 = vmul.f32 %v7552_v20, %v792_v37  ;;  %v10230_v7 = vmul.f32 %v5956_v57, %v7658_v4  ;;  %v5937_v37 = vld [vmem:[%s14001_s0 + $0x2ba] sm:$0xff] }
 0x173   :  { %v10233_v50 = vmul.f32 %v6026_v0, %v7678_v17  ;;  %v2836_v33 = vadd.f32 %v2767_v47, %v2487_v8  ;;  %v2837_v46 = vadd.f32 %v2768_v61, %v2488_v63  ;;  %v722_v60 = vadd.f32 %v653_v27, %v373_v54  ;;  %v5938_v0 = vld [vmem:[%s14001_s0 + $0x2c2] sm:$0xff] }
 0x174   :  { %14246 = vst [vmem:[#allocation242_spill] sm:$0xff] %v10230_v7  ;;  %v723_v26 = vadd.f32 %v654_v39, %v374_v11  ;;  %v1352_v25 = vmul.f32 %v5795_v21, %v7580_v32  ;;  %v1353_v57 = vmul.f32 %v5796_v14, %v7580_v32  ;;  %v6008_v63 = vld [vmem:[%s14001_s0 + $0x4e0] sm:$0xff]  ;;  %v10250_v47 = vmul.f32 %v6027_v42, %v7678_v17  ;;  %v6009_v21 = vld [vmem:[%s14001_s0 + $0x4e8] sm:$0xff]  ;;  %v125_v42 = vld [vmem:[%s14001_s0 + $0x190] sm:$0xff] }
 0x175   :  { %14247 = vst [vmem:[#allocation243_spill] sm:$0xff] %v10233_v50  ;;  %v3185_v61 = vadd.f32 %v3116_v44, %v2836_v33  ;;  %v3186_v8 = vadd.f32 %v3117_v24, %v2837_v46  ;;  %v1701_v54 = vmul.f32 %v5866_v12, %v7601_v41  ;;  %v6079_v14 = vld [vmem:[%s14001_s0 + $0x4e1] sm:$0xff]  ;;  %v1071_v39 = vadd.f32 %v1002_v48, %v722_v60  ;;  %v126_v44 = vld [vmem:[%s14001_s0 + $0x198] sm:$0xff]  ;;  %v6080_v7 = vld [vmem:[%s14001_s0 + $0x4e9] sm:$0xff] }
 0x176   :  { %14248 = vst [vmem:[#allocation244_spill] sm:$0xff] %v10250_v47  ;;  %v1072_v27 = vadd.f32 %v1003_v16, %v723_v26  ;;  %v1702_v11 = vmul.f32 %v5867_v22, %v7601_v41  ;;  %v2050_v50 = vmul.f32 %v5937_v37, %v7624_v52  ;;  %v2051_v33 = vmul.f32 %v5938_v0, %v7624_v52  ;;  %v474_v48 = vld [vmem:[%s14001_s0 + $0x191] sm:$0xff]  ;;  %v475_v16 = vld [vmem:[%s14001_s0 + $0x199] sm:$0xff] }
 0x177   :  { %v3427_v24 = vmul.f32 0.01, %v3185_v61  ;;  %v3428_v12 = vmul.f32 0.01, %v3186_v8  ;;  %v2400_v46 = vmul.f32 %v6008_v63, %v7646_v62  ;;  %v1421_v22 = vadd.f32 %v1352_v25, %v1071_v39  ;;  %v823_v0 = vld [vmem:[%s14001_s0 + $0x192] sm:$0xff]  ;;  %v824_v25 = vld [vmem:[%s14001_s0 + $0x19a] sm:$0xff] }
 0x178   :  { %v1422_v37 = vadd.f32 %v1353_v57, %v1072_v27  ;;  %v2401_v60 = vmul.f32 %v6009_v21, %v7646_v62  ;;  %v2749_v26 = vmul.f32 %v6079_v14, %v7666_v13  ;;  %v336_v38 = vmul.f32 %v7509_v3, %v125_v42  ;;  %v6150_v42 = vld [vmem:[%s14001_s0 + $0x4e2] sm:$0xff] }
 0x179   :  { %v3496_v47 = vmax.f32 %v3185_v61, %v3427_v24  ;;  %v3497_v63 = vmax.f32 %v3186_v8, %v3428_v12  ;;  %v337_v58 = vmul.f32 %v7509_v3, %v126_v44  ;;  %v1770_v57 = vadd.f32 %v1701_v54, %v1421_v22  ;;  %v5827_v61 = vld [vmem:[%s14001_s0 + $0x3b8] sm:$0xff]  ;;  %v5828_v8 = vld [vmem:[%s14001_s0 + $0x3c0] sm:$0xff]  ;;  %v6151_v54 = vld [vmem:[%s14001_s0 + $0x4ea] sm:$0xff] }
 0x17a   :  { %v1771_v21 = vadd.f32 %v1702_v11, %v1422_v37  ;;  %v685_v14 = vmul.f32 %v7527_v10, %v474_v48  ;;  %v686_v39 = vmul.f32 %v7527_v10, %v475_v16  ;;  %v405_v11 = vadd.f32 %v336_v38, %v7507_v2  ;;  %v5898_v22 = vld [vmem:[%s14001_s0 + $0x3b9] sm:$0xff]  ;;  %v5899_v37 = vld [vmem:[%s14001_s0 + $0x3c1] sm:$0xff] }
 0x17b   :  { %v3547_v27 = vpack.c.bf16 %v3497_v63, %v3496_v47  ;;  %v406_v44 = vadd.f32 %v337_v58, %v7507_v2  ;;  %v1034_v24 = vmul.f32 %v7552_v20, %v823_v0  ;;  %v2119_v12 = vadd.f32 %v2050_v50, %v1770_v57  ;;  %v5969_v57 = vld [vmem:[%s14001_s0 + $0x3ba] sm:$0xff] }
 0x17c   :  { %v2120_v48 = vadd.f32 %v2051_v33, %v1771_v21  ;;  %v2750_v16 = vmul.f32 %v6080_v7, %v7666_v13  ;;  %v1035_v47 = vmul.f32 %v7552_v20, %v824_v25  ;;  %v754_v38 = vadd.f32 %v685_v14, %v405_v11  ;;  %v5970_v21 = vld [vmem:[%s14001_s0 + $0x3c2] sm:$0xff] }
 0x17d   :  { %6487 = vmatpush3.bf16.msra.mxu1 %v3547_v27  ;;  %v755_v63 = vadd.f32 %v686_v39, %v406_v44  ;;  %v1384_v58 = vmul.f32 %v5827_v61, %v7580_v32  ;;  %v1385_v50 = vmul.f32 %v5828_v8, %v7580_v32  ;;  %v2469_v33 = vadd.f32 %v2400_v46, %v2119_v12  ;;  %v6040_v46 = vld [vmem:[%s14001_s0 + $0x5e0] sm:$0xff] }
 0x17e   :  { %v2470_v0 = vadd.f32 %v2401_v60, %v2120_v48  ;;  %v3098_v7 = vmul.f32 %v6150_v42, %v7685_v28  ;;  %v3099_v25 = vmul.f32 %v6151_v54, %v7685_v28  ;;  %v1103_v14 = vadd.f32 %v1034_v24, %v754_v38  ;;  %v6041_v60 = vld [vmem:[%s14001_s0 + $0x5e8] sm:$0xff]  ;;  %v77_v24 = vld [vmem:[%s14001_s0 + $0x10] sm:$0xff] }
 0x17f   :  { %v1104_v39 = vadd.f32 %v1035_v47, %v755_v63  ;;  %v1733_v61 = vmul.f32 %v5898_v22, %v7601_v41  ;;  %v1734_v8 = vmul.f32 %v5899_v37, %v7601_v41  ;;  %v10333_v27 = vmul.f32 %v10155_v53, %v7697_v34  ;;  %v6111_v44 = vld [vmem:[%s14001_s0 + $0x5e1] sm:$0xff] }
 0x180   :  { %v10337_v42 = vmul.f32 %v10160_v5, %v7697_v34  ;;  %v2818_v54 = vadd.f32 %v2749_v26, %v2469_v33  ;;  %v2819_v11 = vadd.f32 %v2750_v16, %v2470_v0  ;;  %v1453_v12 = vadd.f32 %v1384_v58, %v1103_v14  ;;  %v6112_v5 = vld [vmem:[%s14001_s0 + $0x5e9] sm:$0xff]  ;;  %v78_v26 = vld [vmem:[%s14001_s0 + $0x18] sm:$0xff] }
 0x181   :  { %14249 = vst [vmem:[#allocation245_spill] sm:$0xff] %v10333_v27  ;;  %v1454_v48 = vadd.f32 %v1385_v50, %v1104_v39  ;;  %v2082_v47 = vmul.f32 %v5969_v57, %v7624_v52  ;;  %v2083_v53 = vmul.f32 %v5970_v21, %v7624_v52  ;;  %v2432_v37 = vmul.f32 %v6040_v46, %v7646_v62  ;;  %v6182_v63 = vld [vmem:[%s14001_s0 + $0x5e2] sm:$0xff]  ;;  %v426_v57 = vld [vmem:[%s14001_s0 + $0x11] sm:$0xff] }
 0x182   :  { %14250 = vst [vmem:[#allocation246_spill] sm:$0xff] %v10337_v42  ;;  %v3167_v16 = vadd.f32 %v3098_v7, %v2818_v54  ;;  %v3168_v22 = vadd.f32 %v3099_v25, %v2819_v11  ;;  %v2433_v38 = vmul.f32 %v6041_v60, %v7646_v62  ;;  %v1802_v58 = vadd.f32 %v1733_v61, %v1453_v12  ;;  %v6183_v14 = vld [vmem:[%s14001_s0 + $0x5ea] sm:$0xff]  ;;  %v427_v61 = vld [vmem:[%s14001_s0 + $0x19] sm:$0xff] }
 0x183   :  { %v1803_v50 = vadd.f32 %v1734_v8, %v1454_v48  ;;  %v2781_v33 = vmul.f32 %v6111_v44, %v7666_v13  ;;  %v288_v0 = vmul.f32 %v7509_v3, %v77_v24  ;;  %v2782_v21 = vmul.f32 %v6112_v5, %v7666_v13  ;;  %v775_v11 = vld [vmem:[%s14001_s0 + $0x12] sm:$0xff]  ;;  %v776_v42 = vld [vmem:[%s14001_s0 + $0x1a] sm:$0xff] }
 0x184   :  { %v3409_v7 = vmul.f32 0.01, %v3167_v16  ;;  %v3410_v25 = vmul.f32 0.01, %v3168_v22  ;;  %v289_v39 = vmul.f32 %v7509_v3, %v78_v26  ;;  %v2151_v8 = vadd.f32 %v2082_v47, %v1802_v58 }
 0x185   :  { %v2152_v46 = vadd.f32 %v2083_v53, %v1803_v50  ;;  %v3130_v60 = vmul.f32 %v6182_v63, %v7685_v28  ;;  %v357_v54 = vadd.f32 %v288_v0, %v7507_v2  ;;  %v637_v5 = vmul.f32 %v7527_v10, %v426_v57  ;;  %v5779_v50 = vld [vmem:[%s14001_s0 + $0x238] sm:$0xff] }
 0x186   :  { %v3478_v44 = vmax.f32 %v3167_v16, %v3409_v7  ;;  %v3479_v12 = vmax.f32 %v3168_v22, %v3410_v25  ;;  %v358_v48 = vadd.f32 %v289_v39, %v7507_v2  ;;  %v2501_v47 = vadd.f32 %v2432_v37, %v2151_v8  ;;  %v5780_v37 = vld [vmem:[%s14001_s0 + $0x240] sm:$0xff] }
 0x187   :  { %v2502_v53 = vadd.f32 %v2433_v38, %v2152_v46  ;;  %v3131_v63 = vmul.f32 %v6183_v14, %v7685_v28  ;;  %v638_v58 = vmul.f32 %v7527_v10, %v427_v61  ;;  %v10388_v16 = vmul.f32 %v10170_v30, %v7715_v51  ;;  %v5850_v8 = vld [vmem:[%s14001_s0 + $0x239] sm:$0xff] }
 0x188   :  { %v3538_v22 = vpack.c.bf16 %v3479_v12, %v3478_v44  ;;  %v706_v0 = vadd.f32 %v637_v5, %v357_v54  ;;  %v986_v7 = vmul.f32 %v7552_v20, %v775_v11  ;;  %v2850_v38 = vadd.f32 %v2781_v33, %v2501_v47  ;;  %v5851_v33 = vld [vmem:[%s14001_s0 + $0x241] sm:$0xff] }
 0x189   :  { %14251 = vst [vmem:[#allocation247_spill] sm:$0xff] %v10388_v16  ;;  %v2851_v25 = vadd.f32 %v2782_v21, %v2502_v53  ;;  %v707_v14 = vadd.f32 %v638_v58, %v358_v48  ;;  %v987_v39 = vmul.f32 %v7552_v20, %v776_v42  ;;  %v10400_v30 = vmul.f32 %v10175_v40, %v7715_v51  ;;  %v5921_v40 = vld [vmem:[%s14001_s0 + $0x23a] sm:$0xff] }
 0x18a   :  { %6388 = vmatprep.subr.bf16.mxu0 %v3538_v22  ;;  %v10403_v46 = vmul.f32 %v7519_v6, %v77_v24  ;;  %v1055_v54 = vadd.f32 %v986_v7, %v706_v0  ;;  %v1336_v44 = vmul.f32 %v5779_v50, %v7580_v32  ;;  %v3199_v21 = vadd.f32 %v3130_v60, %v2850_v38  ;;  %v5922_v60 = vld [vmem:[%s14001_s0 + $0x242] sm:$0xff] }
 0x18b   :  { %14252 = vst [vmem:[#allocation248_spill] sm:$0xff] %v10400_v30  ;;  %v3200_v12 = vadd.f32 %v3131_v63, %v2851_v25  ;;  %v1056_v48 = vadd.f32 %v987_v39, %v707_v14  ;;  %v1337_v5 = vmul.f32 %v5780_v37, %v7580_v32  ;;  %v10414_v47 = vmul.f32 %v7519_v6, %v78_v26  ;;  %v5992_v26 = vld [vmem:[%s14001_s0 + $0x460] sm:$0xff]  ;;  %v5993_v39 = vld [vmem:[%s14001_s0 + $0x468] sm:$0xff] }
 0x18c   :  { %14253 = vst [vmem:[#allocation249_spill] sm:$0xff] %v10403_v46  ;;  %v10417_v24 = vmul.f32 %v7525_v9, %v426_v57  ;;  %v1405_v53 = vadd.f32 %v1336_v44, %v1055_v54  ;;  %v1685_v58 = vmul.f32 %v5850_v8, %v7601_v41  ;;  %v3441_v63 = vmul.f32 0.01, %v3199_v21 }
 0x18d   :  { %14254 = vst [vmem:[#allocation250_spill] sm:$0xff] %v10414_v47  ;;  %v3442_v22 = vmul.f32 0.01, %v3200_v12  ;;  %v1406_v0 = vadd.f32 %v1337_v5, %v1056_v48  ;;  %v1686_v7 = vmul.f32 %v5851_v33, %v7601_v41  ;;  %v10428_v38 = vmul.f32 %v7525_v9, %v427_v61  ;;  %v6063_v61 = vld [vmem:[%s14001_s0 + $0x461] sm:$0xff] }
 0x18e   :  { %14255 = vst [vmem:[#allocation251_spill] sm:$0xff] %v10417_v24  ;;  %v10431_v57 = vmul.f32 %v7594_v36, %v775_v11  ;;  %v1754_v25 = vadd.f32 %v1685_v58, %v1405_v53  ;;  %v2034_v14 = vmul.f32 %v5921_v40, %v7624_v52  ;;  %v3510_v54 = vmax.f32 %v3199_v21, %v3441_v63  ;;  %v6064_v11 = vld [vmem:[%s14001_s0 + $0x469] sm:$0xff] }
 0x18f   :  { %14256 = vst [vmem:[#allocation252_spill] sm:$0xff] %v10428_v38  ;;  %v3511_v44 = vmax.f32 %v3200_v12, %v3442_v22  ;;  %v1755_v48 = vadd.f32 %v1686_v7, %v1406_v0  ;;  %v2035_v5 = vmul.f32 %v5922_v60, %v7624_v52  ;;  %v10445_v53 = vmul.f32 %v7594_v36, %v776_v42  ;;  %v6134_v12 = vld [vmem:[%s14001_s0 + $0x462] sm:$0xff]  ;;  %v6135_v42 = vld [vmem:[%s14001_s0 + $0x46a] sm:$0xff] }
 0x190   :  { %14257 = vst [vmem:[#allocation253_spill] sm:$0xff] %v10431_v57  ;;  %v10448_v58 = vmul.f32 %v5779_v50, %v7613_v45  ;;  %v2103_v30 = vadd.f32 %v2034_v14, %v1754_v25  ;;  %v2384_v21 = vmul.f32 %v5992_v26, %v7646_v62  ;;  %v10455_v22 = vmul.f32 %v5780_v37, %v7613_v45  ;;  %v109_v37 = vld [vmem:[%s14001_s0 + $0x110] sm:$0xff] }
 0x191   :  { %14258 = vst [vmem:[#allocation254_spill] sm:$0xff] %v10445_v53  ;;  %v3554_v63 = vpack.c.bf16 %v3511_v44, %v3510_v54  ;;  %v2104_v0 = vadd.f32 %v2035_v5, %v1755_v48  ;;  %v2385_v7 = vmul.f32 %v5993_v39, %v7646_v62  ;;  %v10462_v50 = vmul.f32 %v5850_v8, %v7636_v56  ;;  %v110_v54 = vld [vmem:[%s14001_s0 + $0x118] sm:$0xff]  ;;  %v5793_v53 = vld [vmem:[%s14001_s0 + $0x2a8] sm:$0xff]  ;;  %v5794_v57 = vld [vmem:[%s14001_s0 + $0x2b0] sm:$0xff] }
 0x192   :  { %14259 = vst [vmem:[#allocation255_spill] sm:$0xff] %v10448_v58  ;;  %14260 = vst [vmem:[#allocation256_spill] sm:$0xff] %v10455_v22  ;;  %v2453_v25 = vadd.f32 %v2384_v21, %v2103_v30  ;;  %v2733_v14 = vmul.f32 %v6063_v61, %v7666_v13  ;;  %v2734_v16 = vmul.f32 %v6064_v11, %v7666_v13  ;;  %v458_v5 = vld [vmem:[%s14001_s0 + $0x111] sm:$0xff]  ;;  %v459_v21 = vld [vmem:[%s14001_s0 + $0x119] sm:$0xff] }
 0x193   :  { %14261 = vst [vmem:[#allocation257_spill] sm:$0xff] %v10462_v50  ;;  %6488 = vmatprep.subr.bf16.mxu1 %v3554_v63  ;;  %v10473_v44 = vmul.f32 %v5851_v33, %v7636_v56  ;;  %v10476_v8 = vmul.f32 %v5921_v40, %v7658_v4  ;;  %v2454_v30 = vadd.f32 %v2385_v7, %v2104_v0  ;;  %v807_v50 = vld [vmem:[%s14001_s0 + $0x112] sm:$0xff] }
 0x194   :  { %v3082_v48 = vmul.f32 %v6134_v12, %v7685_v28  ;;  %v10486_v27 = vmul.f32 %v5922_v60, %v7658_v4  ;;  %v10489_v33 = vmul.f32 %v5992_v26, %v7678_v17  ;;  %v2802_v63 = vadd.f32 %v2733_v14, %v2453_v25  ;;  %v808_v60 = vld [vmem:[%s14001_s0 + $0x11a] sm:$0xff] }
 0x195   :  { %14262 = vst [vmem:[#allocation258_spill] sm:$0xff] %v10473_v44  ;;  %14263 = vst [vmem:[#allocation259_spill] sm:$0xff] %v10476_v8  ;;  %v3083_v40 = vmul.f32 %v6135_v42, %v7685_v28  ;;  %v10493_v0 = vmul.f32 %v5993_v39, %v7678_v17  ;;  %v2803_v7 = vadd.f32 %v2734_v16, %v2454_v30 }
 0x196   :  { %14264 = vst [vmem:[#allocation260_spill] sm:$0xff] %v10486_v27  ;;  %14265 = vst [vmem:[#allocation261_spill] sm:$0xff] %v10489_v33  ;;  %v320_v8 = vmul.f32 %v7509_v3, %v109_v37  ;;  %v321_v44 = vmul.f32 %v7509_v3, %v110_v54  ;;  %v10504_v26 = vmul.f32 %v6063_v61, %v7697_v34  ;;  %v5811_v27 = vld [vmem:[%s14001_s0 + $0x338] sm:$0xff]  ;;  %v5812_v61 = vld [vmem:[%s14001_s0 + $0x340] sm:$0xff] }
 0x197   :  { %14266 = vst [vmem:[#allocation262_spill] sm:$0xff] %v10493_v0  ;;  %v3151_v25 = vadd.f32 %v3082_v48, %v2802_v63  ;;  %v669_v39 = vmul.f32 %v7527_v10, %v458_v5  ;;  %v670_v16 = vmul.f32 %v7527_v10, %v459_v21  ;;  %v10509_v14 = vmul.f32 %v6064_v11, %v7697_v34 }
 0x198   :  { %14267 = vst [vmem:[#allocation263_spill] sm:$0xff] %v10504_v26  ;;  %v3152_v30 = vadd.f32 %v3083_v40, %v2803_v7  ;;  %v389_v0 = vadd.f32 %v320_v8, %v7507_v2  ;;  %v390_v33 = vadd.f32 %v321_v44, %v7507_v2  ;;  %v10520_v48 = vmul.f32 %v6134_v12, %v7715_v51  ;;  %v5882_v26 = vld [vmem:[%s14001_s0 + $0x339] sm:$0xff]  ;;  %v5883_v12 = vld [vmem:[%s14001_s0 + $0x341] sm:$0xff] }
 0x199   :  { %14268 = vst [vmem:[#allocation264_spill] sm:$0xff] %v10509_v14  ;;  %v3393_v63 = vmul.f32 0.01, %v3151_v25  ;;  %v1018_v11 = vmul.f32 %v7552_v20, %v807_v50  ;;  %v1019_v40 = vmul.f32 %v7552_v20, %v808_v60  ;;  %v10525_v8 = vmul.f32 %v6135_v42, %v7715_v51 }
 0x19a   :  { %14269 = vst [vmem:[#allocation265_spill] sm:$0xff] %v10520_v48  ;;  %v3394_v44 = vmul.f32 0.01, %v3152_v30  ;;  %v738_v7 = vadd.f32 %v669_v39, %v389_v0  ;;  %v739_v14 = vadd.f32 %v670_v16, %v390_v33  ;;  %v10534_v22 = vmul.f32 %v7519_v6, %v109_v37  ;;  %v5953_v16 = vld [vmem:[%s14001_s0 + $0x33a] sm:$0xff] }
 0x19b   :  { %14270 = vst [vmem:[#allocation266_spill] sm:$0xff] %v10525_v8  ;;  %v3462_v48 = vmax.f32 %v3151_v25, %v3393_v63  ;;  %v1368_v58 = vmul.f32 %v5811_v27, %v7580_v32  ;;  %v1369_v42 = vmul.f32 %v5812_v61, %v7580_v32  ;;  %v10539_v0 = vmul.f32 %v7519_v6, %v110_v54  ;;  %v5954_v25 = vld [vmem:[%s14001_s0 + $0x342] sm:$0xff] }
 0x19c   :  { %14271 = vst [vmem:[#allocation267_spill] sm:$0xff] %v10534_v22  ;;  %v3463_v8 = vmax.f32 %v3152_v30, %v3394_v44  ;;  %v1087_v33 = vadd.f32 %v1018_v11, %v738_v7  ;;  %v1088_v39 = vadd.f32 %v1019_v40, %v739_v14  ;;  %v10548_v37 = vmul.f32 %v7525_v9, %v458_v5  ;;  %v6024_v14 = vld [vmem:[%s14001_s0 + $0x560] sm:$0xff]  ;;  %v6025_v11 = vld [vmem:[%s14001_s0 + $0x568] sm:$0xff] }
 0x19d   :  { %14272 = vst [vmem:[#allocation268_spill] sm:$0xff] %v10539_v0  ;;  %v10551_v63 = vmul.f32 %v7525_v9, %v459_v21  ;;  %v1717_v30 = vmul.f32 %v5882_v26, %v7601_v41  ;;  %v1718_v54 = vmul.f32 %v5883_v12, %v7601_v41  ;;  %v10562_v44 = vmul.f32 %v7594_v36, %v807_v50  ;;  %v10575_v22 = vld [vmem:[%s14001_s0 + $0x561] sm:$0xff] }
 0x19e   :  { %14273 = vst [vmem:[#allocation269_spill] sm:$0xff] %v10548_v37  ;;  %v3530_v40 = vpack.c.bf16 %v3463_v8, %v3462_v48  ;;  %v1437_v5 = vadd.f32 %v1368_v58, %v1087_v33  ;;  %v1438_v7 = vadd.f32 %v1369_v42, %v1088_v39  ;;  %v10565_v21 = vmul.f32 %v7594_v36, %v808_v60  ;;  %v10580_v58 = vld [vmem:[%s14001_s0 + $0x569] sm:$0xff]  ;;  %v91_v50 = vld [vmem:[%s14001_s0 + $0x80] sm:$0xff] }
 0x19f   :  { %14274 = vst [vmem:[#allocation270_spill] sm:$0xff] %v10551_v63  ;;  %14275 = vst [vmem:[#allocation271_spill] sm:$0xff] %v10562_v44  ;;  %v10568_v63 = vmul.f32 %v5811_v27, %v7613_v45  ;;  %v2066_v37 = vmul.f32 %v5953_v16, %v7624_v52  ;;  %v2067_v0 = vmul.f32 %v5954_v25, %v7624_v52  ;;  %v10590_v42 = vld [vmem:[%s14001_s0 + $0x562] sm:$0xff]  ;;  %v10595_v33 = vld [vmem:[%s14001_s0 + $0x56a] sm:$0xff] }
 0x1a0   :  { %14276 = vst [vmem:[#allocation272_spill] sm:$0xff] %v10565_v21  ;;  %6389 = vmatpush3.bf16.msra.mxu0 %v3530_v40  ;;  %v1786_v27 = vadd.f32 %v1717_v30, %v1437_v5  ;;  %v1787_v60 = vadd.f32 %v1718_v54, %v1438_v7  ;;  %v2416_v48 = vmul.f32 %v6024_v14, %v7646_v62  ;;  %v92_v39 = vld [vmem:[%s14001_s0 + $0x88] sm:$0xff] }
 0x1a1   :  { %14277 = vst [vmem:[#allocation273_spill] sm:$0xff] %v10568_v63  ;;  %v2417_v8 = vmul.f32 %v6025_v11, %v7646_v62  ;;  %v10601_v30 = vmul.f32 %v5812_v61, %v7613_v45  ;;  %v10604_v54 = vmul.f32 %v5882_v26, %v7636_v56  ;;  %v10607_v40 = vmul.f32 %v5883_v12, %v7636_v56  ;;  %v440_v7 = vld [vmem:[%s14001_s0 + $0x81] sm:$0xff]  ;;  %v441_v63 = vld [vmem:[%s14001_s0 + $0x89] sm:$0xff] }
 0x1a2   :  { %v10610_v5 = vmul.f32 %v5953_v16, %v7658_v4  ;;  %v2135_v21 = vadd.f32 %v2066_v37, %v1786_v27  ;;  %v2136_v61 = vadd.f32 %v2067_v0, %v1787_v60  ;;  %v2765_v26 = vmul.f32 %v10575_v22, %v7666_v13  ;;  %v789_v16 = vld [vmem:[%s14001_s0 + $0x82] sm:$0xff] }
 0x1a3   :  { %14278 = vst [vmem:[#allocation274_spill] sm:$0xff] %v10601_v30  ;;  %14279 = vst [vmem:[#allocation275_spill] sm:$0xff] %v10604_v54  ;;  %v2766_v12 = vmul.f32 %v10580_v58, %v7666_v13  ;;  %v3115_v0 = vmul.f32 %v10595_v33, %v7685_v28  ;;  %v302_v37 = vmul.f32 %v7509_v3, %v91_v50 }
 0x1a4   :  { %14280 = vst [vmem:[#allocation276_spill] sm:$0xff] %v10607_v40  ;;  %14281 = vst [vmem:[#allocation277_spill] sm:$0xff] %v10610_v5  ;;  %v790_v5 = vld [vmem:[%s14001_s0 + $0x8a] sm:$0xff]  ;;  %v3114_v40 = vmul.f32 %v10590_v42, %v7685_v28  ;;  %v303_v27 = vmul.f32 %v7509_v3, %v92_v39  ;;  %v2485_v60 = vadd.f32 %v2416_v48, %v2135_v21 }
 0x1a5   :  { %v2486_v54 = vadd.f32 %v2417_v8, %v2136_v61  ;;  %v651_v30 = vmul.f32 %v7527_v10, %v440_v7  ;;  %v652_v44 = vmul.f32 %v7527_v10, %v441_v63  ;;  %v371_v38 = vadd.f32 %v302_v37, %v7507_v2  ;;  %v5864_v63 = vld [vmem:[%s14001_s0 + $0x2a9] sm:$0xff]  ;;  %v5865_v37 = vld [vmem:[%s14001_s0 + $0x2b1] sm:$0xff] }
 0x1a6   :  { %v372_v50 = vadd.f32 %v303_v27, %v7507_v2  ;;  %v1000_v39 = vmul.f32 %v7552_v20, %v789_v16  ;;  %v1001_v21 = vmul.f32 %v7552_v20, %v790_v5  ;;  %v10650_v48 = vmul.f32 %v5954_v25, %v7658_v4  ;;  %v5935_v5 = vld [vmem:[%s14001_s0 + $0x2aa] sm:$0xff] }
 0x1a7   :  { %v10653_v8 = vmul.f32 %v6024_v14, %v7678_v17  ;;  %v2834_v7 = vadd.f32 %v2765_v26, %v2485_v60  ;;  %v2835_v61 = vadd.f32 %v2766_v12, %v2486_v54  ;;  %v720_v16 = vadd.f32 %v651_v30, %v371_v38  ;;  %v5936_v14 = vld [vmem:[%s14001_s0 + $0x2b2] sm:$0xff] }
 0x1a8   :  { %14282 = vst [vmem:[#allocation278_spill] sm:$0xff] %v10650_v48  ;;  %v721_v27 = vadd.f32 %v652_v44, %v372_v50  ;;  %v1350_v24 = vmul.f32 %v5793_v53, %v7580_v32  ;;  %v1351_v25 = vmul.f32 %v5794_v57, %v7580_v32  ;;  %v6006_v54 = vld [vmem:[%s14001_s0 + $0x4d0] sm:$0xff]  ;;  %v10670_v26 = vmul.f32 %v6025_v11, %v7678_v17  ;;  %v6007_v53 = vld [vmem:[%s14001_s0 + $0x4d8] sm:$0xff]  ;;  %v123_v11 = vld [vmem:[%s14001_s0 + $0x180] sm:$0xff] }
 0x1a9   :  { %14283 = vst [vmem:[#allocation279_spill] sm:$0xff] %v10653_v8  ;;  %v3183_v12 = vadd.f32 %v3114_v40, %v2834_v7  ;;  %v3184_v60 = vadd.f32 %v3115_v0, %v2835_v61  ;;  %v1699_v38 = vmul.f32 %v5864_v63, %v7601_v41  ;;  %v6077_v57 = vld [vmem:[%s14001_s0 + $0x4d1] sm:$0xff]  ;;  %v1069_v44 = vadd.f32 %v1000_v39, %v720_v16  ;;  %v124_v40 = vld [vmem:[%s14001_s0 + $0x188] sm:$0xff]  ;;  %v6078_v48 = vld [vmem:[%s14001_s0 + $0x4d9] sm:$0xff] }
 0x1aa   :  { %14284 = vst [vmem:[#allocation280_spill] sm:$0xff] %v10670_v26  ;;  %v1070_v30 = vadd.f32 %v1001_v21, %v721_v27  ;;  %v1700_v50 = vmul.f32 %v5865_v37, %v7601_v41  ;;  %v2048_v8 = vmul.f32 %v5935_v5, %v7624_v52  ;;  %v2049_v7 = vmul.f32 %v5936_v14, %v7624_v52  ;;  %v472_v39 = vld [vmem:[%s14001_s0 + $0x181] sm:$0xff]  ;;  %v473_v21 = vld [vmem:[%s14001_s0 + $0x189] sm:$0xff] }
 0x1ab   :  { %v3425_v0 = vmul.f32 0.01, %v3183_v12  ;;  %v3426_v63 = vmul.f32 0.01, %v3184_v60  ;;  %v2398_v61 = vmul.f32 %v6006_v54, %v7646_v62  ;;  %v1419_v37 = vadd.f32 %v1350_v24, %v1069_v44  ;;  %v821_v14 = vld [vmem:[%s14001_s0 + $0x182] sm:$0xff]  ;;  %v822_v24 = vld [vmem:[%s14001_s0 + $0x18a] sm:$0xff] }
 0x1ac   :  { %v1420_v5 = vadd.f32 %v1351_v25, %v1070_v30  ;;  %v2399_v16 = vmul.f32 %v6007_v53, %v7646_v62  ;;  %v2747_v27 = vmul.f32 %v6077_v57, %v7666_v13  ;;  %v334_v47 = vmul.f32 %v7509_v3, %v123_v11  ;;  %v6148_v11 = vld [vmem:[%s14001_s0 + $0x4d2] sm:$0xff] }
 0x1ad   :  { %v3494_v26 = vmax.f32 %v3183_v12, %v3425_v0  ;;  %v3495_v54 = vmax.f32 %v3184_v60, %v3426_v63  ;;  %v335_v46 = vmul.f32 %v7509_v3, %v124_v40  ;;  %v1768_v25 = vadd.f32 %v1699_v38, %v1419_v37  ;;  %v5825_v12 = vld [vmem:[%s14001_s0 + $0x3a8] sm:$0xff]  ;;  %v5826_v60 = vld [vmem:[%s14001_s0 + $0x3b0] sm:$0xff]  ;;  %v6149_v38 = vld [vmem:[%s14001_s0 + $0x4da] sm:$0xff] }
 0x1ae   :  { %v1769_v53 = vadd.f32 %v1700_v50, %v1420_v5  ;;  %v683_v57 = vmul.f32 %v7527_v10, %v472_v39  ;;  %v684_v44 = vmul.f32 %v7527_v10, %v473_v21  ;;  %v403_v50 = vadd.f32 %v334_v47, %v7507_v2  ;;  %v5896_v37 = vld [vmem:[%s14001_s0 + $0x3a9] sm:$0xff]  ;;  %v5897_v5 = vld [vmem:[%s14001_s0 + $0x3b1] sm:$0xff] }
 0x1af   :  { %v3546_v30 = vpack.c.bf16 %v3495_v54, %v3494_v26  ;;  %v404_v40 = vadd.f32 %v335_v46, %v7507_v2  ;;  %v1032_v0 = vmul.f32 %v7552_v20, %v821_v14  ;;  %v2117_v63 = vadd.f32 %v2048_v8, %v1768_v25  ;;  %v5967_v25 = vld [vmem:[%s14001_s0 + $0x3aa] sm:$0xff] }
 0x1b0   :  { %v2118_v39 = vadd.f32 %v2049_v7, %v1769_v53  ;;  %v2748_v21 = vmul.f32 %v6078_v48, %v7666_v13  ;;  %v1033_v26 = vmul.f32 %v7552_v20, %v822_v24  ;;  %v752_v47 = vadd.f32 %v683_v57, %v403_v50  ;;  %v5968_v53 = vld [vmem:[%s14001_s0 + $0x3b2] sm:$0xff] }
 0x1b1   :  { %6489 = vmatpush3.bf16.msra.mxu1 %v3546_v30  ;;  %v753_v54 = vadd.f32 %v684_v44, %v404_v40  ;;  %v1382_v46 = vmul.f32 %v5825_v12, %v7580_v32  ;;  %v1383_v8 = vmul.f32 %v5826_v60, %v7580_v32  ;;  %v2467_v7 = vadd.f32 %v2398_v61, %v2117_v63  ;;  %v6038_v61 = vld [vmem:[%s14001_s0 + $0x5d0] sm:$0xff] }
 0x1b2   :  { %v2468_v14 = vadd.f32 %v2399_v16, %v2118_v39  ;;  %v3096_v48 = vmul.f32 %v6148_v11, %v7685_v28  ;;  %v3097_v24 = vmul.f32 %v6149_v38, %v7685_v28  ;;  %v1101_v57 = vadd.f32 %v1032_v0, %v752_v47  ;;  %v6039_v16 = vld [vmem:[%s14001_s0 + $0x5d8] sm:$0xff]  ;;  %v75_v0 = vld [vmem:[%s14001_s0] sm:$0xff] }
 0x1b3   :  { %v1102_v44 = vadd.f32 %v1033_v26, %v753_v54  ;;  %v1731_v12 = vmul.f32 %v5896_v37, %v7601_v41  ;;  %v1732_v60 = vmul.f32 %v5897_v5, %v7601_v41  ;;  %v10753_v30 = vmul.f32 %v10575_v22, %v7697_v34  ;;  %v6109_v40 = vld [vmem:[%s14001_s0 + $0x5d1] sm:$0xff] }
 0x1b4   :  { %v10757_v11 = vmul.f32 %v10580_v58, %v7697_v34  ;;  %v2816_v38 = vadd.f32 %v2747_v27, %v2467_v7  ;;  %v2817_v50 = vadd.f32 %v2748_v21, %v2468_v14  ;;  %v1451_v63 = vadd.f32 %v1382_v46, %v1101_v57  ;;  %v6110_v58 = vld [vmem:[%s14001_s0 + $0x5d9] sm:$0xff]  ;;  %v76_v27 = vld [vmem:[%s14001_s0 + $0x8] sm:$0xff] }
 0x1b5   :  { %14285 = vst [vmem:[#allocation281_spill] sm:$0xff] %v10753_v30  ;;  %v1452_v39 = vadd.f32 %v1383_v8, %v1102_v44  ;;  %v2080_v26 = vmul.f32 %v5967_v25, %v7624_v52  ;;  %v2081_v22 = vmul.f32 %v5968_v53, %v7624_v52  ;;  %v2430_v5 = vmul.f32 %v6038_v61, %v7646_v62  ;;  %v6180_v54 = vld [vmem:[%s14001_s0 + $0x5d2] sm:$0xff]  ;;  %v424_v25 = vld [vmem:[%s14001_s0 + $0x1] sm:$0xff] }
 0x1b6   :  { %14286 = vst [vmem:[#allocation282_spill] sm:$0xff] %v10757_v11  ;;  %v3165_v21 = vadd.f32 %v3096_v48, %v2816_v38  ;;  %v3166_v37 = vadd.f32 %v3097_v24, %v2817_v50  ;;  %v2431_v47 = vmul.f32 %v6039_v16, %v7646_v62  ;;  %v1800_v46 = vadd.f32 %v1731_v12, %v1451_v63  ;;  %v6181_v57 = vld [vmem:[%s14001_s0 + $0x5da] sm:$0xff]  ;;  %v425_v12 = vld [vmem:[%s14001_s0 + $0x9] sm:$0xff] }
 0x1b7   :  { %v1801_v8 = vadd.f32 %v1732_v60, %v1452_v39  ;;  %v2779_v7 = vmul.f32 %v6109_v40, %v7666_v13  ;;  %v286_v14 = vmul.f32 %v7509_v3, %v75_v0  ;;  %v2780_v53 = vmul.f32 %v6110_v58, %v7666_v13  ;;  %v773_v50 = vld [vmem:[%s14001_s0 + $0x2] sm:$0xff]  ;;  %v774_v11 = vld [vmem:[%s14001_s0 + $0xa] sm:$0xff] }
 0x1b8   :  { %v3407_v48 = vmul.f32 0.01, %v3165_v21  ;;  %v3408_v24 = vmul.f32 0.01, %v3166_v37  ;;  %v287_v44 = vmul.f32 %v7509_v3, %v76_v27  ;;  %v2149_v60 = vadd.f32 %v2080_v26, %v1800_v46 }
 0x1b9   :  { %v2150_v61 = vadd.f32 %v2081_v22, %v1801_v8  ;;  %v3128_v16 = vmul.f32 %v6180_v54, %v7685_v28  ;;  %v355_v38 = vadd.f32 %v286_v14, %v7507_v2  ;;  %v635_v58 = vmul.f32 %v7527_v10, %v424_v25  ;;  %v5777_v8 = vld [vmem:[%s14001_s0 + $0x228] sm:$0xff] }
 0x1ba   :  { %v3476_v40 = vmax.f32 %v3165_v21, %v3407_v48  ;;  %v3477_v63 = vmax.f32 %v3166_v37, %v3408_v24  ;;  %v356_v39 = vadd.f32 %v287_v44, %v7507_v2  ;;  %v2499_v26 = vadd.f32 %v2430_v5, %v2149_v60  ;;  %v5778_v5 = vld [vmem:[%s14001_s0 + $0x230] sm:$0xff] }
 0x1bb   :  { %v2500_v22 = vadd.f32 %v2431_v47, %v2150_v61  ;;  %v3129_v54 = vmul.f32 %v6181_v57, %v7685_v28  ;;  %v636_v46 = vmul.f32 %v7527_v10, %v425_v12  ;;  %v10808_v21 = vmul.f32 %v10590_v42, %v7715_v51  ;;  %v5848_v60 = vld [vmem:[%s14001_s0 + $0x229] sm:$0xff] }
 0x1bc   :  { %v3537_v37 = vpack.c.bf16 %v3477_v63, %v3476_v40  ;;  %v704_v14 = vadd.f32 %v635_v58, %v355_v38  ;;  %v984_v48 = vmul.f32 %v7552_v20, %v773_v50  ;;  %v2848_v47 = vadd.f32 %v2779_v7, %v2499_v26  ;;  %v5849_v7 = vld [vmem:[%s14001_s0 + $0x231] sm:$0xff] }
 0x1bd   :  { %14287 = vst [vmem:[#allocation283_spill] sm:$0xff] %v10808_v21  ;;  %v2849_v24 = vadd.f32 %v2780_v53, %v2500_v22  ;;  %v705_v57 = vadd.f32 %v636_v46, %v356_v39  ;;  %v985_v44 = vmul.f32 %v7552_v20, %v774_v11  ;;  %v10820_v42 = vmul.f32 %v10595_v33, %v7715_v51  ;;  %v5919_v33 = vld [vmem:[%s14001_s0 + $0x22a] sm:$0xff] }
 0x1be   :  { %6390 = vmatprep.subr.bf16.mxu0 %v3537_v37  ;;  %v10823_v61 = vmul.f32 %v7519_v6, %v75_v0  ;;  %v1053_v38 = vadd.f32 %v984_v48, %v704_v14  ;;  %v1334_v40 = vmul.f32 %v5777_v8, %v7580_v32  ;;  %v3197_v53 = vadd.f32 %v3128_v16, %v2848_v47  ;;  %v5920_v16 = vld [vmem:[%s14001_s0 + $0x232] sm:$0xff] }
 0x1bf   :  { %14288 = vst [vmem:[#allocation284_spill] sm:$0xff] %v10820_v42  ;;  %v3198_v63 = vadd.f32 %v3129_v54, %v2849_v24  ;;  %v1054_v39 = vadd.f32 %v985_v44, %v705_v57  ;;  %v1335_v58 = vmul.f32 %v5778_v5, %v7580_v32  ;;  %v10834_v26 = vmul.f32 %v7519_v6, %v76_v27  ;;  %v5990_v27 = vld [vmem:[%s14001_s0 + $0x450] sm:$0xff]  ;;  %v5991_v44 = vld [vmem:[%s14001_s0 + $0x458] sm:$0xff] }
 0x1c0   :  { %v10837_v0 = vmul.f32 %v7525_v9, %v424_v25  ;;  %v1403_v22 = vadd.f32 %v1334_v40, %v1053_v38  ;;  %v1683_v46 = vmul.f32 %v5848_v60, %v7601_v41  ;;  %v3439_v54 = vmul.f32 0.01, %v3197_v53 }
 0x1c1   :  { %v3440_v37 = vmul.f32 0.01, %v3198_v63  ;;  %v1404_v14 = vadd.f32 %v1335_v58, %v1054_v39  ;;  %v1684_v48 = vmul.f32 %v5849_v7, %v7601_v41  ;;  %v10848_v47 = vmul.f32 %v7525_v9, %v425_v12  ;;  %v6061_v12 = vld [vmem:[%s14001_s0 + $0x451] sm:$0xff] }
 0x1c2   :  { %v10851_v25 = vmul.f32 %v7594_v36, %v773_v50  ;;  %v1752_v24 = vadd.f32 %v1683_v46, %v1403_v22  ;;  %v2032_v57 = vmul.f32 %v5919_v33, %v7624_v52  ;;  %v3508_v38 = vmax.f32 %v3197_v53, %v3439_v54  ;;  %v6062_v50 = vld [vmem:[%s14001_s0 + $0x459] sm:$0xff] }
 0x1c3   :  { %v3509_v40 = vmax.f32 %v3198_v63, %v3440_v37  ;;  %v1753_v39 = vadd.f32 %v1684_v48, %v1404_v14  ;;  %v2033_v58 = vmul.f32 %v5920_v16, %v7624_v52  ;;  %v10865_v22 = vmul.f32 %v7594_v36, %v774_v11  ;;  %v6132_v63 = vld [vmem:[%s14001_s0 + $0x452] sm:$0xff]  ;;  %v6133_v11 = vld [vmem:[%s14001_s0 + $0x45a] sm:$0xff] }
 0x1c4   :  { %v10868_v46 = vmul.f32 %v5777_v8, %v7613_v45  ;;  %v2101_v42 = vadd.f32 %v2032_v57, %v1752_v24  ;;  %v2382_v53 = vmul.f32 %v5990_v27, %v7646_v62  ;;  %v10875_v37 = vmul.f32 %v5778_v5, %v7613_v45  ;;  %v107_v5 = vld [vmem:[%s14001_s0 + $0x100] sm:$0xff] }
 0x1c5   :  { %v3553_v54 = vpack.c.bf16 %v3509_v40, %v3508_v38  ;;  %v2102_v14 = vadd.f32 %v2033_v58, %v1753_v39  ;;  %v2383_v48 = vmul.f32 %v5991_v44, %v7646_v62  ;;  %v10882_v8 = vmul.f32 %v5848_v60, %v7636_v56  ;;  %v108_v38 = vld [vmem:[%s14001_s0 + $0x108] sm:$0xff] }
 0x1c6   :  { %14289 = vst [vmem:[#allocation285_spill] sm:$0xff] %v10868_v46  ;;  %14290 = vst [vmem:[#allocation286_spill] sm:$0xff] %v10875_v37  ;;  %v2451_v24 = vadd.f32 %v2382_v53, %v2101_v42  ;;  %v2731_v57 = vmul.f32 %v6061_v12, %v7666_v13  ;;  %v2732_v21 = vmul.f32 %v6062_v50, %v7666_v13  ;;  %v456_v58 = vld [vmem:[%s14001_s0 + $0x101] sm:$0xff]  ;;  %v457_v53 = vld [vmem:[%s14001_s0 + $0x109] sm:$0xff] }
 0x1c7   :  { %14291 = vst [vmem:[#allocation287_spill] sm:$0xff] %v10882_v8  ;;  %6490 = vmatprep.subr.bf16.mxu1 %v3553_v54  ;;  %v10893_v40 = vmul.f32 %v5849_v7, %v7636_v56  ;;  %v10896_v60 = vmul.f32 %v5919_v33, %v7658_v4  ;;  %v2452_v42 = vadd.f32 %v2383_v48, %v2102_v14  ;;  %v805_v8 = vld [vmem:[%s14001_s0 + $0x102] sm:$0xff] }
 0x1c8   :  { %v3080_v39 = vmul.f32 %v6132_v63, %v7685_v28  ;;  %v10906_v30 = vmul.f32 %v5920_v16, %v7658_v4  ;;  %v10909_v7 = vmul.f32 %v5990_v27, %v7678_v17  ;;  %v2800_v54 = vadd.f32 %v2731_v57, %v2451_v24  ;;  %v806_v16 = vld [vmem:[%s14001_s0 + $0x10a] sm:$0xff] }
 0x1c9   :  { %14292 = vst [vmem:[#allocation288_spill] sm:$0xff] %v10893_v40  ;;  %14293 = vst [vmem:[#allocation289_spill] sm:$0xff] %v10896_v60  ;;  %v3081_v33 = vmul.f32 %v6133_v11, %v7685_v28  ;;  %v10913_v14 = vmul.f32 %v5991_v44, %v7678_v17  ;;  %v2801_v48 = vadd.f32 %v2732_v21, %v2452_v42 }
 0x1ca   :  { %14294 = vst [vmem:[#allocation290_spill] sm:$0xff] %v10906_v30  ;;  %14295 = vst [vmem:[#allocation291_spill] sm:$0xff] %v10909_v7  ;;  %v318_v60 = vmul.f32 %v7509_v3, %v107_v5  ;;  %v319_v40 = vmul.f32 %v7509_v3, %v108_v38  ;;  %v10924_v27 = vmul.f32 %v6061_v12, %v7697_v34  ;;  %v5809_v30 = vld [vmem:[%s14001_s0 + $0x328] sm:$0xff]  ;;  %v5810_v12 = vld [vmem:[%s14001_s0 + $0x330] sm:$0xff] }
 0x1cb   :  { %14296 = vst [vmem:[#allocation292_spill] sm:$0xff] %v10913_v14  ;;  %v3149_v24 = vadd.f32 %v3080_v39, %v2800_v54  ;;  %v667_v44 = vmul.f32 %v7527_v10, %v456_v58  ;;  %v668_v21 = vmul.f32 %v7527_v10, %v457_v53  ;;  %v10929_v57 = vmul.f32 %v6062_v50, %v7697_v34 }
 0x1cc   :  { %14297 = vst [vmem:[#allocation293_spill] sm:$0xff] %v10924_v27  ;;  %v3150_v42 = vadd.f32 %v3081_v33, %v2801_v48  ;;  %v387_v14 = vadd.f32 %v318_v60, %v7507_v2  ;;  %v388_v7 = vadd.f32 %v319_v40, %v7507_v2  ;;  %v10940_v39 = vmul.f32 %v6132_v63, %v7715_v51  ;;  %v5880_v27 = vld [vmem:[%s14001_s0 + $0x329] sm:$0xff]  ;;  %v5881_v63 = vld [vmem:[%s14001_s0 + $0x331] sm:$0xff] }
 0x1cd   :  { %14298 = vst [vmem:[#allocation294_spill] sm:$0xff] %v10929_v57  ;;  %v3391_v54 = vmul.f32 0.01, %v3149_v24  ;;  %v1016_v50 = vmul.f32 %v7552_v20, %v805_v8  ;;  %v1017_v33 = vmul.f32 %v7552_v20, %v806_v16  ;;  %v10945_v60 = vmul.f32 %v6133_v11, %v7715_v51 }
 0x1ce   :  { %14299 = vst [vmem:[#allocation295_spill] sm:$0xff] %v10940_v39  ;;  %v3392_v40 = vmul.f32 0.01, %v3150_v42  ;;  %v736_v48 = vadd.f32 %v667_v44, %v387_v14  ;;  %v737_v57 = vadd.f32 %v668_v21, %v388_v7  ;;  %v10954_v37 = vmul.f32 %v7519_v6, %v107_v5  ;;  %v5952_v5 = vld [vmem:[%s14001_s0 + $0x332] sm:$0xff] }
 0x1cf   :  { %14300 = vst [vmem:[#allocation296_spill] sm:$0xff] %v10945_v60  ;;  %v3460_v39 = vmax.f32 %v3149_v24, %v3391_v54  ;;  %v1366_v46 = vmul.f32 %v5809_v30, %v7580_v32  ;;  %v1367_v11 = vmul.f32 %v5810_v12, %v7580_v32  ;;  %v10961_v7 = vmul.f32 %v7519_v6, %v108_v38  ;;  %v5951_v60 = vld [vmem:[%s14001_s0 + $0x32a] sm:$0xff] }
 0x1d0   :  { %14301 = vst [vmem:[#allocation297_spill] sm:$0xff] %v10954_v37  ;;  %v3461_v14 = vmax.f32 %v3150_v42, %v3392_v40  ;;  %v1085_v44 = vadd.f32 %v1016_v50, %v736_v48  ;;  %v1086_v21 = vadd.f32 %v1017_v33, %v737_v57  ;;  %v10970_v24 = vmul.f32 %v7525_v9, %v456_v58  ;;  %v6022_v57 = vld [vmem:[%s14001_s0 + $0x550] sm:$0xff]  ;;  %v6023_v50 = vld [vmem:[%s14001_s0 + $0x558] sm:$0xff] }
 0x1d1   :  { %14302 = vst [vmem:[#allocation298_spill] sm:$0xff] %v10961_v7  ;;  %v10973_v54 = vmul.f32 %v7525_v9, %v457_v53  ;;  %v1715_v42 = vmul.f32 %v5880_v27, %v7601_v41  ;;  %v1716_v38 = vmul.f32 %v5881_v63, %v7601_v41  ;;  %v10984_v40 = vmul.f32 %v7594_v36, %v805_v8  ;;  %v6093_v53 = vld [vmem:[%s14001_s0 + $0x551] sm:$0xff]  ;;  %v6094_v8 = vld [vmem:[%s14001_s0 + $0x559] sm:$0xff] }
 0x1d2   :  { %14303 = vst [vmem:[#allocation299_spill] sm:$0xff] %v10970_v24  ;;  %v3529_v33 = vpack.c.bf16 %v3461_v14, %v3460_v39  ;;  %v1435_v58 = vadd.f32 %v1366_v46, %v1085_v44  ;;  %v1436_v48 = vadd.f32 %v1367_v11, %v1086_v21  ;;  %v10993_v24 = vmul.f32 %v5809_v30, %v7613_v45  ;;  %v6164_v46 = vld [vmem:[%s14001_s0 + $0x552] sm:$0xff]  ;;  %v6165_v44 = vld [vmem:[%s14001_s0 + $0x55a] sm:$0xff] }
 0x1d3   :  { %14304 = vst [vmem:[#allocation300_spill] sm:$0xff] %v10973_v54  ;;  %v10990_v54 = vmul.f32 %v7594_v36, %v806_v16  ;;  %v2064_v7 = vmul.f32 %v5951_v60, %v7624_v52  ;;  %v2065_v37 = vmul.f32 %v5952_v5, %v7624_v52  ;;  %v6886_v16 = vld [vmem:[%s14004_s3] ss:$20 sps:$4 sm:$0xff]   ;;  %v2414_v11 = vmul.f32 %v6022_v57, %v7646_v62 }
 0x1d4   :  { %14306 = vst [vmem:[#allocation302_spill] sm:$0xff] %v10993_v24  ;;  %6391 = vmatpush3.bf16.msra.mxu0 %v3529_v33  ;;  %v1784_v39 = vadd.f32 %v1715_v42, %v1435_v58  ;;  %v1785_v30 = vadd.f32 %v1716_v38, %v1436_v48  ;;  %v2415_v14 = vmul.f32 %v6023_v50, %v7646_v62  ;;  %v6892_v21 = vld [vmem:[%s14004_s3 + $0x2c] ss:$20 sps:$4 sm:$0xff]  }
 0x1d5   :  { %14305 = vst [vmem:[#allocation301_spill] sm:$0xff] %v10990_v54  ;;  %v143_v24 = vld [vmem:[%s14001_s0 + $0x220] sm:$0xf]  ;;  %v11018_v42 = vmul.f32 %v5810_v12, %v7613_v45  ;;  %v11021_v38 = vmul.f32 %v5880_v27, %v7636_v56  ;;  %v11024_v57 = vmul.f32 %v5881_v63, %v7636_v56  ;;  %v11027_v50 = vmul.f32 %v5951_v60, %v7658_v4 }
 0x1d6   :  { %v2133_v33 = vadd.f32 %v2064_v7, %v1784_v39  ;;  %v2134_v58 = vadd.f32 %v2065_v37, %v1785_v30  ;;  %v2763_v48 = vmul.f32 %v6093_v53, %v7666_v13  ;;  %v2764_v54 = vmul.f32 %v6094_v8, %v7666_v13  ;;  %v492_v12 = vld [vmem:[%s14001_s0 + $0x221] sm:$0xf] }
 0x1d7   :  { %14307 = vst [vmem:[#allocation303_spill] sm:$0xff] %v11024_v57  ;;  %14308 = vst [vmem:[#allocation304_spill] sm:$0xff] %v11027_v50  ;;  %v841_v27 = vld [vmem:[%s14001_s0 + $0x222] sm:$0xf]  ;;  %v3112_v63 = vmul.f32 %v6164_v46, %v7685_v28  ;;  %v3113_v57 = vmul.f32 %v6165_v44, %v7685_v28  ;;  %4162 = vmatmul.mubr.bf16.vlgmr.msra.gmra.mxu0 %v6886_v16  ;;  %v11040_v60 = vstv %s10958_s28  ;;  %v5845_v46 = vld [vmem:[%s14001_s0 + $0x448] sm:$0xf] }
 0x1d8   :  { %v354_v37 = vmul.f32 %v7509_v3, %v143_v24  ;;  %v2483_v7 = vadd.f32 %v2414_v11, %v2133_v33  ;;  %v2484_v53 = vadd.f32 %v2415_v14, %v2134_v58  ;;  %4169 = vmatprep.mubr.bf16.mxu0 %v6892_v21  ;;  %v245_v8 = vadd.f32 %v7547_v18, %v11040_v60  ;;  %v5916_v16 = vld [vmem:[%s14001_s0 + $0x449] sm:$0xf]  ;;  %v6058_v58 = vld [vmem:[%s14001_s0 + $0x670] sm:$0xf] }
 0x1d9   :  { %v246_v39 = vadd.f32 %v7550_v19, %v11040_v60  ;;  %v5987_v24 = vld [vmem:[%s14001_s0 + $0x44a] sm:$0xf]  ;;  %v11057_v30 = vmul.f32 %v5952_v5, %v7658_v4  ;;  %v703_v11 = vmul.f32 %v7527_v10, %v492_v12  ;;  %v1052_v19 = vmul.f32 %v7552_v20, %v841_v27  ;;  %v6129_v5 = vld [vmem:[%s14001_s0 + $0x671] sm:$0xf] }
 0x1da   :  { %v423_v18 = vadd.f32 %v354_v37, %v7507_v2  ;;  %v2832_v14 = vadd.f32 %v2763_v48, %v2483_v7  ;;  %v2833_v44 = vadd.f32 %v2764_v54, %v2484_v53  ;;  %v594_v21 = vadd.f32 %v7575_v29, %v245_v8  ;;  %v6200_v12 = vld [vmem:[%s14001_s0 + $0x672] sm:$0xf]  ;;  %v6896_v54 = vld [vmem:[%s14004_s3 + $0x28] ss:$20 sps:$4 sm:$0xff]  }
 0x1db   :  { %14309 = vst [vmem:[#allocation305_spill] sm:$0xff] %v11057_v30  ;;  %v595_v33 = vadd.f32 %v7591_v35, %v246_v39  ;;  %v1402_v29 = vmul.f32 %v5845_v46, %v7580_v32  ;;  %v1751_v35 = vmul.f32 %v5916_v16, %v7601_v41  ;;  %v2100_v27 = vmul.f32 %v5987_v24, %v7624_v52  ;;  %v6898_v53 = vld [vmem:[%s14004_s3 + $0x54] ss:$20 sps:$4 sm:$0xff]  }
 0x1dc   :  { %v772_v48 = vadd.f32 %v703_v11, %v423_v18  ;;  %v3181_v37 = vadd.f32 %v3112_v63, %v2832_v14  ;;  %v3182_v7 = vadd.f32 %v3113_v57, %v2833_v44  ;;  %v943_v8 = vadd.f32 %v7621_v49, %v594_v21 }
 0x1dd   :  { %v944_v39 = vadd.f32 %v7633_v55, %v595_v33  ;;  %v2450_v50 = vmul.f32 %v6058_v58, %v7646_v62  ;;  %v2799_v18 = vmul.f32 %v6129_v5, %v7666_v13  ;;  %v3148_v46 = vmul.f32 %v6200_v12, %v7685_v28  ;;  %v14312_v5 = vld [vmem:[#allocation37_spill] sm:$0xff] }
 0x1de   :  { %v1121_v30 = vadd.f32 %v1052_v19, %v772_v48  ;;  %v3423_v16 = vmul.f32 0.01, %v3181_v37  ;;  %v3424_v11 = vmul.f32 0.01, %v3182_v7  ;;  %v1293_v63 = vadd.f32 %v7643_v59, %v943_v8  ;;  %v7093_v19 = vld [vmem:[%s14001_s0 + $0xe0] sm:$0xff]  ;;  %v14310_v59 = vld [vmem:[#allocation11_spill] sm:$0xff] }
 0x1df   :  { %v1294_v57 = vadd.f32 %v7655_v1, %v944_v39  ;;  %4170 = vmatmul.mubr.bf16.gmra.mxu0 %v6896_v54  ;;  %v229_v49 = vadd.f32 %v7862_v31, %v11040_v60  ;;  %v230_v55 = vadd.f32 %v7873_v43, %v11040_v60  ;;  %v174_v14 = vmul.f32 %v7093_v19, %v7519_v6  ;;  %v14311_v1 = vld [vmem:[#allocation12_spill] sm:$0xff]  ;;  %v14313_v31 = vld [vmem:[#allocation38_spill] sm:$0xff]  ;;  %v14314_v8 = vld [vmem:[#allocation13_spill] sm:$0xff] }
 0x1e0   :  { %v1471_v24 = vadd.f32 %v1402_v29, %v1121_v30  ;;  %v3492_v44 = vmax.f32 %v3181_v37, %v3423_v16  ;;  %v3493_v21 = vmax.f32 %v3182_v7, %v3424_v11  ;;  %4177 = vmatprep.mubr.bf16.mxu0 %v6898_v53  ;;  %v1642_v33 = vadd.f32 %v14310_v59, %v1293_v63  ;;  %v7094_v43 = vld [vmem:[%s14001_s0 + $0xe8] sm:$0xff]  ;;  %v6902_v16 = vld [vmem:[%s14004_s3 + $0x50] ss:$20 sps:$4 sm:$0xff]   ;;  %v14319_v59 = vld [vmem:[#allocation16_spill] sm:$0xff] }
 0x1e1   :  { %v1643_v58 = vadd.f32 %v14311_v1, %v1294_v57  ;;  %v578_v12 = vadd.f32 %v14312_v5, %v229_v49  ;;  %v579_v54 = vadd.f32 %v14313_v31, %v230_v55  ;;  %v175_v48 = vmul.f32 %v7094_v43, %v7519_v6  ;;  %v14315_v7 = vld [vmem:[#allocation14_spill] sm:$0xff]  ;;  %v14316_v63 = vld [vmem:[#allocation39_spill] sm:$0xff] }
 0x1e2   :  { %v1820_v30 = vadd.f32 %v1751_v35, %v1471_v24  ;;  %v3545_v29 = vpack.c.bf16 %v3493_v21, %v3492_v44  ;;  %v1991_v37 = vadd.f32 %v14314_v8, %v1642_v33  ;;  %v243_v39 = vadd.f32 %v174_v14, %v11040_v60  ;;  %v6889_v35 = vld [vmem:[%s14004_s3 + $0x8] ss:$20 sps:$4 sm:$0xff]   ;;  %v14318_v44 = vld [vmem:[#allocation15_spill] sm:$0xff]  ;;  %v14322_v8 = vld [vmem:[#allocation17_spill] sm:$0xff] }
 0x1e3   :  { %v1992_v53 = vadd.f32 %v14315_v7, %v1643_v58  ;;  %v927_v57 = vadd.f32 %v14316_v63, %v578_v12  ;;  %v14317_v24 = vld [vmem:[#allocation40_spill] sm:$0xff]  ;;  %v244_v55 = vadd.f32 %v175_v48, %v11040_v60  ;;  %v6894_v19 = vld [vmem:[%s14004_s3 + $0x34] ss:$20 sps:$4 sm:$0xff]   ;;  %v14320_v12 = vld [vmem:[#allocation41_spill] sm:$0xff] }
 0x1e4   :  { %v2169_v11 = vadd.f32 %v2100_v27, %v1820_v30  ;;  %v928_v49 = vadd.f32 %v14317_v24, %v579_v54  ;;  %6491 = vmatpush3.bf16.msra.mxu1 %v3545_v29  ;;  %v6904_v14 = vld [vmem:[%s14004_s3 + $0x7c] ss:$20 sps:$4 sm:$0xff]   ;;  %v2341_v21 = vadd.f32 %v14318_v44, %v1991_v37  ;;  %v7095_v27 = vld [vmem:[%s14001_s0 + $0xe1] sm:$0xff] }
 0x1e5   :  { %v2342_v33 = vadd.f32 %v14319_v59, %v1992_v53  ;;  %v523_v1 = vmul.f32 %v7095_v27, %v7525_v9  ;;  %v7096_v58 = vld [vmem:[%s14001_s0 + $0xe9] sm:$0xff]  ;;  %v1277_v31 = vadd.f32 %v14320_v12, %v927_v57  ;;  %v14325_v57 = vld [vmem:[#allocation44_spill] sm:$0xff] }
 0x1e6   :  { %v524_v30 = vmul.f32 %v7096_v58, %v7525_v9  ;;  %v2519_v5 = vadd.f32 %v2450_v50, %v2169_v11  ;;  %v14321_v54 = vld [vmem:[#allocation42_spill] sm:$0xff]  ;;  %v2690_v37 = vadd.f32 %v14322_v8, %v2341_v21  ;;  %v14324_v50 = vld [vmem:[#allocation43_spill] sm:$0xff]  ;;  %v14327_v58 = vld [vmem:[#allocation20_spill] sm:$0xff] }
 0x1e7   :  { %v1278_v43 = vadd.f32 %v14321_v54, %v928_v49  ;;  %v7097_v48 = vld [vmem:[%s14001_s0 + $0xe2] sm:$0xff]  ;;  %v592_v63 = vadd.f32 %v523_v1, %v243_v39  ;;  %4307 = vmatmul.mubr.bf16.vlgmr.msra.gmra.mxu1 %v6889_v35  ;;  %4178 = vmatmul.mubr.bf16.gmra.mxu0 %v6902_v16  ;;  %v1626_v11 = vadd.f32 %v14324_v50, %v1277_v31  ;;  %v14326_v49 = vld [vmem:[#allocation19_spill] sm:$0xff]  ;;  %v14331_v8 = vld [vmem:[#allocation48_spill] sm:$0xff] }
 0x1e8   :  { %v872_v29 = vmul.f32 %v7097_v48, %v7594_v36  ;;  %v14323_v7 = vld [vmem:[#allocation18_spill] sm:$0xff]  ;;  %v593_v24 = vadd.f32 %v524_v30, %v244_v55  ;;  %v2868_v44 = vadd.f32 %v2799_v18, %v2519_v5  ;;  %4314 = vmatprep.mubr.bf16.mxu1 %v6894_v19  ;;  %4185 = vmatprep.mubr.bf16.mxu0 %v6904_v14  ;;  %v14328_v16 = vld [vmem:[#allocation45_spill] sm:$0xff]  ;;  %v14330_v48 = vld [vmem:[#allocation47_spill] sm:$0xff] }
 0x1e9   :  { %v2691_v53 = vadd.f32 %v14323_v7, %v2342_v33  ;;  %v1627_v59 = vadd.f32 %v14325_v57, %v1278_v43  ;;  %v3039_v27 = vadd.f32 %v14326_v49, %v2690_v37  ;;  %v7098_v21 = vld [vmem:[%s14001_s0 + $0xea] sm:$0xff]  ;;  %v1975_v18 = vadd.f32 %v14328_v16, %v1626_v11 }
 0x1ea   :  { %v873_v39 = vmul.f32 %v7098_v21, %v7594_v36  ;;  %v3217_v35 = vadd.f32 %v3148_v46, %v2868_v44  ;;  %v14329_v55 = vld [vmem:[#allocation46_spill] sm:$0xff]  ;;  %v941_v1 = vadd.f32 %v872_v29, %v592_v63  ;;  %v6897_v54 = vld [vmem:[%s14004_s3 + $0x30] ss:$20 sps:$4 sm:$0xff]  }
 0x1eb   :  { %v3040_v12 = vadd.f32 %v14327_v58, %v2691_v53  ;;  %v1976_v33 = vadd.f32 %v14329_v55, %v1627_v59  ;;  %v3248_v30 = vmul.f32 0.01, %v3039_v27  ;;  %v7099_v5 = vld [vmem:[%s14001_s0 + $0x308] sm:$0xff]  ;;  %v2325_v29 = vadd.f32 %v14330_v48, %v1975_v18  ;;  %v7100_v7 = vld [vmem:[%s14001_s0 + $0x310] sm:$0xff]  ;;  %v14332_v58 = vld [vmem:[#allocation49_spill] sm:$0xff] }
 0x1ec   :  { %v942_v14 = vadd.f32 %v873_v39, %v593_v24  ;;  %v1222_v31 = vmul.f32 %v7099_v5, %v7613_v45  ;;  %v6908_v46 = vld [vmem:[%s14004_s3 + $0x78] ss:$20 sps:$4 sm:$0xff]   ;;  %v3459_v43 = vmul.f32 0.01, %v3217_v35  ;;  %v1223_v53 = vmul.f32 %v7100_v7, %v7613_v45  ;;  %v6900_v63 = vld [vmem:[%s14004_s3 + $0x5c] ss:$20 sps:$4 sm:$0xff]  }
 0x1ed   :  { %v3249_v19 = vmul.f32 0.01, %v3040_v12  ;;  %v2326_v37 = vadd.f32 %v14331_v8, %v1976_v33  ;;  %v6910_v24 = vld [vmem:[%s14004_s3 + $0xa4] ss:$20 sps:$4 sm:$0xff]   ;;  %v3317_v44 = vmax.f32 %v3039_v27, %v3248_v30  ;;  %v7101_v57 = vld [vmem:[%s14001_s0 + $0x309] sm:$0xff]  ;;  %v2674_v21 = vadd.f32 %v14332_v58, %v2325_v29 }
 0x1ee   :  { %v1291_v11 = vadd.f32 %v1222_v31, %v941_v1  ;;  %v1571_v59 = vmul.f32 %v7101_v57, %v7636_v56  ;;  %v3528_v49 = vmax.f32 %v3217_v35, %v3459_v43  ;;  %v14333_v39 = vld [vmem:[#allocation50_spill] sm:$0xff]  ;;  %v1292_v18 = vadd.f32 %v1223_v53, %v942_v14  ;;  %v7102_v33 = vld [vmem:[%s14001_s0 + $0x311] sm:$0xff]  ;;  %v7108_v57 = vld [vmem:[%s14001_s0 + $0x539] sm:$0xff] }
 0x1ef   :  { %v3318_v50 = vmax.f32 %v3040_v12, %v3249_v19  ;;  %v2675_v16 = vadd.f32 %v14333_v39, %v2326_v37  ;;  %v1572_v27 = vmul.f32 %v7102_v33, %v7636_v56  ;;  %v7103_v1 = vld [vmem:[%s14001_s0 + $0x30a] sm:$0xff]  ;;  %4315 = vmatmul.mubr.bf16.gmra.mxu1 %v6897_v54  ;;  %4186 = vmatmul.mubr.bf16.gmra.mxu0 %v6908_v46  ;;  %v14335_v14 = vld [vmem:[#allocation52_spill] sm:$0xff]  ;;  %v6914_v58 = vld [vmem:[%s14004_s3 + $0xa0] ss:$20 sps:$4 sm:$0xff]  }
 0x1f0   :  { %v1640_v12 = vadd.f32 %v1571_v59, %v1291_v11  ;;  %v1920_v30 = vmul.f32 %v7103_v1, %v7658_v4  ;;  %v3563_v35 = vpack.c.bf16 %v3528_v49, %v3528_v49  ;;  %v14334_v19 = vld [vmem:[#allocation51_spill] sm:$0xff]  ;;  %4322 = vmatprep.mubr.bf16.mxu1 %v6900_v63  ;;  %4193 = vmatprep.mubr.bf16.mxu0 %v6910_v24  ;;  %v7106_v24 = vld [vmem:[%s14001_s0 + $0x538] sm:$0xff] }
 0x1f1   :  { %v3371_v55 = vpack.c.bf16 %v3318_v50, %v3317_v44  ;;  %v3023_v5 = vadd.f32 %v14334_v19, %v2674_v21  ;;  %v3024_v31 = vadd.f32 %v14335_v14, %v2675_v16  ;;  %v1641_v43 = vadd.f32 %v1572_v27, %v1292_v18  ;;  %v7104_v48 = vld [vmem:[%s14001_s0 + $0x312] sm:$0xff]  ;;  %v6916_v27 = vld [vmem:[%s14004_s3 + $0xcc] ss:$20 sps:$4 sm:$0xff]  }
 0x1f2   :  { %v1921_v29 = vmul.f32 %v7104_v48, %v7658_v4  ;;  %v1989_v8 = vadd.f32 %v1920_v30, %v1640_v12  ;;  %6878 = vmatprep.subr.msk.bf16.mxu0 %vm4125_vm0, %v3563_v35  ;;  %v4127_v37 = vsel %vm4125_vm0, %v3563_v35, 0  ;;  %v7105_v7 = vld [vmem:[%s14001_s0 + $0x530] sm:$0xff]  ;;  %v2271_v44 = vmul.f32 %v7106_v24, %v7678_v17  ;;  %v6903_v49 = vld [vmem:[%s14004_s3 + $0x58] ss:$20 sps:$4 sm:$0xff]  }
 0x1f3   :  { %6593 = vmatprep.subr.bf16.mxu1 %v3371_v55  ;;  %v3232_v54 = vmul.f32 0.01, %v3023_v5  ;;  %v3233_v46 = vmul.f32 0.01, %v3024_v31  ;;  %v2270_v53 = vmul.f32 %v7105_v7, %v7678_v17  ;;  %6811 = vmatpush3.bf16.msra.mxu0 %v4127_v37  ;;  %v7107_v50 = vld [vmem:[%s14001_s0 + $0x531] sm:$0xff]  ;;  %v2620_v59 = vmul.f32 %v7108_v57, %v7697_v34  ;;  %v7110_v1 = vld [vmem:[%s14001_s0 + $0x53a] sm:$0xff] }
 0x1f4   :  { %v1990_v63 = vadd.f32 %v1921_v29, %v1641_v43  ;;  %v2619_v11 = vmul.f32 %v7107_v50, %v7697_v34  ;;  %v7109_v18 = vld [vmem:[%s14001_s0 + $0x532] sm:$0xff]  ;;  %v2969_v30 = vmul.f32 %v7110_v1, %v7715_v51  ;;  %v14338_v37 = vld [vmem:[#allocation73_spill] sm:$0xff] }
 0x1f5   :  { %v3301_v21 = vmax.f32 %v3023_v5, %v3232_v54  ;;  %v3302_v39 = vmax.f32 %v3024_v31, %v3233_v46  ;;  %v2339_v16 = vadd.f32 %v2270_v53, %v1989_v8  ;;  %v2968_v55 = vmul.f32 %v7109_v18, %v7715_v51  ;;  %v6906_v33 = vld [vmem:[%s14004_s3 + $0x84] ss:$20 sps:$4 sm:$0xff]   ;;  %v14336_v35 = vld [vmem:[#allocation71_spill] sm:$0xff]  ;;  %v14339_v53 = vld [vmem:[#allocation74_spill] sm:$0xff] }
 0x1f6   :  { %v2340_v12 = vadd.f32 %v2271_v44, %v1990_v63  ;;  %v227_v19 = vadd.f32 %v14336_v35, %v11040_v60  ;;  %v14337_v5 = vld [vmem:[#allocation72_spill] sm:$0xff]  ;;  %v7111_v48 = vld [vmem:[%s14001_s0 + $0xd0] sm:$0xff] }
 0x1f7   :  { %v228_v14 = vadd.f32 %v14337_v5, %v11040_v60  ;;  %v3363_v31 = vpack.c.bf16 %v3302_v39, %v3301_v21  ;;  %v2688_v43 = vadd.f32 %v2619_v11, %v2339_v16  ;;  %v172_v29 = vmul.f32 %v7111_v48, %v7519_v6  ;;  %v7112_v8 = vld [vmem:[%s14001_s0 + $0xd8] sm:$0xff]  ;;  %4323 = vmatmul.mubr.bf16.gmra.mxu1 %v6903_v49  ;;  %v14340_v21 = vld [vmem:[#allocation75_spill] sm:$0xff] }
 0x1f8   :  { %v173_v54 = vmul.f32 %v7112_v8, %v7519_v6  ;;  %v2689_v46 = vadd.f32 %v2620_v59, %v2340_v12  ;;  %v576_v7 = vadd.f32 %v14338_v37, %v227_v19  ;;  %v7113_v24 = vld [vmem:[%s14001_s0 + $0xd1] sm:$0xff]  ;;  %4194 = vmatmul.mubr.bf16.gmra.mxu0 %v6914_v58  ;;  %4330 = vmatprep.mubr.bf16.mxu1 %v6906_v33  ;;  %v7114_v1 = vld [vmem:[%s14001_s0 + $0xd9] sm:$0xff]  ;;  %v14343_v19 = vld [vmem:[#allocation78_spill] sm:$0xff] }
 0x1f9   :  { %v577_v63 = vadd.f32 %v14339_v53, %v228_v14  ;;  %v521_v44 = vmul.f32 %v7113_v24, %v7525_v9  ;;  %v3037_v50 = vadd.f32 %v2968_v55, %v2688_v43  ;;  %v241_v11 = vadd.f32 %v172_v29, %v11040_v60  ;;  %4201 = vmatprep.mubr.bf16.mxu0 %v6916_v27  ;;  %v14341_v16 = vld [vmem:[#allocation76_spill] sm:$0xff]  ;;  %v6909_v43 = vld [vmem:[%s14004_s3 + $0x80] ss:$20 sps:$4 sm:$0xff]  }
 0x1fa   :  { %v242_v57 = vadd.f32 %v173_v54, %v11040_v60  ;;  %v3038_v59 = vadd.f32 %v2969_v30, %v2689_v46  ;;  %v925_v39 = vadd.f32 %v14340_v21, %v576_v7  ;;  %6594 = vmatpush3.bf16.msra.mxu1 %v3363_v31  ;;  %v522_v49 = vmul.f32 %v7114_v1, %v7525_v9  ;;  %v7115_v55 = vld [vmem:[%s14001_s0 + $0xd2] sm:$0xff]  ;;  %v14342_v30 = vld [vmem:[#allocation77_spill] sm:$0xff]  ;;  %v6920_v48 = vld [vmem:[%s14004_s3 + $0xc8] ss:$20 sps:$4 sm:$0xff]  }
 0x1fb   :  { %v926_v18 = vadd.f32 %v14341_v16, %v577_v63  ;;  %v3246_v12 = vmul.f32 0.01, %v3037_v50  ;;  %v590_v58 = vadd.f32 %v521_v44, %v241_v11  ;;  %v870_v33 = vmul.f32 %v7115_v55, %v7594_v36  ;;  %v7116_v14 = vld [vmem:[%s14001_s0 + $0xda] sm:$0xff]  ;;  %v6922_v53 = vld [vmem:[%s14004_s3 + $0xf4] ss:$20 sps:$4 sm:$0xff]  }
 0x1fc   :  { %v3247_v27 = vmul.f32 0.01, %v3038_v59  ;;  %v1275_v35 = vadd.f32 %v14342_v30, %v925_v39  ;;  %v871_v31 = vmul.f32 %v7116_v14, %v7594_v36  ;;  %v591_v8 = vadd.f32 %v522_v49, %v242_v57  ;;  %v7117_v46 = vld [vmem:[%s14001_s0 + $0x2f8] sm:$0xff]  ;;  %v6912_v7 = vld [vmem:[%s14004_s3 + $0xac] ss:$20 sps:$4 sm:$0xff]   ;;  %v14344_v24 = vld [vmem:[#allocation79_spill] sm:$0xff] }
 0x1fd   :  { %v1276_v5 = vadd.f32 %v14343_v19, %v926_v18  ;;  %v3315_v29 = vmax.f32 %v3037_v50, %v3246_v12  ;;  %v939_v54 = vadd.f32 %v870_v33, %v590_v58  ;;  %v1220_v37 = vmul.f32 %v7117_v46, %v7613_v45  ;;  %v14345_v50 = vld [vmem:[#allocation80_spill] sm:$0xff]  ;;  %v7118_v57 = vld [vmem:[%s14001_s0 + $0x300] sm:$0xff]  ;;  %v14347_v33 = vld [vmem:[#allocation82_spill] sm:$0xff] }
 0x1fe   :  { %v3316_v63 = vmax.f32 %v3038_v59, %v3247_v27  ;;  %v1624_v44 = vadd.f32 %v14344_v24, %v1275_v35  ;;  %v1221_v21 = vmul.f32 %v7118_v57, %v7613_v45  ;;  %v940_v39 = vadd.f32 %v871_v31, %v591_v8  ;;  %v7119_v18 = vld [vmem:[%s14001_s0 + $0x2f9] sm:$0xff]  ;;  %v7120_v59 = vld [vmem:[%s14001_s0 + $0x301] sm:$0xff] }
 0x1ff   :  { %v1625_v11 = vadd.f32 %v14345_v50, %v1276_v5  ;;  %v1289_v16 = vadd.f32 %v1220_v37, %v939_v54  ;;  %v1569_v12 = vmul.f32 %v7119_v18, %v7636_v56  ;;  %v1570_v1 = vmul.f32 %v7120_v59, %v7636_v56  ;;  %v14346_v58 = vld [vmem:[#allocation81_spill] sm:$0xff]  ;;  %4331 = vmatmul.mubr.bf16.gmra.mxu1 %v6909_v43  ;;  %v14349_v54 = vld [vmem:[#allocation84_spill] sm:$0xff]  ;;  %v7124_v24 = vld [vmem:[%s14001_s0 + $0x528] sm:$0xff] }
 0x200   :  { %v3370_v49 = vpack.c.bf16 %v3316_v63, %v3315_v29  ;;  %v1973_v55 = vadd.f32 %v14346_v58, %v1624_v44  ;;  %v7121_v30 = vld [vmem:[%s14001_s0 + $0x2fa] sm:$0xff]  ;;  %4202 = vmatmul.mubr.bf16.gmra.mxu0 %v6920_v48  ;;  %v1290_v19 = vadd.f32 %v1221_v21, %v940_v39  ;;  %v7122_v14 = vld [vmem:[%s14001_s0 + $0x302] sm:$0xff]  ;;  %4338 = vmatprep.mubr.bf16.mxu1 %v6912_v7  ;;  %v14348_v29 = vld [vmem:[#allocation83_spill] sm:$0xff] }
 0x201   :  { %v1974_v27 = vadd.f32 %v14347_v33, %v1625_v11  ;;  %v1918_v35 = vmul.f32 %v7121_v30, %v7658_v4  ;;  %v1638_v5 = vadd.f32 %v1569_v12, %v1289_v16  ;;  %v1919_v31 = vmul.f32 %v7122_v14, %v7658_v4  ;;  %4209 = vmatprep.mubr.bf16.mxu0 %v6922_v53  ;;  %v7123_v37 = vld [vmem:[%s14001_s0 + $0x520] sm:$0xff]  ;;  %v14351_v57 = vld [vmem:[#allocation86_spill] sm:$0xff] }
 0x202   :  { %v2323_v8 = vadd.f32 %v14348_v29, %v1973_v55  ;;  %v2268_v43 = vmul.f32 %v7123_v37, %v7678_v17  ;;  %6595 = vmatprep.subr.bf16.mxu1 %v3370_v49  ;;  %v1639_v48 = vadd.f32 %v1570_v1, %v1290_v19  ;;  %v2269_v7 = vmul.f32 %v7124_v24, %v7678_v17  ;;  %v7125_v53 = vld [vmem:[%s14001_s0 + $0x521] sm:$0xff]  ;;  %v7126_v39 = vld [vmem:[%s14001_s0 + $0x529] sm:$0xff] }
 0x203   :  { %v2324_v46 = vadd.f32 %v14349_v54, %v1974_v27  ;;  %v1987_v63 = vadd.f32 %v1918_v35, %v1638_v5  ;;  %v2617_v44 = vmul.f32 %v7125_v53, %v7697_v34  ;;  %v14350_v50 = vld [vmem:[#allocation85_spill] sm:$0xff]  ;;  %v2618_v16 = vmul.f32 %v7126_v39, %v7697_v34  ;;  %v6915_v59 = vld [vmem:[%s14004_s3 + $0xa8] ss:$20 sps:$4 sm:$0xff]   ;;  %v14352_v27 = vld [vmem:[#allocation107_spill] sm:$0xff] }
 0x204   :  { %v2672_v11 = vadd.f32 %v14350_v50, %v2323_v8  ;;  %v7127_v18 = vld [vmem:[%s14001_s0 + $0x522] sm:$0xff]  ;;  %v1988_v49 = vadd.f32 %v1919_v31, %v1639_v48  ;;  %v7128_v55 = vld [vmem:[%s14001_s0 + $0x52a] sm:$0xff]  ;;  %v225_v30 = vadd.f32 %v14352_v27, %v11040_v60  ;;  %v14354_v31 = vld [vmem:[#allocation88_spill] sm:$0xff] }
 0x205   :  { %v2673_v21 = vadd.f32 %v14351_v57, %v2324_v46  ;;  %v2966_v12 = vmul.f32 %v7127_v18, %v7715_v51  ;;  %v6926_v1 = vld [vmem:[%s14004_s3 + $0xf0] ss:$20 sps:$4 sm:$0xff]   ;;  %v2337_v58 = vadd.f32 %v2268_v43, %v1987_v63  ;;  %v2967_v33 = vmul.f32 %v7128_v55, %v7715_v51  ;;  %v6918_v35 = vld [vmem:[%s14004_s3 + $0xd4] ss:$20 sps:$4 sm:$0xff]   ;;  %v14355_v8 = vld [vmem:[#allocation108_spill] sm:$0xff] }
 0x206   :  { %v6928_v19 = vld [vmem:[%s14004_s3 + $0x11c] ss:$20 sps:$4 sm:$0xff]   ;;  %v226_v54 = vadd.f32 %v14355_v8, %v11040_v60  ;;  %v7129_v46 = vld [vmem:[%s14001_s0 + $0xc0] sm:$0xff]  ;;  %v2338_v43 = vadd.f32 %v2269_v7, %v1988_v49  ;;  %v7130_v53 = vld [vmem:[%s14001_s0 + $0xc8] sm:$0xff] }
 0x207   :  { %v14353_v5 = vld [vmem:[#allocation87_spill] sm:$0xff]  ;;  %v3022_v29 = vadd.f32 %v14354_v31, %v2673_v21  ;;  %v170_v37 = vmul.f32 %v7129_v46, %v7519_v6  ;;  %v2686_v48 = vadd.f32 %v2617_v44, %v2337_v58  ;;  %v14356_v63 = vld [vmem:[#allocation109_spill] sm:$0xff]  ;;  %v171_v50 = vmul.f32 %v7130_v53, %v7519_v6  ;;  %v14357_v21 = vld [vmem:[#allocation110_spill] sm:$0xff]  ;;  %4339 = vmatmul.mubr.bf16.gmra.mxu1 %v6915_v59 }
 0x208   :  { %v3021_v14 = vadd.f32 %v14353_v5, %v2672_v11  ;;  %v574_v24 = vadd.f32 %v14356_v63, %v225_v30  ;;  %v575_v39 = vadd.f32 %v14357_v21, %v226_v54  ;;  %4210 = vmatmul.mubr.bf16.gmra.mxu0 %v6926_v1  ;;  %v2687_v55 = vadd.f32 %v2618_v16, %v2338_v43  ;;  %v14358_v7 = vld [vmem:[#allocation111_spill] sm:$0xff]  ;;  %v14359_v30 = vld [vmem:[#allocation112_spill] sm:$0xff]  ;;  %v14360_v46 = vld [vmem:[#allocation113_spill] sm:$0xff] }
 0x209   :  { %v3231_v57 = vmul.f32 0.01, %v3022_v29  ;;  %v239_v18 = vadd.f32 %v170_v37, %v11040_v60  ;;  %v3035_v27 = vadd.f32 %v2966_v12, %v2686_v48  ;;  %4346 = vmatprep.mubr.bf16.mxu1 %v6918_v35  ;;  %4217 = vmatprep.mubr.bf16.mxu0 %v6928_v19  ;;  %v240_v54 = vadd.f32 %v171_v50, %v11040_v60  ;;  %v14361_v37 = vld [vmem:[#allocation114_spill] sm:$0xff]  ;;  %v6921_v35 = vld [vmem:[%s14004_s3 + $0xd0] ss:$20 sps:$4 sm:$0xff]   ;;  %v14363_v21 = vld [vmem:[#allocation116_spill] sm:$0xff] }
 0x20a   :  { %v3230_v11 = vmul.f32 0.01, %v3021_v14  ;;  %v923_v44 = vadd.f32 %v14358_v7, %v574_v24  ;;  %v924_v5 = vadd.f32 %v14359_v30, %v575_v39  ;;  %v3036_v31 = vadd.f32 %v2967_v33, %v2687_v55  ;;  %v7131_v16 = vld [vmem:[%s14001_s0 + $0xc1] sm:$0xff]  ;;  %v7132_v1 = vld [vmem:[%s14001_s0 + $0xc9] sm:$0xff] }
 0x20b   :  { %v3300_v58 = vmax.f32 %v3022_v29, %v3231_v57  ;;  %v3244_v8 = vmul.f32 0.01, %v3035_v27  ;;  %v519_v12 = vmul.f32 %v7131_v16, %v7525_v9  ;;  %v520_v33 = vmul.f32 %v7132_v1, %v7525_v9  ;;  %v6932_v19 = vld [vmem:[%s14004_s3 + $0x118] ss:$20 sps:$4 sm:$0xff]   ;;  %v14362_v43 = vld [vmem:[#allocation115_spill] sm:$0xff]  ;;  %v7133_v24 = vld [vmem:[%s14001_s0 + $0xc2] sm:$0xff] }
 0x20c   :  { %v3299_v49 = vmax.f32 %v3021_v14, %v3230_v11  ;;  %v1273_v63 = vadd.f32 %v14360_v46, %v923_v44  ;;  %v1274_v59 = vadd.f32 %v14361_v37, %v924_v5  ;;  %v3245_v14 = vmul.f32 0.01, %v3036_v31  ;;  %v6924_v11 = vld [vmem:[%s14004_s3 + $0xfc] ss:$20 sps:$4 sm:$0xff]   ;;  %v6934_v57 = vld [vmem:[%s14004_s3 + $0x144] ss:$20 sps:$4 sm:$0xff]  }
 0x20d   :  { %v3313_v29 = vmax.f32 %v3035_v27, %v3244_v8  ;;  %v868_v50 = vmul.f32 %v7133_v24, %v7594_v36  ;;  %v588_v55 = vadd.f32 %v519_v12, %v239_v18  ;;  %v589_v27 = vadd.f32 %v520_v33, %v240_v54  ;;  %v7134_v7 = vld [vmem:[%s14001_s0 + $0xca] sm:$0xff] }
 0x20e   :  { %v3362_v53 = vpack.c.bf16 %v3300_v58, %v3299_v49  ;;  %v1622_v48 = vadd.f32 %v14362_v43, %v1273_v63  ;;  %v1623_v39 = vadd.f32 %v14363_v21, %v1274_v59  ;;  %v869_v44 = vmul.f32 %v7134_v7, %v7594_v36  ;;  %v14364_v58 = vld [vmem:[#allocation117_spill] sm:$0xff]  ;;  %v7135_v5 = vld [vmem:[%s14001_s0 + $0x2e8] sm:$0xff]  ;;  %v7136_v18 = vld [vmem:[%s14001_s0 + $0x2f0] sm:$0xff] }
 0x20f   :  { %v3314_v49 = vmax.f32 %v3036_v31, %v3245_v14  ;;  %v1218_v8 = vmul.f32 %v7135_v5, %v7613_v45  ;;  %v1219_v46 = vmul.f32 %v7136_v18, %v7613_v45  ;;  %v14365_v63 = vld [vmem:[#allocation118_spill] sm:$0xff]  ;;  %4347 = vmatmul.mubr.bf16.gmra.mxu1 %v6921_v35  ;;  %v14366_v12 = vld [vmem:[#allocation119_spill] sm:$0xff]  ;;  %v14367_v43 = vld [vmem:[#allocation120_spill] sm:$0xff] }
 0x210   :  { %6596 = vmatpush3.bf16.msra.mxu1 %v3362_v53  ;;  %v1971_v30 = vadd.f32 %v14364_v58, %v1622_v48  ;;  %v1972_v54 = vadd.f32 %v14365_v63, %v1623_v39  ;;  %v937_v53 = vadd.f32 %v868_v50, %v588_v55  ;;  %v938_v37 = vadd.f32 %v869_v44, %v589_v27  ;;  %v7137_v31 = vld [vmem:[%s14001_s0 + $0x2e9] sm:$0xff]  ;;  %v7138_v33 = vld [vmem:[%s14001_s0 + $0x2f1] sm:$0xff]  ;;  %v14368_v21 = vld [vmem:[#allocation121_spill] sm:$0xff] }
 0x211   :  { %v1567_v59 = vmul.f32 %v7137_v31, %v7636_v56  ;;  %4218 = vmatmul.mubr.bf16.gmra.mxu0 %v6932_v19  ;;  %v3369_v16 = vpack.c.bf16 %v3314_v49, %v3313_v29  ;;  %v1568_v14 = vmul.f32 %v7138_v33, %v7636_v56  ;;  %4354 = vmatprep.mubr.bf16.mxu1 %v6924_v11  ;;  %v7139_v35 = vld [vmem:[%s14001_s0 + $0x2ea] sm:$0xff]  ;;  %v7140_v29 = vld [vmem:[%s14001_s0 + $0x2f2] sm:$0xff] }
 0x212   :  { %v2321_v1 = vadd.f32 %v14366_v12, %v1971_v30  ;;  %4225 = vmatprep.mubr.bf16.mxu0 %v6934_v57  ;;  %v2322_v48 = vadd.f32 %v14367_v43, %v1972_v54  ;;  %v1287_v24 = vadd.f32 %v1218_v8, %v937_v53  ;;  %v1288_v50 = vadd.f32 %v1219_v46, %v938_v37  ;;  %v7141_v57 = vld [vmem:[%s14001_s0 + $0x510] sm:$0xff]  ;;  %v14369_v27 = vld [vmem:[#allocation122_spill] sm:$0xff]  ;;  %v7142_v58 = vld [vmem:[%s14001_s0 + $0x518] sm:$0xff] }
 0x213   :  { %6597 = vmatprep.subr.bf16.mxu1 %v3369_v16  ;;  %v1916_v19 = vmul.f32 %v7139_v35, %v7658_v4  ;;  %v1917_v11 = vmul.f32 %v7140_v29, %v7658_v4  ;;  %v2266_v55 = vmul.f32 %v7141_v57, %v7678_v17  ;;  %v2267_v30 = vmul.f32 %v7142_v58, %v7678_v17  ;;  %v141_v5 = vld [vmem:[%s14001_s0 + $0x210] sm:$0xff]  ;;  %v6927_v8 = vld [vmem:[%s14004_s3 + $0xf8] ss:$20 sps:$4 sm:$0xff]  }
 0x214   :  { %v2670_v39 = vadd.f32 %v14368_v21, %v2321_v1  ;;  %v2671_v7 = vadd.f32 %v14369_v27, %v2322_v48  ;;  %v1636_v44 = vadd.f32 %v1567_v59, %v1287_v24  ;;  %v1637_v49 = vadd.f32 %v1568_v14, %v1288_v50  ;;  %v6938_v18 = vld [vmem:[%s14004_s3 + $0x140] ss:$20 sps:$4 sm:$0xff]   ;;  %v142_v12 = vld [vmem:[%s14001_s0 + $0x218] sm:$0xff] }
 0x215   :  { %v14370_v46 = vld [vmem:[#allocation123_spill] sm:$0xff]  ;;  %v7144_v37 = vld [vmem:[%s14001_s0 + $0x519] sm:$0xff]  ;;  %v352_v58 = vmul.f32 %v7509_v3, %v141_v5 }
 0x216   :  { %v3019_v63 = vadd.f32 %v14370_v46, %v2670_v39  ;;  %v7143_v54 = vld [vmem:[%s14001_s0 + $0x511] sm:$0xff]  ;;  %v2616_v31 = vmul.f32 %v7144_v37, %v7697_v34  ;;  %v6940_v33 = vld [vmem:[%s14004_s3 + $0x16c] ss:$20 sps:$4 sm:$0xff]   ;;  %v1985_v48 = vadd.f32 %v1916_v19, %v1636_v44  ;;  %v1986_v24 = vadd.f32 %v1917_v11, %v1637_v49 }
 0x217   :  { %v2615_v53 = vmul.f32 %v7143_v54, %v7697_v34  ;;  %v7145_v59 = vld [vmem:[%s14001_s0 + $0x512] sm:$0xff]  ;;  %v7146_v50 = vld [vmem:[%s14001_s0 + $0x51a] sm:$0xff]  ;;  %v353_v19 = vmul.f32 %v7509_v3, %v142_v12  ;;  %4355 = vmatmul.mubr.bf16.gmra.mxu1 %v6927_v8  ;;  %v14375_v37 = vld [vmem:[#allocation146_spill] sm:$0xff] }
 0x218   :  { %v2964_v16 = vmul.f32 %v7145_v59, %v7715_v51  ;;  %v6930_v1 = vld [vmem:[%s14004_s3 + $0x124] ss:$20 sps:$4 sm:$0xff]   ;;  %v2965_v21 = vmul.f32 %v7146_v50, %v7715_v51  ;;  %v3228_v39 = vmul.f32 0.01, %v3019_v63  ;;  %v14372_v35 = vld [vmem:[#allocation143_spill] sm:$0xff]  ;;  %v2335_v54 = vadd.f32 %v2266_v55, %v1985_v48 }
 0x219   :  { %v14371_v14 = vld [vmem:[#allocation124_spill] sm:$0xff]  ;;  %v223_v29 = vadd.f32 %v14372_v35, %v11040_v60  ;;  %4226 = vmatmul.mubr.bf16.gmra.mxu0 %v6938_v18  ;;  %v14374_v44 = vld [vmem:[#allocation145_spill] sm:$0xff]  ;;  %4362 = vmatprep.mubr.bf16.mxu1 %v6930_v1  ;;  %v14376_v8 = vld [vmem:[#allocation147_spill] sm:$0xff]  ;;  %v421_v48 = vadd.f32 %v352_v58, %v7507_v2  ;;  %v422_v1 = vadd.f32 %v353_v19, %v7507_v2 }
 0x21a   :  { %v3020_v43 = vadd.f32 %v14371_v14, %v2671_v7  ;;  %v14373_v57 = vld [vmem:[#allocation144_spill] sm:$0xff]  ;;  %v2336_v7 = vadd.f32 %v2267_v30, %v1986_v24  ;;  %v3297_v11 = vmax.f32 %v3019_v63, %v3228_v39  ;;  %4233 = vmatprep.mubr.bf16.mxu0 %v6940_v33  ;;  %v2684_v5 = vadd.f32 %v2615_v53, %v2335_v54  ;;  %v14378_v58 = vld [vmem:[#allocation149_spill] sm:$0xff]  ;;  %v14379_v54 = vld [vmem:[#allocation150_spill] sm:$0xff] }
 0x21b   :  { %v224_v27 = vadd.f32 %v14373_v57, %v11040_v60  ;;  %v572_v49 = vadd.f32 %v14374_v44, %v223_v29  ;;  %v490_v14 = vld [vmem:[%s14001_s0 + $0x211] sm:$0xff]  ;;  %v491_v55 = vld [vmem:[%s14001_s0 + $0x219] sm:$0xff] }
 0x21c   :  { %v3229_v46 = vmul.f32 0.01, %v3020_v43  ;;  %v2685_v35 = vadd.f32 %v2616_v31, %v2336_v7  ;;  %v839_v30 = vld [vmem:[%s14001_s0 + $0x212] sm:$0xff]  ;;  %v840_v53 = vld [vmem:[%s14001_s0 + $0x21a] sm:$0xff]  ;;  %v701_v39 = vmul.f32 %v7527_v10, %v490_v14 }
 0x21d   :  { %v573_v59 = vadd.f32 %v14375_v37, %v224_v27  ;;  %v921_v18 = vadd.f32 %v14376_v8, %v572_v49  ;;  %v14377_v63 = vld [vmem:[#allocation148_spill] sm:$0xff]  ;;  %v6933_v31 = vld [vmem:[%s14004_s3 + $0x120] ss:$20 sps:$4 sm:$0xff]  }
 0x21e   :  { %v3298_v50 = vmax.f32 %v3020_v43, %v3229_v46  ;;  %v3033_v43 = vadd.f32 %v2964_v16, %v2684_v5  ;;  %v3034_v24 = vadd.f32 %v2965_v21, %v2685_v35  ;;  %v5843_v29 = vld [vmem:[%s14001_s0 + $0x438] sm:$0xff]  ;;  %v6936_v57 = vld [vmem:[%s14004_s3 + $0x14c] ss:$20 sps:$4 sm:$0xff]   ;;  %v702_v16 = vmul.f32 %v7527_v10, %v491_v55  ;;  %v14380_v14 = vld [vmem:[#allocation151_spill] sm:$0xff] }
 0x21f   :  { %v922_v12 = vadd.f32 %v14377_v63, %v573_v59  ;;  %v6944_v27 = vld [vmem:[%s14004_s3 + $0x168] ss:$20 sps:$4 sm:$0xff]   ;;  %v1271_v46 = vadd.f32 %v14378_v58, %v921_v18  ;;  %v1050_v21 = vmul.f32 %v7552_v20, %v839_v30  ;;  %v5844_v19 = vld [vmem:[%s14001_s0 + $0x440] sm:$0xff]  ;;  %v770_v37 = vadd.f32 %v701_v39, %v421_v48  ;;  %4363 = vmatmul.mubr.bf16.gmra.mxu1 %v6933_v31 }
 0x220   :  { %v3361_v33 = vpack.c.bf16 %v3298_v50, %v3297_v11  ;;  %v6946_v11 = vld [vmem:[%s14004_s3 + $0x194] ss:$20 sps:$4 sm:$0xff]   ;;  %v3242_v44 = vmul.f32 0.01, %v3033_v43  ;;  %v3243_v49 = vmul.f32 0.01, %v3034_v24  ;;  %v1051_v59 = vmul.f32 %v7552_v20, %v840_v53  ;;  %4370 = vmatprep.mubr.bf16.mxu1 %v6936_v57 }
 0x221   :  { %v1272_v7 = vadd.f32 %v14379_v54, %v922_v12  ;;  %v1620_v50 = vadd.f32 %v14380_v14, %v1271_v46  ;;  %v14381_v5 = vld [vmem:[#allocation152_spill] sm:$0xff]  ;;  %v771_v55 = vadd.f32 %v702_v16, %v422_v1  ;;  %v1400_v30 = vmul.f32 %v5843_v29, %v7580_v32  ;;  %v5915_v48 = vld [vmem:[%s14001_s0 + $0x441] sm:$0xff]  ;;  %4234 = vmatmul.mubr.bf16.gmra.mxu0 %v6944_v27  ;;  %v14384_v16 = vld [vmem:[#allocation155_spill] sm:$0xff] }
 0x222   :  { %6598 = vmatpush3.bf16.msra.mxu1 %v3361_v33  ;;  %v5914_v8 = vld [vmem:[%s14001_s0 + $0x439] sm:$0xff]  ;;  %v3311_v18 = vmax.f32 %v3033_v43, %v3242_v44  ;;  %v3312_v63 = vmax.f32 %v3034_v24, %v3243_v49  ;;  %v1119_v12 = vadd.f32 %v1050_v21, %v770_v37  ;;  %v1401_v33 = vmul.f32 %v5844_v19, %v7580_v32  ;;  %v14383_v1 = vld [vmem:[#allocation154_spill] sm:$0xff] }
 0x223   :  { %v1621_v35 = vadd.f32 %v14381_v5, %v1272_v7  ;;  %v14382_v53 = vld [vmem:[#allocation153_spill] sm:$0xff]  ;;  %v1120_v29 = vadd.f32 %v1051_v59, %v771_v55  ;;  %4241 = vmatprep.mubr.bf16.mxu0 %v6946_v11  ;;  %v1749_v54 = vmul.f32 %v5914_v8, %v7601_v41  ;;  %v6057_v7 = vld [vmem:[%s14001_s0 + $0x668] sm:$0xff]  ;;  %v14385_v19 = vld [vmem:[#allocation156_spill] sm:$0xff]  ;;  %v1750_v37 = vmul.f32 %v5915_v48, %v7601_v41 }
 0x224   :  { %v1969_v39 = vadd.f32 %v14382_v53, %v1620_v50  ;;  %v5985_v46 = vld [vmem:[%s14001_s0 + $0x43a] sm:$0xff]  ;;  %v5986_v43 = vld [vmem:[%s14001_s0 + $0x442] sm:$0xff]  ;;  %v3368_v31 = vpack.c.bf16 %v3312_v63, %v3311_v18  ;;  %v1469_v27 = vadd.f32 %v1400_v30, %v1119_v12  ;;  %v6199_v55 = vld [vmem:[%s14001_s0 + $0x66a] sm:$0xff]  ;;  %v2449_v53 = vmul.f32 %v6057_v7, %v7646_v62 }
 0x225   :  { %v1970_v58 = vadd.f32 %v14383_v1, %v1621_v35  ;;  %v6056_v24 = vld [vmem:[%s14001_s0 + $0x660] sm:$0xff]  ;;  %v1470_v49 = vadd.f32 %v1401_v33, %v1120_v29  ;;  %v6128_v11 = vld [vmem:[%s14001_s0 + $0x669] sm:$0xff]  ;;  %v2098_v50 = vmul.f32 %v5985_v46, %v7624_v52  ;;  %v2099_v5 = vmul.f32 %v5986_v43, %v7624_v52 }
 0x226   :  { %v2319_v21 = vadd.f32 %v14384_v16, %v1969_v39  ;;  %v6127_v57 = vld [vmem:[%s14001_s0 + $0x661] sm:$0xff]  ;;  %6599 = vmatprep.subr.bf16.mxu1 %v3368_v31  ;;  %v1818_v14 = vadd.f32 %v1749_v54, %v1469_v27  ;;  %v2448_v35 = vmul.f32 %v6056_v24, %v7646_v62  ;;  %v6952_v1 = vld [vmem:[%s14004_s3 + $0x1bc] ss:$20 sps:$4 sm:$0xff]   ;;  %v2798_v46 = vmul.f32 %v6128_v11, %v7666_v13 }
 0x227   :  { %v2320_v44 = vadd.f32 %v14385_v19, %v1970_v58  ;;  %v6198_v59 = vld [vmem:[%s14001_s0 + $0x662] sm:$0xff]  ;;  %v1819_v48 = vadd.f32 %v1750_v37, %v1470_v49  ;;  %v2797_v29 = vmul.f32 %v6127_v57, %v7666_v13  ;;  %v14388_v24 = vld [vmem:[#allocation159_spill] sm:$0xff]  ;;  %v14389_v27 = vld [vmem:[#allocation160_spill] sm:$0xff]  ;;  %v3147_v16 = vmul.f32 %v6199_v55, %v7685_v28 }
 0x228   :  { %v6939_v30 = vld [vmem:[%s14004_s3 + $0x148] ss:$20 sps:$4 sm:$0xff]   ;;  %v6950_v8 = vld [vmem:[%s14004_s3 + $0x190] ss:$20 sps:$4 sm:$0xff]   ;;  %v2167_v58 = vadd.f32 %v2098_v50, %v1818_v14  ;;  %v3146_v43 = vmul.f32 %v6198_v59, %v7685_v28 }
 0x229   :  { %v14386_v18 = vld [vmem:[#allocation157_spill] sm:$0xff]  ;;  %v14387_v12 = vld [vmem:[#allocation158_spill] sm:$0xff]  ;;  %v2168_v7 = vadd.f32 %v2099_v5, %v1819_v48  ;;  %v7147_v19 = vld [vmem:[%s14001_s0 + $0xb0] sm:$0xff]  ;;  %4371 = vmatmul.mubr.bf16.gmra.mxu1 %v6939_v30  ;;  %4242 = vmatmul.mubr.bf16.gmra.mxu0 %v6950_v8 }
 0x22a   :  { %v2668_v63 = vadd.f32 %v14386_v18, %v2319_v21  ;;  %v2669_v33 = vadd.f32 %v14387_v12, %v2320_v44  ;;  %v6942_v39 = vld [vmem:[%s14004_s3 + $0x174] ss:$20 sps:$4 sm:$0xff]   ;;  %v2517_v21 = vadd.f32 %v2448_v35, %v2167_v58  ;;  %v168_v44 = vmul.f32 %v7147_v19, %v7519_v6  ;;  %v7148_v49 = vld [vmem:[%s14001_s0 + $0xb8] sm:$0xff]  ;;  %4249 = vmatprep.mubr.bf16.mxu0 %v6952_v1 }
 0x22b   :  { %v169_v37 = vmul.f32 %v7148_v49, %v7519_v6  ;;  %v7149_v57 = vld [vmem:[%s14001_s0 + $0xb1] sm:$0xff]  ;;  %v2518_v50 = vadd.f32 %v2449_v53, %v2168_v7  ;;  %v7150_v5 = vld [vmem:[%s14001_s0 + $0xb9] sm:$0xff]  ;;  %4378 = vmatprep.mubr.bf16.mxu1 %v6942_v39 }
 0x22c   :  { %v3017_v31 = vadd.f32 %v14388_v24, %v2668_v63  ;;  %v3018_v54 = vadd.f32 %v14389_v27, %v2669_v33  ;;  %v517_v11 = vmul.f32 %v7149_v57, %v7525_v9  ;;  %v518_v35 = vmul.f32 %v7150_v5, %v7525_v9  ;;  %v7151_v8 = vld [vmem:[%s14001_s0 + $0xb2] sm:$0xff]  ;;  %v7152_v39 = vld [vmem:[%s14001_s0 + $0xba] sm:$0xff] }
 0x22d   :  { %v2866_v55 = vadd.f32 %v2797_v29, %v2517_v21  ;;  %v237_v18 = vadd.f32 %v168_v44, %v11040_v60  ;;  %v238_v63 = vadd.f32 %v169_v37, %v11040_v60  ;;  %v2867_v30 = vadd.f32 %v2798_v46, %v2518_v50  ;;  %v6945_v29 = vld [vmem:[%s14004_s3 + $0x170] ss:$20 sps:$4 sm:$0xff]   ;;  %v6956_v46 = vld [vmem:[%s14004_s3 + $0x1b8] ss:$20 sps:$4 sm:$0xff]  }
 0x22e   :  { %v3226_v59 = vmul.f32 0.01, %v3017_v31  ;;  %v3227_v14 = vmul.f32 0.01, %v3018_v54  ;;  %v866_v48 = vmul.f32 %v7151_v8, %v7594_v36  ;;  %v867_v1 = vmul.f32 %v7152_v39, %v7594_v36  ;;  %v7154_v7 = vld [vmem:[%s14001_s0 + $0x2e0] sm:$0xff] }
 0x22f   :  { %v3215_v53 = vadd.f32 %v3146_v43, %v2866_v55  ;;  %v586_v58 = vadd.f32 %v517_v11, %v237_v18  ;;  %v587_v24 = vadd.f32 %v518_v35, %v238_v63  ;;  %v3216_v27 = vadd.f32 %v3147_v16, %v2867_v30  ;;  %v7153_v43 = vld [vmem:[%s14001_s0 + $0x2d8] sm:$0xff]  ;;  %v7158_v55 = vld [vmem:[%s14001_s0 + $0x2e2] sm:$0xff] }
 0x230   :  { %v3295_v12 = vmax.f32 %v3017_v31, %v3226_v59  ;;  %v3296_v33 = vmax.f32 %v3018_v54, %v3227_v14  ;;  %v1216_v54 = vmul.f32 %v7153_v43, %v7613_v45  ;;  %v1217_v21 = vmul.f32 %v7154_v7, %v7613_v45  ;;  %v6948_v19 = vld [vmem:[%s14004_s3 + $0x19c] ss:$20 sps:$4 sm:$0xff]   ;;  %v6958_v16 = vld [vmem:[%s14004_s3 + $0x1e4] ss:$20 sps:$4 sm:$0xff]  }
 0x231   :  { %v3457_v44 = vmul.f32 0.01, %v3215_v53  ;;  %v935_v49 = vadd.f32 %v866_v48, %v586_v58  ;;  %v936_v37 = vadd.f32 %v867_v1, %v587_v24  ;;  %v7155_v57 = vld [vmem:[%s14001_s0 + $0x2d9] sm:$0xff]  ;;  %v3458_v59 = vmul.f32 0.01, %v3216_v27  ;;  %v7156_v14 = vld [vmem:[%s14001_s0 + $0x2e1] sm:$0xff]  ;;  %4379 = vmatmul.mubr.bf16.gmra.mxu1 %v6945_v29  ;;  %4250 = vmatmul.mubr.bf16.gmra.mxu0 %v6956_v46 }
 0x232   :  { %v3360_v31 = vpack.c.bf16 %v3296_v33, %v3295_v12  ;;  %v1565_v11 = vmul.f32 %v7155_v57, %v7636_v56  ;;  %v1566_v50 = vmul.f32 %v7156_v14, %v7636_v56  ;;  %v7157_v5 = vld [vmem:[%s14001_s0 + $0x2da] sm:$0xff]  ;;  %v1915_v18 = vmul.f32 %v7158_v55, %v7658_v4  ;;  %v7160_v58 = vld [vmem:[%s14001_s0 + $0x508] sm:$0xff]  ;;  %4386 = vmatprep.mubr.bf16.mxu1 %v6948_v19 }
 0x233   :  { %v1914_v35 = vmul.f32 %v7157_v5, %v7658_v4  ;;  %v3526_v63 = vmax.f32 %v3215_v53, %v3457_v44  ;;  %v1285_v12 = vadd.f32 %v1216_v54, %v935_v49  ;;  %v1286_v33 = vadd.f32 %v1217_v21, %v936_v37  ;;  %v7159_v30 = vld [vmem:[%s14001_s0 + $0x500] sm:$0xff]  ;;  %4257 = vmatprep.mubr.bf16.mxu0 %v6958_v16  ;;  %v7162_v29 = vld [vmem:[%s14001_s0 + $0x509] sm:$0xff] }
 0x234   :  { %6600 = vmatpush3.bf16.msra.mxu1 %v3360_v31  ;;  %v2264_v8 = vmul.f32 %v7159_v30, %v7678_v17  ;;  %v3527_v48 = vmax.f32 %v3216_v27, %v3458_v59  ;;  %v2265_v24 = vmul.f32 %v7160_v58, %v7678_v17  ;;  %v7161_v53 = vld [vmem:[%s14001_s0 + $0x501] sm:$0xff]  ;;  %v2614_v46 = vmul.f32 %v7162_v29, %v7697_v34  ;;  %v7164_v7 = vld [vmem:[%s14001_s0 + $0x50a] sm:$0xff]  ;;  %v14391_v30 = vld [vmem:[#allocation180_spill] sm:$0xff] }
 0x235   :  { %v2613_v39 = vmul.f32 %v7161_v53, %v7697_v34  ;;  %v1634_v1 = vadd.f32 %v1565_v11, %v1285_v12  ;;  %v1635_v31 = vadd.f32 %v1566_v50, %v1286_v33  ;;  %v7163_v43 = vld [vmem:[%s14001_s0 + $0x502] sm:$0xff]  ;;  %v2963_v21 = vmul.f32 %v7164_v7, %v7715_v51  ;;  %v6951_v11 = vld [vmem:[%s14004_s3 + $0x198] ss:$20 sps:$4 sm:$0xff]   ;;  %v14390_v59 = vld [vmem:[#allocation179_spill] sm:$0xff] }
 0x236   :  { %v3562_v27 = vpack.c.bf16 %v3527_v48, %v3526_v63  ;;  %v2962_v54 = vmul.f32 %v7163_v43, %v7715_v51  ;;  %v221_v19 = vadd.f32 %v9557_v15, %v11040_v60  ;;  %v222_v49 = vadd.f32 %v9568_v23, %v11040_v60  ;;  %v7165_v37 = vld [vmem:[%s14001_s0 + $0xa0] sm:$0xff]  ;;  %v7166_v23 = vld [vmem:[%s14001_s0 + $0xa8] sm:$0xff] }
 0x237   :  { %v1983_v16 = vadd.f32 %v1914_v35, %v1634_v1  ;;  %v1984_v44 = vadd.f32 %v1915_v18, %v1635_v31  ;;  %v166_v57 = vmul.f32 %v7165_v37, %v7519_v6  ;;  %v6962_v15 = vld [vmem:[%s14004_s3 + $0x1e0] ss:$20 sps:$4 sm:$0xff]   ;;  %v167_v50 = vmul.f32 %v7166_v23, %v7519_v6  ;;  %v7168_v55 = vld [vmem:[%s14001_s0 + $0xa9] sm:$0xff]  ;;  %v6954_v63 = vld [vmem:[%s14004_s3 + $0x1c4] ss:$20 sps:$4 sm:$0xff]  }
 0x238   :  { %6812 = vmatprep.subr.bf16.mxu0 %v3562_v27  ;;  %v570_v14 = vadd.f32 %v14390_v59, %v221_v19  ;;  %v7167_v5 = vld [vmem:[%s14001_s0 + $0xa1] sm:$0xff]  ;;  %v516_v18 = vmul.f32 %v7168_v55, %v7525_v9  ;;  %v571_v48 = vadd.f32 %v14391_v30, %v222_v49  ;;  %v14394_v37 = vld [vmem:[#allocation183_spill] sm:$0xff] }
 0x239   :  { %v515_v35 = vmul.f32 %v7167_v5, %v7525_v9  ;;  %6813 = vmatpush3.bf16.msra.mxu0 %v3562_v27  ;;  %v2333_v12 = vadd.f32 %v2264_v8, %v1983_v16  ;;  %v2334_v33 = vadd.f32 %v2265_v24, %v1984_v44  ;;  %v235_v58 = vadd.f32 %v166_v57, %v11040_v60  ;;  %v14392_v53 = vld [vmem:[#allocation181_spill] sm:$0xff]  ;;  %v7170_v27 = vld [vmem:[%s14001_s0 + $0xaa] sm:$0xff] }
 0x23a   :  { %v919_v1 = vadd.f32 %v14392_v53, %v570_v14  ;;  %v236_v31 = vadd.f32 %v167_v50, %v11040_v60  ;;  %v7169_v29 = vld [vmem:[%s14001_s0 + $0xa2] sm:$0xff]  ;;  %v865_v8 = vmul.f32 %v7170_v27, %v7594_v36  ;;  %v6964_v24 = vld [vmem:[%s14004_s3 + $0x20c] ss:$20 sps:$4 sm:$0x3f]   ;;  %4387 = vmatmul.mubr.bf16.gmra.mxu1 %v6951_v11  ;;  %4258 = vmatmul.mubr.bf16.gmra.mxu0 %v6962_v15  ;;  %v7172_v15 = vld [vmem:[%s14001_s0 + $0x2d0] sm:$0xff] }
 0x23b   :  { %v864_v43 = vmul.f32 %v7169_v29, %v7594_v36  ;;  %v2682_v7 = vadd.f32 %v2613_v39, %v2333_v12  ;;  %v2683_v19 = vadd.f32 %v2614_v46, %v2334_v33  ;;  %v14393_v16 = vld [vmem:[#allocation182_spill] sm:$0xff]  ;;  %v584_v49 = vadd.f32 %v515_v35, %v235_v58  ;;  %4394 = vmatprep.mubr.bf16.mxu1 %v6954_v63  ;;  %v14395_v39 = vld [vmem:[#allocation184_spill] sm:$0xff]  ;;  %v14396_v12 = vld [vmem:[#allocation185_spill] sm:$0xff] }
 0x23c   :  { %v920_v44 = vadd.f32 %v14393_v16, %v571_v48  ;;  %v1269_v57 = vadd.f32 %v14394_v37, %v919_v1  ;;  %v585_v59 = vadd.f32 %v516_v18, %v236_v31  ;;  %v7171_v14 = vld [vmem:[%s14001_s0 + $0x2c8] sm:$0xff]  ;;  %v1215_v18 = vmul.f32 %v7172_v15, %v7613_v45  ;;  %4265 = vmatprep.mubr.bf16.mxu0 %v6964_v24  ;;  %v6957_v53 = vld [vmem:[%s14004_s3 + $0x1c0] ss:$20 sps:$4 sm:$0xff]   ;;  %v7178_v15 = vld [vmem:[%s14001_s0 + $0x4f8] sm:$0xff] }
 0x23d   :  { %v1214_v23 = vmul.f32 %v7171_v14, %v7613_v45  ;;  %v3031_v50 = vadd.f32 %v2962_v54, %v2682_v7  ;;  %v3032_v5 = vadd.f32 %v2963_v21, %v2683_v19  ;;  %v933_v55 = vadd.f32 %v864_v43, %v584_v49  ;;  %v7173_v33 = vld [vmem:[%s14001_s0 + $0x2c9] sm:$0xff]  ;;  %v7174_v43 = vld [vmem:[%s14001_s0 + $0x2d1] sm:$0xff] }
 0x23e   :  { %v1270_v46 = vadd.f32 %v14395_v39, %v920_v44  ;;  %v1618_v35 = vadd.f32 %v14396_v12, %v1269_v57  ;;  %v934_v11 = vadd.f32 %v865_v8, %v585_v59  ;;  %v1563_v63 = vmul.f32 %v7173_v33, %v7636_v56  ;;  %v14397_v30 = vld [vmem:[#allocation186_spill] sm:$0xff]  ;;  %v14398_v1 = vld [vmem:[#allocation187_spill] sm:$0xff]  ;;  %v14399_v44 = vld [vmem:[#allocation188_spill] sm:$0xff] }
 0x23f   :  { %v3240_v54 = vmul.f32 0.01, %v3031_v50  ;;  %v3241_v21 = vmul.f32 0.01, %v3032_v5  ;;  %v1283_v58 = vadd.f32 %v1214_v23, %v933_v55  ;;  %v1564_v27 = vmul.f32 %v7174_v43, %v7636_v56  ;;  %v7175_v8 = vld [vmem:[%s14001_s0 + $0x2ca] sm:$0xff]  ;;  %v14400_v57 = vld [vmem:[#allocation189_spill] sm:$0xff] }
 0x240   :  { %v1619_v48 = vadd.f32 %v14397_v30, %v1270_v46  ;;  %v1967_v31 = vadd.f32 %v14398_v1, %v1618_v35  ;;  %v1284_v29 = vadd.f32 %v1215_v18, %v934_v11  ;;  %v1912_v24 = vmul.f32 %v7175_v8, %v7658_v4  ;;  %v6960_v7 = vld [vmem:[%s14004_s3 + $0x1ec] ss:$20 sps:$4 sm:$0xff]   ;;  %v7176_v23 = vld [vmem:[%s14001_s0 + $0x2d2] sm:$0xff] }
 0x241   :  { %v3309_v19 = vmax.f32 %v3031_v50, %v3240_v54  ;;  %v3310_v16 = vmax.f32 %v3032_v5, %v3241_v21  ;;  %v1632_v37 = vadd.f32 %v1563_v63, %v1283_v58  ;;  %v1913_v39 = vmul.f32 %v7176_v23, %v7658_v4  ;;  %v7177_v46 = vld [vmem:[%s14001_s0 + $0x4f0] sm:$0xff]  ;;  %v6968_v50 = vld [vmem:[%s14004_s3 + $0x208] ss:$20 sps:$4 sm:$0x3f]   ;;  %v14404_v8 = vld [vmem:[#allocation193_spill] sm:$0xff] }
 0x242   :  { %v1968_v49 = vadd.f32 %v14399_v44, %v1619_v48  ;;  %v2317_v59 = vadd.f32 %v14400_v57, %v1967_v31  ;;  %v1633_v14 = vadd.f32 %v1564_v27, %v1284_v29  ;;  %v2262_v55 = vmul.f32 %v7177_v46, %v7678_v17  ;;  %v14401_v12 = vld [vmem:[#allocation190_spill] sm:$0xff]  ;;  %v6970_v33 = vld [vmem:[%s14004_s3 + $0x10] ss:$20 sps:$4 sm:$0xff]   ;;  %4395 = vmatmul.mubr.bf16.gmra.mxu1 %v6957_v53  ;;  %v7180_v58 = vld [vmem:[%s14001_s0 + $0x4f9] sm:$0xff] }
 0x243   :  { %v3367_v5 = vpack.c.bf16 %v3310_v16, %v3309_v19  ;;  %v1981_v11 = vadd.f32 %v1912_v24, %v1632_v37  ;;  %v2263_v18 = vmul.f32 %v7178_v15, %v7678_v17  ;;  %v14402_v63 = vld [vmem:[#allocation191_spill] sm:$0xff]  ;;  %v2612_v1 = vmul.f32 %v7180_v58, %v7697_v34  ;;  %4402 = vmatprep.mubr.bf16.mxu1 %v6960_v7  ;;  %v14403_v31 = vld [vmem:[#allocation192_spill] sm:$0xff]  ;;  %v14405_v7 = vld [vmem:[#allocation213_spill] sm:$0xff] }
 0x244   :  { %v2318_v35 = vadd.f32 %v14401_v12, %v1968_v49  ;;  %v2666_v54 = vadd.f32 %v14402_v63, %v2317_v59  ;;  %v1982_v21 = vadd.f32 %v1913_v39, %v1633_v14  ;;  %v7179_v30 = vld [vmem:[%s14001_s0 + $0x4f1] sm:$0xff]  ;;  %v7182_v16 = vld [vmem:[%s14001_s0 + $0x4fa] sm:$0xff]  ;;  %v219_v49 = vadd.f32 %v14405_v7, %v11040_v60  ;;  %4266 = vmatmul.mubr.bf16.gmra.mxu0 %v6968_v50  ;;  %v14406_v37 = vld [vmem:[#allocation194_spill] sm:$0xff] }
 0x245   :  { %v2611_v48 = vmul.f32 %v7179_v30, %v7697_v34  ;;  %6601 = vmatprep.subr.bf16.mxu1 %v3367_v5  ;;  %v2331_v53 = vadd.f32 %v2262_v55, %v1981_v11  ;;  %v7181_v43 = vld [vmem:[%s14001_s0 + $0x4f2] sm:$0xff]  ;;  %v2961_v44 = vmul.f32 %v7182_v16, %v7715_v51  ;;  %v14407_v14 = vld [vmem:[#allocation214_spill] sm:$0xff]  ;;  %6816 = vmatprep.mubr.msk.bf16.mxu0 %vm4082_vm1, %v6970_v33 }
 0x246   :  { %v2667_v29 = vadd.f32 %v14403_v31, %v2318_v35  ;;  %v2960_v27 = vmul.f32 %v7181_v43, %v7715_v51  ;;  %v3015_v24 = vadd.f32 %v14404_v8, %v2666_v54  ;;  %v2332_v19 = vadd.f32 %v2263_v18, %v1982_v21  ;;  %v7183_v39 = vld [vmem:[%s14001_s0 + $0x90] sm:$0xff]  ;;  %v6963_v55 = vld [vmem:[%s14004_s3 + $0x1e8] ss:$20 sps:$4 sm:$0xff]  }
 0x247   :  { %v2680_v59 = vadd.f32 %v2611_v48, %v2331_v53  ;;  %v220_v23 = vadd.f32 %v14407_v14, %v11040_v60  ;;  %v164_v46 = vmul.f32 %v7183_v39, %v7519_v6  ;;  %v14408_v12 = vld [vmem:[#allocation215_spill] sm:$0xff]  ;;  %v7184_v11 = vld [vmem:[%s14001_s0 + $0x98] sm:$0xff]  ;;  %v14411_v8 = vld [vmem:[#allocation218_spill] sm:$0xff] }
 0x248   :  { %v3016_v57 = vadd.f32 %v14406_v37, %v2667_v29  ;;  %v3224_v5 = vmul.f32 0.01, %v3015_v24  ;;  %v2681_v50 = vadd.f32 %v2612_v1, %v2332_v19  ;;  %v568_v35 = vadd.f32 %v14408_v12, %v219_v49  ;;  %v14409_v54 = vld [vmem:[#allocation216_spill] sm:$0xff]  ;;  %v6966_v33 = vld [vmem:[%s14004_s3 + $0x214] ss:$20 sps:$4 sm:$0x3f]  }
 0x249   :  { %v165_v15 = vmul.f32 %v7184_v11, %v7519_v6  ;;  %v3029_v63 = vadd.f32 %v2960_v27, %v2680_v59  ;;  %v569_v21 = vadd.f32 %v14409_v54, %v220_v23  ;;  %v233_v30 = vadd.f32 %v164_v46, %v11040_v60  ;;  %v14410_v1 = vld [vmem:[#allocation217_spill] sm:$0xff]  ;;  %v7185_v27 = vld [vmem:[%s14001_s0 + $0x91] sm:$0xff] }
 0x24a   :  { %v3225_v18 = vmul.f32 0.01, %v3016_v57  ;;  %v3293_v48 = vmax.f32 %v3015_v24, %v3224_v5  ;;  %v3030_v58 = vadd.f32 %v2961_v44, %v2681_v50  ;;  %v917_v31 = vadd.f32 %v14410_v1, %v568_v35  ;;  %4403 = vmatmul.mubr.bf16.gmra.mxu1 %v6963_v55  ;;  %v14412_v49 = vld [vmem:[#allocation219_spill] sm:$0xff]  ;;  %v7186_v24 = vld [vmem:[%s14001_s0 + $0x99] sm:$0xff] }
 0x24b   :  { %v234_v29 = vadd.f32 %v165_v15, %v11040_v60  ;;  %v3238_v43 = vmul.f32 0.01, %v3029_v63  ;;  %v918_v19 = vadd.f32 %v14411_v8, %v569_v21  ;;  %v513_v16 = vmul.f32 %v7185_v27, %v7525_v9  ;;  %v14413_v39 = vld [vmem:[#allocation220_spill] sm:$0xff]  ;;  %4410 = vmatprep.mubr.bf16.mxu1 %v6966_v33  ;;  %v14414_v50 = vld [vmem:[#allocation221_spill] sm:$0xff]  ;;  %v14416_v1 = vld [vmem:[#allocation223_spill] sm:$0xff] }
 0x24c   :  { %v3294_v53 = vmax.f32 %v3016_v57, %v3225_v18  ;;  %v3239_v7 = vmul.f32 0.01, %v3030_v58  ;;  %v1267_v37 = vadd.f32 %v14412_v49, %v917_v31  ;;  %v514_v44 = vmul.f32 %v7186_v24, %v7525_v9  ;;  %v7187_v57 = vld [vmem:[%s14001_s0 + $0x92] sm:$0xff]  ;;  %v7188_v11 = vld [vmem:[%s14001_s0 + $0x9a] sm:$0xff]  ;;  %v14415_v18 = vld [vmem:[#allocation222_spill] sm:$0xff] }
 0x24d   :  { %v862_v59 = vmul.f32 %v7187_v57, %v7594_v36  ;;  %v3307_v23 = vmax.f32 %v3029_v63, %v3238_v43  ;;  %v1268_v46 = vadd.f32 %v14413_v39, %v918_v19  ;;  %v582_v55 = vadd.f32 %v513_v16, %v233_v30  ;;  %v7189_v63 = vld [vmem:[%s14001_s0 + $0x2b8] sm:$0xff]  ;;  %v7190_v30 = vld [vmem:[%s14001_s0 + $0x2c0] sm:$0xff] }
 0x24e   :  { %v3359_v14 = vpack.c.bf16 %v3294_v53, %v3293_v48  ;;  %v3308_v5 = vmax.f32 %v3030_v58, %v3239_v7  ;;  %v1616_v12 = vadd.f32 %v14414_v50, %v1267_v37  ;;  %v583_v35 = vadd.f32 %v514_v44, %v234_v29  ;;  %v6969_v29 = vld [vmem:[%s14004_s3 + $0x210] ss:$20 sps:$4 sm:$0x3f]   ;;  %v7191_v43 = vld [vmem:[%s14001_s0 + $0x2b9] sm:$0xff] }
 0x24f   :  { %v863_v15 = vmul.f32 %v7188_v11, %v7594_v36  ;;  %v1617_v54 = vadd.f32 %v14415_v18, %v1268_v46  ;;  %v931_v21 = vadd.f32 %v862_v59, %v582_v55  ;;  %v1212_v33 = vmul.f32 %v7189_v63, %v7613_v45  ;;  %v14417_v19 = vld [vmem:[#allocation224_spill] sm:$0xff]  ;;  %v7192_v7 = vld [vmem:[%s14001_s0 + $0x2c1] sm:$0xff] }
 0x250   :  { %6602 = vmatpush3.bf16.msra.mxu1 %v3359_v14  ;;  %v1213_v48 = vmul.f32 %v7190_v30, %v7613_v45  ;;  %v3366_v58 = vpack.c.bf16 %v3308_v5, %v3307_v23  ;;  %v1965_v31 = vadd.f32 %v14416_v1, %v1616_v12  ;;  %v1561_v8 = vmul.f32 %v7191_v43, %v7636_v56  ;;  %v7193_v37 = vld [vmem:[%s14001_s0 + $0x2ba] sm:$0xff]  ;;  %v7194_v23 = vld [vmem:[%s14001_s0 + $0x2c2] sm:$0xff] }
 0x251   :  { %v932_v53 = vadd.f32 %v863_v15, %v583_v35  ;;  %v1966_v27 = vadd.f32 %v14417_v19, %v1617_v54  ;;  %v1281_v16 = vadd.f32 %v1212_v33, %v931_v21  ;;  %v1562_v49 = vmul.f32 %v7192_v7, %v7636_v56  ;;  %v6973_v44 = vld [vmem:[%s14003_s2 + $0x4] ss:$20 sps:$4 sm:$0xff]   ;;  %v14419_v5 = vld [vmem:[#allocation226_spill] sm:$0xff]  ;;  %v14420_v21 = vld [vmem:[#allocation227_spill] sm:$0xff] }
 0x252   :  { %v1910_v24 = vmul.f32 %v7193_v37, %v7658_v4  ;;  %6603 = vmatprep.subr.bf16.mxu1 %v3366_v58  ;;  %v14418_v57 = vld [vmem:[#allocation225_spill] sm:$0xff]  ;;  %v1911_v39 = vmul.f32 %v7194_v23, %v7658_v4  ;;  %v7196_v35 = vld [vmem:[%s14001_s0 + $0x4e8] sm:$0xff]  ;;  %4411 = vmatmul.mubr.bf16.gmra.mxu1 %v6969_v29 }
 0x253   :  { %v2315_v59 = vadd.f32 %v14418_v57, %v1965_v31  ;;  %v1282_v14 = vadd.f32 %v1213_v48, %v932_v53  ;;  %v7195_v46 = vld [vmem:[%s14001_s0 + $0x4e0] sm:$0xff]  ;;  %v2316_v50 = vadd.f32 %v14419_v5, %v1966_v27  ;;  %v1630_v12 = vadd.f32 %v1561_v8, %v1281_v16  ;;  %v7198_v30 = vld [vmem:[%s14001_s0 + $0x4e9] sm:$0xff]  ;;  %v14421_v53 = vld [vmem:[#allocation228_spill] sm:$0xff]  ;;  %4991 = vmatprep.mubr.bf16.mxu1 %v6973_v44 }
 0x254   :  { %v2260_v55 = vmul.f32 %v7195_v46, %v7678_v17  ;;  %v2261_v11 = vmul.f32 %v7196_v35, %v7678_v17  ;;  %v7197_v15 = vld [vmem:[%s14001_s0 + $0x4e1] sm:$0xff]  ;;  %v2610_v48 = vmul.f32 %v7198_v30, %v7697_v34  ;;  %v7200_v8 = vld [vmem:[%s14001_s0 + $0x4ea] sm:$0xff] }
 0x255   :  { %v2609_v18 = vmul.f32 %v7197_v15, %v7697_v34  ;;  %v139_v54 = vld [vmem:[%s14001_s0 + $0x200] sm:$0xff]  ;;  %v2664_v63 = vadd.f32 %v14420_v21, %v2315_v59  ;;  %v1631_v33 = vadd.f32 %v1562_v49, %v1282_v14  ;;  %v140_v31 = vld [vmem:[%s14001_s0 + $0x208] sm:$0xff]  ;;  %v2665_v43 = vadd.f32 %v14421_v53, %v2316_v50  ;;  %v14426_v5 = vld [vmem:[#allocation251_spill] sm:$0xff] }
 0x256   :  { %v7199_v58 = vld [vmem:[%s14001_s0 + $0x4e2] sm:$0xff]  ;;  %v1979_v29 = vadd.f32 %v1910_v24, %v1630_v12  ;;  %v2959_v19 = vmul.f32 %v7200_v8, %v7715_v51  ;;  %v350_v14 = vmul.f32 %v7509_v3, %v139_v54  ;;  %v351_v12 = vmul.f32 %v7509_v3, %v140_v31  ;;  %v14427_v21 = vld [vmem:[#allocation252_spill] sm:$0xff] }
 0x257   :  { %v2958_v1 = vmul.f32 %v7199_v58, %v7715_v51  ;;  %v14422_v27 = vld [vmem:[#allocation249_spill] sm:$0xff]  ;;  %v1980_v37 = vadd.f32 %v1911_v39, %v1631_v33  ;;  %v14424_v57 = vld [vmem:[#allocation250_spill] sm:$0xff] }
 0x258   :  { %v217_v16 = vadd.f32 %v14422_v27, %v11040_v60  ;;  %v14423_v7 = vld [vmem:[#allocation229_spill] sm:$0xff]  ;;  %v218_v59 = vadd.f32 %v14424_v57, %v11040_v60  ;;  %v14425_v23 = vld [vmem:[#allocation230_spill] sm:$0xff]  ;;  %v2329_v46 = vadd.f32 %v2260_v55, %v1979_v29  ;;  %v420_v3 = vadd.f32 %v351_v12, %v7507_v2 }
 0x259   :  { %v3013_v49 = vadd.f32 %v14423_v7, %v2664_v63  ;;  %v3014_v24 = vadd.f32 %v14425_v23, %v2665_v43  ;;  %v488_v35 = vld [vmem:[%s14001_s0 + $0x201] sm:$0xff]  ;;  %v2330_v15 = vadd.f32 %v2261_v11, %v1980_v37  ;;  %v419_v63 = vadd.f32 %v350_v14, %v7507_v2  ;;  %v489_v54 = vld [vmem:[%s14001_s0 + $0x209] sm:$0xff] }
 0x25a   :  { %v566_v50 = vadd.f32 %v14426_v5, %v217_v16  ;;  %v567_v39 = vadd.f32 %v14427_v21, %v218_v59  ;;  %v2678_v55 = vadd.f32 %v2609_v18, %v2329_v46  ;;  %v14428_v30 = vld [vmem:[#allocation253_spill] sm:$0xff]  ;;  %v14429_v43 = vld [vmem:[#allocation254_spill] sm:$0xff]  ;;  %v699_v8 = vmul.f32 %v7527_v10, %v488_v35  ;;  %v14430_v7 = vld [vmem:[#allocation255_spill] sm:$0xff] }
 0x25b   :  { %v3222_v44 = vmul.f32 0.01, %v3013_v49  ;;  %v3223_v33 = vmul.f32 0.01, %v3014_v24  ;;  %v837_v31 = vld [vmem:[%s14001_s0 + $0x202] sm:$0xff]  ;;  %v2679_v11 = vadd.f32 %v2610_v48, %v2330_v15  ;;  %v700_v18 = vmul.f32 %v7527_v10, %v489_v54  ;;  %v838_v2 = vld [vmem:[%s14001_s0 + $0x20a] sm:$0xff] }
 0x25c   :  { %v915_v58 = vadd.f32 %v14428_v30, %v566_v50  ;;  %v916_v29 = vadd.f32 %v14429_v43, %v567_v39  ;;  %v3027_v16 = vadd.f32 %v2958_v1, %v2678_v55  ;;  %v14431_v59 = vld [vmem:[#allocation256_spill] sm:$0xff]  ;;  %v768_v23 = vadd.f32 %v699_v8, %v419_v63  ;;  %v5842_v1 = vld [vmem:[%s14001_s0 + $0x430] sm:$0xff]  ;;  %v14432_v46 = vld [vmem:[#allocation257_spill] sm:$0xff] }
 0x25d   :  { %v3291_v53 = vmax.f32 %v3013_v49, %v3222_v44  ;;  %v3292_v27 = vmax.f32 %v3014_v24, %v3223_v33  ;;  %v3028_v57 = vadd.f32 %v2959_v19, %v2679_v11  ;;  %v1048_v48 = vmul.f32 %v7552_v20, %v837_v31  ;;  %v5841_v49 = vld [vmem:[%s14001_s0 + $0x428] sm:$0xff]  ;;  %v5913_v39 = vld [vmem:[%s14001_s0 + $0x431] sm:$0xff] }
 0x25e   :  { %v1265_v37 = vadd.f32 %v14430_v7, %v915_v58  ;;  %v1266_v14 = vadd.f32 %v14431_v59, %v916_v29  ;;  %v3236_v10 = vmul.f32 0.01, %v3027_v16  ;;  %v769_v50 = vadd.f32 %v700_v18, %v420_v3  ;;  %v5912_v19 = vld [vmem:[%s14001_s0 + $0x429] sm:$0xff]  ;;  %v14435_v31 = vld [vmem:[#allocation260_spill] sm:$0xff] }
 0x25f   :  { %v3358_v24 = vpack.c.bf16 %v3292_v27, %v3291_v53  ;;  %v3237_v12 = vmul.f32 0.01, %v3028_v57  ;;  %v14433_v35 = vld [vmem:[#allocation258_spill] sm:$0xff]  ;;  %v1049_v15 = vmul.f32 %v7552_v20, %v838_v2  ;;  %v1117_v21 = vadd.f32 %v1048_v48, %v768_v23  ;;  %v14434_v33 = vld [vmem:[#allocation259_spill] sm:$0xff]  ;;  %v6055_v8 = vld [vmem:[%s14001_s0 + $0x658] sm:$0xff] }
 0x260   :  { %v1614_v5 = vadd.f32 %v14432_v46, %v1265_v37  ;;  %v1615_v44 = vadd.f32 %v14433_v35, %v1266_v14  ;;  %v5983_v63 = vld [vmem:[%s14001_s0 + $0x42a] sm:$0xff]  ;;  %v3305_v54 = vmax.f32 %v3027_v16, %v3236_v10  ;;  %v1398_v30 = vmul.f32 %v5841_v49, %v7580_v32  ;;  %v5984_v20 = vld [vmem:[%s14001_s0 + $0x432] sm:$0xff]  ;;  %v14436_v27 = vld [vmem:[#allocation261_spill] sm:$0xff] }
 0x261   :  { %6604 = vmatpush3.bf16.msra.mxu1 %v3358_v24  ;;  %v1399_v58 = vmul.f32 %v5842_v1, %v7580_v32  ;;  %v3306_v3 = vmax.f32 %v3028_v57, %v3237_v12  ;;  %v1118_v11 = vadd.f32 %v1049_v15, %v769_v50  ;;  %v1747_v43 = vmul.f32 %v5912_v19, %v7601_v41  ;;  %v6054_v29 = vld [vmem:[%s14001_s0 + $0x650] sm:$0xff]  ;;  %v6126_v2 = vld [vmem:[%s14001_s0 + $0x659] sm:$0xff]  ;;  %v14437_v59 = vld [vmem:[#allocation262_spill] sm:$0xff] }
 0x262   :  { %v1963_v55 = vadd.f32 %v14434_v33, %v1614_v5  ;;  %v1964_v53 = vadd.f32 %v14435_v31, %v1615_v44  ;;  %v1467_v16 = vadd.f32 %v1398_v30, %v1117_v21  ;;  %v1748_v7 = vmul.f32 %v5913_v39, %v7601_v41  ;;  %v6125_v18 = vld [vmem:[%s14001_s0 + $0x651] sm:$0xff]  ;;  %v6197_v49 = vld [vmem:[%s14001_s0 + $0x65a] sm:$0xff] }
 0x263   :  { %v2096_v37 = vmul.f32 %v5983_v63, %v7624_v52  ;;  %v3365_v57 = vpack.c.bf16 %v3306_v3, %v3305_v54  ;;  %v1468_v23 = vadd.f32 %v1399_v58, %v1118_v11  ;;  %v2097_v48 = vmul.f32 %v5984_v20, %v7624_v52  ;;  %v6196_v41 = vld [vmem:[%s14001_s0 + $0x652] sm:$0xff]  ;;  %v14440_v44 = vld [vmem:[#allocation265_spill] sm:$0xff]  ;;  %v14441_v54 = vld [vmem:[#allocation266_spill] sm:$0xff] }
 0x264   :  { %v2313_v32 = vadd.f32 %v14436_v27, %v1963_v55  ;;  %v2314_v14 = vadd.f32 %v14437_v59, %v1964_v53  ;;  %v14438_v1 = vld [vmem:[#allocation263_spill] sm:$0xff]  ;;  %v1816_v10 = vadd.f32 %v1747_v43, %v1467_v16  ;;  %v2446_v46 = vmul.f32 %v6054_v29, %v7646_v62  ;;  %v14439_v50 = vld [vmem:[#allocation264_spill] sm:$0xff] }
 0x265   :  { %v2447_v5 = vmul.f32 %v6055_v8, %v7646_v62  ;;  %6605 = vmatprep.subr.bf16.mxu1 %v3365_v57  ;;  %v1817_v12 = vadd.f32 %v1748_v7, %v1468_v23  ;;  %v2795_v52 = vmul.f32 %v6125_v18, %v7666_v13  ;;  %v2796_v35 = vmul.f32 %v6126_v2, %v7666_v13  ;;  %v7201_v62 = vld [vmem:[%s14001_s0 + $0x80] sm:$0xff]  ;;  %v7202_v13 = vld [vmem:[%s14001_s0 + $0x88] sm:$0xff] }
 0x266   :  { %v2662_v24 = vadd.f32 %v14438_v1, %v2313_v32  ;;  %v2663_v19 = vadd.f32 %v14439_v50, %v2314_v14  ;;  %v2165_v21 = vadd.f32 %v2096_v37, %v1816_v10  ;;  %v3144_v39 = vmul.f32 %v6196_v41, %v7685_v28  ;;  %v7204_v53 = vld [vmem:[%s14001_s0 + $0x89] sm:$0xff] }
 0x267   :  { %v3145_v63 = vmul.f32 %v6197_v49, %v7685_v28  ;;  %v2166_v55 = vadd.f32 %v2097_v48, %v1817_v12  ;;  %v162_v30 = vmul.f32 %v7201_v62, %v7519_v6  ;;  %v163_v58 = vmul.f32 %v7202_v13, %v7519_v6  ;;  %v7203_v28 = vld [vmem:[%s14001_s0 + $0x81] sm:$0xff]  ;;  %v7206_v18 = vld [vmem:[%s14001_s0 + $0x8a] sm:$0xff] }
 0x268   :  { %v3011_v15 = vadd.f32 %v14440_v44, %v2662_v24  ;;  %v3012_v33 = vadd.f32 %v14441_v54, %v2663_v19  ;;  %v2515_v3 = vadd.f32 %v2446_v46, %v2165_v21  ;;  %v511_v31 = vmul.f32 %v7203_v28, %v7525_v9  ;;  %v7205_v7 = vld [vmem:[%s14001_s0 + $0x82] sm:$0xff]  ;;  %v7208_v1 = vld [vmem:[%s14001_s0 + $0x2b0] sm:$0xff] }
 0x269   :  { %v512_v11 = vmul.f32 %v7204_v53, %v7525_v9  ;;  %v2516_v29 = vadd.f32 %v2447_v5, %v2166_v55  ;;  %v231_v8 = vadd.f32 %v162_v30, %v11040_v60  ;;  %v232_v27 = vadd.f32 %v163_v58, %v11040_v60  ;;  %v7207_v41 = vld [vmem:[%s14001_s0 + $0x2a8] sm:$0xff]  ;;  %v7213_v62 = vld [vmem:[%s14001_s0 + $0x4d0] sm:$0xff]  ;;  %v7214_v58 = vld [vmem:[%s14001_s0 + $0x4d8] sm:$0xff] }
 0x26a   :  { %v3220_v20 = vmul.f32 0.01, %v3011_v15  ;;  %v3221_v43 = vmul.f32 0.01, %v3012_v33  ;;  %v2864_v16 = vadd.f32 %v2795_v52, %v2515_v3  ;;  %v860_v37 = vmul.f32 %v7205_v7, %v7594_v36  ;;  %v7209_v10 = vld [vmem:[%s14001_s0 + $0x2a9] sm:$0xff]  ;;  %v7215_v3 = vld [vmem:[%s14001_s0 + $0x4d1] sm:$0xff] }
 0x26b   :  { %v861_v2 = vmul.f32 %v7206_v18, %v7594_v36  ;;  %v2865_v59 = vadd.f32 %v2796_v35, %v2516_v29  ;;  %v580_v14 = vadd.f32 %v511_v31, %v231_v8  ;;  %v581_v23 = vadd.f32 %v512_v11, %v232_v27  ;;  %v7210_v35 = vld [vmem:[%s14001_s0 + $0x2b1] sm:$0xff]  ;;  %v7216_v31 = vld [vmem:[%s14001_s0 + $0x4d9] sm:$0xff] }
 0x26c   :  { %v3289_v32 = vmax.f32 %v3011_v15, %v3220_v20  ;;  %v3290_v57 = vmax.f32 %v3012_v33, %v3221_v43  ;;  %v3213_v48 = vadd.f32 %v3144_v39, %v2864_v16  ;;  %v1210_v49 = vmul.f32 %v7207_v41, %v7613_v45  ;;  %v7211_v15 = vld [vmem:[%s14001_s0 + $0x2aa] sm:$0xff]  ;;  %v7212_v39 = vld [vmem:[%s14001_s0 + $0x2b2] sm:$0xff]  ;;  %v14442_v18 = vld [vmem:[#allocation9_spill] sm:$0xff] }
 0x26d   :  { %v1211_v24 = vmul.f32 %v7208_v1, %v7613_v45  ;;  %v1559_v46 = vmul.f32 %v7209_v10, %v7636_v56  ;;  %v3214_v50 = vadd.f32 %v3145_v63, %v2865_v59  ;;  %v929_v19 = vadd.f32 %v860_v37, %v580_v14  ;;  %v7217_v8 = vld [vmem:[%s14001_s0 + $0x4d2] sm:$0xff]  ;;  %v14444_v1 = vld [vmem:[#allocation21_spill] sm:$0xff] }
 0x26e   :  { %v3357_v5 = vpack.c.bf16 %v3290_v57, %v3289_v32  ;;  %v930_v12 = vadd.f32 %v861_v2, %v581_v23  ;;  %v3455_v52 = vmul.f32 0.01, %v3213_v48  ;;  %v1560_v44 = vmul.f32 %v7210_v35, %v7636_v56  ;;  %v7218_v32 = vld [vmem:[%s14001_s0 + $0x4da] sm:$0xff]  ;;  %v14443_v23 = vld [vmem:[#allocation10_spill] sm:$0xff] }
 0x26f   :  { %v1908_v21 = vmul.f32 %v7211_v15, %v7658_v4  ;;  %v1909_v63 = vmul.f32 %v7212_v39, %v7658_v4  ;;  %v3456_v54 = vmul.f32 0.01, %v3214_v50  ;;  %v1279_v33 = vadd.f32 %v1210_v49, %v929_v19  ;;  %v6975_v35 = vld [vmem:[%s14004_s3 + $0x60] ss:$20 sps:$4 sm:$0xff]  }
 0x270   :  { %6606 = vmatpush3.bf16.msra.mxu1 %v3357_v5  ;;  %v1280_v55 = vadd.f32 %v1211_v24, %v930_v12  ;;  %v2258_v30 = vmul.f32 %v7213_v62, %v7678_v17  ;;  %v3524_v13 = vmax.f32 %v3213_v48, %v3455_v52  ;;  %v2259_v20 = vmul.f32 %v7214_v58, %v7678_v17  ;;  %v6974_v5 = vld [vmem:[%s14004_s3 + $0x38] ss:$20 sps:$4 sm:$0xff]  }
 0x271   :  { %v2607_v28 = vmul.f32 %v7215_v3, %v7697_v34  ;;  %v2608_v53 = vmul.f32 %v7216_v31, %v7697_v34  ;;  %v3525_v11 = vmax.f32 %v3214_v50, %v3456_v54  ;;  %v1628_v43 = vadd.f32 %v1559_v46, %v1279_v33  ;;  %v14446_v50 = vld [vmem:[#allocation22_spill] sm:$0xff]  ;;  %v14450_v33 = vld [vmem:[#allocation24_spill] sm:$0xff]  ;;  %v14454_v3 = vld [vmem:[#allocation25_spill] sm:$0xff] }
 0x272   :  { %v1629_v29 = vadd.f32 %v1560_v44, %v1280_v55  ;;  %v2956_v27 = vmul.f32 %v7217_v8, %v7715_v51  ;;  %v2957_v16 = vmul.f32 %v7218_v32, %v7715_v51  ;;  %v215_v7 = vadd.f32 %v10823_v61, %v11040_v60  ;;  %v14445_v61 = vld [vmem:[#allocation53_spill] sm:$0xff]  ;;  %v14447_v12 = vld [vmem:[#allocation54_spill] sm:$0xff]  ;;  %v14448_v44 = vld [vmem:[#allocation23_spill] sm:$0xff] }
 0x273   :  { %v216_v37 = vadd.f32 %v10834_v26, %v11040_v60  ;;  %v277_v2 = vadd.f32 %v14442_v18, %v11040_v60  ;;  %v3561_v57 = vpack.c.bf16 %v3525_v11, %v3524_v13  ;;  %v1977_v59 = vadd.f32 %v1908_v21, %v1628_v43  ;;  %v14449_v21 = vld [vmem:[#allocation55_spill] sm:$0xff]  ;;  %v14451_v62 = vld [vmem:[#allocation56_spill] sm:$0xff]  ;;  %v14452_v13 = vld [vmem:[#allocation285_spill] sm:$0xff] }
 0x274   :  { %v1978_v14 = vadd.f32 %v1909_v63, %v1629_v29  ;;  %v278_v48 = vadd.f32 %v14443_v23, %v11040_v60  ;;  %v564_v41 = vadd.f32 %v10837_v0, %v215_v7  ;;  %v261_v10 = vadd.f32 %v14445_v61, %v11040_v60  ;;  %v14455_v31 = vld [vmem:[#allocation57_spill] sm:$0xff]  ;;  %v14456_v8 = vld [vmem:[#allocation26_spill] sm:$0xff]  ;;  %v14458_v7 = vld [vmem:[#allocation287_spill] sm:$0xff] }
 0x275   :  { %v565_v49 = vadd.f32 %v10848_v47, %v216_v37  ;;  %v626_v24 = vadd.f32 %v14444_v1, %v277_v2  ;;  %6814 = vmatprep.subr.bf16.mxu0 %v3561_v57  ;;  %v2327_v26 = vadd.f32 %v2258_v30, %v1977_v59  ;;  %v262_v52 = vadd.f32 %v14447_v12, %v11040_v60  ;;  %v14459_v18 = vld [vmem:[#allocation288_spill] sm:$0xff] }
 0x276   :  { %v2328_v46 = vadd.f32 %v2259_v20, %v1978_v14  ;;  %v627_v19 = vadd.f32 %v14446_v50, %v278_v48  ;;  %6815 = vmatpush3.bf16.msra.mxu0 %v3561_v57  ;;  %v913_v0 = vadd.f32 %v10851_v25, %v564_v41  ;;  %v610_v39 = vadd.f32 %v14449_v21, %v261_v10  ;;  %v14453_v20 = vld [vmem:[#allocation286_spill] sm:$0xff]  ;;  %v14460_v57 = vld [vmem:[#allocation27_spill] sm:$0xff]  ;;  %v14467_v50 = vld [vmem:[#allocation61_spill] sm:$0xff] }
 0x277   :  { %v914_v47 = vadd.f32 %v10865_v22, %v565_v49  ;;  %v975_v15 = vadd.f32 %v14448_v44, %v626_v24  ;;  %v2676_v63 = vadd.f32 %v2607_v28, %v2327_v26  ;;  %v611_v30 = vadd.f32 %v14451_v62, %v262_v52  ;;  %v14457_v28 = vld [vmem:[#allocation58_spill] sm:$0xff]  ;;  %v14461_v14 = vld [vmem:[#allocation59_spill] sm:$0xff]  ;;  %v14463_v49 = vld [vmem:[#allocation60_spill] sm:$0xff] }
 0x278   :  { %v2677_v54 = vadd.f32 %v2608_v53, %v2328_v46  ;;  %v976_v55 = vadd.f32 %v14450_v33, %v627_v19  ;;  %v1263_v58 = vadd.f32 %v14452_v13, %v913_v0  ;;  %v959_v11 = vadd.f32 %v14455_v31, %v610_v39  ;;  %v14464_v24 = vld [vmem:[#allocation289_spill] sm:$0xff]  ;;  %v14465_v10 = vld [vmem:[#allocation290_spill] sm:$0xff]  ;;  %v14470_v21 = vld [vmem:[#allocation291_spill] sm:$0xff] }
 0x279   :  { %v1264_v25 = vadd.f32 %v14453_v20, %v914_v47  ;;  %v1325_v22 = vadd.f32 %v14454_v3, %v975_v15  ;;  %v3025_v43 = vadd.f32 %v2956_v27, %v2676_v63  ;;  %6817 = vmatmul.mubr.msk.bf16.vlgmr.msra.gmra.mxu0 %vm4082_vm1, %v6974_v5  ;;  %v960_v53 = vadd.f32 %v14457_v28, %v611_v30  ;;  %v14462_v27 = vld [vmem:[#allocation28_spill] sm:$0xff]  ;;  %v14466_v46 = vld [vmem:[#allocation29_spill] sm:$0xff]  ;;  %v14468_v47 = vld [vmem:[#allocation30_spill] sm:$0xff] }
 0x27a   :  { %v3026_v29 = vadd.f32 %v2957_v16, %v2677_v54  ;;  %v1326_v32 = vadd.f32 %v14456_v8, %v976_v55  ;;  %v1612_v37 = vadd.f32 %v14458_v7, %v1263_v58  ;;  %6820 = vmatprep.mubr.msk.bf16.mxu0 %vm4082_vm1, %v6975_v35  ;;  %v1309_v23 = vadd.f32 %v14461_v14, %v959_v11  ;;  %v6978_v0 = vld [vmem:[%s14004_s3 + $0x88] ss:$20 sps:$4 sm:$0xff]   ;;  %v6980_v33 = vld [vmem:[%s14004_s3 + $0xb0] ss:$20 sps:$4 sm:$0xff]  }
 0x27b   :  { %v1613_v2 = vadd.f32 %v14459_v18, %v1264_v25  ;;  %v1674_v59 = vadd.f32 %v14460_v57, %v1325_v22  ;;  %v3234_v48 = vmul.f32 0.01, %v3025_v43  ;;  %v1310_v1 = vadd.f32 %v14463_v49, %v960_v53  ;;  %v14469_v44 = vld [vmem:[#allocation62_spill] sm:$0xff]  ;;  %v14471_v63 = vld [vmem:[#allocation292_spill] sm:$0xff]  ;;  %v14472_v55 = vld [vmem:[#allocation31_spill] sm:$0xff] }
 0x27c   :  { %v3235_v41 = vmul.f32 0.01, %v3026_v29  ;;  %v1675_v16 = vadd.f32 %v14462_v27, %v1326_v32  ;;  %v1961_v61 = vadd.f32 %v14464_v24, %v1612_v37  ;;  %v1658_v19 = vadd.f32 %v14467_v50, %v1309_v23  ;;  %v14473_v30 = vld [vmem:[#allocation63_spill] sm:$0xff]  ;;  %v14474_v20 = vld [vmem:[#allocation32_spill] sm:$0xff]  ;;  %v7219_v31 = vld [vmem:[%s14001_s0 + $0x1e0] sm:$0xff] }
 0x27d   :  { %v1962_v26 = vadd.f32 %v14465_v10, %v1613_v2  ;;  %v2023_v5 = vadd.f32 %v14466_v46, %v1674_v59  ;;  %v3303_v12 = vmax.f32 %v3025_v43, %v3234_v48  ;;  %v1659_v15 = vadd.f32 %v14469_v44, %v1310_v1  ;;  %v14475_v3 = vld [vmem:[#allocation64_spill] sm:$0xff]  ;;  %v14476_v43 = vld [vmem:[#allocation293_spill] sm:$0xff]  ;;  %v14477_v8 = vld [vmem:[#allocation294_spill] sm:$0xff] }
 0x27e   :  { %v3304_v52 = vmax.f32 %v3026_v29, %v3235_v41  ;;  %v2024_v35 = vadd.f32 %v14468_v47, %v1675_v16  ;;  %v2311_v39 = vadd.f32 %v14470_v21, %v1961_v61  ;;  %v2007_v13 = vadd.f32 %v14473_v30, %v1658_v19  ;;  %v14478_v28 = vld [vmem:[#allocation33_spill] sm:$0xff]  ;;  %v14480_v18 = vld [vmem:[#allocation34_spill] sm:$0xff]  ;;  %v14482_v48 = vld [vmem:[#allocation295_spill] sm:$0xff] }
 0x27f   :  { %v2312_v54 = vadd.f32 %v14471_v63, %v1962_v26  ;;  %v2373_v62 = vadd.f32 %v14472_v55, %v2023_v5  ;;  %v2008_v22 = vadd.f32 %v14475_v3, %v1659_v15  ;;  %v206_v11 = vmul.f32 %v7219_v31, %v7519_v6  ;;  %v14479_v7 = vld [vmem:[#allocation65_spill] sm:$0xff]  ;;  %v14481_v57 = vld [vmem:[#allocation66_spill] sm:$0xff]  ;;  %v14483_v27 = vld [vmem:[#allocation296_spill] sm:$0xff] }
 0x280   :  { %v3364_v58 = vpack.c.bf16 %v3304_v52, %v3303_v12  ;;  %v2374_v25 = vadd.f32 %v14474_v20, %v2024_v35  ;;  %v2660_v29 = vadd.f32 %v14476_v43, %v2311_v39  ;;  %v2357_v37 = vadd.f32 %v14479_v7, %v2007_v13  ;;  %v7220_v14 = vld [vmem:[%s14001_s0 + $0x1e8] sm:$0xff]  ;;  %v14484_v49 = vld [vmem:[#allocation35_spill] sm:$0xff]  ;;  %v14486_v10 = vld [vmem:[#allocation36_spill] sm:$0xff] }
 0x281   :  { %v2661_v32 = vadd.f32 %v14477_v8, %v2312_v54  ;;  %v2722_v53 = vadd.f32 %v14478_v28, %v2373_v62  ;;  %6821 = vmatmul.mubr.msk.bf16.gmra.mxu0 %vm4082_vm1, %v6978_v0  ;;  %v2358_v59 = vadd.f32 %v14481_v57, %v2008_v22  ;;  %v207_v23 = vmul.f32 %v7220_v14, %v7519_v6  ;;  %v14485_v24 = vld [vmem:[#allocation67_spill] sm:$0xff]  ;;  %v14487_v46 = vld [vmem:[#allocation68_spill] sm:$0xff]  ;;  %v14488_v47 = vld [vmem:[#allocation69_spill] sm:$0xff] }
 0x282   :  { %6607 = vmatprep.subr.bf16.mxu1 %v3364_v58  ;;  %v2723_v2 = vadd.f32 %v14480_v18, %v2374_v25  ;;  %v3009_v41 = vadd.f32 %v14482_v48, %v2660_v29  ;;  %6824 = vmatprep.mubr.msk.bf16.mxu0 %vm4082_vm1, %v6980_v33  ;;  %v2706_v61 = vadd.f32 %v14485_v24, %v2357_v37  ;;  %v6983_v44 = vld [vmem:[%s14004_s3 + $0xd8] ss:$20 sps:$4 sm:$0xff]   ;;  %v7221_v63 = vld [vmem:[%s14001_s0 + $0x1e1] sm:$0xff]  ;;  %v7226_v57 = vld [vmem:[%s14001_s0 + $0x410] sm:$0xff] }
 0x283   :  { %v3010_v16 = vadd.f32 %v14483_v27, %v2661_v32  ;;  %v3071_v1 = vadd.f32 %v14484_v49, %v2722_v53  ;;  %v2707_v5 = vadd.f32 %v14487_v46, %v2358_v59  ;;  %v275_v50 = vadd.f32 %v206_v11, %v11040_v60  ;;  %v14489_v21 = vld [vmem:[#allocation70_spill] sm:$0xff]  ;;  %v6985_v13 = vld [vmem:[%s14004_s3 + $0x100] ss:$20 sps:$4 sm:$0xff]  }
 0x284   :  { %v3072_v26 = vadd.f32 %v14486_v10, %v2723_v2  ;;  %v276_v19 = vadd.f32 %v207_v23, %v11040_v60  ;;  %v3218_v12 = vmul.f32 0.01, %v3009_v41  ;;  %v3055_v35 = vadd.f32 %v14488_v47, %v2706_v61  ;;  %v7222_v33 = vld [vmem:[%s14001_s0 + $0x1e9] sm:$0xff]  ;;  %v6971_v53 = vld [vmem:[%s14003_s2] ss:$20 sps:$4 sm:$0xff]  }
 0x285   :  { %v3219_v52 = vmul.f32 0.01, %v3010_v16  ;;  %v3280_v0 = vmul.f32 0.01, %v3071_v1  ;;  %v3056_v39 = vadd.f32 %v14489_v21, %v2707_v5  ;;  %v555_v54 = vmul.f32 %v7221_v63, %v7525_v9  ;;  %v7223_v29 = vld [vmem:[%s14001_s0 + $0x1e2] sm:$0xff]  ;;  %v7224_v32 = vld [vmem:[%s14001_s0 + $0x1ea] sm:$0xff] }
 0x286   :  { %v3281_v15 = vmul.f32 0.01, %v3072_v26  ;;  %v556_v55 = vmul.f32 %v7222_v33, %v7525_v9  ;;  %v3287_v62 = vmax.f32 %v3009_v41, %v3218_v12  ;;  %v3264_v20 = vmul.f32 0.01, %v3055_v35  ;;  %v7225_v18 = vld [vmem:[%s14001_s0 + $0x408] sm:$0xff]  ;;  %v7228_v49 = vld [vmem:[%s14001_s0 + $0x411] sm:$0xff] }
 0x287   :  { %v3288_v30 = vmax.f32 %v3010_v16, %v3219_v52  ;;  %v3349_v58 = vmax.f32 %v3071_v1, %v3280_v0  ;;  %v3265_v3 = vmul.f32 0.01, %v3056_v39  ;;  %v624_v22 = vadd.f32 %v555_v54, %v275_v50  ;;  %v6976_v14 = vld [vmem:[%s14003_s2 + $0x2c] ss:$20 sps:$4 sm:$0xff]   ;;  %v7230_v10 = vld [vmem:[%s14001_s0 + $0x412] sm:$0xff] }
 0x288   :  { %v3350_v25 = vmax.f32 %v3072_v26, %v3281_v15  ;;  %v625_v31 = vadd.f32 %v556_v55, %v276_v19  ;;  %v3333_v43 = vmax.f32 %v3055_v35, %v3264_v20  ;;  %v904_v8 = vmul.f32 %v7223_v29, %v7594_v36  ;;  %v7227_v41 = vld [vmem:[%s14001_s0 + $0x409] sm:$0xff]  ;;  %v7232_v12 = vld [vmem:[%s14001_s0 + $0x638] sm:$0xff] }
 0x289   :  { %v3356_v11 = vpack.c.bf16 %v3288_v30, %v3287_v62  ;;  %v905_v28 = vmul.f32 %v7224_v32, %v7594_v36  ;;  %6825 = vmatmul.mubr.msk.bf16.gmra.mxu0 %vm4082_vm1, %v6983_v44  ;;  %v3334_v37 = vmax.f32 %v3056_v39, %v3265_v3  ;;  %v1254_v2 = vmul.f32 %v7225_v18, %v7613_v45  ;;  %v7229_v24 = vld [vmem:[%s14001_s0 + $0x40a] sm:$0xff]  ;;  %v7234_v44 = vld [vmem:[%s14001_s0 + $0x639] sm:$0xff] }
 0x28a   :  { %v3387_v7 = vpack.c.bf16 %v3350_v25, %v3349_v58  ;;  %v1255_v59 = vmul.f32 %v7226_v57, %v7613_v45  ;;  %6828 = vmatprep.mubr.msk.bf16.mxu0 %vm4082_vm1, %v6985_v13  ;;  %v973_v23 = vadd.f32 %v904_v8, %v624_v22  ;;  %v1603_v27 = vmul.f32 %v7227_v41, %v7636_v56  ;;  %v7231_v50 = vld [vmem:[%s14001_s0 + $0x630] sm:$0xff]  ;;  %v6988_v0 = vld [vmem:[%s14004_s3 + $0x128] ss:$20 sps:$4 sm:$0xff]   ;;  %v14490_v62 = vld [vmem:[#allocation89_spill] sm:$0xff] }
 0x28b   :  { %6608 = vmatpush3.bf16.msra.mxu1 %v3356_v11  ;;  %v974_v48 = vadd.f32 %v905_v28, %v625_v31  ;;  %v3379_v16 = vpack.c.bf16 %v3334_v37, %v3333_v43  ;;  %v1604_v1 = vmul.f32 %v7228_v49, %v7636_v56  ;;  %v1952_v61 = vmul.f32 %v7229_v24, %v7658_v4  ;;  %v7233_v47 = vld [vmem:[%s14001_s0 + $0x631] sm:$0xff]  ;;  %v7236_v33 = vld [vmem:[%s14001_s0 + $0x63a] sm:$0xff]  ;;  %v14491_v58 = vld [vmem:[#allocation90_spill] sm:$0xff] }
 0x28c   :  { %6693 = vmatprep.subr.bf16.mxu0 %v3387_v7  ;;  %v1953_v26 = vmul.f32 %v7230_v10, %v7658_v4  ;;  %v1323_v46 = vadd.f32 %v1254_v2, %v973_v23  ;;  %v2302_v19 = vmul.f32 %v7231_v50, %v7678_v17  ;;  %v2303_v52 = vmul.f32 %v7232_v12, %v7678_v17  ;;  %v7235_v21 = vld [vmem:[%s14001_s0 + $0x632] sm:$0xff]  ;;  %v6979_v37 = vld [vmem:[%s14003_s2 + $0x28] ss:$20 sps:$4 sm:$0xff]  }
 0x28d   :  { %v1324_v5 = vadd.f32 %v1255_v59, %v974_v48  ;;  %6694 = vmatpush3.bf16.msra.mxu0 %v3379_v16  ;;  %v2651_v35 = vmul.f32 %v7233_v47, %v7697_v34  ;;  %v2652_v15 = vmul.f32 %v7234_v44, %v7697_v34  ;;  %v3000_v39 = vmul.f32 %v7235_v21, %v7715_v51  ;;  %v6990_v13 = vld [vmem:[%s14004_s3 + $0x150] ss:$20 sps:$4 sm:$0xff]   ;;  %v7238_v22 = vld [vmem:[%s14001_s0 + $0x1d8] sm:$0xff]  ;;  %v6981_v48 = vld [vmem:[%s14003_s2 + $0x54] ss:$20 sps:$4 sm:$0xff]  }
 0x28e   :  { %4992 = vmatmul.mubr.bf16.vlgmr.msra.gmra.mxu1 %v6971_v53  ;;  %v1672_v63 = vadd.f32 %v1603_v27, %v1323_v46  ;;  %v3001_v55 = vmul.f32 %v7236_v33, %v7715_v51  ;;  %v259_v30 = vadd.f32 %v14490_v62, %v11040_v60  ;;  %v260_v20 = vadd.f32 %v14491_v58, %v11040_v60  ;;  %v7237_v25 = vld [vmem:[%s14001_s0 + $0x1d0] sm:$0xff]  ;;  %v7240_v53 = vld [vmem:[%s14001_s0 + $0x1d9] sm:$0xff] }
 0x28f   :  { %4999 = vmatprep.mubr.bf16.mxu1 %v6976_v14  ;;  %v1673_v54 = vadd.f32 %v1604_v1, %v1324_v5  ;;  %v204_v3 = vmul.f32 %v7237_v25, %v7519_v6  ;;  %v205_v31 = vmul.f32 %v7238_v22, %v7519_v6  ;;  %v7239_v11 = vld [vmem:[%s14001_s0 + $0x1d1] sm:$0xff]  ;;  %v554_v7 = vmul.f32 %v7240_v53, %v7525_v9  ;;  %v14494_v16 = vld [vmem:[#allocation93_spill] sm:$0xff] }
 0x290   :  { %v553_v43 = vmul.f32 %v7239_v11, %v7525_v9  ;;  %v2021_v29 = vadd.f32 %v1952_v61, %v1672_v63  ;;  %v14492_v32 = vld [vmem:[#allocation91_spill] sm:$0xff]  ;;  %v14493_v18 = vld [vmem:[#allocation92_spill] sm:$0xff]  ;;  %v14495_v61 = vld [vmem:[#allocation94_spill] sm:$0xff] }
 0x291   :  { %v2022_v8 = vadd.f32 %v1953_v26, %v1673_v54  ;;  %v608_v28 = vadd.f32 %v14492_v32, %v259_v30  ;;  %6829 = vmatmul.mubr.msk.bf16.gmra.mxu0 %vm4082_vm1, %v6988_v0  ;;  %v609_v2 = vadd.f32 %v14493_v18, %v260_v20  ;;  %v273_v57 = vadd.f32 %v204_v3, %v11040_v60  ;;  %v7241_v14 = vld [vmem:[%s14001_s0 + $0x1d2] sm:$0xff]  ;;  %v7242_v1 = vld [vmem:[%s14001_s0 + $0x1da] sm:$0xff] }
 0x292   :  { %v274_v59 = vadd.f32 %v205_v31, %v11040_v60  ;;  %v902_v23 = vmul.f32 %v7241_v14, %v7594_v36  ;;  %v2371_v41 = vadd.f32 %v2302_v19, %v2021_v29  ;;  %6832 = vmatprep.mubr.msk.bf16.mxu0 %vm4082_vm1, %v6990_v13  ;;  %v903_v24 = vmul.f32 %v7242_v1, %v7594_v36  ;;  %v7243_v5 = vld [vmem:[%s14001_s0 + $0x3f8] sm:$0xff]  ;;  %v7244_v47 = vld [vmem:[%s14001_s0 + $0x400] sm:$0xff]  ;;  %v14499_v31 = vld [vmem:[#allocation98_spill] sm:$0xff] }
 0x293   :  { %v2372_v27 = vadd.f32 %v2303_v52, %v2022_v8  ;;  %v957_v49 = vadd.f32 %v14494_v16, %v608_v28  ;;  %v958_v10 = vadd.f32 %v14495_v61, %v609_v2  ;;  %v622_v26 = vadd.f32 %v553_v43, %v273_v57  ;;  %v14496_v52 = vld [vmem:[#allocation95_spill] sm:$0xff]  ;;  %v14497_v21 = vld [vmem:[#allocation96_spill] sm:$0xff]  ;;  %v14498_v58 = vld [vmem:[#allocation97_spill] sm:$0xff] }
 0x294   :  { %v623_v46 = vadd.f32 %v554_v7, %v274_v59  ;;  %v1252_v50 = vmul.f32 %v7243_v5, %v7613_v45  ;;  %v2720_v19 = vadd.f32 %v2651_v35, %v2371_v41  ;;  %v1253_v44 = vmul.f32 %v7244_v47, %v7613_v45  ;;  %v6993_v54 = vld [vmem:[%s14004_s3 + $0x178] ss:$20 sps:$4 sm:$0xff]   ;;  %v7246_v25 = vld [vmem:[%s14001_s0 + $0x401] sm:$0xff]  ;;  %v14500_v28 = vld [vmem:[#allocation99_spill] sm:$0xff] }
 0x295   :  { %v2721_v12 = vadd.f32 %v2652_v15, %v2372_v27  ;;  %v1307_v0 = vadd.f32 %v14496_v52, %v957_v49  ;;  %v1308_v63 = vadd.f32 %v14497_v21, %v958_v10  ;;  %v971_v33 = vadd.f32 %v902_v23, %v622_v26  ;;  %v7245_v35 = vld [vmem:[%s14001_s0 + $0x3f9] sm:$0xff]  ;;  %v7248_v7 = vld [vmem:[%s14001_s0 + $0x402] sm:$0xff]  ;;  %v14504_v52 = vld [vmem:[#allocation103_spill] sm:$0xff] }
 0x296   :  { %5000 = vmatmul.mubr.bf16.gmra.mxu1 %v6979_v37  ;;  %v972_v62 = vadd.f32 %v903_v24, %v623_v46  ;;  %v1601_v15 = vmul.f32 %v7245_v35, %v7636_v56  ;;  %v3069_v30 = vadd.f32 %v3000_v39, %v2720_v19  ;;  %v1602_v3 = vmul.f32 %v7246_v25, %v7636_v56  ;;  %v6995_v22 = vld [vmem:[%s14004_s3 + $0x1a0] ss:$20 sps:$4 sm:$0xff]   ;;  %v6984_v18 = vld [vmem:[%s14003_s2 + $0x50] ss:$20 sps:$4 sm:$0xff]   ;;  %v14501_v2 = vld [vmem:[#allocation100_spill] sm:$0xff] }
 0x297   :  { %5007 = vmatprep.mubr.bf16.mxu1 %v6981_v48  ;;  %v3070_v13 = vadd.f32 %v3001_v55, %v2721_v12  ;;  %v1656_v20 = vadd.f32 %v14498_v58, %v1307_v0  ;;  %v1657_v11 = vadd.f32 %v14499_v31, %v1308_v63  ;;  %v1321_v43 = vadd.f32 %v1252_v50, %v971_v33  ;;  %v7247_v39 = vld [vmem:[%s14001_s0 + $0x3fa] sm:$0xff]  ;;  %v7250_v24 = vld [vmem:[%s14001_s0 + $0x628] sm:$0xff]  ;;  %v12351_v58 = vpop.f32.mrf.mxu0 }
 0x298   :  { %v1322_v29 = vadd.f32 %v1253_v44, %v972_v62  ;;  %v1950_v55 = vmul.f32 %v7247_v39, %v7658_v4  ;;  %v3278_v8 = vmul.f32 0.01, %v3069_v30  ;;  %v1951_v37 = vmul.f32 %v7248_v7, %v7658_v4  ;;  %v7249_v23 = vld [vmem:[%s14001_s0 + $0x620] sm:$0xff]  ;;  %v6986_v41 = vld [vmem:[%s14003_s2 + $0x7c] ss:$20 sps:$4 sm:$0xff]   ;;  %v14503_v10 = vld [vmem:[#allocation102_spill] sm:$0xff] }
 0x299   :  { %v3279_v32 = vmul.f32 0.01, %v3070_v13  ;;  %v2005_v53 = vadd.f32 %v14500_v28, %v1656_v20  ;;  %v2006_v57 = vadd.f32 %v14501_v2, %v1657_v11  ;;  %6833 = vmatmul.mubr.msk.bf16.gmra.mxu0 %vm4082_vm1, %v6993_v54  ;;  %v1670_v59 = vadd.f32 %v1601_v15, %v1321_v43  ;;  %v14502_v49 = vld [vmem:[#allocation101_spill] sm:$0xff]  ;;  %v7252_v47 = vld [vmem:[%s14001_s0 + $0x629] sm:$0xff]  ;;  %v14505_v54 = vld [vmem:[#allocation104_spill] sm:$0xff]  ;;  %14506 = vst [vmem:[#allocation11_spill] sm:$0xff] %v12351_v58 }
 0x29a   :  { %v1671_v14 = vadd.f32 %v1602_v3, %v1322_v29  ;;  %v2300_v48 = vmul.f32 %v7249_v23, %v7678_v17  ;;  %v3347_v27 = vmax.f32 %v3069_v30, %v3278_v8  ;;  %v2301_v61 = vmul.f32 %v7250_v24, %v7678_v17  ;;  %6836 = vmatprep.mubr.msk.bf16.mxu0 %vm4082_vm1, %v6995_v22  ;;  %v7251_v50 = vld [vmem:[%s14001_s0 + $0x621] sm:$0xff]  ;;  %v7254_v15 = vld [vmem:[%s14001_s0 + $0x62a] sm:$0xff] }
 0x29b   :  { %v3348_v16 = vmax.f32 %v3070_v13, %v3279_v32  ;;  %v2355_v1 = vadd.f32 %v14502_v49, %v2005_v53  ;;  %v2356_v26 = vadd.f32 %v14503_v10, %v2006_v57  ;;  %v2019_v46 = vadd.f32 %v1950_v55, %v1670_v59  ;;  %v7253_v21 = vld [vmem:[%s14001_s0 + $0x622] sm:$0xff]  ;;  %v14511_v7 = vld [vmem:[#allocation127_spill] sm:$0xff] }
 0x29c   :  { %v2020_v5 = vadd.f32 %v1951_v37, %v1671_v14  ;;  %v2649_v19 = vmul.f32 %v7251_v50, %v7697_v34  ;;  %v2650_v44 = vmul.f32 %v7252_v47, %v7697_v34  ;;  %v2998_v63 = vmul.f32 %v7253_v21, %v7715_v51  ;;  %v6998_v13 = vld [vmem:[%s14004_s3 + $0x1c8] ss:$20 sps:$4 sm:$0xff]   ;;  %v14507_v20 = vld [vmem:[#allocation105_spill] sm:$0xff]  ;;  %v6989_v14 = vld [vmem:[%s14003_s2 + $0x78] ss:$20 sps:$4 sm:$0xff]  }
 0x29d   :  { %v3386_v12 = vpack.c.bf16 %v3348_v16, %v3347_v27  ;;  %v2704_v0 = vadd.f32 %v14504_v52, %v2355_v1  ;;  %v2705_v33 = vadd.f32 %v14505_v54, %v2356_v26  ;;  %v2369_v62 = vadd.f32 %v2300_v48, %v2019_v46  ;;  %v14508_v3 = vld [vmem:[#allocation125_spill] sm:$0xff]  ;;  %v14509_v31 = vld [vmem:[#allocation126_spill] sm:$0xff]  ;;  %v12377_v16 = vpop.f32.mrf.mxu0  ;;  %v14517_v47 = vld [vmem:[#allocation131_spill] sm:$0xff] }
 0x29e   :  { %5008 = vmatmul.mubr.bf16.gmra.mxu1 %v6984_v18  ;;  %v2370_v35 = vadd.f32 %v2301_v61, %v2020_v5  ;;  %v2999_v30 = vmul.f32 %v7254_v15, %v7715_v51  ;;  %v257_v22 = vadd.f32 %v14508_v3, %v11040_v60  ;;  %v258_v11 = vadd.f32 %v14509_v31, %v11040_v60  ;;  %v7000_v43 = vld [vmem:[%s14004_s3 + $0x1f0] ss:$20 sps:$4 sm:$0xff]   ;;  %v14510_v29 = vld [vmem:[#allocation106_spill] sm:$0xff]  ;;  %v14512_v18 = vld [vmem:[#allocation128_spill] sm:$0xff] }
 0x29f   :  { %5015 = vmatprep.mubr.bf16.mxu1 %v6986_v41  ;;  %6695 = vmatprep.subr.bf16.mxu0 %v3386_v12  ;;  %v3053_v25 = vadd.f32 %v14507_v20, %v2704_v0  ;;  %v3054_v39 = vadd.f32 %v14510_v29, %v2705_v33  ;;  %v2718_v55 = vadd.f32 %v2649_v19, %v2369_v62  ;;  %v7255_v32 = vld [vmem:[%s14001_s0 + $0x1c0] sm:$0xff]  ;;  %v7256_v57 = vld [vmem:[%s14001_s0 + $0x1c8] sm:$0xff]  ;;  %v12390_v0 = vpop.f32.mrf.mxu0  ;;  %v14518_v21 = vld [vmem:[#allocation132_spill] sm:$0xff] }
 0x2a0   :  { %v2719_v8 = vadd.f32 %v2650_v44, %v2370_v35  ;;  %v202_v28 = vmul.f32 %v7255_v32, %v7519_v6  ;;  %v606_v37 = vadd.f32 %v14511_v7, %v257_v22  ;;  %v607_v2 = vadd.f32 %v14512_v18, %v258_v11  ;;  %14513 = vst [vmem:[#allocation12_spill] sm:$0xff] %v12377_v16  ;;  %v6991_v1 = vld [vmem:[%s14003_s2 + $0xa4] ss:$20 sps:$4 sm:$0xff]   ;;  %v14515_v10 = vld [vmem:[#allocation130_spill] sm:$0xff]  ;;  %v7262_v7 = vld [vmem:[%s14001_s0 + $0x3f0] sm:$0xff] }
 0x2a1   :  { %v3262_v53 = vmul.f32 0.01, %v3053_v25  ;;  %v203_v59 = vmul.f32 %v7256_v57, %v7519_v6  ;;  %v3263_v23 = vmul.f32 0.01, %v3054_v39  ;;  %v3067_v48 = vadd.f32 %v2998_v63, %v2718_v55  ;;  %6837 = vmatmul.mubr.msk.bf16.gmra.mxu0 %vm4082_vm1, %v6998_v13  ;;  %v14514_v24 = vld [vmem:[#allocation129_spill] sm:$0xff]  ;;  %14516 = vst [vmem:[#allocation37_spill] sm:$0xff] %v12390_v0 }
 0x2a2   :  { %v3068_v41 = vadd.f32 %v2999_v30, %v2719_v8  ;;  %v271_v27 = vadd.f32 %v202_v28, %v11040_v60  ;;  %v955_v61 = vadd.f32 %v14514_v24, %v606_v37  ;;  %v956_v26 = vadd.f32 %v14515_v10, %v607_v2  ;;  %6840 = vmatprep.mubr.msk.bf16.mxu0 %vm4082_vm1, %v7000_v43  ;;  %v7257_v12 = vld [vmem:[%s14001_s0 + $0x1c1] sm:$0xff]  ;;  %v7258_v54 = vld [vmem:[%s14001_s0 + $0x1c9] sm:$0xff]  ;;  %v7264_v24 = vld [vmem:[%s14001_s0 + $0x3f1] sm:$0xff] }
 0x2a3   :  { %v3331_v49 = vmax.f32 %v3053_v25, %v3262_v53  ;;  %v272_v46 = vadd.f32 %v203_v59, %v11040_v60  ;;  %v3332_v5 = vmax.f32 %v3054_v39, %v3263_v23  ;;  %v3276_v50 = vmul.f32 0.01, %v3067_v48  ;;  %v7259_v62 = vld [vmem:[%s14001_s0 + $0x1c2] sm:$0xff]  ;;  %v12402_v25 = vpop.f32.mrf.mxu0  ;;  %v7260_v29 = vld [vmem:[%s14001_s0 + $0x1ca] sm:$0xff]  ;;  %v14633_v0 = vld [vmem:[#allocation268_spill] sm:$0xff] }
 0x2a4   :  { %v3277_v19 = vmul.f32 0.01, %v3068_v41  ;;  %v551_v52 = vmul.f32 %v7257_v12, %v7525_v9  ;;  %v1305_v44 = vadd.f32 %v14517_v47, %v955_v61  ;;  %v1306_v63 = vadd.f32 %v14518_v21, %v956_v26  ;;  %14519 = vst [vmem:[#allocation38_spill] sm:$0xff] %v12402_v25  ;;  %v14520_v3 = vld [vmem:[#allocation133_spill] sm:$0xff]  ;;  %v14521_v31 = vld [vmem:[#allocation134_spill] sm:$0xff]  ;;  %v14523_v57 = vld [vmem:[#allocation135_spill] sm:$0xff] }
 0x2a5   :  { %v552_v33 = vmul.f32 %v7258_v54, %v7525_v9  ;;  %v900_v35 = vmul.f32 %v7259_v62, %v7594_v36  ;;  %v3378_v15 = vpack.c.bf16 %v3332_v5, %v3331_v49  ;;  %v3345_v30 = vmax.f32 %v3067_v48, %v3276_v50  ;;  %v7003_v55 = vld [vmem:[%s14004_s3 + $0x218] ss:$20 sps:$4 sm:$0x3f]   ;;  %v12424_v2 = vpop.f32.mrf.mxu0  ;;  %v6994_v49 = vld [vmem:[%s14003_s2 + $0xa0] ss:$20 sps:$4 sm:$0xff]  }
 0x2a6   :  { %5016 = vmatmul.mubr.bf16.gmra.mxu1 %v6989_v14  ;;  %v3346_v13 = vmax.f32 %v3068_v41, %v3277_v19  ;;  %v620_v20 = vadd.f32 %v551_v52, %v271_v27  ;;  %v1654_v22 = vadd.f32 %v14520_v3, %v1305_v44  ;;  %v1655_v11 = vadd.f32 %v14521_v31, %v1306_v63  ;;  %v7261_v28 = vld [vmem:[%s14001_s0 + $0x3e8] sm:$0xff]  ;;  %v14524_v14 = vld [vmem:[#allocation136_spill] sm:$0xff]  ;;  %v14526_v19 = vld [vmem:[#allocation137_spill] sm:$0xff] }
 0x2a7   :  { %5023 = vmatprep.mubr.bf16.mxu1 %v6991_v1  ;;  %v621_v43 = vadd.f32 %v552_v33, %v272_v46  ;;  %v901_v39 = vmul.f32 %v7260_v29, %v7594_v36  ;;  %6696 = vmatpush3.bf16.msra.mxu0 %v3378_v15  ;;  %v1250_v53 = vmul.f32 %v7261_v28, %v7613_v45  ;;  %v7009_v18 = vld [vmem:[%s14003_s2 + $0xc] ss:$20 sps:$4 sm:$0xff]   ;;  %v7266_v46 = vld [vmem:[%s14001_s0 + $0x3f2] sm:$0xff]  ;;  %v12447_v50 = vpop.f32.mrf.mxu0 }
 0x2a8   :  { %v3385_v8 = vpack.c.bf16 %v3346_v13, %v3345_v30  ;;  %v969_v32 = vadd.f32 %v900_v35, %v620_v20  ;;  %v1251_v37 = vmul.f32 %v7262_v7, %v7613_v45  ;;  %14522 = vst [vmem:[#allocation13_spill] sm:$0xff] %v12424_v2  ;;  %v2003_v59 = vadd.f32 %v14523_v57, %v1654_v22  ;;  %v7263_v41 = vld [vmem:[%s14001_s0 + $0x3e9] sm:$0xff]  ;;  %v7268_v62 = vld [vmem:[%s14001_s0 + $0x618] sm:$0xff]  ;;  %v12487_v57 = vpop.f32.mrf.mxu1 }
 0x2a9   :  { %v2004_v23 = vadd.f32 %v14524_v14, %v1655_v11  ;;  %v970_v48 = vadd.f32 %v901_v39, %v621_v43  ;;  %v1599_v27 = vmul.f32 %v7263_v41, %v7636_v56  ;;  %v1600_v61 = vmul.f32 %v7264_v24, %v7636_v56  ;;  %v7265_v10 = vld [vmem:[%s14001_s0 + $0x3ea] sm:$0xff]  ;;  %14525 = vst [vmem:[#allocation14_spill] sm:$0xff] %v12447_v50  ;;  %v7270_v13 = vld [vmem:[%s14001_s0 + $0x619] sm:$0xff]  ;;  %v12471_v3 = vpop.f32.mrf.mxu0 }
 0x2aa   :  { %6697 = vmatprep.subr.bf16.mxu0 %v3385_v8  ;;  %v1319_v1 = vadd.f32 %v1250_v53, %v969_v32  ;;  %v1948_v26 = vmul.f32 %v7265_v10, %v7658_v4  ;;  %v1949_v5 = vmul.f32 %v7266_v46, %v7658_v4  ;;  %v2353_v12 = vadd.f32 %v14526_v19, %v2003_v59  ;;  %v14527_v52 = vld [vmem:[#allocation138_spill] sm:$0xff]  ;;  %v7267_v21 = vld [vmem:[%s14001_s0 + $0x610] sm:$0xff]  ;;  %v14530_v11 = vld [vmem:[#allocation140_spill] sm:$0xff] }
 0x2ab   :  { %v2354_v47 = vadd.f32 %v14527_v52, %v2004_v23  ;;  %v1320_v44 = vadd.f32 %v1251_v37, %v970_v48  ;;  %v2298_v63 = vmul.f32 %v7267_v21, %v7678_v17  ;;  %v6996_v54 = vld [vmem:[%s14003_s2 + $0xcc] ss:$20 sps:$4 sm:$0xff]   ;;  %6841 = vmatmul.mubr.msk.bf16.gmra.mxu0 %vm4082_vm1, %v7003_v55  ;;  %v2299_v35 = vmul.f32 %v7268_v62, %v7678_v17  ;;  %v7269_v15 = vld [vmem:[%s14001_s0 + $0x611] sm:$0xff]  ;;  %v12489_v59 = vpop.f32.mrf.mxu0  ;;  %v12503_v52 = vpop.f32.mrf.mxu1 }
 0x2ac   :  { %v1668_v33 = vadd.f32 %v1599_v27, %v1319_v1  ;;  %v2647_v30 = vmul.f32 %v7269_v15, %v7697_v34  ;;  %v2648_v20 = vmul.f32 %v7270_v13, %v7697_v34  ;;  %5136 = vmatprep.mubr.bf16.mxu0 %v7009_v18  ;;  %14528 = vst [vmem:[#allocation39_spill] sm:$0xff] %v12471_v3  ;;  %v14529_v22 = vld [vmem:[#allocation139_spill] sm:$0xff]  ;;  %v7272_v32 = vld [vmem:[%s14001_s0 + $0x61a] sm:$0xff]  ;;  %v14532_v37 = vld [vmem:[#allocation162_spill] sm:$0xff] }
 0x2ad   :  { %v2702_v31 = vadd.f32 %v14529_v22, %v2353_v12  ;;  %v2703_v43 = vadd.f32 %v14530_v11, %v2354_v47  ;;  %v1669_v29 = vadd.f32 %v1600_v61, %v1320_v44  ;;  %v7271_v39 = vld [vmem:[%s14001_s0 + $0x612] sm:$0xff]  ;;  %v2997_v28 = vmul.f32 %v7272_v32, %v7715_v51  ;;  %v14531_v53 = vld [vmem:[#allocation161_spill] sm:$0xff]  ;;  %14533 = vst [vmem:[#allocation40_spill] sm:$0xff] %v12487_v57  ;;  %v14536_v48 = vld [vmem:[#allocation142_spill] sm:$0xff]  ;;  %v12514_v11 = vpop.f32.mrf.mxu1 }
 0x2ae   :  { %v2996_v55 = vmul.f32 %v7271_v39, %v7715_v51  ;;  %5024 = vmatmul.mubr.bf16.gmra.mxu1 %v6994_v49  ;;  %v2017_v8 = vadd.f32 %v1948_v26, %v1668_v33  ;;  %v255_v7 = vadd.f32 %v14531_v53, %v11040_v60  ;;  %v256_v18 = vadd.f32 %v14532_v37, %v11040_v60  ;;  %v14535_v14 = vld [vmem:[#allocation141_spill] sm:$0xff]  ;;  %v7273_v49 = vld [vmem:[%s14001_s0 + $0x1b0] sm:$0xff]  ;;  %v14538_v26 = vld [vmem:[#allocation164_spill] sm:$0xff] }
 0x2af   :  { %14534 = vst [vmem:[#allocation15_spill] sm:$0xff] %v12489_v59  ;;  %v3051_v23 = vadd.f32 %v14535_v14, %v2702_v31  ;;  %v3052_v41 = vadd.f32 %v14536_v48, %v2703_v43  ;;  %v2018_v27 = vadd.f32 %v1949_v5, %v1669_v29  ;;  %5031 = vmatprep.mubr.bf16.mxu1 %v6996_v54  ;;  %v14537_v61 = vld [vmem:[#allocation163_spill] sm:$0xff]  ;;  %v7274_v19 = vld [vmem:[%s14001_s0 + $0x1b8] sm:$0xff]  ;;  %14539 = vst [vmem:[#allocation16_spill] sm:$0xff] %v12503_v52  ;;  %v12505_v5 = vpop.f32.mrf.mxu0  ;;  %v12531_v48 = vpop.f32.mrf.mxu1 }
 0x2b0   :  { %v200_v1 = vmul.f32 %v7273_v49, %v7519_v6  ;;  %v2367_v24 = vadd.f32 %v2298_v63, %v2017_v8  ;;  %v604_v10 = vadd.f32 %v14537_v61, %v255_v7  ;;  %v605_v46 = vadd.f32 %v14538_v26, %v256_v18  ;;  %14540 = vst [vmem:[#allocation41_spill] sm:$0xff] %v12505_v5  ;;  %v14541_v33 = vld [vmem:[#allocation165_spill] sm:$0xff]  ;;  %v14542_v15 = vld [vmem:[#allocation166_spill] sm:$0xff]  ;;  %v14545_v7 = vld [vmem:[#allocation167_spill] sm:$0xff] }
 0x2b1   :  { %v201_v12 = vmul.f32 %v7274_v19, %v7519_v6  ;;  %v3260_v47 = vmul.f32 0.01, %v3051_v23  ;;  %v3261_v44 = vmul.f32 0.01, %v3052_v41  ;;  %v2368_v21 = vadd.f32 %v2299_v35, %v2018_v27  ;;  %v6999_v22 = vld [vmem:[%s14003_s2 + $0xc8] ss:$20 sps:$4 sm:$0xff]   ;;  %v12516_v43 = vpop.f32.mrf.mxu0 }
 0x2b2   :  { %v269_v54 = vadd.f32 %v200_v1, %v11040_v60  ;;  %v2716_v63 = vadd.f32 %v2647_v30, %v2367_v24  ;;  %v953_v62 = vadd.f32 %v14541_v33, %v604_v10  ;;  %v954_v13 = vadd.f32 %v14542_v15, %v605_v46  ;;  %14543 = vst [vmem:[#allocation42_spill] sm:$0xff] %v12514_v11  ;;  %v7275_v30 = vld [vmem:[%s14001_s0 + $0x1b1] sm:$0xff]  ;;  %v14549_v10 = vld [vmem:[#allocation169_spill] sm:$0xff]  ;;  %v14550_v46 = vld [vmem:[#allocation170_spill] sm:$0xff] }
 0x2b3   :  { %v270_v31 = vadd.f32 %v201_v12, %v11040_v60  ;;  %14544 = vst [vmem:[#allocation17_spill] sm:$0xff] %v12516_v43  ;;  %v3329_v29 = vmax.f32 %v3051_v23, %v3260_v47  ;;  %v3330_v39 = vmax.f32 %v3052_v41, %v3261_v44  ;;  %v2717_v35 = vadd.f32 %v2648_v20, %v2368_v21  ;;  %v7001_v32 = vld [vmem:[%s14003_s2 + $0xf4] ss:$20 sps:$4 sm:$0xff]   ;;  %v14546_v18 = vld [vmem:[#allocation168_spill] sm:$0xff]  ;;  %v12533_v41 = vpop.f32.mrf.mxu0  ;;  %v12541_v47 = vpop.f32.mrf.mxu1 }
 0x2b4   :  { %v549_v8 = vmul.f32 %v7275_v30, %v7525_v9  ;;  %v3065_v53 = vadd.f32 %v2996_v55, %v2716_v63  ;;  %v1303_v37 = vadd.f32 %v14545_v7, %v953_v62  ;;  %v1304_v14 = vadd.f32 %v14546_v18, %v954_v13  ;;  %v7276_v23 = vld [vmem:[%s14001_s0 + $0x1b9] sm:$0xff]  ;;  %14547 = vst [vmem:[#allocation18_spill] sm:$0xff] %v12531_v48  ;;  %v14553_v13 = vld [vmem:[#allocation171_spill] sm:$0xff]  ;;  %v7325_v48 = vld [vmem:[%s14001_s0 + $0x5e2] sm:$0xff] }
 0x2b5   :  { %v550_v20 = vmul.f32 %v7276_v23, %v7525_v9  ;;  %14548 = vst [vmem:[#allocation43_spill] sm:$0xff] %v12533_v41  ;;  %v3377_v27 = vpack.c.bf16 %v3330_v39, %v3329_v29  ;;  %v3066_v49 = vadd.f32 %v2997_v28, %v2717_v35  ;;  %v7277_v55 = vld [vmem:[%s14001_s0 + $0x1b2] sm:$0xff]  ;;  %14551 = vst [vmem:[#allocation44_spill] sm:$0xff] %v12541_v47  ;;  %v12543_v44 = vpop.f32.mrf.mxu0  ;;  %v7278_v21 = vld [vmem:[%s14001_s0 + $0x1ba] sm:$0xff]  ;;  %v12559_v30 = vpop.f32.mrf.mxu1 }
 0x2b6   :  { %v618_v1 = vadd.f32 %v549_v8, %v269_v54  ;;  %v898_v24 = vmul.f32 %v7277_v55, %v7594_v36  ;;  %v3274_v61 = vmul.f32 0.01, %v3065_v53  ;;  %v1652_v26 = vadd.f32 %v14549_v10, %v1303_v37  ;;  %5032 = vmatmul.mubr.bf16.gmra.mxu1 %v6999_v22  ;;  %14552 = vst [vmem:[#allocation19_spill] sm:$0xff] %v12543_v44  ;;  %v7279_v33 = vld [vmem:[%s14001_s0 + $0x3d8] sm:$0xff]  ;;  %v7280_v39 = vld [vmem:[%s14001_s0 + $0x3e0] sm:$0xff]  ;;  %v14608_v47 = vld [vmem:[#allocation234_spill] sm:$0xff] }
 0x2b7   :  { %v1653_v19 = vadd.f32 %v14550_v46, %v1304_v14  ;;  %v619_v12 = vadd.f32 %v550_v20, %v270_v31  ;;  %6698 = vmatpush3.bf16.msra.mxu0 %v3377_v27  ;;  %v3275_v28 = vmul.f32 0.01, %v3066_v49  ;;  %v899_v54 = vmul.f32 %v7278_v21, %v7594_v36  ;;  %5039 = vmatprep.mubr.bf16.mxu1 %v7001_v32  ;;  %v14554_v31 = vld [vmem:[#allocation172_spill] sm:$0xff]  ;;  %v12561_v8 = vpop.f32.mrf.mxu0  ;;  %v14557_v14 = vld [vmem:[#allocation173_spill] sm:$0xff]  ;;  %v14558_v20 = vld [vmem:[#allocation174_spill] sm:$0xff]  ;;  %v12580_v10 = vpop.f32.mrf.mxu1 }
 0x2b8   :  { %v967_v63 = vadd.f32 %v898_v24, %v618_v1  ;;  %v1248_v62 = vmul.f32 %v7279_v33, %v7613_v45  ;;  %v3343_v15 = vmax.f32 %v3065_v53, %v3274_v61  ;;  %v2001_v22 = vadd.f32 %v14553_v13, %v1652_v26  ;;  %14555 = vst [vmem:[#allocation20_spill] sm:$0xff] %v12559_v30  ;;  %v7281_v32 = vld [vmem:[%s14001_s0 + $0x3d9] sm:$0xff]  ;;  %v7282_v1 = vld [vmem:[%s14001_s0 + $0x3e1] sm:$0xff] }
 0x2b9   :  { %v2002_v29 = vadd.f32 %v14554_v31, %v1653_v19  ;;  %v1249_v35 = vmul.f32 %v7280_v39, %v7613_v45  ;;  %14556 = vst [vmem:[#allocation45_spill] sm:$0xff] %v12561_v8  ;;  %v3344_v7 = vmax.f32 %v3066_v49, %v3275_v28  ;;  %v968_v37 = vadd.f32 %v899_v54, %v619_v12  ;;  %v7283_v49 = vld [vmem:[%s14001_s0 + $0x3da] sm:$0xff]  ;;  %v7004_v61 = vld [vmem:[%s14003_s2 + $0xf0] ss:$20 sps:$4 sm:$0xff]   ;;  %v12582_v26 = vpop.f32.mrf.mxu0  ;;  %v7286_v31 = vld [vmem:[%s14001_s0 + $0x608] sm:$0xff]  ;;  %v12601_v39 = vpop.f32.mrf.mxu1 }
 0x2ba   :  { %v1317_v18 = vadd.f32 %v1248_v62, %v967_v63  ;;  %v1597_v53 = vmul.f32 %v7281_v32, %v7636_v56  ;;  %v2351_v23 = vadd.f32 %v14557_v14, %v2001_v22  ;;  %v1598_v55 = vmul.f32 %v7282_v1, %v7636_v56  ;;  %14559 = vst [vmem:[#allocation46_spill] sm:$0xff] %v12580_v10  ;;  %v7284_v28 = vld [vmem:[%s14001_s0 + $0x3e2] sm:$0xff]  ;;  %v7005_v54 = vld [vmem:[%s14003_s2 + $0x11c] ss:$20 sps:$4 sm:$0xff]  }
 0x2bb   :  { %v2352_v27 = vadd.f32 %v14558_v20, %v2002_v29  ;;  %v1946_v24 = vmul.f32 %v7283_v49, %v7658_v4  ;;  %14560 = vst [vmem:[#allocation47_spill] sm:$0xff] %v12582_v26  ;;  %v3384_v46 = vpack.c.bf16 %v3344_v7, %v3343_v15  ;;  %v1318_v19 = vadd.f32 %v1249_v35, %v968_v37  ;;  %v14561_v63 = vld [vmem:[#allocation175_spill] sm:$0xff]  ;;  %v14562_v62 = vld [vmem:[#allocation176_spill] sm:$0xff]  ;;  %v7285_v15 = vld [vmem:[%s14001_s0 + $0x600] sm:$0xff]  ;;  %v12603_v35 = vpop.f32.mrf.mxu0 }
 0x2bc   :  { %v1666_v12 = vadd.f32 %v1597_v53, %v1317_v18  ;;  %v1947_v21 = vmul.f32 %v7284_v28, %v7658_v4  ;;  %v2700_v33 = vadd.f32 %v14561_v63, %v2351_v23  ;;  %v2296_v22 = vmul.f32 %v7285_v15, %v7678_v17  ;;  %14563 = vst [vmem:[#allocation48_spill] sm:$0xff] %v12601_v39  ;;  %v7287_v18 = vld [vmem:[%s14001_s0 + $0x601] sm:$0xff]  ;;  %v7288_v53 = vld [vmem:[%s14001_s0 + $0x609] sm:$0xff]  ;;  %v14603_v43 = vld [vmem:[#allocation212_spill] sm:$0xff] }
 0x2bd   :  { %v2701_v13 = vadd.f32 %v14562_v62, %v2352_v27  ;;  %v2297_v29 = vmul.f32 %v7286_v31, %v7678_v17  ;;  %14564 = vst [vmem:[#allocation49_spill] sm:$0xff] %v12603_v35  ;;  %6699 = vmatprep.subr.bf16.mxu0 %v3384_v46  ;;  %v1667_v7 = vadd.f32 %v1598_v55, %v1318_v19  ;;  %v14565_v23 = vld [vmem:[#allocation177_spill] sm:$0xff]  ;;  %v14566_v27 = vld [vmem:[#allocation178_spill] sm:$0xff]  ;;  %v12623_v19 = vpop.f32.mrf.mxu1  ;;  %v14612_v50 = vld [vmem:[#allocation236_spill] sm:$0xff] }
 0x2be   :  { %v2015_v37 = vadd.f32 %v1946_v24, %v1666_v12  ;;  %v2645_v32 = vmul.f32 %v7287_v18, %v7697_v34  ;;  %v2646_v14 = vmul.f32 %v7288_v53, %v7697_v34  ;;  %v3049_v20 = vadd.f32 %v14565_v23, %v2700_v33  ;;  %v7289_v55 = vld [vmem:[%s14001_s0 + $0x602] sm:$0xff]  ;;  %v7290_v24 = vld [vmem:[%s14001_s0 + $0x60a] sm:$0xff]  ;;  %5040 = vmatmul.mubr.bf16.gmra.mxu1 %v7004_v61  ;;  %v12625_v12 = vpop.f32.mrf.mxu0  ;;  %v14638_v16 = vld [vmem:[#allocation272_spill] sm:$0xff] }
 0x2bf   :  { %v3050_v1 = vadd.f32 %v14566_v27, %v2701_v13  ;;  %v2994_v49 = vmul.f32 %v7289_v55, %v7715_v51  ;;  %v2995_v46 = vmul.f32 %v7290_v24, %v7715_v51  ;;  %14567 = vst [vmem:[#allocation50_spill] sm:$0xff] %v12623_v19  ;;  %14568 = vst [vmem:[#allocation51_spill] sm:$0xff] %v12625_v12  ;;  %v14569_v33 = vld [vmem:[#allocation195_spill] sm:$0xff]  ;;  %v14570_v13 = vld [vmem:[#allocation196_spill] sm:$0xff]  ;;  %5047 = vmatprep.mubr.bf16.mxu1 %v7005_v54 }
 0x2c0   :  { %v2016_v28 = vadd.f32 %v1947_v21, %v1667_v7  ;;  %v2365_v63 = vadd.f32 %v2296_v22, %v2015_v37  ;;  %v253_v62 = vadd.f32 %v14569_v33, %v11040_v60  ;;  %v254_v15 = vadd.f32 %v14570_v13, %v11040_v60  ;;  %v7291_v53 = vld [vmem:[%s14001_s0 + $0x1a0] sm:$0xff]  ;;  %v7292_v21 = vld [vmem:[%s14001_s0 + $0x1a8] sm:$0xff]  ;;  %v12639_v7 = vpop.f32.mrf.mxu1  ;;  %v12641_v37 = vpop.f32.mrf.mxu0  ;;  %v14577_v19 = vld [vmem:[#allocation199_spill] sm:$0xff] }
 0x2c1   :  { %v3258_v31 = vmul.f32 0.01, %v3049_v20  ;;  %v3259_v18 = vmul.f32 0.01, %v3050_v1  ;;  %v198_v61 = vmul.f32 %v7291_v53, %v7519_v6  ;;  %v199_v22 = vmul.f32 %v7292_v21, %v7519_v6  ;;  %14571 = vst [vmem:[#allocation52_spill] sm:$0xff] %v12639_v7  ;;  %14572 = vst [vmem:[#allocation71_spill] sm:$0xff] %v12641_v37 }
 0x2c2   :  { %v2366_v23 = vadd.f32 %v2297_v29, %v2016_v28  ;;  %v2714_v54 = vadd.f32 %v2645_v32, %v2365_v63  ;;  %v14573_v27 = vld [vmem:[#allocation197_spill] sm:$0xff]  ;;  %v14574_v24 = vld [vmem:[#allocation198_spill] sm:$0xff]  ;;  %v12647_v44 = vpop.f32.mrf.mxu1  ;;  %v12649_v41 = vpop.f32.mrf.mxu0  ;;  %v14578_v29 = vld [vmem:[#allocation200_spill] sm:$0xff] }
 0x2c3   :  { %v602_v55 = vadd.f32 %v14573_v27, %v253_v62  ;;  %v603_v33 = vadd.f32 %v14574_v24, %v254_v15  ;;  %v3327_v13 = vmax.f32 %v3049_v20, %v3258_v31  ;;  %v3328_v12 = vmax.f32 %v3050_v1, %v3259_v18  ;;  %14575 = vst [vmem:[#allocation72_spill] sm:$0xff] %v12647_v44  ;;  %v7010_v28 = vld [vmem:[%s14003_s2 + $0x118] ss:$20 sps:$4 sm:$0xff]   ;;  %v7293_v1 = vld [vmem:[%s14001_s0 + $0x1a1] sm:$0xff]  ;;  %v14654_v26 = vld [vmem:[#allocation299_spill] sm:$0xff] }
 0x2c4   :  { %v267_v53 = vadd.f32 %v198_v61, %v11040_v60  ;;  %v268_v35 = vadd.f32 %v199_v22, %v11040_v60  ;;  %14576 = vst [vmem:[#allocation73_spill] sm:$0xff] %v12649_v41  ;;  %v2715_v21 = vadd.f32 %v2646_v14, %v2366_v23  ;;  %v3063_v7 = vadd.f32 %v2994_v49, %v2714_v54  ;;  %v7294_v14 = vld [vmem:[%s14001_s0 + $0x1a9] sm:$0xff]  ;;  %v12671_v15 = vpop.f32.mrf.mxu1  ;;  %v12673_v31 = vpop.f32.mrf.mxu0  ;;  %v14581_v22 = vld [vmem:[#allocation201_spill] sm:$0xff]  ;;  %v14655_v39 = vld [vmem:[#allocation300_spill] sm:$0xff] }
 0x2c5   :  { %v951_v37 = vadd.f32 %v14577_v19, %v602_v55  ;;  %v952_v32 = vadd.f32 %v14578_v29, %v603_v33  ;;  %v3376_v20 = vpack.c.bf16 %v3328_v12, %v3327_v13  ;;  %v547_v63 = vmul.f32 %v7293_v1, %v7525_v9  ;;  %v7295_v19 = vld [vmem:[%s14001_s0 + $0x1a2] sm:$0xff]  ;;  %14579 = vst [vmem:[#allocation74_spill] sm:$0xff] %v12671_v15  ;;  %v7296_v33 = vld [vmem:[%s14001_s0 + $0x1aa] sm:$0xff]  ;;  %v14586_v1 = vld [vmem:[#allocation204_spill] sm:$0xff] }
 0x2c6   :  { %v548_v49 = vmul.f32 %v7294_v14, %v7525_v9  ;;  %v896_v62 = vmul.f32 %v7295_v19, %v7594_v36  ;;  %v7011_v12 = vld [vmem:[%s14003_s2 + $0x144] ss:$20 sps:$4 sm:$0xff]   ;;  %14580 = vst [vmem:[#allocation75_spill] sm:$0xff] %v12673_v31  ;;  %v3064_v18 = vadd.f32 %v2995_v46, %v2715_v21  ;;  %v3272_v61 = vmul.f32 0.01, %v3063_v7  ;;  %v14582_v54 = vld [vmem:[#allocation202_spill] sm:$0xff]  ;;  %v12685_v21 = vpop.f32.mrf.mxu1  ;;  %5048 = vmatmul.mubr.bf16.gmra.mxu1 %v7010_v28 }
 0x2c7   :  { %v1301_v23 = vadd.f32 %v14581_v22, %v951_v37  ;;  %v1302_v27 = vadd.f32 %v14582_v54, %v952_v32  ;;  %6700 = vmatpush3.bf16.msra.mxu0 %v3376_v20  ;;  %v616_v55 = vadd.f32 %v547_v63, %v267_v53  ;;  %v897_v13 = vmul.f32 %v7296_v33, %v7594_v36  ;;  %v7297_v29 = vld [vmem:[%s14001_s0 + $0x3c8] sm:$0xff]  ;;  %v12687_v37 = vpop.f32.mrf.mxu0  ;;  %v14585_v53 = vld [vmem:[#allocation203_spill] sm:$0xff] }
 0x2c8   :  { %v617_v24 = vadd.f32 %v548_v49, %v268_v35  ;;  %v1246_v46 = vmul.f32 %v7297_v29, %v7613_v45  ;;  %14583 = vst [vmem:[#allocation76_spill] sm:$0xff] %v12685_v21  ;;  %14584 = vst [vmem:[#allocation77_spill] sm:$0xff] %v12687_v37  ;;  %v3273_v32 = vmul.f32 0.01, %v3064_v18  ;;  %v3341_v20 = vmax.f32 %v3063_v7, %v3272_v61  ;;  %v7298_v19 = vld [vmem:[%s14001_s0 + $0x3d0] sm:$0xff]  ;;  %v12699_v7 = vpop.f32.mrf.mxu1  ;;  %v7328_v31 = vld [vmem:[%s14001_s0 + $0x188] sm:$0xff] }
 0x2c9   :  { %v1650_v35 = vadd.f32 %v14585_v53, %v1301_v23  ;;  %v1651_v63 = vadd.f32 %v14586_v1, %v1302_v27  ;;  %v965_v14 = vadd.f32 %v896_v62, %v616_v55  ;;  %v1247_v22 = vmul.f32 %v7298_v19, %v7613_v45  ;;  %v7299_v54 = vld [vmem:[%s14001_s0 + $0x3c9] sm:$0xff]  ;;  %5055 = vmatprep.mubr.bf16.mxu1 %v7011_v12  ;;  %v12701_v61 = vpop.f32.mrf.mxu0  ;;  %v14589_v62 = vld [vmem:[#allocation205_spill] sm:$0xff] }
 0x2ca   :  { %v966_v49 = vadd.f32 %v897_v13, %v617_v24  ;;  %v1595_v33 = vmul.f32 %v7299_v54, %v7636_v56  ;;  %14587 = vst [vmem:[#allocation78_spill] sm:$0xff] %v12699_v7  ;;  %14588 = vst [vmem:[#allocation79_spill] sm:$0xff] %v12701_v61  ;;  %v3342_v28 = vmax.f32 %v3064_v18, %v3273_v32  ;;  %v14590_v27 = vld [vmem:[#allocation206_spill] sm:$0xff]  ;;  %v7300_v24 = vld [vmem:[%s14001_s0 + $0x3d1] sm:$0xff] }
 0x2cb   :  { %v1999_v23 = vadd.f32 %v14589_v62, %v1650_v35  ;;  %v2000_v55 = vadd.f32 %v14590_v27, %v1651_v63  ;;  %v1596_v13 = vmul.f32 %v7300_v24, %v7636_v56  ;;  %v1315_v29 = vadd.f32 %v1246_v46, %v965_v14  ;;  %v7301_v12 = vld [vmem:[%s14001_s0 + $0x3ca] sm:$0xff]  ;;  %v7302_v18 = vld [vmem:[%s14001_s0 + $0x3d2] sm:$0xff]  ;;  %v12717_v35 = vpop.f32.mrf.mxu1  ;;  %v12719_v63 = vpop.f32.mrf.mxu0  ;;  %v14652_v61 = vld [vmem:[#allocation297_spill] sm:$0xff] }
 0x2cc   :  { %v1316_v53 = vadd.f32 %v1247_v22, %v966_v49  ;;  %v1944_v1 = vmul.f32 %v7301_v12, %v7658_v4  ;;  %v1945_v32 = vmul.f32 %v7302_v18, %v7658_v4  ;;  %14591 = vst [vmem:[#allocation80_spill] sm:$0xff] %v12717_v35  ;;  %14592 = vst [vmem:[#allocation81_spill] sm:$0xff] %v12719_v63  ;;  %v14593_v54 = vld [vmem:[#allocation207_spill] sm:$0xff]  ;;  %v14594_v14 = vld [vmem:[#allocation208_spill] sm:$0xff] }
 0x2cd   :  { %v3383_v19 = vpack.c.bf16 %v3342_v28, %v3341_v20  ;;  %v2349_v46 = vadd.f32 %v14593_v54, %v1999_v23  ;;  %v2350_v49 = vadd.f32 %v14594_v14, %v2000_v55  ;;  %v7303_v22 = vld [vmem:[%s14001_s0 + $0x5f0] sm:$0xff]  ;;  %v1664_v24 = vadd.f32 %v1595_v33, %v1315_v29  ;;  %v7304_v20 = vld [vmem:[%s14001_s0 + $0x5f8] sm:$0xff]  ;;  %v7017_v18 = vld [vmem:[%s14003_s2 + $0x16c] ss:$20 sps:$4 sm:$0xff]   ;;  %v12741_v54 = vpop.f32.mrf.mxu1  ;;  %v12743_v33 = vpop.f32.mrf.mxu0 }
 0x2ce   :  { %v2294_v62 = vmul.f32 %v7303_v22, %v7678_v17  ;;  %v7015_v27 = vld [vmem:[%s14003_s2 + $0x140] ss:$20 sps:$4 sm:$0xff]   ;;  %v1665_v12 = vadd.f32 %v1596_v13, %v1316_v53  ;;  %v2295_v28 = vmul.f32 %v7304_v20, %v7678_v17  ;;  %14595 = vst [vmem:[#allocation82_spill] sm:$0xff] %v12741_v54  ;;  %14596 = vst [vmem:[#allocation83_spill] sm:$0xff] %v12743_v33  ;;  %v14598_v53 = vld [vmem:[#allocation210_spill] sm:$0xff] }
 0x2cf   :  { %v7305_v23 = vld [vmem:[%s14001_s0 + $0x5f1] sm:$0xff]  ;;  %6701 = vmatprep.subr.bf16.mxu0 %v3383_v19  ;;  %v14597_v13 = vld [vmem:[#allocation209_spill] sm:$0xff]  ;;  %v2699_v14 = vadd.f32 %v14598_v53, %v2350_v49  ;;  %v2013_v54 = vadd.f32 %v1944_v1, %v1664_v24  ;;  %v12761_v53 = vpop.f32.mrf.mxu1  ;;  %5056 = vmatmul.mubr.bf16.gmra.mxu1 %v7015_v27  ;;  %v247_v7 = vadd.f32 %v14652_v61, %v11040_v60  ;;  %v14653_v21 = vld [vmem:[#allocation298_spill] sm:$0xff] }
 0x2d0   :  { %v2643_v55 = vmul.f32 %v7305_v23, %v7697_v34  ;;  %v2698_v29 = vadd.f32 %v14597_v13, %v2349_v46  ;;  %v7306_v22 = vld [vmem:[%s14001_s0 + $0x5f9] sm:$0xff]  ;;  %v2014_v35 = vadd.f32 %v1945_v32, %v1665_v12  ;;  %v14599_v49 = vld [vmem:[#allocation231_spill] sm:$0xff]  ;;  %14600 = vst [vmem:[#allocation84_spill] sm:$0xff] %v12761_v53  ;;  %5063 = vmatprep.mubr.bf16.mxu1 %v7017_v18 }
 0x2d1   :  { %v2644_v20 = vmul.f32 %v7306_v22, %v7697_v34  ;;  %v7307_v23 = vld [vmem:[%s14001_s0 + $0x5f2] sm:$0xff]  ;;  %v7308_v19 = vld [vmem:[%s14001_s0 + $0x5fa] sm:$0xff]  ;;  %v251_v13 = vadd.f32 %v14599_v49, %v11040_v60  ;;  %v12763_v22 = vpop.f32.mrf.mxu0  ;;  %v3048_v5 = vadd.f32 %v14603_v43, %v2699_v14  ;;  %v596_v8 = vadd.f32 %v14654_v26, %v247_v7 }
 0x2d2   :  { %v2992_v41 = vmul.f32 %v7307_v23, %v7715_v51  ;;  %v2993_v46 = vmul.f32 %v7308_v19, %v7715_v51  ;;  %14601 = vst [vmem:[#allocation85_spill] sm:$0xff] %v12763_v22  ;;  %v14602_v15 = vld [vmem:[#allocation211_spill] sm:$0xff]  ;;  %v14604_v1 = vld [vmem:[#allocation232_spill] sm:$0xff]  ;;  %v2363_v23 = vadd.f32 %v2294_v62, %v2013_v54  ;;  %v2364_v19 = vadd.f32 %v2295_v28, %v2014_v35  ;;  %v14605_v49 = vld [vmem:[#allocation233_spill] sm:$0xff] }
 0x2d3   :  { %v3047_v44 = vadd.f32 %v14602_v15, %v2698_v29  ;;  %v252_v32 = vadd.f32 %v14604_v1, %v11040_v60  ;;  %v7309_v24 = vld [vmem:[%s14001_s0 + $0x190] sm:$0xff]  ;;  %v600_v53 = vadd.f32 %v14605_v49, %v251_v13  ;;  %v7310_v15 = vld [vmem:[%s14001_s0 + $0x198] sm:$0xff]  ;;  %v12778_v29 = vpop.f32.mrf.mxu1  ;;  %v12780_v14 = vpop.f32.mrf.mxu0  ;;  %v3257_v30 = vmul.f32 0.01, %v3048_v5 }
 0x2d4   :  { %v196_v12 = vmul.f32 %v7309_v24, %v7519_v6  ;;  %v197_v43 = vmul.f32 %v7310_v15, %v7519_v6  ;;  %14606 = vst [vmem:[#allocation86_spill] sm:$0xff] %v12778_v29  ;;  %14607 = vst [vmem:[#allocation107_spill] sm:$0xff] %v12780_v14  ;;  %v2712_v35 = vadd.f32 %v2643_v55, %v2363_v23  ;;  %v14609_v28 = vld [vmem:[#allocation235_spill] sm:$0xff]  ;;  %v7312_v23 = vld [vmem:[%s14001_s0 + $0x199] sm:$0xff] }
 0x2d5   :  { %v3256_v1 = vmul.f32 0.01, %v3047_v44  ;;  %v601_v24 = vadd.f32 %v14608_v47, %v252_v32  ;;  %v2713_v27 = vadd.f32 %v2644_v20, %v2364_v19  ;;  %v949_v54 = vadd.f32 %v14609_v28, %v600_v53  ;;  %v12786_v49 = vpop.f32.mrf.mxu1  ;;  %v12788_v15 = vpop.f32.mrf.mxu0  ;;  %v7311_v47 = vld [vmem:[%s14001_s0 + $0x191] sm:$0xff] }
 0x2d6   :  { %v265_v62 = vadd.f32 %v196_v12, %v11040_v60  ;;  %v266_v13 = vadd.f32 %v197_v43, %v11040_v60  ;;  %14610 = vst [vmem:[#allocation87_spill] sm:$0xff] %v12786_v49  ;;  %14611 = vst [vmem:[#allocation88_spill] sm:$0xff] %v12788_v15  ;;  %v3326_v29 = vmax.f32 %v3048_v5, %v3257_v30  ;;  %v14613_v12 = vld [vmem:[#allocation237_spill] sm:$0xff]  ;;  %v14616_v43 = vld [vmem:[#allocation238_spill] sm:$0xff] }
 0x2d7   :  { %v3325_v18 = vmax.f32 %v3047_v44, %v3256_v1  ;;  %v950_v2 = vadd.f32 %v14612_v50, %v601_v24  ;;  %v545_v32 = vmul.f32 %v7311_v47, %v7525_v9  ;;  %v3061_v55 = vadd.f32 %v2992_v41, %v2712_v35  ;;  %v7021_v50 = vld [vmem:[%s14003_s2 + $0x168] ss:$20 sps:$4 sm:$0xff]   ;;  %v12803_v5 = vpop.f32.mrf.mxu1  ;;  %v12805_v44 = vpop.f32.mrf.mxu0  ;;  %v7313_v1 = vld [vmem:[%s14001_s0 + $0x192] sm:$0xff]  ;;  %v14634_v49 = vld [vmem:[#allocation269_spill] sm:$0xff] }
 0x2d8   :  { %v3062_v20 = vadd.f32 %v2993_v46, %v2713_v27  ;;  %v1299_v53 = vadd.f32 %v14613_v12, %v949_v54  ;;  %v546_v19 = vmul.f32 %v7312_v23, %v7525_v9  ;;  %14614 = vst [vmem:[#allocation108_spill] sm:$0xff] %v12803_v5  ;;  %14615 = vst [vmem:[#allocation109_spill] sm:$0xff] %v12805_v44  ;;  %v7023_v35 = vld [vmem:[%s14003_s2 + $0x194] ss:$20 sps:$4 sm:$0xff]   ;;  %5064 = vmatmul.mubr.bf16.gmra.mxu1 %v7021_v50  ;;  %v14651_v63 = vld [vmem:[#allocation284_spill] sm:$0xff] }
 0x2d9   :  { %v3375_v30 = vpack.c.bf16 %v3326_v29, %v3325_v18  ;;  %v1300_v41 = vadd.f32 %v14616_v43, %v950_v2  ;;  %v614_v46 = vadd.f32 %v545_v32, %v265_v62  ;;  %v894_v24 = vmul.f32 %v7313_v1, %v7594_v36  ;;  %v14617_v54 = vld [vmem:[#allocation239_spill] sm:$0xff]  ;;  %v12816_v23 = vpop.f32.mrf.mxu1  ;;  %v12818_v29 = vpop.f32.mrf.mxu0  ;;  %v14619_v2 = vld [vmem:[#allocation240_spill] sm:$0xff]  ;;  %5071 = vmatprep.mubr.bf16.mxu1 %v7023_v35  ;;  %v7318_v50 = vld [vmem:[%s14001_s0 + $0x3c1] sm:$0xff] }
 0x2da   :  { %v3270_v27 = vmul.f32 0.01, %v3061_v55  ;;  %v3271_v28 = vmul.f32 0.01, %v3062_v20  ;;  %v1648_v47 = vadd.f32 %v14617_v54, %v1299_v53  ;;  %v615_v12 = vadd.f32 %v546_v19, %v266_v13  ;;  %14618 = vst [vmem:[#allocation110_spill] sm:$0xff] %v12818_v29  ;;  %v7314_v18 = vld [vmem:[%s14001_s0 + $0x19a] sm:$0xff] }
 0x2db   :  { %6702 = vmatpush3.bf16.msra.mxu0 %v3375_v30  ;;  %v1649_v62 = vadd.f32 %v14619_v2, %v1300_v41  ;;  %v895_v32 = vmul.f32 %v7314_v18, %v7594_v36  ;;  %v963_v43 = vadd.f32 %v894_v24, %v614_v46  ;;  %v7315_v1 = vld [vmem:[%s14001_s0 + $0x3b8] sm:$0xff]  ;;  %v14620_v54 = vld [vmem:[#allocation241_spill] sm:$0xff]  ;;  %v12834_v2 = vpop.f32.mrf.mxu1  ;;  %v12836_v46 = vpop.f32.mrf.mxu0  ;;  %v14621_v24 = vld [vmem:[#allocation242_spill] sm:$0xff]  ;;  %v945_v26 = vadd.f32 %v10984_v40, %v596_v8 }
 0x2dc   :  { %v1244_v13 = vmul.f32 %v7315_v1, %v7613_v45  ;;  %v3339_v53 = vmax.f32 %v3061_v55, %v3270_v27  ;;  %v3340_v19 = vmax.f32 %v3062_v20, %v3271_v28  ;;  %v1997_v29 = vadd.f32 %v14620_v54, %v1648_v47  ;;  %v7316_v30 = vld [vmem:[%s14001_s0 + $0x3c0] sm:$0xff]  ;;  %v14622_v28 = vld [vmem:[#allocation243_spill] sm:$0xff]  ;;  %v14624_v35 = vld [vmem:[#allocation244_spill] sm:$0xff] }
 0x2dd   :  { %v1245_v41 = vmul.f32 %v7316_v30, %v7613_v45  ;;  %v1998_v18 = vadd.f32 %v14621_v24, %v1649_v62  ;;  %v964_v44 = vadd.f32 %v895_v32, %v615_v12  ;;  %v7317_v55 = vld [vmem:[%s14001_s0 + $0x3b9] sm:$0xff]  ;;  %v1594_v1 = vmul.f32 %v7318_v50, %v7636_v56  ;;  %v12852_v32 = vpop.f32.mrf.mxu1  ;;  %v14628_v50 = vld [vmem:[#allocation246_spill] sm:$0xff] }
 0x2de   :  { %v1313_v15 = vadd.f32 %v1244_v13, %v963_v43  ;;  %v1593_v20 = vmul.f32 %v7317_v55, %v7636_v56  ;;  %v3382_v27 = vpack.c.bf16 %v3340_v19, %v3339_v53  ;;  %v2347_v47 = vadd.f32 %v14622_v28, %v1997_v29  ;;  %v7319_v12 = vld [vmem:[%s14001_s0 + $0x3ba] sm:$0xff]  ;;  %14623 = vst [vmem:[#allocation111_spill] sm:$0xff] %v12852_v32  ;;  %v12854_v43 = vpop.f32.mrf.mxu0  ;;  %v7320_v19 = vld [vmem:[%s14001_s0 + $0x3c2] sm:$0xff] }
 0x2df   :  { %v1942_v62 = vmul.f32 %v7319_v12, %v7658_v4  ;;  %v2348_v13 = vadd.f32 %v14624_v35, %v1998_v18  ;;  %v1314_v53 = vadd.f32 %v1245_v41, %v964_v44  ;;  %v1943_v54 = vmul.f32 %v7320_v19, %v7658_v4  ;;  %v14625_v30 = vld [vmem:[#allocation245_spill] sm:$0xff]  ;;  %v7322_v44 = vld [vmem:[%s14001_s0 + $0x5e8] sm:$0xff] }
 0x2e0   :  { %v1662_v29 = vadd.f32 %v1593_v20, %v1313_v15  ;;  %6703 = vmatprep.subr.bf16.mxu0 %v3382_v27  ;;  %v2696_v24 = vadd.f32 %v14625_v30, %v2347_v47  ;;  %v7321_v55 = vld [vmem:[%s14001_s0 + $0x5e0] sm:$0xff]  ;;  %v2293_v15 = vmul.f32 %v7322_v44, %v7678_v17  ;;  %v12877_v27 = vpop.f32.mrf.mxu1  ;;  %v12879_v47 = vpop.f32.mrf.mxu0  ;;  %v7324_v30 = vld [vmem:[%s14001_s0 + $0x5e9] sm:$0xff] }
 0x2e1   :  { %v2292_v28 = vmul.f32 %v7321_v55, %v7678_v17  ;;  %v7323_v41 = vld [vmem:[%s14001_s0 + $0x5e1] sm:$0xff]  ;;  %14626 = vst [vmem:[#allocation112_spill] sm:$0xff] %v12877_v27  ;;  %14627 = vst [vmem:[#allocation113_spill] sm:$0xff] %v12879_v47  ;;  %v2697_v12 = vadd.f32 %v14628_v50, %v2348_v13  ;;  %v1663_v35 = vadd.f32 %v1594_v1, %v1314_v53  ;;  %v7029_v44 = vld [vmem:[%s14003_s2 + $0x1bc] ss:$20 sps:$4 sm:$0xff]  }
 0x2e2   :  { %v2641_v18 = vmul.f32 %v7323_v41, %v7697_v34  ;;  %v7027_v20 = vld [vmem:[%s14003_s2 + $0x190] ss:$20 sps:$4 sm:$0xff]   ;;  %v2011_v19 = vadd.f32 %v1942_v62, %v1662_v29  ;;  %v2642_v55 = vmul.f32 %v7324_v30, %v7697_v34  ;;  %v2990_v13 = vmul.f32 %v7325_v48, %v7715_v51  ;;  %v12900_v50 = vpop.f32.mrf.mxu1  ;;  %v12902_v30 = vpop.f32.mrf.mxu0  ;;  %v7045_v40 = vld [vmem:[%s14003_s2 + $0x208] ss:$20 sps:$4 sm:$0x3f]  }
 0x2e3   :  { %v14629_v41 = vld [vmem:[#allocation247_spill] sm:$0xff]  ;;  %14631 = vst [vmem:[#allocation114_spill] sm:$0xff] %v12902_v30  ;;  %v2012_v11 = vadd.f32 %v1943_v54, %v1663_v35  ;;  %v250_v48 = vadd.f32 %v14633_v0, %v11040_v60  ;;  %5072 = vmatmul.mubr.bf16.gmra.mxu1 %v7027_v20 }
 0x2e4   :  { %v3045_v14 = vadd.f32 %v14629_v41, %v2696_v24  ;;  %v7326_v1 = vld [vmem:[%s14001_s0 + $0x5ea] sm:$0xff]  ;;  %v14632_v24 = vld [vmem:[#allocation248_spill] sm:$0xff]  ;;  %v2361_v25 = vadd.f32 %v2292_v28, %v2011_v19  ;;  %v12916_v54 = vpop.f32.mrf.mxu1  ;;  %v12918_v28 = vpop.f32.mrf.mxu0  ;;  %5079 = vmatprep.mubr.bf16.mxu1 %v7029_v44 }
 0x2e5   :  { %v2991_v62 = vmul.f32 %v7326_v1, %v7715_v51  ;;  %v14630_v53 = vld [vmem:[#allocation267_spill] sm:$0xff]  ;;  %v3046_v41 = vadd.f32 %v14632_v24, %v2697_v12  ;;  %v7327_v1 = vld [vmem:[%s14001_s0 + $0x180] sm:$0xff]  ;;  %v195_v12 = vmul.f32 %v7328_v31, %v7519_v6  ;;  %v2362_v35 = vadd.f32 %v2293_v15, %v2012_v11  ;;  %v14635_v19 = vld [vmem:[#allocation270_spill] sm:$0xff] }
 0x2e6   :  { %v249_v29 = vadd.f32 %v14630_v53, %v11040_v60  ;;  %v3254_v5 = vmul.f32 0.01, %v3045_v14  ;;  %v194_v53 = vmul.f32 %v7327_v1, %v7519_v6  ;;  %v14636_v27 = vld [vmem:[#allocation271_spill] sm:$0xff]  ;;  %v12924_v33 = vpop.f32.mrf.mxu1  ;;  %v12926_v31 = vpop.f32.mrf.mxu0 }
 0x2e7   :  { %v3255_v0 = vmul.f32 0.01, %v3046_v41  ;;  %v264_v22 = vadd.f32 %v195_v12, %v11040_v60  ;;  %14637 = vst [vmem:[#allocation115_spill] sm:$0xff] %v12924_v33  ;;  %v2711_v52 = vadd.f32 %v2642_v55, %v2362_v35  ;;  %v7033_v55 = vld [vmem:[%s14003_s2 + $0x1b8] ss:$20 sps:$4 sm:$0xff]  }
 0x2e8   :  { %v598_v37 = vadd.f32 %v14634_v49, %v249_v29  ;;  %v2710_v49 = vadd.f32 %v2641_v18, %v2361_v25  ;;  %v599_v29 = vadd.f32 %v14635_v19, %v250_v48  ;;  %v3323_v24 = vmax.f32 %v3045_v14, %v3254_v5  ;;  %v14639_v25 = vld [vmem:[#allocation273_spill] sm:$0xff]  ;;  %v7330_v5 = vld [vmem:[%s14001_s0 + $0x189] sm:$0xff]  ;;  %v12945_v44 = vpop.f32.mrf.mxu1 }
 0x2e9   :  { %v263_v32 = vadd.f32 %v194_v53, %v11040_v60  ;;  %v3324_v20 = vmax.f32 %v3046_v41, %v3255_v0  ;;  %v7329_v14 = vld [vmem:[%s14001_s0 + $0x181] sm:$0xff]  ;;  %v544_v18 = vmul.f32 %v7330_v5, %v7525_v9  ;;  %14640 = vst [vmem:[#allocation116_spill] sm:$0xff] %v12945_v44  ;;  %v3060_v48 = vadd.f32 %v2991_v62, %v2711_v52 }
 0x2ea   :  { %v947_v1 = vadd.f32 %v14636_v27, %v598_v37  ;;  %v3059_v57 = vadd.f32 %v2990_v13, %v2710_v49  ;;  %v948_v11 = vadd.f32 %v14638_v16, %v599_v29  ;;  %v543_v37 = vmul.f32 %v7329_v14, %v7525_v9  ;;  %v7331_v27 = vld [vmem:[%s14001_s0 + $0x182] sm:$0xff]  ;;  %v12947_v13 = vpop.f32.mrf.mxu0  ;;  %v14642_v49 = vld [vmem:[#allocation275_spill] sm:$0xff]  ;;  %v12958_v5 = vpop.f32.mrf.mxu1  ;;  %v7344_v44 = vld [vmem:[%s14001_s0 + $0x5da] sm:$0xff] }
 0x2eb   :  { %v892_v16 = vmul.f32 %v7331_v27, %v7594_v36  ;;  %v3374_v41 = vpack.c.bf16 %v3324_v20, %v3323_v24  ;;  %v14641_v12 = vld [vmem:[#allocation274_spill] sm:$0xff]  ;;  %v7035_v35 = vld [vmem:[%s14003_s2 + $0x1e4] ss:$20 sps:$4 sm:$0xff]   ;;  %v3269_v62 = vmul.f32 0.01, %v3060_v48  ;;  %5080 = vmatmul.mubr.bf16.gmra.mxu1 %v7033_v55  ;;  %v14646_v55 = vld [vmem:[#allocation279_spill] sm:$0xff] }
 0x2ec   :  { %v1297_v15 = vadd.f32 %v14639_v25, %v947_v1  ;;  %v3268_v53 = vmul.f32 0.01, %v3059_v57  ;;  %v1298_v0 = vadd.f32 %v14641_v12, %v948_v11  ;;  %v612_v29 = vadd.f32 %v543_v37, %v263_v32  ;;  %v7332_v25 = vld [vmem:[%s14001_s0 + $0x18a] sm:$0xff]  ;;  %v12960_v52 = vpop.f32.mrf.mxu0  ;;  %v14643_v20 = vld [vmem:[#allocation276_spill] sm:$0xff]  ;;  %5087 = vmatprep.mubr.bf16.mxu1 %v7035_v35 }
 0x2ed   :  { %v613_v1 = vadd.f32 %v544_v18, %v264_v22  ;;  %v893_v14 = vmul.f32 %v7332_v25, %v7594_v36  ;;  %6704 = vmatpush3.bf16.msra.mxu0 %v3374_v41  ;;  %v7333_v32 = vld [vmem:[%s14001_s0 + $0x3a8] sm:$0xff]  ;;  %v7334_v12 = vld [vmem:[%s14001_s0 + $0x3b0] sm:$0xff] }
 0x2ee   :  { %v1646_v19 = vadd.f32 %v14642_v49, %v1297_v15  ;;  %v3337_v24 = vmax.f32 %v3059_v57, %v3268_v53  ;;  %v1647_v11 = vadd.f32 %v14643_v20, %v1298_v0  ;;  %v1242_v22 = vmul.f32 %v7333_v32, %v7613_v45  ;;  %v14644_v15 = vld [vmem:[#allocation277_spill] sm:$0xff]  ;;  %v12972_v57 = vpop.f32.mrf.mxu1  ;;  %v12974_v53 = vpop.f32.mrf.mxu0  ;;  %v14645_v49 = vld [vmem:[#allocation278_spill] sm:$0xff]  ;;  %v7338_v35 = vld [vmem:[%s14001_s0 + $0x3b2] sm:$0xff] }
 0x2ef   :  { %v961_v18 = vadd.f32 %v892_v16, %v612_v29  ;;  %v962_v27 = vadd.f32 %v893_v14, %v613_v1  ;;  %v1243_v41 = vmul.f32 %v7334_v12, %v7613_v45  ;;  %v3338_v0 = vmax.f32 %v3060_v48, %v3269_v62  ;;  %v7336_v29 = vld [vmem:[%s14001_s0 + $0x3b1] sm:$0xff] }
 0x2f0   :  { %v1995_v37 = vadd.f32 %v14644_v15, %v1646_v19  ;;  %v1996_v25 = vadd.f32 %v14645_v49, %v1647_v11  ;;  %v7335_v19 = vld [vmem:[%s14001_s0 + $0x3a9] sm:$0xff]  ;;  %v1592_v1 = vmul.f32 %v7336_v29, %v7636_v56  ;;  %v12990_v11 = vpop.f32.mrf.mxu1  ;;  %v12992_v15 = vpop.f32.mrf.mxu0  ;;  %v14647_v49 = vld [vmem:[#allocation280_spill] sm:$0xff] }
 0x2f1   :  { %v1591_v16 = vmul.f32 %v7335_v19, %v7636_v56  ;;  %v1311_v20 = vadd.f32 %v1242_v22, %v961_v18  ;;  %v1312_v32 = vadd.f32 %v1243_v41, %v962_v27  ;;  %v7337_v48 = vld [vmem:[%s14001_s0 + $0x3aa] sm:$0xff]  ;;  %v3381_v12 = vpack.c.bf16 %v3338_v0, %v3337_v24  ;;  %v14648_v27 = vld [vmem:[#allocation281_spill] sm:$0xff]  ;;  %v7340_v24 = vld [vmem:[%s14001_s0 + $0x5d8] sm:$0xff] }
 0x2f2   :  { %v2345_v14 = vadd.f32 %v14646_v55, %v1995_v37  ;;  %v1940_v62 = vmul.f32 %v7337_v48, %v7658_v4  ;;  %v2346_v19 = vadd.f32 %v14647_v49, %v1996_v25  ;;  %v1941_v22 = vmul.f32 %v7338_v35, %v7658_v4  ;;  %v7339_v37 = vld [vmem:[%s14001_s0 + $0x5d0] sm:$0xff]  ;;  %v13011_v48 = vpop.f32.mrf.mxu1  ;;  %v13013_v49 = vpop.f32.mrf.mxu0  ;;  %v14649_v35 = vld [vmem:[#allocation282_spill] sm:$0xff] }
 0x2f3   :  { %v2290_v18 = vmul.f32 %v7339_v37, %v7678_v17  ;;  %v1660_v29 = vadd.f32 %v1591_v16, %v1311_v20  ;;  %v1661_v55 = vadd.f32 %v1592_v1, %v1312_v32  ;;  %v2291_v0 = vmul.f32 %v7340_v24, %v7678_v17  ;;  %v7039_v25 = vld [vmem:[%s14003_s2 + $0x1e0] ss:$20 sps:$4 sm:$0xff]   ;;  %6705 = vmatprep.subr.bf16.mxu0 %v3381_v12 }
 0x2f4   :  { %v2694_v41 = vadd.f32 %v14648_v27, %v2345_v14  ;;  %v2695_v37 = vadd.f32 %v14649_v35, %v2346_v19  ;;  %v7341_v16 = vld [vmem:[%s14001_s0 + $0x5d1] sm:$0xff]  ;;  %v7342_v14 = vld [vmem:[%s14001_s0 + $0x5d9] sm:$0xff]  ;;  %v13036_v33 = vpop.f32.mrf.mxu1  ;;  %v13038_v58 = vpop.f32.mrf.mxu0  ;;  %5088 = vmatmul.mubr.bf16.gmra.mxu1 %v7039_v25 }
 0x2f5   :  { %v2639_v1 = vmul.f32 %v7341_v16, %v7697_v34  ;;  %v2640_v20 = vmul.f32 %v7342_v14, %v7697_v34  ;;  %v7343_v32 = vld [vmem:[%s14001_s0 + $0x5d2] sm:$0xff]  ;;  %v7041_v19 = vld [vmem:[%s14003_s2 + $0x20c] ss:$20 sps:$4 sm:$0x3f]   ;;  %v2009_v35 = vadd.f32 %v1940_v62, %v1660_v29  ;;  %v2010_v16 = vadd.f32 %v1941_v22, %v1661_v55 }
 0x2f6   :  { %v2988_v12 = vmul.f32 %v7343_v32, %v7715_v51  ;;  %v14650_v27 = vld [vmem:[#allocation283_spill] sm:$0xff]  ;;  %v2989_v14 = vmul.f32 %v7344_v44, %v7715_v51  ;;  %v3044_v32 = vadd.f32 %v14651_v63, %v2695_v37  ;;  %v7345_v62 = vld [vmem:[%s14001_s0 + $0x220] sm:$0xf]  ;;  %v13053_v61 = vpop.f32.mrf.mxu1  ;;  %v13055_v37 = vpop.f32.mrf.mxu0  ;;  %5095 = vmatprep.mubr.bf16.mxu1 %v7041_v19 }
 0x2f7   :  { %v3043_v24 = vadd.f32 %v14650_v27, %v2694_v41  ;;  %v248_v41 = vadd.f32 %v14653_v21, %v11040_v60  ;;  %v214_v22 = vmul.f32 %v7345_v62, %v7519_v6  ;;  %v2359_v44 = vadd.f32 %v2290_v18, %v2009_v35  ;;  %v7346_v27 = vld [vmem:[%s14001_s0 + $0x221] sm:$0xf] }
 0x2f8   :  { %v2360_v55 = vadd.f32 %v2291_v0, %v2010_v16  ;;  %v563_v63 = vmul.f32 %v7346_v27, %v7525_v9  ;;  %v3253_v21 = vmul.f32 0.01, %v3044_v32  ;;  %v7347_v16 = vld [vmem:[%s14001_s0 + $0x222] sm:$0xf]  ;;  %v13064_v27 = vpop.f32.mrf.mxu1  ;;  %v13066_v59 = vpop.f32.mrf.mxu0 }
 0x2f9   :  { %v3252_v29 = vmul.f32 0.01, %v3043_v24  ;;  %v597_v10 = vadd.f32 %v14655_v39, %v248_v41  ;;  %v283_v62 = vadd.f32 %v214_v22, %v11040_v60  ;;  %v2708_v0 = vadd.f32 %v2639_v1, %v2359_v44  ;;  %v14656_v39 = vld [vmem:[#allocation301_spill] sm:$0xff]  ;;  %v7348_v1 = vld [vmem:[%s14001_s0 + $0x448] sm:$0xf] }
 0x2fa   :  { %v2709_v35 = vadd.f32 %v2640_v20, %v2360_v55  ;;  %v912_v25 = vmul.f32 %v7347_v16, %v7594_v36  ;;  %v3322_v3 = vmax.f32 %v3044_v32, %v3253_v21  ;;  %v1262_v20 = vmul.f32 %v7348_v1, %v7613_v45  ;;  %v7349_v22 = vld [vmem:[%s14001_s0 + $0x449] sm:$0xf]  ;;  %v13081_v8 = vpop.f32.mrf.mxu1  ;;  %v7350_v21 = vld [vmem:[%s14001_s0 + $0x550] sm:$0xff] }
 0x2fb   :  { %v3321_v18 = vmax.f32 %v3043_v24, %v3252_v29  ;;  %v946_v7 = vadd.f32 %v14656_v39, %v597_v10  ;;  %v632_v41 = vadd.f32 %v563_v63, %v283_v62  ;;  %v3057_v19 = vadd.f32 %v2988_v12, %v2708_v0  ;;  %v13083_v10 = vpop.f32.mrf.mxu0  ;;  %v7050_v63 = vld [vmem:[%s14003_s2 + $0x10] ss:$20 sps:$4 sm:$0xff]   ;;  %v7351_v0 = vld [vmem:[%s14001_s0 + $0x558] sm:$0xff] }
 0x2fc   :  { %v3058_v24 = vadd.f32 %v2989_v14, %v2709_v35  ;;  %v1611_v29 = vmul.f32 %v7349_v22, %v7636_v56  ;;  %v14657_v14 = vld [vmem:[#allocation302_spill] sm:$0xff]  ;;  %v2274_v62 = vmul.f32 %v7350_v21, %v7678_v17  ;;  %v7353_v22 = vld [vmem:[%s14001_s0 + $0x551] sm:$0xff]  ;;  %5096 = vmatmul.mubr.bf16.gmra.mxu1 %v7045_v40  ;;  %v7357_v40 = vld [vmem:[%s14001_s0 + $0x55a] sm:$0xff] }
 0x2fd   :  { %v3373_v12 = vpack.c.bf16 %v3322_v3, %v3321_v18  ;;  %v1295_v32 = vadd.f32 %v14657_v14, %v945_v26  ;;  %v1296_v44 = vadd.f32 %v11018_v42, %v946_v7  ;;  %v981_v55 = vadd.f32 %v912_v25, %v632_v41  ;;  %v13098_v42 = vpop.f32.mrf.mxu1  ;;  %v13100_v16 = vpop.f32.mrf.mxu0  ;;  %v14658_v26 = vld [vmem:[#allocation303_spill] sm:$0xff]  ;;  %v7352_v41 = vld [vmem:[%s14001_s0 + $0x44a] sm:$0xf]  ;;  %v14660_v21 = vld [vmem:[#allocation304_spill] sm:$0xff]  ;;  %6850 = vmatprep.mubr.msk.bf16.mxu1 %vm4082_vm1, %v7050_v63 }
 0x2fe   :  { %v2275_v3 = vmul.f32 %v7351_v0, %v7678_v17  ;;  %v3266_v18 = vmul.f32 0.01, %v3057_v19  ;;  %v3267_v35 = vmul.f32 0.01, %v3058_v24  ;;  %v1960_v1 = vmul.f32 %v7352_v41, %v7658_v4 }
 0x2ff   :  { %6706 = vmatpush3.bf16.msra.mxu0 %v3373_v12  ;;  %v1644_v25 = vadd.f32 %v11021_v38, %v1295_v32  ;;  %v1645_v39 = vadd.f32 %v14658_v26, %v1296_v44  ;;  %v1331_v7 = vadd.f32 %v1262_v20, %v981_v55  ;;  %v2623_v14 = vmul.f32 %v7353_v22, %v7697_v34  ;;  %v7354_v12 = vld [vmem:[%s14001_s0 + $0x559] sm:$0xff]  ;;  %v13116_v44 = vpop.f32.mrf.mxu1  ;;  %v13118_v55 = vpop.f32.mrf.mxu0  ;;  %v7355_v22 = vld [vmem:[%s14001_s0 + $0x670] sm:$0xf] }
 0x300   :  { %v2624_v38 = vmul.f32 %v7354_v12, %v7697_v34  ;;  %v3335_v32 = vmax.f32 %v3057_v19, %v3266_v18  ;;  %v3336_v20 = vmax.f32 %v3058_v24, %v3267_v35  ;;  %14659 = vst [vmem:[#allocation117_spill] sm:$0xff] %v13118_v55  ;;  %v14661_v26 = vld [vmem:[#allocation305_spill] sm:$0xff]  ;;  %v2310_v47 = vmul.f32 %v7355_v22, %v7678_v17  ;;  %v7356_v19 = vld [vmem:[%s14001_s0 + $0x552] sm:$0xff] }
 0x301   :  { %v1993_v0 = vadd.f32 %v14660_v21, %v1644_v25  ;;  %v1994_v41 = vadd.f32 %v14661_v26, %v1645_v39  ;;  %v1680_v30 = vadd.f32 %v1611_v29, %v1331_v7  ;;  %v2972_v24 = vmul.f32 %v7356_v19, %v7715_v51  ;;  %v13135_v35 = vpop.f32.mrf.mxu1  ;;  %v13137_v25 = vpop.f32.mrf.mxu0  ;;  %v7358_v12 = vld [vmem:[%s14001_s0 + $0x671] sm:$0xf] }
 0x302   :  { %v2973_v29 = vmul.f32 %v7357_v40, %v7715_v51  ;;  %v3380_v18 = vpack.c.bf16 %v3336_v20, %v3335_v32  ;;  %14662 = vst [vmem:[#allocation118_spill] sm:$0xff] %v13137_v25  ;;  %v2659_v21 = vmul.f32 %v7358_v12, %v7697_v34  ;;  %v7359_v26 = vld [vmem:[%s14001_s0 + $0x672] sm:$0xf]  ;;  %v7366_v25 = vld [vmem:[%s14001_s0 + $0x438] sm:$0xff] }
 0x303   :  { %v2343_v39 = vadd.f32 %v2274_v62, %v1993_v0  ;;  %v2344_v7 = vadd.f32 %v2275_v3, %v1994_v41  ;;  %v2029_v63 = vadd.f32 %v1960_v1, %v1680_v30  ;;  %v3008_v32 = vmul.f32 %v7359_v26, %v7715_v51  ;;  %v7360_v20 = vld [vmem:[%s14001_s0 + $0x210] sm:$0xff]  ;;  %v7361_v30 = vld [vmem:[%s14001_s0 + $0x218] sm:$0xff]  ;;  %v13155_v1 = vpop.f32.mrf.mxu1  ;;  %v13157_v0 = vpop.f32.mrf.mxu0 }
 0x304   :  { %6707 = vmatprep.subr.bf16.mxu0 %v3380_v18  ;;  %v212_v62 = vmul.f32 %v7360_v20, %v7519_v6  ;;  %v213_v3 = vmul.f32 %v7361_v30, %v7519_v6  ;;  %14663 = vst [vmem:[#allocation119_spill] sm:$0xff] %v13157_v0  ;;  %v7362_v40 = vld [vmem:[%s14001_s0 + $0x211] sm:$0xff]  ;;  %v7363_v20 = vld [vmem:[%s14001_s0 + $0x219] sm:$0xff] }
 0x305   :  { %v2692_v41 = vadd.f32 %v2623_v14, %v2343_v39  ;;  %v2693_v22 = vadd.f32 %v2624_v38, %v2344_v7  ;;  %v2379_v19 = vadd.f32 %v2310_v47, %v2029_v63  ;;  %v561_v18 = vmul.f32 %v7362_v40, %v7525_v9  ;;  %v7364_v47 = vld [vmem:[%s14001_s0 + $0x212] sm:$0xff]  ;;  %v13173_v38 = vpop.f32.mrf.mxu1  ;;  %v13175_v39 = vpop.f32.mrf.mxu0 }
 0x306   :  { %v281_v12 = vadd.f32 %v212_v62, %v11040_v60  ;;  %v282_v26 = vadd.f32 %v213_v3, %v11040_v60  ;;  %v562_v30 = vmul.f32 %v7363_v20, %v7525_v9  ;;  %v910_v14 = vmul.f32 %v7364_v47, %v7594_v36  ;;  %14664 = vst [vmem:[#allocation120_spill] sm:$0xff] %v13175_v39  ;;  %v7365_v3 = vld [vmem:[%s14001_s0 + $0x21a] sm:$0xff] }
 0x307   :  { %v3041_v7 = vadd.f32 %v2972_v24, %v2692_v41  ;;  %v3042_v63 = vadd.f32 %v2973_v29, %v2693_v22  ;;  %v2728_v62 = vadd.f32 %v2659_v21, %v2379_v19  ;;  %v911_v40 = vmul.f32 %v7365_v3, %v7594_v36  ;;  %v7367_v24 = vld [vmem:[%s14001_s0 + $0x440] sm:$0xff]  ;;  %v13189_v21 = vpop.f32.mrf.mxu1  ;;  %v13191_v3 = vpop.f32.mrf.mxu0 }
 0x308   :  { %v630_v20 = vadd.f32 %v561_v18, %v281_v12  ;;  %v631_v0 = vadd.f32 %v562_v30, %v282_v26  ;;  %v1260_v47 = vmul.f32 %v7366_v25, %v7613_v45  ;;  %v1261_v29 = vmul.f32 %v7367_v24, %v7613_v45  ;;  %14665 = vst [vmem:[#allocation121_spill] sm:$0xff] %v13191_v3  ;;  %v7368_v26 = vld [vmem:[%s14001_s0 + $0x439] sm:$0xff]  ;;  %v7369_v30 = vld [vmem:[%s14001_s0 + $0x441] sm:$0xff] }
 0x309   :  { %v3250_v41 = vmul.f32 0.01, %v3041_v7  ;;  %v3251_v22 = vmul.f32 0.01, %v3042_v63  ;;  %v3077_v19 = vadd.f32 %v3008_v32, %v2728_v62  ;;  %v1609_v25 = vmul.f32 %v7368_v26, %v7636_v56  ;;  %v13201_v39 = vpop.f32.mrf.mxu1 }
 0x30a   :  { %v979_v18 = vadd.f32 %v910_v14, %v630_v20  ;;  %v980_v12 = vadd.f32 %v911_v40, %v631_v0  ;;  %v1610_v24 = vmul.f32 %v7369_v30, %v7636_v56  ;;  %14666 = vst [vmem:[#allocation122_spill] sm:$0xff] %v13201_v39  ;;  %v7370_v0 = vld [vmem:[%s14001_s0 + $0x43a] sm:$0xff]  ;;  %v7371_v20 = vld [vmem:[%s14001_s0 + $0x442] sm:$0xff] }
 0x30b   :  { %v3319_v55 = vmax.f32 %v3041_v7, %v3250_v41  ;;  %v3320_v32 = vmax.f32 %v3042_v63, %v3251_v22  ;;  %v3286_v62 = vmul.f32 0.01, %v3077_v19  ;;  %v1958_v40 = vmul.f32 %v7370_v0, %v7658_v4  ;;  %v13211_v30 = vpop.f32.mrf.mxu1  ;;  %v13213_v63 = vpop.f32.mrf.mxu0  ;;  %v7372_v22 = vld [vmem:[%s14001_s0 + $0x660] sm:$0xff]  ;;  %v7375_v0 = vld [vmem:[%s14001_s0 + $0x669] sm:$0xff] }
 0x30c   :  { %v1329_v3 = vadd.f32 %v1260_v47, %v979_v18  ;;  %v1330_v14 = vadd.f32 %v1261_v29, %v980_v12  ;;  %v1959_v26 = vmul.f32 %v7371_v20, %v7658_v4  ;;  %14667 = vst [vmem:[#allocation123_spill] sm:$0xff] %v13213_v63  ;;  %v7007_v47 = vld [vmem:[%s14003_s2 + $0x8] ss:$20 sps:$4 sm:$0xff]   ;;  %v2308_v18 = vmul.f32 %v7372_v22, %v7678_v17 }
 0x30d   :  { %v3372_v39 = vpack.c.bf16 %v3320_v32, %v3319_v55  ;;  %v3355_v7 = vmax.f32 %v3077_v19, %v3286_v62  ;;  %v7373_v12 = vld [vmem:[%s14001_s0 + $0x668] sm:$0xff]  ;;  %v13226_v19 = vpop.f32.mrf.mxu1  ;;  %v2658_v20 = vmul.f32 %v7375_v0, %v7697_v34 }
 0x30e   :  { %v1678_v29 = vadd.f32 %v1609_v25, %v1329_v3  ;;  %v1679_v41 = vadd.f32 %v1610_v24, %v1330_v14  ;;  %v2309_v55 = vmul.f32 %v7373_v12, %v7678_v17  ;;  %14668 = vst [vmem:[#allocation124_spill] sm:$0xff] %v13226_v19  ;;  %v7013_v3 = vld [vmem:[%s14003_s2 + $0x34] ss:$20 sps:$4 sm:$0xff]  }
 0x30f   :  { %6708 = vmatpush3.bf16.msra.mxu0 %v3372_v39  ;;  %v3390_v32 = vpack.c.bf16 %v3355_v7, %v3355_v7  ;;  %v7374_v25 = vld [vmem:[%s14001_s0 + $0x661] sm:$0xff]  ;;  %v13243_v22 = vpop.f32.mrf.mxu1 }
 0x310   :  { %v2657_v24 = vmul.f32 %v7374_v25, %v7697_v34  ;;  %v2027_v62 = vadd.f32 %v1958_v40, %v1678_v29  ;;  %v2028_v14 = vadd.f32 %v1959_v26, %v1679_v41  ;;  %v7376_v39 = vld [vmem:[%s14001_s0 + $0x662] sm:$0xff]  ;;  %14669 = vst [vmem:[#allocation143_spill] sm:$0xff] %v13243_v22  ;;  %v7377_v40 = vld [vmem:[%s14001_s0 + $0x66a] sm:$0xff] }
 0x311   :  { %v3006_v7 = vmul.f32 %v7376_v39, %v7715_v51  ;;  %6879 = vmatprep.subr.msk.bf16.mxu1 %vm4125_vm0, %v3390_v32  ;;  %v4957_v12 = vsel %vm4125_vm0, %v3390_v32, 0  ;;  %v3007_v26 = vmul.f32 %v7377_v40, %v7715_v51  ;;  %v7378_v29 = vld [vmem:[%s14001_s0 + $0x200] sm:$0xff]  ;;  %v7379_v25 = vld [vmem:[%s14001_s0 + $0x208] sm:$0xff]  ;;  %v13259_v39 = vpop.f32.mrf.mxu0  ;;  %v13268_v19 = vpop.f32.mrf.mxu1 }
 0x312   :  { %v210_v41 = vmul.f32 %v7378_v29, %v7519_v6  ;;  %v211_v0 = vmul.f32 %v7379_v25, %v7519_v6  ;;  %5137 = vmatmul.mubr.bf16.vlgmr.msra.gmra.mxu0 %v7007_v47  ;;  %6845 = vmatpush3.bf16.msra.mxu1 %v4957_v12  ;;  %v2377_v32 = vadd.f32 %v2308_v18, %v2027_v62  ;;  %v7380_v40 = vld [vmem:[%s14001_s0 + $0x201] sm:$0xff]  ;;  %v5408_v29 = vld [vmem:[%s14005_s4 + $0x70] sm:$0xff] }
 0x313   :  { %v2378_v63 = vadd.f32 %v2309_v55, %v2028_v14  ;;  %v559_v22 = vmul.f32 %v7380_v40, %v7525_v9  ;;  %5144 = vmatprep.mubr.bf16.mxu0 %v7013_v3  ;;  %v7381_v18 = vld [vmem:[%s14001_s0 + $0x209] sm:$0xff] }
 0x314   :  { %v279_v6 = vadd.f32 %v210_v41, %v11040_v60  ;;  %v280_v47 = vadd.f32 %v211_v0, %v11040_v60  ;;  %v560_v55 = vmul.f32 %v7381_v18, %v7525_v9  ;;  %v7382_v62 = vld [vmem:[%s14001_s0 + $0x202] sm:$0xff]  ;;  %v2726_v12 = vadd.f32 %v2657_v24, %v2377_v32  ;;  %v7383_v3 = vld [vmem:[%s14001_s0 + $0x20a] sm:$0xff]  ;;  %v13288_v0 = vpop.f32.mrf.mxu1  ;;  %v13298_v32 = vpop.f32.mrf.mxu0 }
 0x315   :  { %v908_v14 = vmul.f32 %v7382_v62, %v7594_v36  ;;  %v2727_v25 = vadd.f32 %v2658_v20, %v2378_v63  ;;  %v909_v60 = vmul.f32 %v7383_v3, %v7594_v36  ;;  %v14011_v41 = vmov 0   ;;  %v5406_v9 = vld [vmem:[%s14005_s4 + $0x60] sm:$0xff]  ;;  %v7384_v63 = vld [vmem:[%s14001_s0 + $0x428] sm:$0xff]  ;;  %v7385_v36 = vld [vmem:[%s14001_s0 + $0x430] sm:$0xff]  ;;  %14670 = vst [vmem:[#allocation144_spill] sm:$0xff] %v13298_v32 }
 0x316   :  { %6884 = vset.pattern.permute.xlu0 %v14011_v41  ;;  %v628_v40 = vadd.f32 %v559_v22, %v279_v6  ;;  %v629_v18 = vadd.f32 %v560_v55, %v280_v47  ;;  %v1258_v24 = vmul.f32 %v7384_v63, %v7613_v45  ;;  %v1259_v20 = vmul.f32 %v7385_v36, %v7613_v45  ;;  %v7016_v22 = vld [vmem:[%s14003_s2 + $0x30] ss:$20 sps:$4 sm:$0xff]   ;;  %v5409_v55 = vld [vmem:[%s14005_s4 + $0x78] sm:$0xff]  ;;  %v13307_v62 = vpop.f32.mrf.mxu1 }
 0x317   :  { %5494 = vperm.xlu0 %6884, %v5408_v29   ;;  %v3075_v6 = vadd.f32 %v3006_v7, %v2726_v12  ;;  %v3076_v47 = vadd.f32 %v3007_v26, %v2727_v25  ;;  %6885 = vset.pattern.permute.xlu1 %v14011_v41  ;;  %v7019_v45 = vld [vmem:[%s14003_s2 + $0x5c] ss:$20 sps:$4 sm:$0xff]   ;;  %v14671_v32 = vmov 0  }
 0x318   :  { %v977_v29 = vadd.f32 %v908_v14, %v628_v40  ;;  %v978_v3 = vadd.f32 %v909_v60, %v629_v18  ;;  %v7386_v63 = vld [vmem:[%s14001_s0 + $0x429] sm:$0xff]  ;;  %v7387_v26 = vld [vmem:[%s14001_s0 + $0x431] sm:$0xff]  ;;  %5484 = vperm.xlu1 %6885, %v5406_v9   ;;  %v13320_v41 = vpop.f32.mrf.mxu1  ;;  %5685 = vmatprep.subr.bf16.mxu0 %v14671_v32 }
 0x319   :  { %v1607_v7 = vmul.f32 %v7386_v63, %v7636_v56  ;;  %v1608_v12 = vmul.f32 %v7387_v26, %v7636_v56  ;;  %v3284_v25 = vmul.f32 0.01, %v3075_v6  ;;  %v3285_v36 = vmul.f32 0.01, %v3076_v47  ;;  %v7388_v40 = vld [vmem:[%s14001_s0 + $0x42a] sm:$0xff]  ;;  %v7389_v63 = vld [vmem:[%s14001_s0 + $0x432] sm:$0xff]  ;;  %v13334_v26 = vpop.f32.mrf.mxu0 }
 0x31a   :  { %v1327_v14 = vadd.f32 %v1258_v24, %v977_v29  ;;  %v1328_v60 = vadd.f32 %v1259_v20, %v978_v3  ;;  %v1956_v18 = vmul.f32 %v7388_v40, %v7658_v4  ;;  %v1957_v56 = vmul.f32 %v7389_v63, %v7658_v4  ;;  %v5407_v9 = vld [vmem:[%s14005_s4 + $0x68] sm:$0xff]  ;;  %5145 = vmatmul.mubr.bf16.gmra.mxu0 %v7016_v22  ;;  %v5404_v29 = vld [vmem:[%s14005_s4 + $0x50] sm:$0xff]  ;;  %v13339_v3 = vpop.f32.mrf.mxu1  ;;  %v7391_v22 = vld [vmem:[%s14001_s0 + $0x658] sm:$0xff] }
 0x31b   :  { %5499 = vperm.xlu0 %6884, %v5409_v55   ;;  %v3353_v24 = vmax.f32 %v3075_v6, %v3284_v25  ;;  %v3354_v20 = vmax.f32 %v3076_v47, %v3285_v36  ;;  %5152 = vmatprep.mubr.bf16.mxu0 %v7019_v45  ;;  %v7390_v4 = vld [vmem:[%s14001_s0 + $0x650] sm:$0xff]  ;;  %v2307_v6 = vmul.f32 %v7391_v22, %v7678_v17  ;;  %v5405_v63 = vld [vmem:[%s14005_s4 + $0x58] sm:$0xff] }
 0x31c   :  { %v1676_v40 = vadd.f32 %v1607_v7, %v1327_v14  ;;  %v1677_v32 = vadd.f32 %v1608_v12, %v1328_v60  ;;  %v2306_v55 = vmul.f32 %v7390_v4, %v7678_v17  ;;  %v7392_v25 = vld [vmem:[%s14001_s0 + $0x651] sm:$0xff]  ;;  %5489 = vperm.xlu1 %6885, %v5407_v9   ;;  %v13353_v7 = vpop.f32.mrf.mxu1  ;;  %v7393_v14 = vld [vmem:[%s14001_s0 + $0x659] sm:$0xff]  ;;  %v13361_v17 = vadd.f32 %v12834_v2, %v12816_v23  ;;  %v13366_v9 = vpop.f32.mrf.mxu0 }
 0x31d   :  { %v3389_v47 = vpack.c.bf16 %v3354_v20, %v3353_v24  ;;  %v2655_v45 = vmul.f32 %v7392_v25, %v7697_v34  ;;  %v2656_v60 = vmul.f32 %v7393_v14, %v7697_v34  ;;  %v5402_v34 = vld [vmem:[%s14005_s4 + $0x40] sm:$0xff]  ;;  %v7394_v20 = vld [vmem:[%s14001_s0 + $0x652] sm:$0xff]  ;;  %v13395_v4 = vadd.f32 %v12972_v57, %v12958_v5 }
 0x31e   :  { %v2025_v12 = vadd.f32 %v1956_v18, %v1676_v40  ;;  %v2026_v36 = vadd.f32 %v1957_v56, %v1677_v32  ;;  %v7022_v32 = vld [vmem:[%s14003_s2 + $0x58] ss:$20 sps:$4 sm:$0xff]   ;;  %v13373_v18 = vadd.f32 %v12916_v54, %v12900_v50  ;;  %v6570_v23 = vpop.f32.mrf.mxu1  ;;  %v13391_v40 = vadd.f32 %v12854_v43, %v12836_v46  ;;  %v6473_v43 = vpop.f32.mrf.mxu0 }
 0x31f   :  { %5474 = vperm.xlu0 %6884, %v5404_v29   ;;  %6846 = vmatprep.subr.bf16.mxu1 %v3389_v47  ;;  %v7025_v2 = vld [vmem:[%s14003_s2 + $0x84] ss:$20 sps:$4 sm:$0xff]   ;;  %v3004_v29 = vmul.f32 %v7394_v20, %v7715_v51  ;;  %v13403_v25 = vadd.f32 %v12926_v31, %v12918_v28  ;;  %v5403_v46 = vld [vmem:[%s14005_s4 + $0x48] sm:$0xff]  ;;  %v6445_v5 = vadd.f32 %v12960_v52, %v12947_v13  ;;  %v5400_v31 = vld [vmem:[%s14005_s4 + $0x30] sm:$0xff] }
 0x320   :  { %6847 = vmatpush3.bf16.msra.mxu1 %v3389_v47  ;;  %v2375_v56 = vadd.f32 %v2306_v55, %v2025_v12  ;;  %v2376_v24 = vadd.f32 %v2307_v6, %v2026_v36  ;;  %v7395_v50 = vld [vmem:[%s14001_s0 + $0x65a] sm:$0xff]  ;;  %v13399_v55 = vadd.f32 %v13011_v48, %v12990_v11  ;;  %5479 = vperm.xlu1 %6885, %v5405_v63   ;;  %v6571_v22 = vpop.f32.mrf.mxu1 }
 0x321   :  { %v3005_v54 = vmul.f32 %v7395_v50, %v7715_v51  ;;  %v13407_v51 = vadd.f32 %v13053_v61, %v13036_v33  ;;  %v6545_v57 = vadd.f32 %v13081_v8, %v13064_v27  ;;  %v6448_v28 = vadd.f32 %v12992_v15, %v12974_v53  ;;  %v14672_v8 = vld [vmem:[#allocation122_spill] sm:$0xff]  ;;  %v14673_v12 = vld [vmem:[#allocation117_spill] sm:$0xff]  ;;  %v14675_v36 = vld [vmem:[#allocation124_spill] sm:$0xff] }
 0x322   :  { %v2724_v6 = vadd.f32 %v2655_v45, %v2375_v56  ;;  %v2725_v47 = vadd.f32 %v2656_v60, %v2376_v24  ;;  %5153 = vmatmul.mubr.bf16.gmra.mxu0 %v7022_v32  ;;  %v6548_v33 = vadd.f32 %v13116_v44, %v13098_v42  ;;  %v6573_v11 = vpop.f32.mrf.mxu1  ;;  %v6451_v13 = vadd.f32 %v13038_v58, %v13013_v49  ;;  %v14674_v58 = vld [vmem:[#allocation118_spill] sm:$0xff]  ;;  %v5398_v60 = vld [vmem:[%s14005_s4 + $0x20] sm:$0xff]  ;;  %v14680_v32 = vld [vmem:[#allocation123_spill] sm:$0xff] }
 0x323   :  { %5464 = vperm.xlu0 %6884, %v5402_v34   ;;  %5160 = vmatprep.mubr.bf16.mxu0 %v7025_v2  ;;  %v6551_v52 = vadd.f32 %v13155_v1, %v13135_v35  ;;  %v6454_v53 = vadd.f32 %v13066_v59, %v13055_v37  ;;  %v6554_v15 = vadd.f32 %v13189_v21, %v13173_v38  ;;  %v14676_v35 = vld [vmem:[#allocation143_spill] sm:$0xff]  ;;  %v5401_v59 = vld [vmem:[%s14005_s4 + $0x38] sm:$0xff]  ;;  %v6474_v37 = vpop.f32.mrf.mxu0  ;;  %v14679_v63 = vld [vmem:[#allocation121_spill] sm:$0xff] }
 0x324   :  { %v3073_v48 = vadd.f32 %v3004_v29, %v2724_v6  ;;  %v3074_v61 = vadd.f32 %v3005_v54, %v2725_v47  ;;  %v6457_v27 = vadd.f32 %v13100_v16, %v13083_v10  ;;  %v6557_v42 = vadd.f32 %v13211_v30, %v14672_v8  ;;  %5469 = vperm.xlu1 %6885, %v5403_v46   ;;  %v6574_v38 = vpop.f32.mrf.mxu1  ;;  %v7028_v10 = vld [vmem:[%s14003_s2 + $0x80] ss:$20 sps:$4 sm:$0xff]   ;;  %v14678_v21 = vld [vmem:[#allocation120_spill] sm:$0xff]  ;;  %v14683_v46 = vld [vmem:[#allocation114_spill] sm:$0xff] }
 0x325   :  { %v6460_v49 = vadd.f32 %v14674_v58, %v14673_v12  ;;  %v6560_v1 = vadd.f32 %v14676_v35, %v14675_v36  ;;  %v14677_v16 = vld [vmem:[#allocation119_spill] sm:$0xff]  ;;  %v6563_v14 = vadd.f32 %v13288_v0, %v13268_v19  ;;  %v6466_v34 = vadd.f32 %v14680_v32, %v14679_v63  ;;  %v7031_v56 = vld [vmem:[%s14003_s2 + $0xac] ss:$20 sps:$4 sm:$0xff]   ;;  %v14681_v29 = vld [vmem:[#allocation144_spill] sm:$0xff] }
 0x326   :  { %v3282_v44 = vmul.f32 0.01, %v3073_v48  ;;  %v3283_v45 = vmul.f32 0.01, %v3074_v61  ;;  %v6463_v30 = vadd.f32 %v14678_v21, %v14677_v16  ;;  %v6566_v2 = vadd.f32 %v13320_v41, %v13307_v62  ;;  %v14682_v62 = vld [vmem:[#allocation113_spill] sm:$0xff]  ;;  %v5419_v58 = vld [vmem:[%s14005_s4 + $0xc8] sm:$0xff] }
 0x327   :  { %5454 = vperm.xlu0 %6884, %v5400_v31   ;;  %v6469_v50 = vadd.f32 %v14681_v29, %v13259_v39  ;;  %v6569_v19 = vadd.f32 %v13353_v7, %v13339_v3  ;;  %v6472_v0 = vadd.f32 %v13366_v9, %v13334_v26  ;;  %v6572_v54 = vadd.f32 %v6571_v22, %v6570_v23  ;;  %v5396_v39 = vld [vmem:[%s14005_s4 + $0x10] sm:$0xff]  ;;  %v7051_v26 = vld [vmem:[%s14003_s2 + $0x38] ss:$20 sps:$4 sm:$0xff]  }
 0x328   :  { %v3351_v24 = vmax.f32 %v3073_v48, %v3282_v44  ;;  %v3352_v20 = vmax.f32 %v3074_v61, %v3283_v45  ;;  %5459 = vperm.xlu1 %6885, %v5401_v59   ;;  %v6475_v6 = vadd.f32 %v6474_v37, %v6473_v43  ;;  %v6575_v47 = vadd.f32 %v6574_v38, %v6573_v11  ;;  %v5399_v48 = vld [vmem:[%s14005_s4 + $0x28] sm:$0xff]  ;;  %v7055_v3 = vld [vmem:[%s14003_s2 + $0x60] ss:$20 sps:$4 sm:$0xff]   ;;  %v5397_v9 = vld [vmem:[%s14005_s4 + $0x18] sm:$0xff] }
 0x329   :  { %v6439_v31 = vadd.f32 %v14683_v46, %v14682_v62  ;;  %v13481_v7 = vadd.f32 %v13395_v4, %v13391_v40  ;;  %v13489_v22 = vadd.f32 %v6548_v33, %v6448_v28  ;;  %v7034_v43 = vld [vmem:[%s14003_s2 + $0xa8] ss:$20 sps:$4 sm:$0xff]   ;;  %v5394_v11 = vld [vmem:[%s14005_s4] sm:$0xff]  ;;  %v13499_v40 = vadd.f32 %v13407_v51, %v13403_v25  ;;  %v7061_v36 = vld [vmem:[%s14003_s2 + $0xd8] ss:$20 sps:$4 sm:$0xff]  }
 0x32a   :  { %v3388_v41 = vpack.c.bf16 %v3352_v20, %v3351_v24  ;;  %5161 = vmatmul.mubr.bf16.gmra.mxu0 %v7028_v10  ;;  %v13501_v4 = vadd.f32 %v6551_v52, %v6451_v13  ;;  %v13503_v61 = vadd.f32 %v6545_v57, %v6445_v5  ;;  %v7037_v28 = vld [vmem:[%s14003_s2 + $0xd4] ss:$20 sps:$4 sm:$0xff]   ;;  %v13511_v33 = vadd.f32 %v6554_v15, %v6454_v53  ;;  %v7060_v15 = vld [vmem:[%s14003_s2 + $0xb0] ss:$20 sps:$4 sm:$0xff]   ;;  %v7046_v59 = vld [vmem:[%s14003_s2 + $0xf8] ss:$20 sps:$4 sm:$0xff]  }
 0x32b   :  { %5444 = vperm.xlu0 %6884, %v5398_v60   ;;  %5168 = vmatprep.mubr.bf16.mxu0 %v7031_v56  ;;  %v13487_v23 = vadd.f32 %v13399_v55, %v6439_v31  ;;  %v13505_v55 = vadd.f32 %v6560_v1, %v6460_v49  ;;  %v13513_v8 = vadd.f32 %v6563_v14, %v6463_v30  ;;  %v5395_v13 = vld [vmem:[%s14005_s4 + $0x8] sm:$0xff]  ;;  %v5420_v52 = vld [vmem:[%s14005_s4 + $0xd0] sm:$0xff]  ;;  %v5418_v45 = vld [vmem:[%s14005_s4 + $0xc0] sm:$0xff] }
 0x32c   :  { %6848 = vmatprep.subr.bf16.mxu1 %v3388_v41  ;;  %5449 = vperm.xlu1 %6885, %v5399_v48   ;;  %v13515_v44 = vadd.f32 %v6557_v42, %v6457_v27  ;;  %v13517_v25 = vadd.f32 %v6572_v54, %v6472_v0  ;;  %v13520_v51 = vadd.f32 %v6566_v2, %v6466_v34  ;;  %v7056_v53 = vld [vmem:[%s14003_s2 + $0x88] ss:$20 sps:$4 sm:$0xff]   ;;  %v5421_v27 = vld [vmem:[%s14005_s4 + $0xd8] sm:$0xf]  ;;  %v7040_v42 = vld [vmem:[%s14003_s2 + $0xd0] ss:$20 sps:$4 sm:$0xff]  }
 0x32d   :  { %6849 = vmatpush3.bf16.msra.mxu1 %v3388_v41  ;;  %v13522_v5 = vadd.f32 %v6575_v47, %v6475_v6  ;;  %v13524_v57 = vadd.f32 %v6569_v19, %v6469_v50  ;;  %v7043_v12 = vld [vmem:[%s14003_s2 + $0xfc] ss:$20 sps:$4 sm:$0xff]   ;;  %v7065_v35 = vld [vmem:[%s14003_s2 + $0x100] ss:$20 sps:$4 sm:$0xff]   ;;  %v7049_v38 = vld [vmem:[%s14003_s2 + $0x124] ss:$20 sps:$4 sm:$0xff]  }
 0x32e   :  { %v5416_v49 = vld [vmem:[%s14005_s4 + $0xb0] sm:$0xff]  ;;  %v5417_v1 = vld [vmem:[%s14005_s4 + $0xb8] sm:$0xff]  ;;  %v5414_v37 = vld [vmem:[%s14005_s4 + $0xa0] sm:$0xff] }
 0x32f   :  { %5434 = vperm.xlu0 %6884, %v5396_v39   ;;  %v14684_v10 = vld [vmem:[#allocation39_spill] sm:$0xff]  ;;  %v14686_v30 = vld [vmem:[#allocation46_spill] sm:$0xff]  ;;  %v14687_v14 = vld [vmem:[#allocation48_spill] sm:$0xff] }
 0x330   :  { %6851 = vmatmul.mubr.msk.bf16.vlgmr.msra.gmra.mxu1 %vm4082_vm1, %v7051_v26  ;;  %5439 = vperm.xlu1 %6885, %v5397_v9   ;;  %v14685_v16 = vld [vmem:[#allocation15_spill] sm:$0xff]  ;;  %v6503_v60 = vadd.f32 %v14687_v14, %v14686_v30  ;;  %v5415_v63 = vld [vmem:[%s14005_s4 + $0xa8] sm:$0xff]  ;;  %v14688_v20 = vld [vmem:[#allocation45_spill] sm:$0xff] }
 0x331   :  { %6854 = vmatprep.mubr.msk.bf16.mxu1 %vm4082_vm1, %v7055_v3  ;;  %v6403_v21 = vadd.f32 %v14685_v16, %v14684_v10  ;;  %v5412_v34 = vld [vmem:[%s14005_s4 + $0x90] sm:$0xff]  ;;  %v7066_v2 = vld [vmem:[%s14003_s2 + $0x128] ss:$20 sps:$4 sm:$0xff]   ;;  %v5410_v46 = vld [vmem:[%s14005_s4 + $0x80] sm:$0xff] }
 0x332   :  { %5169 = vmatmul.mubr.bf16.gmra.mxu0 %v7034_v43  ;;  %v7070_v56 = vld [vmem:[%s14003_s2 + $0x150] ss:$20 sps:$4 sm:$0xff]   ;;  %v14690_v19 = vld [vmem:[#allocation76_spill] sm:$0xff]  ;;  %v14691_v0 = vld [vmem:[#allocation78_spill] sm:$0xff] }
 0x333   :  { %5424 = vperm.xlu0 %6884, %v5394_v11   ;;  %5176 = vmatprep.mubr.bf16.mxu0 %v7037_v28  ;;  %v14689_v29 = vld [vmem:[#allocation47_spill] sm:$0xff]  ;;  %v6512_v54 = vadd.f32 %v14691_v0, %v14690_v19  ;;  %v4320_v6 = vadd.f32 %v6503_v60, %v6403_v21  ;;  %v5413_v47 = vld [vmem:[%s14005_s4 + $0x98] sm:$0xff]  ;;  %v7054_v31 = vld [vmem:[%s14003_s2 + $0x14c] ss:$20 sps:$4 sm:$0xff]  }
 0x334   :  { %5429 = vperm.xlu1 %6885, %v5395_v13   ;;  %v6412_v50 = vadd.f32 %v14689_v29, %v14688_v20  ;;  %v7047_v41 = vld [vmem:[%s14003_s2 + $0x120] ss:$20 sps:$4 sm:$0xff]   ;;  %v5411_v3 = vld [vmem:[%s14005_s4 + $0x88] sm:$0xff]  ;;  %v14701_v21 = vld [vmem:[#allocation112_spill] sm:$0xff] }
 0x335   :  { %v7071_v43 = vld [vmem:[%s14003_s2 + $0x178] ss:$20 sps:$4 sm:$0xff]   ;;  %v7075_v28 = vld [vmem:[%s14003_s2 + $0x1a0] ss:$20 sps:$4 sm:$0xff]   ;;  %v7080_v0 = vld [vmem:[%s14003_s2 + $0x1f0] ss:$20 sps:$4 sm:$0xff]  }
 0x336   :  { %v4333_v26 = vadd.f32 %v6512_v54, %v6412_v50  ;;  %v14700_v16 = vld [vmem:[#allocation111_spill] sm:$0xff]  ;;  %v14705_v20 = vld [vmem:[#allocation108_spill] sm:$0xff]  ;;  %v14706_v54 = vld [vmem:[#allocation37_spill] sm:$0xff] }
 0x337   :  { %5554 = vperm.xlu0 %6884, %v5420_v52   ;;  %v14692_v52 = vld [vmem:[#allocation79_spill] sm:$0xff]  ;;  %v6527_v30 = vadd.f32 %v14701_v21, %v14700_v16  ;;  %v7076_v50 = vld [vmem:[%s14003_s2 + $0x1c8] ss:$20 sps:$4 sm:$0xff]  }
 0x338   :  { %6855 = vmatmul.mubr.msk.bf16.gmra.mxu1 %vm4082_vm1, %v7056_v53  ;;  %5559 = vperm.xlu1 %6885, %v5421_v27   ;;  %v14693_v53 = vld [vmem:[#allocation81_spill] sm:$0xff]  ;;  %v7052_v27 = vld [vmem:[%s14003_s2 + $0x148] ss:$20 sps:$4 sm:$0xff]  }
 0x339   :  { %6858 = vmatprep.mubr.msk.bf16.mxu1 %vm4082_vm1, %v7060_v15  ;;  %v13585_v32 = vpop.f32.mrf.mxu0  ;;  %v6424_v15 = vadd.f32 %v14693_v53, %v14692_v52  ;;  %v14711_v52 = vld [vmem:[#allocation88_spill] sm:$0xff] }
 0x33a   :  { %5177 = vmatmul.mubr.bf16.gmra.mxu0 %v7040_v42  ;;  %v14714_v16 = vld [vmem:[#allocation44_spill] sm:$0xff] }
 0x33b   :  { %5544 = vperm.xlu0 %6884, %v5418_v45   ;;  %5184 = vmatprep.mubr.bf16.mxu0 %v7043_v12  ;;  %v4453_v24 = vpop.f32.mrf.mxu0  ;;  %v7059_v45 = vld [vmem:[%s14003_s2 + $0x174] ss:$20 sps:$4 sm:$0xff]   ;;  %v4349_v14 = vadd.f32 %v13361_v17, %v6424_v15  ;;  %v7064_v15 = vld [vmem:[%s14003_s2 + $0x19c] ss:$20 sps:$4 sm:$0xff]  }
 0x33c   :  { %5549 = vperm.xlu1 %6885, %v5419_v58   ;;  %v14694_v12 = vld [vmem:[#allocation11_spill] sm:$0xff]  ;;  %v14695_v58 = vld [vmem:[#allocation12_spill] sm:$0xff] }
 0x33d   :  { %v6819_v62 = vpop.f32.mrf.mxu0  ;;  %v14715_v21 = vld [vmem:[#allocation20_spill] sm:$0xff] }
 0x33e   :  { %v13613_v48 = vadd.f32 %v6819_v62, %v4320_v6  ;;  %v14707_v6 = vld [vmem:[#allocation38_spill] sm:$0xff] }
 0x33f   :  { %5534 = vperm.xlu0 %6884, %v5416_v49   ;;  %v13616_v39 = vpop.f32.mrf.mxu0  ;;  %v6394_v49 = vadd.f32 %v14695_v58, %v14694_v12  ;;  %v14709_v62 = vld [vmem:[#allocation18_spill] sm:$0xff] }
 0x340   :  { %6859 = vmatmul.mubr.msk.bf16.gmra.mxu1 %vm4082_vm1, %v7061_v36  ;;  %5539 = vperm.xlu1 %6885, %v5417_v1   ;;  %v14697_v1 = vld [vmem:[#allocation16_spill] sm:$0xff] }
 0x341   :  { %6862 = vmatprep.mubr.msk.bf16.mxu1 %vm4082_vm1, %v7065_v35  ;;  %v6822_v9 = vpop.f32.mrf.mxu0  ;;  %v14696_v35 = vld [vmem:[#allocation40_spill] sm:$0xff] }
 0x342   :  { %5185 = vmatmul.mubr.bf16.gmra.mxu0 %v7046_v59  ;;  %v13624_v11 = vadd.f32 %v6822_v9, %v4333_v26  ;;  %v6494_v59 = vadd.f32 %v14697_v1, %v14696_v35 }
 0x343   :  { %5524 = vperm.xlu0 %6884, %v5414_v37   ;;  %5192 = vmatprep.mubr.bf16.mxu0 %v7049_v38  ;;  %v13629_v13 = vpop.f32.mrf.mxu0  ;;  %v14698_v37 = vld [vmem:[#allocation83_spill] sm:$0xff]  ;;  %v14699_v38 = vld [vmem:[#allocation85_spill] sm:$0xff] }
 0x344   :  { %5529 = vperm.xlu1 %6885, %v5415_v63   ;;  %v6427_v10 = vadd.f32 %v14699_v38, %v14698_v37  ;;  %v14702_v63 = vld [vmem:[#allocation75_spill] sm:$0xff]  ;;  %v14712_v37 = vld [vmem:[#allocation13_spill] sm:$0xff]  ;;  %v14713_v38 = vld [vmem:[#allocation14_spill] sm:$0xff] }
 0x345   :  { %v13636_v42 = vpop.f32.mrf.mxu0 }
 0x346   :  { %v4352_v26 = vadd.f32 %v6527_v30, %v6427_v10  ;;  %v6400_v10 = vadd.f32 %v14713_v38, %v14712_v37  ;;  %v6500_v30 = vadd.f32 %v14715_v21, %v14714_v16  ;;  %v14722_v37 = vld [vmem:[#allocation50_spill] sm:$0xff]  ;;  %v14723_v38 = vld [vmem:[#allocation52_spill] sm:$0xff] }
 0x347   :  { %5514 = vperm.xlu0 %6884, %v5412_v34   ;;  %v13645_v36 = vpop.f32.mrf.mxu0  ;;  %v14703_v34 = vld [vmem:[#allocation77_spill] sm:$0xff] }
 0x348   :  { %6863 = vmatmul.mubr.msk.bf16.gmra.mxu1 %vm4082_vm1, %v7066_v2  ;;  %5519 = vperm.xlu1 %6885, %v5413_v47   ;;  %v6421_v2 = vadd.f32 %v14703_v34, %v14702_v63  ;;  %v6397_v47 = vadd.f32 %v14707_v6, %v14706_v54  ;;  %v14718_v63 = vld [vmem:[#allocation115_spill] sm:$0xff]  ;;  %v14719_v34 = vld [vmem:[#allocation116_spill] sm:$0xff] }
 0x349   :  { %6866 = vmatprep.mubr.msk.bf16.mxu1 %vm4082_vm1, %v7070_v56  ;;  %v6826_v60 = vpop.f32.mrf.mxu0  ;;  %v14704_v56 = vld [vmem:[#allocation87_spill] sm:$0xff] }
 0x34a   :  { %5193 = vmatmul.mubr.bf16.gmra.mxu0 %v7047_v41  ;;  %v6521_v29 = vadd.f32 %v14705_v20, %v14704_v56  ;;  %v13661_v19 = vadd.f32 %v6826_v60, %v4349_v14  ;;  %v14708_v41 = vld [vmem:[#allocation42_spill] sm:$0xff]  ;;  %v14716_v14 = vld [vmem:[#allocation109_spill] sm:$0xff] }
 0x34b   :  { %5504 = vperm.xlu0 %6884, %v5410_v46   ;;  %5200 = vmatprep.mubr.bf16.mxu0 %v7054_v31  ;;  %v13666_v17 = vpop.f32.mrf.mxu0  ;;  %v6497_v46 = vadd.f32 %v14709_v62, %v14708_v41  ;;  %v4309_v31 = vadd.f32 %v6494_v59, %v6394_v49 }
 0x34c   :  { %5509 = vperm.xlu1 %6885, %v5411_v3   ;;  %v7057_v3 = vld [vmem:[%s14003_s2 + $0x170] ss:$20 sps:$4 sm:$0xff]   ;;  %v4344_v12 = vadd.f32 %v6521_v29, %v6421_v2  ;;  %v6533_v2 = vadd.f32 %v14719_v34, %v14718_v63  ;;  %v7081_v29 = vld [vmem:[%s14003_s2 + $0x218] ss:$20 sps:$4 sm:$0x3f]  }
 0x34d   :  { %v4312_v1 = vadd.f32 %v6497_v46, %v6397_v47  ;;  %v7067_v34 = vld [vmem:[%s14003_s2 + $0x1c0] ss:$20 sps:$4 sm:$0xff]  }
 0x34e   :  { %v6609_v9 = vpop.f32.mrf.mxu1 }
 0x350   :  { %6867 = vmatmul.mubr.msk.bf16.gmra.mxu1 %vm4082_vm1, %v7071_v43  ;;  %v6827_v43 = vpop.f32.mrf.mxu0  ;;  %v6610_v58 = vpop.f32.mrf.mxu1 }
 0x351   :  { %6870 = vmatprep.mubr.msk.bf16.mxu1 %vm4082_vm1, %v7075_v28  ;;  %v14710_v28 = vld [vmem:[#allocation107_spill] sm:$0xff]  ;;  %v6611_v35 = vadd.f32 %v6610_v58, %v6609_v9 }
 0x352   :  { %5201 = vmatmul.mubr.bf16.gmra.mxu0 %v7052_v27  ;;  %v6430_v53 = vadd.f32 %v14711_v52, %v14710_v28  ;;  %v4454_v27 = vadd.f32 %v4453_v24, %v4309_v31  ;;  %v4488_v49 = vpop.f32.mrf.mxu0  ;;  %v14717_v24 = vld [vmem:[#allocation110_spill] sm:$0xff]  ;;  %v6612_v56 = vpop.f32.mrf.mxu1 }
 0x353   :  { %5208 = vmatprep.mubr.bf16.mxu0 %v7059_v45  ;;  %v13681_v45 = vadd.f32 %v6827_v43, %v4352_v26  ;;  %v13684_v59 = vadd.f32 %v4488_v49, %v4344_v12  ;;  %v6433_v60 = vadd.f32 %v14717_v24, %v14716_v14  ;;  %v7062_v31 = vld [vmem:[%s14003_s2 + $0x198] ss:$20 sps:$4 sm:$0xff]   ;;  %v14720_v49 = vld [vmem:[#allocation41_spill] sm:$0xff]  ;;  %v14724_v24 = vld [vmem:[#allocation43_spill] sm:$0xff] }
 0x354   :  { %v6830_v20 = vpop.f32.mrf.mxu0  ;;  %v4357_v6 = vadd.f32 %v13373_v18, %v6430_v53  ;;  %v6613_v47 = vpop.f32.mrf.mxu1 }
 0x355   :  { %v13701_v54 = vadd.f32 %v6830_v20, %v13481_v7  ;;  %v6614_v62 = vadd.f32 %v6613_v47, %v6612_v56  ;;  %v4317_v7 = vadd.f32 %v6500_v30, %v6400_v10  ;;  %v4360_v43 = vadd.f32 %v6533_v2, %v6433_v60  ;;  %v14725_v60 = vld [vmem:[#allocation19_spill] sm:$0xff]  ;;  %v14726_v20 = vld [vmem:[#allocation72_spill] sm:$0xff] }
 0x356   :  { %v4501_v41 = vpop.f32.mrf.mxu0  ;;  %v6615_v26 = vpop.f32.mrf.mxu1  ;;  %v6506_v10 = vadd.f32 %v14723_v38, %v14722_v37  ;;  %v6409_v63 = vadd.f32 %v14725_v60, %v14724_v24  ;;  %v14730_v37 = vld [vmem:[#allocation80_spill] sm:$0xff] }
 0x357   :  { %v13704_v46 = vadd.f32 %v4501_v41, %v4357_v6  ;;  %v4462_v53 = vadd.f32 %v13585_v32, %v4317_v7 }
 0x358   :  { %6871 = vmatmul.mubr.msk.bf16.gmra.mxu1 %vm4082_vm1, %v7076_v50  ;;  %v13697_v50 = vadd.f32 %v6611_v35, %v4454_v27  ;;  %v6616_v28 = vpop.f32.mrf.mxu1  ;;  %v14721_v35 = vld [vmem:[#allocation17_spill] sm:$0xff] }
 0x359   :  { %6874 = vmatprep.mubr.msk.bf16.mxu1 %vm4082_vm1, %v7080_v0  ;;  %v4457_v0 = vadd.f32 %v13616_v39, %v4312_v1  ;;  %v7069_v39 = vld [vmem:[%s14003_s2 + $0x1c4] ss:$20 sps:$4 sm:$0xff]   ;;  %v6406_v1 = vadd.f32 %v14721_v35, %v14720_v49  ;;  %v14729_v35 = vld [vmem:[#allocation51_spill] sm:$0xff] }
 0x35a   :  { %5209 = vmatmul.mubr.bf16.gmra.mxu0 %v7057_v3  ;;  %v6831_v3 = vpop.f32.mrf.mxu0  ;;  %v6618_v12 = vpop.f32.mrf.mxu1  ;;  %v14728_v49 = vld [vmem:[#allocation49_spill] sm:$0xff] }
 0x35b   :  { %5216 = vmatprep.mubr.bf16.mxu0 %v7064_v15  ;;  %v13713_v9 = vadd.f32 %v6614_v62, %v4457_v0  ;;  %v13716_v18 = vadd.f32 %v6831_v3, %v13487_v23  ;;  %v6617_v15 = vadd.f32 %v6616_v28, %v6615_v26  ;;  %v4325_v6 = vadd.f32 %v6506_v10, %v6406_v1 }
 0x35c   :  { %v4504_v52 = vpop.f32.mrf.mxu0  ;;  %v6619_v21 = vpop.f32.mrf.mxu1  ;;  %v6415_v1 = vadd.f32 %v14729_v35, %v14728_v49 }
 0x35d   :  { %v13719_v27 = vadd.f32 %v4504_v52, %v4360_v43  ;;  %v13725_v23 = vadd.f32 %v6617_v15, %v4462_v53  ;;  %v6620_v30 = vadd.f32 %v6619_v21, %v6618_v12 }
 0x35e   :  { %v6834_v58 = vpop.f32.mrf.mxu0  ;;  %v6621_v2 = vpop.f32.mrf.mxu1 }
 0x35f   :  { %v13728_v16 = vadd.f32 %v6834_v58, %v13489_v22  ;;  %v7074_v22 = vld [vmem:[%s14003_s2 + $0x1ec] ss:$20 sps:$4 sm:$0xff]  }
 0x360   :  { %6875 = vmatmul.mubr.msk.bf16.gmra.mxu1 %vm4082_vm1, %v7081_v29  ;;  %v4517_v32 = vpop.f32.mrf.mxu0  ;;  %v14727_v29 = vld [vmem:[#allocation74_spill] sm:$0xff]  ;;  %v6622_v41 = vpop.f32.mrf.mxu1 }
 0x361   :  { %v13731_v14 = vadd.f32 %v4517_v32, %v13499_v40  ;;  %v6509_v0 = vadd.f32 %v14727_v29, %v14726_v20  ;;  %v13744_v40 = vadd.f32 %v6620_v30, %v13613_v48  ;;  %v6623_v26 = vadd.f32 %v6622_v41, %v6621_v2  ;;  %v14735_v20 = vld [vmem:[#allocation86_spill] sm:$0xff] }
 0x362   :  { %5217 = vmatmul.mubr.bf16.gmra.mxu0 %v7062_v31  ;;  %v6835_v56 = vpop.f32.mrf.mxu0  ;;  %v4470_v31 = vadd.f32 %v13629_v13, %v4325_v6 }
 0x363   :  { %5224 = vmatprep.mubr.bf16.mxu0 %v7069_v39  ;;  %v13747_v47 = vadd.f32 %v6835_v56, %v13501_v4  ;;  %v6624_v39 = vpop.f32.mrf.mxu1  ;;  %v4328_v43 = vadd.f32 %v6509_v0, %v6409_v63  ;;  %v14732_v63 = vld [vmem:[#allocation71_spill] sm:$0xff]  ;;  %v14734_v56 = vld [vmem:[#allocation84_spill] sm:$0xff] }
 0x364   :  { %v4520_v62 = vpop.f32.mrf.mxu0  ;;  %v13753_v28 = vadd.f32 %v6623_v26, %v4470_v31  ;;  %v6518_v29 = vadd.f32 %v14735_v20, %v14734_v56  ;;  %v7077_v26 = vld [vmem:[%s14003_s2 + $0x210] ss:$20 sps:$4 sm:$0x3f]  }
 0x365   :  { %v13751_v3 = vadd.f32 %v4520_v62, %v13503_v61  ;;  %v6625_v4 = vpop.f32.mrf.mxu1  ;;  %v4473_v53 = vadd.f32 %v13645_v36, %v4328_v43  ;;  %v7072_v61 = vld [vmem:[%s14003_s2 + $0x1e8] ss:$20 sps:$4 sm:$0xff]  }
 0x366   :  { %v6838_v7 = vpop.f32.mrf.mxu0  ;;  %v6626_v15 = vadd.f32 %v6625_v4, %v6624_v39  ;;  %v7079_v36 = vld [vmem:[%s14003_s2 + $0x214] ss:$20 sps:$4 sm:$0x3f]  }
 0x367   :  { %v13756_v48 = vadd.f32 %v6838_v7, %v13505_v55  ;;  %v6627_v12 = vpop.f32.mrf.mxu1  ;;  %v14731_v55 = vld [vmem:[#allocation82_spill] sm:$0xff] }
 0x368   :  { %v4533_v52 = vpop.f32.mrf.mxu0  ;;  %v6515_v38 = vadd.f32 %v14731_v55, %v14730_v37  ;;  %v13772_v10 = vadd.f32 %v6626_v15, %v4473_v53 }
 0x369   :  { %v13760_v13 = vadd.f32 %v4533_v52, %v13511_v33  ;;  %v6628_v21 = vpop.f32.mrf.mxu1 }
 0x36a   :  { %5225 = vmatmul.mubr.bf16.gmra.mxu0 %v7067_v34  ;;  %v6839_v58 = vpop.f32.mrf.mxu0  ;;  %v6629_v30 = vadd.f32 %v6628_v21, %v6627_v12  ;;  %v14733_v34 = vld [vmem:[#allocation73_spill] sm:$0xff]  ;;  %v4336_v0 = vadd.f32 %v6515_v38, %v6415_v1 }
 0x36b   :  { %5232 = vmatprep.mubr.bf16.mxu0 %v7074_v22  ;;  %v13775_v33 = vadd.f32 %v6839_v58, %v13513_v8  ;;  %v6630_v60 = vpop.f32.mrf.mxu1  ;;  %v6418_v2 = vadd.f32 %v14733_v34, %v14732_v63 }
 0x36c   :  { %v4536_v32 = vpop.f32.mrf.mxu0  ;;  %v13785_v22 = vadd.f32 %v6629_v30, %v13624_v11 }
 0x36d   :  { %v13778_v24 = vadd.f32 %v4536_v32, %v13515_v44  ;;  %v6631_v6 = vpop.f32.mrf.mxu1  ;;  %v4481_v44 = vadd.f32 %v13636_v42, %v4336_v0  ;;  %v4341_v43 = vadd.f32 %v6518_v29, %v6418_v2 }
 0x36e   :  { %v6842_v8 = vpop.f32.mrf.mxu0  ;;  %v6632_v62 = vadd.f32 %v6631_v6, %v6630_v60 }
 0x36f   :  { %v13788_v41 = vadd.f32 %v6842_v8, %v13517_v25  ;;  %v6633_v39 = vpop.f32.mrf.mxu1  ;;  %v4486_v42 = vadd.f32 %v13666_v17, %v4341_v43 }
 0x370   :  { %v4549_v31 = vpop.f32.mrf.mxu0  ;;  %v13797_v11 = vadd.f32 %v6632_v62, %v4481_v44 }
 0x371   :  { %v13795_v7 = vadd.f32 %v4549_v31, %v13520_v51  ;;  %v6634_v52 = vpop.f32.mrf.mxu1 }
 0x372   :  { %5233 = vmatmul.mubr.bf16.gmra.mxu0 %v7072_v61  ;;  %v6843_v4 = vpop.f32.mrf.mxu0  ;;  %v6635_v53 = vadd.f32 %v6634_v52, %v6633_v39 }
 0x373   :  { %5240 = vmatprep.mubr.bf16.mxu0 %v7079_v36  ;;  %v13800_v25 = vadd.f32 %v6843_v4, %v13522_v5  ;;  %v6636_v15 = vpop.f32.mrf.mxu1 }
 0x374   :  { %v13803_v61 = vadd.f32 %v6635_v53, %v4486_v42 }
 0x375   :  { %v6637_v12 = vpop.f32.mrf.mxu1 }
 0x376   :  { %v6638_v58 = vadd.f32 %v6637_v12, %v6636_v15 }
 0x377   :  { %v6639_v49 = vpop.f32.mrf.mxu1 }
 0x378   :  { %v13806_v51 = vadd.f32 %v6638_v58, %v13684_v59 }
 0x379   :  { %v6640_v35 = vpop.f32.mrf.mxu1 }
 0x37a   :  { %5241 = vmatmul.mubr.bf16.gmra.mxu0 %v7077_v26  ;;  %v6641_v1 = vadd.f32 %v6640_v35, %v6639_v49 }
 0x37b   :  { %v6642_v37 = vpop.f32.mrf.mxu1 }
 0x37c   :  { %v13809_v55 = vadd.f32 %v6641_v1, %v13661_v19 }
 0x37d   :  { %v6643_v5 = vpop.f32.mrf.mxu1 }
 0x37e   :  { %v6644_v38 = vadd.f32 %v6643_v5, %v6642_v37 }
 0x37f   :  { %v6645_v17 = vpop.f32.mrf.mxu1 }
 0x380   :  { %v13812_v36 = vadd.f32 %v6644_v38, %v13681_v45 }
 0x381   :  { %v6646_v21 = vpop.f32.mrf.mxu1 }
 0x382   :  { %v6647_v32 = vadd.f32 %v6646_v21, %v6645_v17 }
 0x383   :  { %v6648_v30 = vpop.f32.mrf.mxu1 }
 0x384   :  { %v13815_v60 = vadd.f32 %v6647_v32, %v13704_v46 }
 0x385   :  { %v6649_v59 = vpop.f32.mrf.mxu1 }
 0x386   :  { %v6650_v63 = vadd.f32 %v6649_v59, %v6648_v30 }
 0x387   :  { %v6651_v2 = vpop.f32.mrf.mxu1 }
 0x388   :  { %v13818_v34 = vadd.f32 %v6650_v63, %v13719_v27 }
 0x389   :  { %v6652_v19 = vpop.f32.mrf.mxu1 }
 0x38a   :  { %v6653_v56 = vadd.f32 %v6652_v19, %v6651_v2  ;;  %v4552_v2 = vpop.f32.mrf.mxu0 }
 0x38b   :  { %v6654_v20 = vpop.f32.mrf.mxu1 }
 0x38c   :  { %v13821_v29 = vadd.f32 %v6653_v56, %v13701_v54 }
 0x38d   :  { %v6655_v45 = vpop.f32.mrf.mxu1 }
 0x38e   :  { %v6656_v0 = vadd.f32 %v6655_v45, %v6654_v20  ;;  %v4553_v20 = vadd.f32 %v4552_v2, %v13524_v57 }
 0x38f   :  { %v6657_v8 = vpop.f32.mrf.mxu1 }
 0x390   :  { %v13824_v6 = vadd.f32 %v6656_v0, %v13716_v18 }
 0x391   :  { %v6658_v46 = vpop.f32.mrf.mxu1 }
 0x392   :  { %v6659_v44 = vadd.f32 %v6658_v46, %v6657_v8 }
 0x393   :  { %v6660_v62 = vpop.f32.mrf.mxu1 }
 0x394   :  { %v13827_v31 = vadd.f32 %v6659_v44, %v13731_v14 }
 0x395   :  { %v6661_v27 = vpop.f32.mrf.mxu1 }
 0x396   :  { %v6662_v26 = vadd.f32 %v6661_v27, %v6660_v62 }
 0x398   :  { %v13830_v39 = vadd.f32 %v6662_v26, %v13751_v3  ;;  %v6663_v43 = vpop.f32.mrf.mxu1  ;;  %v13859_v26 = vpop.permute.xlu0 %5494 }
 0x39a   :  { %v6664_v54 = vpop.f32.mrf.mxu1 }
 0x39b   :  { %v6665_v4 = vadd.f32 %v6664_v54, %v6663_v43  ;;  %v13864_v43 = vpop.permute.xlu1 %5484 }
 0x39c   :  { %v6666_v52 = vpop.f32.mrf.mxu1  ;;  %v13866_v57 = vpop.permute.xlu0 %5499 }
 0x39d   :  { %v13833_v42 = vadd.f32 %v6665_v4, %v13728_v16 }
 0x39e   :  { %v6667_v18 = vpop.f32.mrf.mxu1 }
 0x39f   :  { %v6668_v53 = vadd.f32 %v6667_v18, %v6666_v52  ;;  %v13868_v4 = vpop.permute.xlu1 %5489 }
 0x3a1   :  { %v13836_v12 = vadd.f32 %v6668_v53, %v13747_v47  ;;  %v13870_v53 = vpop.permute.xlu0 %5474 }
 0x3a3   :  { %v6669_v15 = vpop.f32.mrf.mxu1 }
 0x3a5   :  { %v6670_v14 = vpop.f32.mrf.mxu1 }
 0x3a6   :  { %v6671_v58 = vadd.f32 %v6670_v14, %v6669_v15 }
 0x3a7   :  { %v6672_v49 = vpop.f32.mrf.mxu1 }
 0x3a8   :  { %v13839_v35 = vadd.f32 %v6671_v58, %v13760_v13 }
 0x3a9   :  { %v6673_v3 = vpop.f32.mrf.mxu1 }
 0x3aa   :  { %v6674_v1 = vadd.f32 %v6673_v3, %v6672_v49  ;;  %v13873_v49 = vpop.permute.xlu1 %5479  ;;  %v13875_v3 = vpop.permute.xlu0 %5464 }
 0x3ab   :  { %v6675_v37 = vpop.f32.mrf.mxu1 }
 0x3ac   :  { %v13842_v5 = vadd.f32 %v6674_v1, %v13778_v24 }
 0x3ad   :  { %v6676_v16 = vpop.f32.mrf.mxu1 }
 0x3ae   :  { %v6677_v38 = vadd.f32 %v6676_v16, %v6675_v37 }
 0x3af   :  { %v6678_v17 = vpop.f32.mrf.mxu1 }
 0x3b0   :  { %v13845_v21 = vadd.f32 %v6677_v38, %v13756_v48 }
 0x3b1   :  { %v6679_v47 = vpop.f32.mrf.mxu1 }
 0x3b2   :  { %14736 = vst [vmem:[#allocation145_spill] sm:$0xff] %v13845_v21  ;;  %v6680_v32 = vadd.f32 %v6679_v47, %v6678_v17  ;;  %v13878_v17 = vpop.permute.xlu1 %5469 }
 0x3b4   :  { %v6681_v30 = vpop.f32.mrf.mxu1  ;;  %v13848_v59 = vadd.f32 %v6680_v32, %v13775_v33 }
 0x3b6   :  { %14737 = vst [vmem:[#allocation146_spill] sm:$0xff] %v13848_v59  ;;  %v6682_v13 = vpop.f32.mrf.mxu1 }
 0x3b7   :  { %v6683_v63 = vadd.f32 %v6682_v13, %v6681_v30  ;;  %v5455_v13 = vpop.permute.xlu0 %5454 }
 0x3b8   :  { %v6684_v19 = vpop.f32.mrf.mxu1 }
 0x3b9   :  { %v13851_v56 = vadd.f32 %v6683_v63, %v13795_v7 }
 0x3ba   :  { %v6685_v24 = vpop.f32.mrf.mxu1 }
 0x3bb   :  { %14738 = vst [vmem:[#allocation147_spill] sm:$0xff] %v13851_v56  ;;  %v6686_v45 = vadd.f32 %v6685_v24, %v6684_v19  ;;  %v7084_v19 = vld [vmem:[%s14006_s5 + $0x4] ss:$8 sps:$4 sm:$0x3f]  }
 0x3bc   :  { %v6687_v0 = vpop.f32.mrf.mxu1  ;;  %6373 = vmatprep.mubr.msk.bf16.mxu0 %vm5677_vm2, %v7084_v19 }
 0x3bd   :  { %v13854_v48 = vadd.f32 %v6686_v45, %v4553_v20  ;;  %v5445_v45 = vpop.permute.xlu0 %5444 }
 0x3be   :  { %v6688_v8 = vpop.f32.mrf.mxu1 }
 0x3bf   :  { %14739 = vst [vmem:[#allocation148_spill] sm:$0xff] %v13854_v48  ;;  %v6689_v46 = vadd.f32 %v6688_v8, %v6687_v0 }
 0x3c0   :  { %v6690_v44 = vpop.f32.mrf.mxu1 }
 0x3c1   :  { %v13857_v33 = vadd.f32 %v6689_v46, %v13788_v41 }
 0x3c2   :  { %v6691_v62 = vpop.f32.mrf.mxu1 }
 0x3c3   :  { %14740 = vst [vmem:[#allocation149_spill] sm:$0xff] %v13857_v33  ;;  %v6692_v27 = vadd.f32 %v6691_v62, %v6690_v44 }
 0x3c5   :  { %v13862_v7 = vadd.f32 %v6692_v27, %v13800_v25 }
 0x3c7   :  { %14741 = vst [vmem:[#allocation150_spill] sm:$0xff] %v13862_v7 }
 0x3d2   :  { %v6709_v54 = vpop.f32.mrf.mxu0 }
 0x3d4   :  { %v6710_v52 = vpop.f32.mrf.mxu0 }
 0x3d5   :  { %v6711_v18 = vadd.f32 %v6710_v52, %v6709_v54 }
 0x3d6   :  { %v6712_v41 = vpop.f32.mrf.mxu0 }
 0x3d7   :  { %v5139_v15 = vadd.f32 %v6711_v18, %v13697_v50 }
 0x3d8   :  { %v6713_v14 = vpop.f32.mrf.mxu0 }
 0x3d9   :  { %v6714_v58 = vadd.f32 %v6713_v14, %v6712_v41 }
 0x3da   :  { %v6715_v25 = vpop.f32.mrf.mxu0 }
 0x3db   :  { %v5142_v1 = vadd.f32 %v6714_v58, %v13713_v9  ;;  %v13885_v9 = vpop.permute.xlu1 %5459 }
 0x3dc   :  { %v6716_v37 = vpop.f32.mrf.mxu0 }
 0x3dd   :  { %v6717_v16 = vadd.f32 %v6716_v37, %v6715_v25 }
 0x3de   :  { %v6718_v38 = vpop.f32.mrf.mxu0 }
 0x3df   :  { %v5147_v47 = vadd.f32 %v6717_v16, %v13725_v23  ;;  %v13888_v46 = vpop.permute.xlu1 %5449 }
 0x3e0   :  { %v6719_v32 = vpop.f32.mrf.mxu0 }
 0x3e1   :  { %v6720_v30 = vadd.f32 %v6719_v32, %v6718_v38 }
 0x3e2   :  { %v6721_v50 = vpop.f32.mrf.mxu0 }
 0x3e3   :  { %v5150_v63 = vadd.f32 %v6720_v30, %v13744_v40  ;;  %v5435_v40 = vpop.permute.xlu0 %5434  ;;  %v5440_v41 = vpop.permute.xlu1 %5439 }
 0x3e4   :  { %v6722_v2 = vpop.f32.mrf.mxu0 }
 0x3e5   :  { %v6723_v24 = vadd.f32 %v6722_v2, %v6721_v50 }
 0x3e6   :  { %v6724_v20 = vpop.f32.mrf.mxu0 }
 0x3e7   :  { %v5155_v23 = vadd.f32 %v6723_v24, %v13753_v28  ;;  %v5425_v16 = vpop.permute.xlu0 %5424 }
 0x3e8   :  { %v6725_v0 = vpop.f32.mrf.mxu0 }
 0x3e9   :  { %v6726_v48 = vadd.f32 %v6725_v0, %v6724_v20 }
 0x3ea   :  { %v6727_v8 = vpop.f32.mrf.mxu0 }
 0x3eb   :  { %v5158_v0 = vadd.f32 %v6726_v48, %v13772_v10 }
 0x3ec   :  { %v6728_v44 = vpop.f32.mrf.mxu0 }
 0x3ed   :  { %v6729_v14 = vadd.f32 %v6728_v44, %v6727_v8 }
 0x3ee   :  { %v6730_v62 = vpop.f32.mrf.mxu0 }
 0x3ef   :  { %v5163_v33 = vadd.f32 %v6729_v14, %v13785_v22 }
 0x3f0   :  { %v6852_v27 = vpop.f32.mrf.mxu1  ;;  %v6731_v54 = vpop.f32.mrf.mxu0 }
 0x3f1   :  { %v5292_v52 = vadd.f32 %v6852_v27, %v5147_v47  ;;  %v6732_v47 = vadd.f32 %v6731_v54, %v6730_v62  ;;  %v5430_v27 = vpop.permute.xlu1 %5429 }
 0x3f2   :  { %v5283_v18 = vpop.f32.mrf.mxu1  ;;  %v6733_v58 = vpop.f32.mrf.mxu0 }
 0x3f3   :  { %v5564_v25 = vadd.f32 %v5435_v40, %v5292_v52  ;;  %v5284_v37 = vadd.f32 %v5283_v18, %v5139_v15  ;;  %v5166_v22 = vadd.f32 %v6732_v47, %v13797_v11 }
 0x3f4   :  { %v6853_v38 = vpop.f32.mrf.mxu1  ;;  %v6734_v32 = vpop.f32.mrf.mxu0 }
 0x3f5   :  { %v5562_v28 = vadd.f32 %v5425_v16, %v5284_v37  ;;  %v5295_v30 = vadd.f32 %v6853_v38, %v5150_v63  ;;  %v5592_v19 = vmul.f32 0.01, %v5564_v25  ;;  %v6735_v21 = vadd.f32 %v6734_v32, %v6733_v58  ;;  %v13900_v11 = vpop.permute.xlu1 %5559 }
 0x3f6   :  { %v5286_v50 = vpop.f32.mrf.mxu1  ;;  %v6736_v2 = vpop.f32.mrf.mxu0 }
 0x3f7   :  { %v5565_v24 = vadd.f32 %v5440_v41, %v5295_v30  ;;  %v5287_v7 = vadd.f32 %v5286_v50, %v5142_v1  ;;  %v5590_v44 = vmul.f32 0.01, %v5562_v28  ;;  %v5620_v37 = vmax.f32 %v5564_v25, %v5592_v19  ;;  %v13891_v41 = vpop.permute.xlu0 %5554 }
 0x3f8   :  { %v6856_v56 = vpop.f32.mrf.mxu1  ;;  %v6737_v8 = vpop.f32.mrf.mxu0 }
 0x3f9   :  { %v5593_v40 = vmul.f32 0.01, %v5565_v24  ;;  %v5563_v15 = vadd.f32 %v5430_v27, %v5287_v7  ;;  %v5308_v52 = vadd.f32 %v6856_v56, %v5163_v33  ;;  %v5618_v54 = vmax.f32 %v5562_v28, %v5590_v44 }
 0x3fa   :  { %v5299_v18 = vpop.f32.mrf.mxu1  ;;  %v6739_v59 = vpop.f32.mrf.mxu0  ;;  %v6738_v28 = vadd.f32 %v6737_v8, %v6736_v2 }
 0x3fb   :  { %v5621_v63 = vmax.f32 %v5565_v24, %v5593_v40  ;;  %v5591_v16 = vmul.f32 0.01, %v5563_v15  ;;  %v5300_v38 = vadd.f32 %v5299_v18, %v5155_v23  ;;  %v5568_v1 = vadd.f32 %v5455_v13, %v5308_v52  ;;  %v13905_v27 = vpop.permute.xlu0 %5544 }
 0x3fc   :  { %v6857_v20 = vpop.f32.mrf.mxu1  ;;  %v6740_v62 = vpop.f32.mrf.mxu0 }
 0x3fd   :  { %v13895_v14 = vpack.c.bf16 %v5621_v63, %v5620_v37  ;;  %v5619_v56 = vmax.f32 %v5563_v15, %v5591_v16  ;;  %v5566_v33 = vadd.f32 %v5445_v45, %v5300_v38  ;;  %v6741_v7 = vadd.f32 %v6740_v62, %v6739_v59 }
 0x3fe   :  { %v5311_v25 = vadd.f32 %v6857_v20, %v5166_v22  ;;  %v5302_v30 = vpop.f32.mrf.mxu1  ;;  %v6742_v50 = vpop.f32.mrf.mxu0  ;;  %v5596_v32 = vmul.f32 0.01, %v5568_v1  ;;  %v5171_v59 = vadd.f32 %v6735_v21, %v13803_v61  ;;  %v5174_v21 = vadd.f32 %v6738_v28, %v13806_v51 }
 0x3ff   :  { %v13897_v23 = vpack.c.bf16 %v5619_v56, %v5618_v54  ;;  %v5303_v58 = vadd.f32 %v5302_v30, %v5158_v0  ;;  %v5179_v10 = vadd.f32 %v6741_v7, %v13809_v55  ;;  %v5594_v24 = vmul.f32 0.01, %v5566_v33  ;;  %v13913_v0 = vpop.permute.xlu1 %5549 }
 0x400   :  { %v5569_v13 = vadd.f32 %v13885_v9, %v5311_v25  ;;  %v6860_v48 = vpop.f32.mrf.mxu1  ;;  %v6743_v19 = vpop.f32.mrf.mxu0  ;;  %v5624_v37 = vmax.f32 %v5568_v1, %v5596_v32 }
 0x401   :  { %v5567_v45 = vadd.f32 %v13888_v46, %v5303_v58  ;;  %v6744_v47 = vadd.f32 %v6743_v19, %v6742_v50  ;;  %v5324_v40 = vadd.f32 %v6860_v48, %v5179_v10  ;;  %v5622_v46 = vmax.f32 %v5566_v33, %v5594_v24 }
 0x402   :  { %v5597_v44 = vmul.f32 0.01, %v5569_v13  ;;  %v5315_v15 = vpop.f32.mrf.mxu1  ;;  %v6745_v52 = vpop.f32.mrf.mxu0 }
 0x403   :  { %v5595_v9 = vmul.f32 0.01, %v5567_v45  ;;  %v5316_v18 = vadd.f32 %v5315_v15, %v5171_v59  ;;  %v5572_v55 = vadd.f32 %v13870_v53, %v5324_v40  ;;  %v5182_v2 = vadd.f32 %v6744_v47, %v13812_v36  ;;  %v13917_v36 = vpop.permute.xlu0 %5534 }
 0x404   :  { %v5625_v63 = vmax.f32 %v5569_v13, %v5597_v44  ;;  %v6861_v8 = vpop.f32.mrf.mxu1  ;;  %v6746_v16 = vpop.f32.mrf.mxu0 }
 0x405   :  { %v5623_v38 = vmax.f32 %v5567_v45, %v5595_v9  ;;  %v5570_v61 = vadd.f32 %v13875_v3, %v5316_v18  ;;  %v6747_v22 = vadd.f32 %v6746_v16, %v6745_v52  ;;  %v5327_v62 = vadd.f32 %v6861_v8, %v5182_v2  ;;  %v13922_v45 = vpop.permute.xlu1 %5539 }
 0x406   :  { %v13911_v20 = vpack.c.bf16 %v5625_v63, %v5624_v37  ;;  %v5318_v1 = vpop.f32.mrf.mxu1  ;;  %v6748_v54 = vpop.f32.mrf.mxu0  ;;  %v5600_v7 = vmul.f32 0.01, %v5572_v55 }
 0x407   :  { %v13915_v56 = vpack.c.bf16 %v5623_v38, %v5622_v46  ;;  %v5319_v53 = vadd.f32 %v5318_v1, %v5174_v21  ;;  %v5573_v33 = vadd.f32 %v13873_v49, %v5327_v62  ;;  %v5598_v30 = vmul.f32 0.01, %v5570_v61 }
 0x408   :  { %v6864_v25 = vpop.f32.mrf.mxu1  ;;  %v6749_v3 = vpop.f32.mrf.mxu0  ;;  %v5187_v50 = vadd.f32 %v6747_v22, %v13815_v60  ;;  %v5628_v19 = vmax.f32 %v5572_v55, %v5600_v7 }
 0x409   :  { %v5571_v51 = vadd.f32 %v13878_v17, %v5319_v53  ;;  %v6750_v58 = vadd.f32 %v6749_v3, %v6748_v54  ;;  %v5601_v32 = vmul.f32 0.01, %v5573_v33  ;;  %v5626_v49 = vmax.f32 %v5570_v61, %v5598_v30  ;;  %v13926_v60 = vpop.permute.xlu0 %5524 }
 0x40a   :  { %v5331_v13 = vpop.f32.mrf.mxu1  ;;  %v6751_v10 = vpop.f32.mrf.mxu0 }
 0x40b   :  { %v5599_v48 = vmul.f32 0.01, %v5571_v51  ;;  %v5332_v28 = vadd.f32 %v5331_v13, %v5187_v50  ;;  %v5629_v24 = vmax.f32 %v5573_v33, %v5601_v32  ;;  %v5190_v17 = vadd.f32 %v6750_v58, %v13818_v34  ;;  %v13934_v34 = vpop.permute.xlu1 %5529 }
 0x40c   :  { %v6865_v59 = vpop.f32.mrf.mxu1  ;;  %v6752_v47 = vpop.f32.mrf.mxu0 }
 0x40d   :  { %v5627_v44 = vmax.f32 %v5571_v51, %v5599_v48  ;;  %v5574_v40 = vadd.f32 %v13864_v43, %v5332_v28  ;;  %v6753_v15 = vadd.f32 %v6752_v47, %v6751_v10  ;;  %v13928_v52 = vpack.c.bf16 %v5629_v24, %v5628_v19  ;;  %v5515_v62 = vpop.permute.xlu0 %5514 }
 0x40e   :  { %v5334_v9 = vpop.f32.mrf.mxu1  ;;  %v6754_v18 = vpop.f32.mrf.mxu0 }
 0x40f   :  { %v13930_v37 = vpack.c.bf16 %v5627_v44, %v5626_v49  ;;  %v5335_v63 = vadd.f32 %v5334_v9, %v5190_v17  ;;  %v5195_v55 = vadd.f32 %v6753_v15, %v13821_v29  ;;  %v5602_v16 = vmul.f32 0.01, %v5574_v40  ;;  %v5520_v58 = vpop.permute.xlu1 %5519 }
 0x410   :  { %v6868_v2 = vpop.f32.mrf.mxu1  ;;  %v6755_v8 = vpop.f32.mrf.mxu0 }
 0x411   :  { %v5575_v46 = vadd.f32 %v13868_v4, %v5335_v63  ;;  %v6756_v43 = vadd.f32 %v6755_v8, %v6754_v18  ;;  %v5340_v38 = vadd.f32 %v6864_v25, %v5195_v55  ;;  %v5630_v7 = vmax.f32 %v5574_v40, %v5602_v16  ;;  %v5505_v48 = vpop.permute.xlu0 %5504 }
 0x412   :  { %v6757_v61 = vpop.f32.mrf.mxu0  ;;  %v5347_v22 = vpop.f32.mrf.mxu1  ;;  %v14742_v16 = vmov 0  }
 0x413   :  { %v5603_v21 = vmul.f32 0.01, %v5575_v46  ;;  %v5576_v1 = vadd.f32 %v13859_v26, %v5340_v38  ;;  %v5198_v54 = vadd.f32 %v6756_v43, %v13824_v6  ;;  %v5510_v15 = vpop.permute.xlu1 %5509 }
 0x414   :  { %v6758_v53 = vpop.f32.mrf.mxu0  ;;  %v6869_v4 = vpop.f32.mrf.mxu1 }
 0x415   :  { %v5631_v29 = vmax.f32 %v5575_v46, %v5603_v21  ;;  %v6759_v33 = vadd.f32 %v6758_v53, %v6757_v61  ;;  %v5343_v3 = vadd.f32 %v6865_v59, %v5198_v54  ;;  %v5604_v50 = vmul.f32 0.01, %v5576_v1 }
 0x416   :  { %v6760_v30 = vpop.f32.mrf.mxu0  ;;  %v5350_v19 = vpop.f32.mrf.mxu1 }
 0x417   :  { %v5652_v51 = vpack.c.bf16 %v5631_v29, %v5630_v7  ;;  %v5577_v25 = vadd.f32 %v13866_v57, %v5343_v3  ;;  %v5203_v32 = vadd.f32 %v6759_v33, %v13827_v31  ;;  %v5632_v24 = vmax.f32 %v5576_v1, %v5604_v50 }
 0x418   :  { %v6761_v13 = vpop.f32.mrf.mxu0  ;;  %v6872_v18 = vpop.f32.mrf.mxu1 }
 0x419   :  { %v6762_v10 = vadd.f32 %v6761_v13, %v6760_v30  ;;  %v5605_v26 = vmul.f32 0.01, %v5577_v25  ;;  %v5348_v28 = vadd.f32 %v5347_v22, %v5203_v32 }
 0x41a   :  { %v6763_v6 = vpop.f32.mrf.mxu0 }
 0x41b   :  { %v5633_v47 = vmax.f32 %v5577_v25, %v5605_v26  ;;  %v5578_v49 = vadd.f32 %v5505_v48, %v5348_v28  ;;  %v5206_v59 = vadd.f32 %v6762_v10, %v13830_v39  ;;  %v5363_v39 = vpop.f32.mrf.mxu1 }
 0x41c   :  { %v6764_v44 = vpop.f32.mrf.mxu0 }
 0x41d   :  { %v6765_v40 = vadd.f32 %v6764_v44, %v6763_v6  ;;  %v5653_v17 = vpack.c.bf16 %v5633_v47, %v5632_v24  ;;  %v5351_v57 = vadd.f32 %v5350_v19, %v5206_v59  ;;  %v5606_v63 = vmul.f32 0.01, %v5578_v49  ;;  %v6873_v3 = vpop.f32.mrf.mxu1  ;;  %v14743_v24 = vld [vmem:[#allocation145_spill] sm:$0xff] }
 0x41e   :  { %v6766_v9 = vpop.f32.mrf.mxu0 }
 0x41f   :  { %v5211_v31 = vadd.f32 %v6765_v40, %v13833_v42  ;;  %v5579_v55 = vadd.f32 %v5510_v15, %v5351_v57  ;;  %5686 = vmatpush1.bf16.msra.mxu0 %v5653_v17  ;;  %v5634_v22 = vmax.f32 %v5578_v49, %v5606_v63  ;;  %v5366_v13 = vpop.f32.mrf.mxu1 }
 0x420   :  { %v6767_v8 = vpop.f32.mrf.mxu0  ;;  %5687 = vmatprep.subr.bf16.mxu0 %v14742_v16 }
 0x421   :  { %v6768_v46 = vadd.f32 %v6767_v8, %v6766_v9  ;;  %v5356_v43 = vadd.f32 %v6868_v2, %v5211_v31  ;;  %v5607_v38 = vmul.f32 0.01, %v5579_v55  ;;  %v6876_v19 = vpop.f32.mrf.mxu1  ;;  %v14744_v9 = vld [vmem:[#allocation146_spill] sm:$0xff] }
 0x422   :  { %v6769_v61 = vpop.f32.mrf.mxu0 }
 0x423   :  { %v5580_v21 = vadd.f32 %v5515_v62, %v5356_v43  ;;  %v5214_v1 = vadd.f32 %v6768_v46, %v13836_v12  ;;  %v5635_v54 = vmax.f32 %v5579_v55, %v5607_v38  ;;  %5688 = vmatpush1.bf16.msra.mxu0 %v5652_v51  ;;  %v5379_v17 = vpop.f32.mrf.mxu1 }
 0x424   :  { %v6770_v53 = vpop.f32.mrf.mxu0  ;;  %5689 = vmatprep.subr.bf16.mxu0 %v14742_v16 }
 0x425   :  { %v6771_v42 = vadd.f32 %v6770_v53, %v6769_v61  ;;  %v5359_v7 = vadd.f32 %v6869_v4, %v5214_v1  ;;  %v13945_v29 = vpack.c.bf16 %v5635_v54, %v5634_v22  ;;  %v5608_v30 = vmul.f32 0.01, %v5580_v21  ;;  %v6877_v43 = vpop.f32.mrf.mxu1  ;;  %v14745_v61 = vld [vmem:[#allocation147_spill] sm:$0xff] }
 0x426   :  { %v6772_v33 = vpop.f32.mrf.mxu0 }
 0x427   :  { %v5581_v2 = vadd.f32 %v5520_v58, %v5359_v7  ;;  %v5219_v50 = vadd.f32 %v6771_v42, %v13839_v35  ;;  %5690 = vmatpush1.bf16.msra.mxu0 %v13928_v52  ;;  %v5636_v10 = vmax.f32 %v5580_v21, %v5608_v30  ;;  %v5382_v54 = vpop.f32.mrf.mxu1 }
 0x428   :  { %v6773_v62 = vpop.f32.mrf.mxu0  ;;  %5691 = vmatprep.subr.bf16.mxu0 %v14742_v16 }
 0x429   :  { %v6774_v12 = vadd.f32 %v6773_v62, %v6772_v33  ;;  %v5609_v51 = vmul.f32 0.01, %v5581_v2  ;;  %v5364_v25 = vadd.f32 %v5363_v39, %v5219_v50  ;;  %v14746_v33 = vld [vmem:[#allocation148_spill] sm:$0xff]  ;;  %v14747_v62 = vld [vmem:[#allocation149_spill] sm:$0xff] }
 0x42a   :  { %v6775_v32 = vpop.f32.mrf.mxu0 }
 0x42b   :  { %v5637_v4 = vmax.f32 %v5581_v2, %v5609_v51  ;;  %v5582_v48 = vadd.f32 %v13926_v60, %v5364_v25  ;;  %v5222_v26 = vadd.f32 %v6774_v12, %v13842_v5  ;;  %5692 = vmatpush1.bf16.msra.mxu0 %v13930_v37 }
 0x42c   :  { %v6776_v58 = vpop.f32.mrf.mxu0  ;;  %5693 = vmatprep.subr.bf16.mxu0 %v14742_v16 }
 0x42d   :  { %v6777_v35 = vadd.f32 %v6776_v58, %v6775_v32  ;;  %v13954_v52 = vpack.c.bf16 %v5637_v4, %v5636_v10  ;;  %v5367_v28 = vadd.f32 %v5366_v13, %v5222_v26  ;;  %v5610_v49 = vmul.f32 0.01, %v5582_v48 }
 0x42e   :  { %v6778_v6 = vpop.f32.mrf.mxu0 }
 0x42f   :  { %v5227_v47 = vadd.f32 %v6777_v35, %v14743_v24  ;;  %v5583_v59 = vadd.f32 %v13934_v34, %v5367_v28  ;;  %5694 = vmatpush1.bf16.msra.mxu0 %v13911_v20  ;;  %v5638_v57 = vmax.f32 %v5582_v48, %v5610_v49 }
 0x430   :  { %v6779_v60 = vpop.f32.mrf.mxu0  ;;  %5695 = vmatprep.subr.bf16.mxu0 %v14742_v16 }
 0x431   :  { %v6780_v5 = vadd.f32 %v6779_v60, %v6778_v6  ;;  %v5372_v37 = vadd.f32 %v6872_v18, %v5227_v47  ;;  %v5611_v44 = vmul.f32 0.01, %v5583_v59 }
 0x432   :  { %v6781_v40 = vpop.f32.mrf.mxu0 }
 0x433   :  { %v5584_v15 = vadd.f32 %v13917_v36, %v5372_v37  ;;  %v5230_v31 = vadd.f32 %v6780_v5, %v14744_v9  ;;  %v5639_v63 = vmax.f32 %v5583_v59, %v5611_v44  ;;  %5696 = vmatpush1.bf16.msra.mxu0 %v13915_v56 }
 0x434   :  { %v6782_v55 = vpop.f32.mrf.mxu0  ;;  %5697 = vmatprep.subr.bf16.mxu0 %v14742_v16 }
 0x435   :  { %v6783_v20 = vadd.f32 %v6782_v55, %v6781_v40  ;;  %v5375_v34 = vadd.f32 %v6873_v3, %v5230_v31  ;;  %v5656_v8 = vpack.c.bf16 %v5639_v63, %v5638_v57  ;;  %v5612_v18 = vmul.f32 0.01, %v5584_v15 }
 0x436   :  { %v6784_v46 = vpop.f32.mrf.mxu0 }
 0x437   :  { %v5585_v38 = vadd.f32 %v13922_v45, %v5375_v34  ;;  %v5235_v39 = vadd.f32 %v6783_v20, %v14745_v61  ;;  %5698 = vmatpush1.bf16.msra.mxu0 %v13895_v14  ;;  %v5640_v53 = vmax.f32 %v5584_v15, %v5612_v18  ;;  %v5727_v15 = vstv %s6374_s24 }
 0x438   :  { %v6785_v36 = vpop.f32.mrf.mxu0  ;;  %5699 = vmatprep.subr.bf16.mxu0 %v14742_v16 }
 0x439   :  { %v5613_v21 = vmul.f32 0.01, %v5585_v38  ;;  %v6786_v56 = vadd.f32 %v6785_v36, %v6784_v46  ;;  %v5380_v22 = vadd.f32 %v5379_v17, %v5235_v39 }
 0x43a   :  { %v6787_v1 = vpop.f32.mrf.mxu0 }
 0x43b   :  { %v5641_v42 = vmax.f32 %v5585_v38, %v5613_v21  ;;  %v5586_v7 = vadd.f32 %v13905_v27, %v5380_v22  ;;  %v5238_v3 = vadd.f32 %v6786_v56, %v14746_v33  ;;  %5700 = vmatpush1.bf16.msra.mxu0 %v13897_v23  ;;  %v14748_v23 = vld [vmem:[#allocation150_spill] sm:$0xff] }
 0x43c   :  { %v6788_v45 = vpop.f32.mrf.mxu0  ;;  %5705 = vmatprep.subr.bf16.mxu0 %v14742_v16 }
 0x43d   :  { %v5657_v14 = vpack.c.bf16 %v5641_v42, %v5640_v53  ;;  %v6789_v30 = vadd.f32 %v6788_v45, %v6787_v1  ;;  %v5383_v2 = vadd.f32 %v5382_v54, %v5238_v3  ;;  %v5614_v51 = vmul.f32 0.01, %v5586_v7 }
 0x43e   :  { %v6790_v50 = vpop.f32.mrf.mxu0 }
 0x43f   :  { %v5243_v12 = vadd.f32 %v6789_v30, %v14747_v62  ;;  %v5587_v25 = vadd.f32 %v13913_v0, %v5383_v2  ;;  %v5642_v48 = vmax.f32 %v5586_v7, %v5614_v51 }
 0x440   :  { %v6791_v32 = vpop.f32.mrf.mxu0 }
 0x441   :  { %v5388_v13 = vadd.f32 %v6876_v19, %v5243_v12  ;;  %v6792_v10 = vadd.f32 %v6791_v32, %v6790_v50  ;;  %v5615_v27 = vmul.f32 0.01, %v5587_v25  ;;  %v5665_v19 = vstv %s5664_s21 }
 0x443   :  { %v5588_v4 = vadd.f32 %v13891_v41, %v5388_v13  ;;  %v5246_v26 = vadd.f32 %v6792_v10, %v14748_v23  ;;  %v5643_v58 = vmax.f32 %v5587_v25, %v5615_v27  ;;  %v7082_v41 = vld [vmem:[%s14006_s5] ss:$8 sps:$4 sm:$0x3f]   ;;  %s6375_s5 = sld [smem:[#allocation6 + $0x2]] }
 0x445   :  { %v5391_v35 = vadd.f32 %v6877_v43, %v5246_v26  ;;  %v5658_v28 = vpack.c.bf16 %v5643_v58, %v5642_v48  ;;  %v5616_v6 = vmul.f32 0.01, %v5588_v4 }
 0x447   :  { %v5589_v24 = vadd.f32 %v13900_v11, %v5391_v35  ;;  %v5644_v49 = vmax.f32 %v5588_v4, %v5616_v6  ;;  %v5662_v11 = vld [vmem:[%s14002_s1] sm:$0xff] }
 0x448   :  { %v5666_v5 = vmul.f32 %v5665_v19, %v5662_v11 }
 0x449   :  { %v5617_v47 = vmul.f32 0.01, %v5589_v24  ;;  %v5740_v18 = vstv %s6375_s5 }
 0x44b   :  { %v5645_v59 = vmax.f32 %v5589_v24, %v5617_v47 }
 0x44d   :  { %v5659_v0 = vpack.c.bf16 %v5645_v59, %v5644_v49 }
 0x44f   :  { %v5683_v60 = vsel %vm5681_vm3, %v5659_v0, 0 }
 0x450   :  { %5706 = vmatpush2.bf16.msra.mxu0 %v5683_v60 }
 0x451   :  { %5707 = vmatprep.subr.bf16.mxu0 %v14742_v16 }
 0x454   :  { %5708 = vmatpush2.bf16.msra.mxu0 %v5658_v28 }
 0x455   :  { %5709 = vmatprep.subr.bf16.mxu0 %v14742_v16 }
 0x458   :  { %5710 = vmatpush2.bf16.msra.mxu0 %v5657_v14 }
 0x459   :  { %5711 = vmatprep.subr.bf16.mxu0 %v14742_v16 }
 0x45c   :  { %5712 = vmatpush2.bf16.msra.mxu0 %v5656_v8 }
 0x45d   :  { %5713 = vmatprep.subr.bf16.mxu0 %v14742_v16 }
 0x460   :  { %5714 = vmatpush2.bf16.msra.mxu0 %v13954_v52  ;;  %v5663_v52 = vld [vmem:[%s14002_s1 + $0x8] sm:$0x7] }
 0x461   :  { %5715 = vmatprep.subr.bf16.mxu0 %v14742_v16  ;;  %v5667_v37 = vmul.f32 %v5665_v19, %v5663_v52 }
 0x464   :  { %5716 = vmatpush2.bf16.msra.mxu0 %v13945_v29 }
 0x467   :  { %5718 = vmatmul.mubr.bf16.vlgmr.msra.gmra.mxu0 %v7082_v41 }
 0x527   :  { %v5719_v16 = vpop.f32.mrf.mxu0 }
 0x528   :  { %v5720_v40 = vadd.f32 %v5719_v16, %v5666_v5 }
 0x529   :  { %v5721_v44 = vpop.f32.mrf.mxu0 }
 0x52a   :  { %v5728_v31 = vadd.f32 %v5727_v15, %v5720_v40 }
 0x52b   :  { %v5722_v17 = vpop.f32.mrf.mxu0 }
 0x52c   :  { %v5723_v29 = vadd.f32 %v5722_v17, %v5667_v37 }
 0x52d   :  { %v5724_v57 = vpop.f32.mrf.mxu0 }
 0x52e   :  { %v5729_v9 = vadd.f32 %v5727_v15, %v5723_v29 }
 0x530   :  { %v5732_v63 = vsel %vm5731_vm4, %v5729_v9, -inf }
 0x531   :  { %v5733_v55 = vmax.f32 %v5728_v31, %v5732_v63 }
 0x533   :  { %v5734_v20 = vrot.slane %v5733_v55, 4 }
 0x535   :  { %v5735_v34 = vmax.f32 %v5733_v55, %v5734_v20 }
 0x537   :  { %v5736_v8 = vrot.slane %v5735_v34, 2 }
 0x539   :  { %v5737_v46 = vmax.f32 %v5735_v34, %v5736_v8 }
 0x53b   :  { %v5738_v43 = vrot.slane %v5737_v46, 1 }
 0x53d   :  { %v5739_v38 = vmax.f32 %v5737_v46, %v5738_v43 }
 0x53f   :  { %v5741_v61 = vmax.f32 %v5739_v38, %v5740_v18 }
 0x541   :  { %v5742_v39 = vsub.f32 %v5728_v31, %v5741_v61  ;;  %v5743_v36 = vsub.f32 %v5729_v9, %v5741_v61  ;;  %v5756_v22 = vsub.f32 %v5740_v18, %v5741_v61 }
 0x543   :  { %v5744_v21 = vmul.f32 1.442695, %v5742_v39  ;;  %v5746_v56 = vmul.f32 1.442695, %v5743_v36  ;;  %v5757_v1 = vmul.f32 1.442695, %v5756_v22 }
 0x545   :  { %7085 = vpow2.f32 %v5744_v21 }
 0x546   :  { %7087 = vpow2.f32 %v5746_v56 }
 0x547   :  { %7089 = vpow2.f32 %v5757_v1 }
 0x552   :  { %v7086_v54 = vpop.eup %7085 }
 0x553   :  { %v7088_v53 = vpop.eup %7087 }
 0x554   :  { %v5748_v42 = vsel %vm5731_vm4, %v7088_v53, 0.0  ;;  %v7090_v50 = vpop.eup %7089 }
 0x555   :  { %v5749_v7 = vadd.f32 %v7086_v54, %v5748_v42 }
 0x557   :  { %v5750_v33 = vrot.slane %v5749_v7, 4 }
 0x559   :  { %v5751_v3 = vadd.f32 %v5750_v33, %v5749_v7 }
 0x55b   :  { %v5752_v45 = vrot.slane %v5751_v3, 2 }
 0x55d   :  { %v5753_v14 = vadd.f32 %v5752_v45, %v5751_v3 }
 0x55f   :  { %v5754_v30 = vrot.slane %v5753_v14, 1 }
 0x561   :  { %v5755_v2 = vadd.f32 %v5754_v30, %v5753_v14 }
 0x563   :  { %v5759_v62 = vadd.f32 %v7090_v50, %v5755_v2 }
 0x565   :  { %7091 = vrcp.f32 %v5759_v62 }
 0x572   :  { %v7092_v12 = vpop.eup %7091 }
 0x573   :  { %v5761_v51 = vmul.f32 %v7092_v12, %v7086_v54  ;;  %v5762_v25 = vmul.f32 %v7092_v12, %v7088_v53 }
 0x575   :  { %5763 = vst [vmem:[%s14010_s9] sm:$0xff] %v5761_v51  ;;  %5764 = vst [vmem:[%s14010_s9 + $0x8] sm:$0x7] %v5762_v25 }
 0x576   :  { %5769 = vsyncpa [#allocation3], 1 }
 0x577   :  { %5770 = vsyncpa [#allocation5], 1 }

</bundles_post_ra>
